<compile_context>
chip_gen: v6e
topology: v6e:2x2x1
jax: 0.10.0
libtpu: 0.0.40
codegen_flags: <defaults>
</compile_context>

<pallas_src>
import functools

import jax
import jax.numpy as jnp
from jax.experimental import pallas as pl
from jax.experimental.pallas import tpu as pltpu


def _round_up(v, m):
    return ((v + m - 1) // m) * m


def _tpu_config():
    """Generation-aware knobs: v7x has 64 MiB VMEM/TC, v5e/v6e have 128 MiB."""
    vmem_cap = 64 * 1024 * 1024
    try:
        info = pltpu.get_tpu_info()
        vmem_cap = int(getattr(info, "vmem_capacity_bytes", vmem_cap))
    except Exception:
        pass
    th_cap = 64 if vmem_cap >= 100 * 1024 * 1024 else 32
    vmem_limit = max(32 * 1024 * 1024,
                     min(int(vmem_cap * 3 // 4), 96 * 1024 * 1024))
    return th_cap, vmem_limit


def _pick_th(h, cap, mult, wp8, cin, cout, budget):
    """Largest row tile th that divides h, is a multiple of `mult`, fits budget."""
    cands = [t for t in range(mult, min(h, cap) + 1, mult) if h % t == 0]
    if not cands:
        cands = [mult]
    for t in sorted(cands, reverse=True):
        m = t * wp8
        est = (m * cin * 2 * 6            # input tile (2 bufs) + slab copies, bf16
               + m * cout * 8             # f32 accumulator + bf16 out (2 bufs)
               + 9 * cin * cout * 2 * 2)  # resident weights (2 bufs), bf16
        if est <= budget:
            return t
    return cands[0]


# ----------------------------------------------------------------------------
# 3x3 "same" conv (dilation d) + bias + ReLU, optional fused 2x2 maxpool,
# output written already width-padded for the next layer.
# ----------------------------------------------------------------------------
def _conv3x3_kernel(xt_ref, xm_ref, xb_ref, w_ref, b_ref, o_ref, *,
                    th, wp8, wo, d, pool, next_pad, out_wp, relu):
    # xt_ref : (1, d,  wp8, cin)  d rows just above the main block (bf16)
    # xm_ref : (1, th, wp8, cin)  main rows (bf16, width already zero-padded)
    # xb_ref : (1, d,  wp8, cin)  d rows just below the main block (bf16)
    # w_ref  : (9, cin, cout)     bf16 weights, tap index = kh*3 + kw (resident)
    # b_ref  : (1, cout)          f32 bias
    # o_ref  : (1, th_o, out_wp, cout)  bf16 output tile (width-padded for next)
    cin = xm_ref.shape[-1]
    cout = o_ref.shape[-1]
    m = th * wp8
    hw = d * wp8

    i = pl.program_id(1)
    last = pl.num_programs(1) - 1

    xm = xm_ref[0].astype(jnp.bfloat16).reshape(m, cin)
    xt = xt_ref[0].astype(jnp.bfloat16).reshape(hw, cin)
    xb = xb_ref[0].astype(jnp.bfloat16).reshape(hw, cin)
    # Rows above row 0 / below row H-1 are "same"-padding: force them to zero
    # at the image boundary (the clamped halo index maps read real rows there).
    xt = jnp.where(i == 0, jnp.zeros_like(xt), xt)
    xb = jnp.where(i == last, jnp.zeros_like(xb), xb)

    # Flattened row-major (h, w) slab covering rows [i*th - d, i*th + th + d);
    # 8 zero rows cover the kw over-reads that land in discarded (>= wo) cols.
    tail = jnp.zeros((8, cin), jnp.bfloat16)
    slab = jnp.concatenate([xt, xm, xb, tail], axis=0)

    # Hoist the (sublane-unaligned) width shifts: one shifted slab per kw, then
    # every kh tap slices at a sublane-aligned offset kh*d*wp8.
    span = m + 2 * d * wp8
    slabs = [slab[kw * d: kw * d + span, :] for kw in range(3)]

    acc = None
    for kh in range(3):
        base = kh * d * wp8
        for kw in range(3):
            lhs = slabs[kw][base:base + m, :]
            contrib = jnp.dot(lhs, w_ref[kh * 3 + kw],
                              preferred_element_type=jnp.float32)
            acc = contrib if acc is None else acc + contrib

    res = acc + b_ref[...]                       # f32 epilogue
    if relu:
        res = jnp.maximum(res, 0.0)

    if pool:                                     # fused 2x2 maxpool, stride 2
        r = res.reshape(m // 2, 2, cout)         # adjacent flat rows = W pairs
        r = jnp.maximum(r[:, 0, :], r[:, 1, :])              # pool over W
        r = r.reshape(th // 2, 2, wp8 // 2, cout)
        res = jnp.maximum(r[:, 0, :, :], r[:, 1, :, :])      # pool over H
        th_o, wo_o = th // 2, wo // 2
    else:
        res = res.reshape(th, wp8, cout)
        th_o, wo_o = th, wo

    core = res[:, :wo_o, :].astype(o_ref.dtype)  # drop garbage width columns
    parts = []
    if next_pad > 0:                             # next layer's left zero halo
        parts.append(jnp.zeros((th_o, next_pad, cout), o_ref.dtype))
    parts.append(core)
    rpad = out_wp - next_pad - wo_o              # right halo + lane alignment
    if rpad > 0:
        parts.append(jnp.zeros((th_o, rpad, cout), o_ref.dtype))
    out = parts[0] if len(parts) == 1 else jnp.concatenate(parts, axis=1)
    o_ref[0] = out


def conv3x3_fused(x, w, b, *, w_real, dilation, pool=False, next_pad=0,
                  relu=True):
    """x: (N, H, Wp8, Cin) bf16, width pre-padded with `dilation` zero cols on
    the left and zeros up to Wp8 on the right.  Returns (N, H', out_wp, Cout)
    bf16 pre-padded with `next_pad` columns for the next conv."""
    n, h, wp8, cin = x.shape
    d = dilation
    cout = w.shape[-1]

    assert 2 * d <= 8, "zero tail only covers kw over-reads for dilation <= 4"
    assert wp8 == _round_up(w_real + 2 * d, 8), (wp8, w_real, d)
    assert h % (2 * d) == 0, "height must be a multiple of 2*dilation"
    if pool:
        assert h % 2 == 0 and w_real % 2 == 0

    th_cap, vmem_limit = _tpu_config()
    th = _pick_th(h, th_cap, 2 * d, wp8, cin, cout, int(vmem_limit * 0.6))
    assert h % th == 0 and th % (2 * d) == 0
    num_h = h // th
    tb = th // d                       # main tile size in halo-block units
    hb_last = h // d - 1               # last valid halo-block index

    th_out = th // 2 if pool else th
    h_out = h // 2 if pool else h
    w_out = w_real // 2 if pool else w_real
    out_wp = _round_up(w_out + 2 * next_pad, 8) if next_pad > 0 else w_out

    kernel = functools.partial(_conv3x3_kernel, th=th, wp8=wp8, wo=w_real, d=d,
                               pool=pool, next_pad=next_pad, out_wp=out_wp,
                               relu=relu)

    flops = 2 * 9 * n * h * w_real * cin * cout
    bytes_accessed = (2 * int(x.size) + 2 * int(w.size) + 4 * int(b.size)
                      + 2 * n * h_out * out_wp * cout)

    return pl.pallas_call(
        kernel,
        out_shape=jax.ShapeDtypeStruct((n, h_out, out_wp, cout), jnp.bfloat16),
        grid=(n, num_h),
        in_specs=[
            # d rows just above the main block (clamped at the top boundary)
            pl.BlockSpec((1, d, wp8, cin),
                         lambda b_, i: (b_, jnp.maximum(i * tb - 1, 0), 0, 0)),
            # main rows [i*th, i*th + th)
            pl.BlockSpec((1, th, wp8, cin), lambda b_, i: (b_, i, 0, 0)),
            # d rows just below the main block (clamped at the bottom boundary)
            pl.BlockSpec((1, d, wp8, cin),
                         lambda b_, i: (b_, jnp.minimum((i + 1) * tb, hb_last),
                                        0, 0)),
            # full weights / bias, constant index map -> resident, DMA'd once
            pl.BlockSpec((9, cin, cout), lambda b_, i: (0, 0, 0)),
            pl.BlockSpec((1, cout), lambda b_, i: (0, 0)),
        ],
        out_specs=pl.BlockSpec((1, th_out, out_wp, cout),
                               lambda b_, i: (b_, i, 0, 0)),
        compiler_params=pltpu.CompilerParams(
            dimension_semantics=("parallel", "parallel"),
            vmem_limit_bytes=vmem_limit,
        ),
        cost_estimate=pl.CostEstimate(flops=flops, transcendentals=0,
                                      bytes_accessed=bytes_accessed),
    )(x, x, x, w, b)


# ----------------------------------------------------------------------------
# output_layer: 1x1 conv, 64 -> 1, no ReLU.  Produces a lane-dense (N, H, W)
# map instead of an NHWC tensor with a size-1 channel.
# ----------------------------------------------------------------------------
def _conv1x1_kernel(x_ref, w_ref, b_ref, o_ref):
    c = x_ref.shape[-1]
    x = x_ref[0].astype(jnp.float32)                      # (H, W, C)
    w = w_ref[...].astype(jnp.float32).reshape(1, 1, c)   # (1, 1, C)
    y = jnp.sum(x * w, axis=-1) + b_ref[...]              # (H, W) + (1, 1)
    o_ref[0] = y.astype(o_ref.dtype)


def conv1x1_to_scalar(x, w, b):
    n, h, wdt, c = x.shape
    return pl.pallas_call(
        _conv1x1_kernel,
        out_shape=jax.ShapeDtypeStruct((n, h, wdt), jnp.float32),
        grid=(n,),
        in_specs=[
            pl.BlockSpec((1, h, wdt, c), lambda b_: (b_, 0, 0, 0)),
            pl.BlockSpec((1, c), lambda b_: (0, 0)),
            pl.BlockSpec((1, 1), lambda b_: (0, 0)),
        ],
        out_specs=pl.BlockSpec((1, h, wdt), lambda b_: (b_, 0, 0)),
        compiler_params=pltpu.CompilerParams(
            dimension_semantics=("parallel",)),
    )(x, w, b)


# ----------------------------------------------------------------------------
# Parameter construction + forward (mirrors make_layers / VGG16.forward).
# The 'M' maxpool entries are fused into the preceding conv (pool=True).
# ----------------------------------------------------------------------------
FRONTEND_FEAT = [64, 64, 'M', 128, 128, 'M', 256, 256, 256, 'M', 512, 512, 512]
BACKEND_FEAT = [512, 512, 512, 256, 128, 64]


def _make_conv_stack(key, cfg, in_ch, dilation):
    convs = []
    i = 0
    while i < len(cfg):
        v = cfg[i]
        assert v != 'M'
        key, sub = jax.random.split(key)
        std = (2.0 / (9 * in_ch)) ** 0.5
        w = (jax.random.normal(sub, (9, in_ch, v), jnp.float32)
             * std).astype(jnp.bfloat16)
        b = jnp.zeros((1, v), jnp.float32)
        pool = (i + 1 < len(cfg) and cfg[i + 1] == 'M')
        convs.append(dict(w=w, b=b, dilation=dilation, pool=pool))
        in_ch = v
        i += 2 if pool else 1
    return key, convs, in_ch


def init_vgg16_params(key):
    key, frontend, ch = _make_conv_stack(key, FRONTEND_FEAT, 3, 1)
    key, backend, ch = _make_conv_stack(key, BACKEND_FEAT, ch, 2)
    convs = frontend + backend
    key, sub = jax.random.split(key)                       # output_layer 64 -> 1
    w_out = jax.random.normal(sub, (1, ch), jnp.float32) * (2.0 / ch) ** 0.5
    b_out = jnp.zeros((1, 1), jnp.float32)
    return convs, (w_out, b_out)


def vgg16_forward(x_nchw, params):
    convs, (w_out, b_out) = params
    x = jnp.transpose(x_nchw, (0, 2, 3, 1)).astype(jnp.bfloat16)  # NCHW->NHWC
    n, h, w_real, _ = x.shape
    d0 = convs[0]['dilation']
    wp0 = _round_up(w_real + 2 * d0, 8)
    # Only wrapper-side pad in the whole net: the tiny 3-channel input image.
    x = jnp.pad(x, ((0, 0), (0, 0), (d0, wp0 - w_real - d0), (0, 0)))
    for k, c in enumerate(convs):
        next_pad = convs[k + 1]['dilation'] if k + 1 < len(convs) else 0
        x = conv3x3_fused(x, c['w'], c['b'], w_real=w_real,
                          dilation=c['dilation'], pool=c['pool'],
                          next_pad=next_pad, relu=True)
        if c['pool']:
            w_real //= 2
    y = conv1x1_to_scalar(x, w_out, b_out)        # (N, H, W) f32
    return y[:, None, :, :]                       # -> NCHW (N, 1, H, W)


if __name__ == "__main__":
    key = jax.random.PRNGKey(0)
    kx, kp = jax.random.split(key)

    # Small NCHW input consistent with the module (3 input channels; spatial 32
    # so three 2x2 maxpools leave a 4x4 map for the dilated backend).
    x = jax.random.normal(kx, (2, 3, 32, 32), jnp.float32)
    params = init_vgg16_params(kp)

    y = vgg16_forward(x, params)
    y = jax.block_until_ready(y)
    assert y.shape == (2, 1, 4, 4), y.shape
    assert y.dtype == jnp.float32
    print("KERNEL_OK")
</pallas_src>

<mosaic_0001>
module attributes {stable_mosaic.version = 11 : i64} {
  func.func @_conv3x3_kernel(%arg0: i32, %arg1: i32, %arg2: memref<1x1x40x3xbf16, #tpu.memory_space<vmem>>, %arg3: memref<1x32x40x3xbf16, #tpu.memory_space<vmem>>, %arg4: memref<1x1x40x3xbf16, #tpu.memory_space<vmem>>, %arg5: memref<9x3x64xbf16, #tpu.memory_space<vmem>>, %arg6: memref<1x64xf32, #tpu.memory_space<vmem>>, %arg7: memref<1x32x40x64xbf16, #tpu.memory_space<vmem>>) attributes {dimension_semantics = [#tpu.dimension_semantics<parallel>, #tpu.dimension_semantics<parallel>], iteration_bounds = array<i64: 2, 1>, scalar_prefetch = 0 : i64, scratch_operands = 0 : i64, tpu.core_type = #tpu.core_type<tc>, window_params = [{transform_indices = @transform_0, window_bounds = array<i64: 1, 1, 40, 3>}, {transform_indices = @transform_1, window_bounds = array<i64: 1, 32, 40, 3>}, {transform_indices = @transform_2, window_bounds = array<i64: 1, 1, 40, 3>}, {pipeline_mode = #tpu.pipeline_mode<synchronous>, transform_indices = @transform_3, window_bounds = array<i64: 9, 3, 64>}, {pipeline_mode = #tpu.pipeline_mode<synchronous>, transform_indices = @transform_4, window_bounds = array<i64: 1, 64>}, {transform_indices = @transform_5, window_bounds = array<i64: 1, 32, 40, 64>}]} {
    %c0 = arith.constant 0 : index
    %c0_0 = arith.constant 0 : index
    %c0_1 = arith.constant 0 : index
    %c0_2 = arith.constant 0 : index
    %0 = vector.load %arg3[%c0, %c0_0, %c0_1, %c0_2] : memref<1x32x40x3xbf16, #tpu.memory_space<vmem>>, vector<1x32x40x3xbf16>
    %1 = vector.shape_cast %0 : vector<1x32x40x3xbf16> to vector<32x40x3xbf16>
    %2 = vector.shape_cast %1 : vector<32x40x3xbf16> to vector<1280x3xbf16>
    %c0_3 = arith.constant 0 : index
    %c0_4 = arith.constant 0 : index
    %c0_5 = arith.constant 0 : index
    %c0_6 = arith.constant 0 : index
    %3 = vector.load %arg2[%c0_3, %c0_4, %c0_5, %c0_6] : memref<1x1x40x3xbf16, #tpu.memory_space<vmem>>, vector<1x1x40x3xbf16>
    %4 = vector.shape_cast %3 : vector<1x1x40x3xbf16> to vector<1x40x3xbf16>
    %5 = vector.shape_cast %4 : vector<1x40x3xbf16> to vector<40x3xbf16>
    %c0_7 = arith.constant 0 : index
    %c0_8 = arith.constant 0 : index
    %c0_9 = arith.constant 0 : index
    %c0_10 = arith.constant 0 : index
    %6 = vector.load %arg4[%c0_7, %c0_8, %c0_9, %c0_10] : memref<1x1x40x3xbf16, #tpu.memory_space<vmem>>, vector<1x1x40x3xbf16>
    %7 = vector.shape_cast %6 : vector<1x1x40x3xbf16> to vector<1x40x3xbf16>
    %8 = vector.shape_cast %7 : vector<1x40x3xbf16> to vector<40x3xbf16>
    %c0_i32 = arith.constant 0 : i32
    %9 = arith.cmpi eq, %arg1, %c0_i32 : i32
    %cst = arith.constant 0.000000e+00 : bf16
    %10 = vector.broadcast %cst : bf16 to vector<40x3xbf16>
    %11 = arith.select %9, %10, %5 : vector<40x3xbf16>
    %c0_i32_11 = arith.constant 0 : i32
    %12 = arith.cmpi eq, %arg1, %c0_i32_11 : i32
    %cst_12 = arith.constant 0.000000e+00 : bf16
    %13 = vector.broadcast %cst_12 : bf16 to vector<40x3xbf16>
    %14 = arith.select %12, %13, %8 : vector<40x3xbf16>
    %cst_13 = arith.constant 0.000000e+00 : bf16
    %15 = vector.broadcast %cst_13 : bf16 to vector<8x3xbf16>
    %16 = tpu.concatenate %11, %2, %14, %15 in 0 : vector<40x3xbf16>, vector<1280x3xbf16>, vector<40x3xbf16>, vector<8x3xbf16> -> vector<1368x3xbf16>
    %17 = vector.extract_strided_slice %16 {offsets = [0, 0], sizes = [1360, 3], strides = [1, 1]} : vector<1368x3xbf16> to vector<1360x3xbf16>
    %18 = vector.extract_strided_slice %16 {offsets = [1, 0], sizes = [1360, 3], strides = [1, 1]} : vector<1368x3xbf16> to vector<1360x3xbf16>
    %19 = vector.extract_strided_slice %16 {offsets = [2, 0], sizes = [1360, 3], strides = [1, 1]} : vector<1368x3xbf16> to vector<1360x3xbf16>
    %20 = vector.extract_strided_slice %17 {offsets = [0, 0], sizes = [1280, 3], strides = [1, 1]} : vector<1360x3xbf16> to vector<1280x3xbf16>
    %c0_14 = arith.constant 0 : index
    %c0_15 = arith.constant 0 : index
    %c0_16 = arith.constant 0 : index
    %21 = vector.load %arg5[%c0_14, %c0_15, %c0_16] : memref<9x3x64xbf16, #tpu.memory_space<vmem>>, vector<1x3x64xbf16>
    %22 = vector.shape_cast %21 : vector<1x3x64xbf16> to vector<3x64xbf16>
    %cst_17 = arith.constant dense<0.000000e+00> : vector<1280x64xf32>
    %23 = tpu.matmul %20, %22, %cst_17 {dimension_numbers = #tpu.dot_dimension_numbers<[1], [0], [0], [1], [0, 0, 1, 1], [], []>} : vector<1280x3xbf16>, vector<3x64xbf16>, vector<1280x64xf32> -> vector<1280x64xf32>
    %24 = vector.extract_strided_slice %18 {offsets = [0, 0], sizes = [1280, 3], strides = [1, 1]} : vector<1360x3xbf16> to vector<1280x3xbf16>
    %c1 = arith.constant 1 : index
    %c0_18 = arith.constant 0 : index
    %c0_19 = arith.constant 0 : index
    %25 = vector.load %arg5[%c1, %c0_18, %c0_19] : memref<9x3x64xbf16, #tpu.memory_space<vmem>>, vector<1x3x64xbf16>
    %26 = vector.shape_cast %25 : vector<1x3x64xbf16> to vector<3x64xbf16>
    %cst_20 = arith.constant dense<0.000000e+00> : vector<1280x64xf32>
    %27 = tpu.matmul %24, %26, %cst_20 {dimension_numbers = #tpu.dot_dimension_numbers<[1], [0], [0], [1], [0, 0, 1, 1], [], []>} : vector<1280x3xbf16>, vector<3x64xbf16>, vector<1280x64xf32> -> vector<1280x64xf32>
    %28 = arith.addf %23, %27 : vector<1280x64xf32>
    %29 = vector.extract_strided_slice %19 {offsets = [0, 0], sizes = [1280, 3], strides = [1, 1]} : vector<1360x3xbf16> to vector<1280x3xbf16>
    %c2 = arith.constant 2 : index
    %c0_21 = arith.constant 0 : index
    %c0_22 = arith.constant 0 : index
    %30 = vector.load %arg5[%c2, %c0_21, %c0_22] : memref<9x3x64xbf16, #tpu.memory_space<vmem>>, vector<1x3x64xbf16>
    %31 = vector.shape_cast %30 : vector<1x3x64xbf16> to vector<3x64xbf16>
    %cst_23 = arith.constant dense<0.000000e+00> : vector<1280x64xf32>
    %32 = tpu.matmul %29, %31, %cst_23 {dimension_numbers = #tpu.dot_dimension_numbers<[1], [0], [0], [1], [0, 0, 1, 1], [], []>} : vector<1280x3xbf16>, vector<3x64xbf16>, vector<1280x64xf32> -> vector<1280x64xf32>
    %33 = arith.addf %28, %32 : vector<1280x64xf32>
    %34 = vector.extract_strided_slice %17 {offsets = [40, 0], sizes = [1280, 3], strides = [1, 1]} : vector<1360x3xbf16> to vector<1280x3xbf16>
    %c3 = arith.constant 3 : index
    %c0_24 = arith.constant 0 : index
    %c0_25 = arith.constant 0 : index
    %35 = vector.load %arg5[%c3, %c0_24, %c0_25] : memref<9x3x64xbf16, #tpu.memory_space<vmem>>, vector<1x3x64xbf16>
    %36 = vector.shape_cast %35 : vector<1x3x64xbf16> to vector<3x64xbf16>
    %cst_26 = arith.constant dense<0.000000e+00> : vector<1280x64xf32>
    %37 = tpu.matmul %34, %36, %cst_26 {dimension_numbers = #tpu.dot_dimension_numbers<[1], [0], [0], [1], [0, 0, 1, 1], [], []>} : vector<1280x3xbf16>, vector<3x64xbf16>, vector<1280x64xf32> -> vector<1280x64xf32>
    %38 = arith.addf %33, %37 : vector<1280x64xf32>
    %39 = vector.extract_strided_slice %18 {offsets = [40, 0], sizes = [1280, 3], strides = [1, 1]} : vector<1360x3xbf16> to vector<1280x3xbf16>
    %c4 = arith.constant 4 : index
    %c0_27 = arith.constant 0 : index
    %c0_28 = arith.constant 0 : index
    %40 = vector.load %arg5[%c4, %c0_27, %c0_28] : memref<9x3x64xbf16, #tpu.memory_space<vmem>>, vector<1x3x64xbf16>
    %41 = vector.shape_cast %40 : vector<1x3x64xbf16> to vector<3x64xbf16>
    %cst_29 = arith.constant dense<0.000000e+00> : vector<1280x64xf32>
    %42 = tpu.matmul %39, %41, %cst_29 {dimension_numbers = #tpu.dot_dimension_numbers<[1], [0], [0], [1], [0, 0, 1, 1], [], []>} : vector<1280x3xbf16>, vector<3x64xbf16>, vector<1280x64xf32> -> vector<1280x64xf32>
    %43 = arith.addf %38, %42 : vector<1280x64xf32>
    %44 = vector.extract_strided_slice %19 {offsets = [40, 0], sizes = [1280, 3], strides = [1, 1]} : vector<1360x3xbf16> to vector<1280x3xbf16>
    %c5 = arith.constant 5 : index
    %c0_30 = arith.constant 0 : index
    %c0_31 = arith.constant 0 : index
    %45 = vector.load %arg5[%c5, %c0_30, %c0_31] : memref<9x3x64xbf16, #tpu.memory_space<vmem>>, vector<1x3x64xbf16>
    %46 = vector.shape_cast %45 : vector<1x3x64xbf16> to vector<3x64xbf16>
    %cst_32 = arith.constant dense<0.000000e+00> : vector<1280x64xf32>
    %47 = tpu.matmul %44, %46, %cst_32 {dimension_numbers = #tpu.dot_dimension_numbers<[1], [0], [0], [1], [0, 0, 1, 1], [], []>} : vector<1280x3xbf16>, vector<3x64xbf16>, vector<1280x64xf32> -> vector<1280x64xf32>
    %48 = arith.addf %43, %47 : vector<1280x64xf32>
    %49 = vector.extract_strided_slice %17 {offsets = [80, 0], sizes = [1280, 3], strides = [1, 1]} : vector<1360x3xbf16> to vector<1280x3xbf16>
    %c6 = arith.constant 6 : index
    %c0_33 = arith.constant 0 : index
    %c0_34 = arith.constant 0 : index
    %50 = vector.load %arg5[%c6, %c0_33, %c0_34] : memref<9x3x64xbf16, #tpu.memory_space<vmem>>, vector<1x3x64xbf16>
    %51 = vector.shape_cast %50 : vector<1x3x64xbf16> to vector<3x64xbf16>
    %cst_35 = arith.constant dense<0.000000e+00> : vector<1280x64xf32>
    %52 = tpu.matmul %49, %51, %cst_35 {dimension_numbers = #tpu.dot_dimension_numbers<[1], [0], [0], [1], [0, 0, 1, 1], [], []>} : vector<1280x3xbf16>, vector<3x64xbf16>, vector<1280x64xf32> -> vector<1280x64xf32>
    %53 = arith.addf %48, %52 : vector<1280x64xf32>
    %54 = vector.extract_strided_slice %18 {offsets = [80, 0], sizes = [1280, 3], strides = [1, 1]} : vector<1360x3xbf16> to vector<1280x3xbf16>
    %c7 = arith.constant 7 : index
    %c0_36 = arith.constant 0 : index
    %c0_37 = arith.constant 0 : index
    %55 = vector.load %arg5[%c7, %c0_36, %c0_37] : memref<9x3x64xbf16, #tpu.memory_space<vmem>>, vector<1x3x64xbf16>
    %56 = vector.shape_cast %55 : vector<1x3x64xbf16> to vector<3x64xbf16>
    %cst_38 = arith.constant dense<0.000000e+00> : vector<1280x64xf32>
    %57 = tpu.matmul %54, %56, %cst_38 {dimension_numbers = #tpu.dot_dimension_numbers<[1], [0], [0], [1], [0, 0, 1, 1], [], []>} : vector<1280x3xbf16>, vector<3x64xbf16>, vector<1280x64xf32> -> vector<1280x64xf32>
    %58 = arith.addf %53, %57 : vector<1280x64xf32>
    %59 = vector.extract_strided_slice %19 {offsets = [80, 0], sizes = [1280, 3], strides = [1, 1]} : vector<1360x3xbf16> to vector<1280x3xbf16>
    %c8 = arith.constant 8 : index
    %c0_39 = arith.constant 0 : index
    %c0_40 = arith.constant 0 : index
    %60 = vector.load %arg5[%c8, %c0_39, %c0_40] : memref<9x3x64xbf16, #tpu.memory_space<vmem>>, vector<1x3x64xbf16>
    %61 = vector.shape_cast %60 : vector<1x3x64xbf16> to vector<3x64xbf16>
    %cst_41 = arith.constant dense<0.000000e+00> : vector<1280x64xf32>
    %62 = tpu.matmul %59, %61, %cst_41 {dimension_numbers = #tpu.dot_dimension_numbers<[1], [0], [0], [1], [0, 0, 1, 1], [], []>} : vector<1280x3xbf16>, vector<3x64xbf16>, vector<1280x64xf32> -> vector<1280x64xf32>
    %63 = arith.addf %58, %62 : vector<1280x64xf32>
    %c0_42 = arith.constant 0 : index
    %c0_43 = arith.constant 0 : index
    %64 = vector.load %arg6[%c0_42, %c0_43] : memref<1x64xf32, #tpu.memory_space<vmem>>, vector<1x64xf32>
    %65 = vector.broadcast %64 : vector<1x64xf32> to vector<1280x64xf32>
    %66 = arith.addf %63, %65 : vector<1280x64xf32>
    %cst_44 = arith.constant 0.000000e+00 : f32
    %67 = vector.broadcast %cst_44 : f32 to vector<1280x64xf32>
    %68 = arith.maximumf %66, %67 : vector<1280x64xf32>
    %69 = vector.shape_cast %68 : vector<1280x64xf32> to vector<32x40x64xf32>
    %70 = vector.extract_strided_slice %69 {offsets = [0, 0, 0], sizes = [32, 32, 64], strides = [1, 1, 1]} : vector<32x40x64xf32> to vector<32x32x64xf32>
    %71 = arith.truncf %70 : vector<32x32x64xf32> to vector<32x32x64xbf16>
    %cst_45 = arith.constant 0.000000e+00 : bf16
    %72 = vector.broadcast %cst_45 : bf16 to vector<32x1x64xbf16>
    %cst_46 = arith.constant 0.000000e+00 : bf16
    %73 = vector.broadcast %cst_46 : bf16 to vector<32x7x64xbf16>
    %74 = tpu.concatenate %72, %71, %73 in 1 : vector<32x1x64xbf16>, vector<32x32x64xbf16>, vector<32x7x64xbf16> -> vector<32x40x64xbf16>
    %c0_47 = arith.constant 0 : index
    %c0_48 = arith.constant 0 : index
    %c0_49 = arith.constant 0 : index
    %c0_50 = arith.constant 0 : index
    %75 = vector.load %arg7[%c0_47, %c0_48, %c0_49, %c0_50] : memref<1x32x40x64xbf16, #tpu.memory_space<vmem>>, vector<1x32x40x64xbf16>
    %76 = vector.shape_cast %75 : vector<1x32x40x64xbf16> to vector<32x40x64xbf16>
    %77 = vector.shape_cast %74 : vector<32x40x64xbf16> to vector<1x32x40x64xbf16>
    tpu.vector_store %arg7[%c0_47, %c0_48, %c0_49, %c0_50], %77 {strides = array<i32>} : memref<1x32x40x64xbf16, #tpu.memory_space<vmem>>, vector<1x32x40x64xbf16>,
    return
  }
  func.func @transform_0(%arg0: i32, %arg1: i32) -> (i32, i32, i32, i32) {
    %c32_i32 = arith.constant 32 : i32
    %0 = arith.muli %arg1, %c32_i32 : i32
    %c1_i32 = arith.constant 1 : i32
    %1 = arith.subi %0, %c1_i32 : i32
    %c0_i32 = arith.constant 0 : i32
    %2 = arith.maxsi %1, %c0_i32 : i32
    %c0_i32_0 = arith.constant 0 : i32
    %c0_i32_1 = arith.constant 0 : i32
    %c0_i32_2 = arith.constant 0 : i32
    return %arg0, %2, %c0_i32_0, %c0_i32_1 : i32, i32, i32, i32
  }
  func.func @transform_1(%arg0: i32, %arg1: i32) -> (i32, i32, i32, i32) {
    %c0_i32 = arith.constant 0 : i32
    %c0_i32_0 = arith.constant 0 : i32
    %c0_i32_1 = arith.constant 0 : i32
    return %arg0, %arg1, %c0_i32, %c0_i32_0 : i32, i32, i32, i32
  }
  func.func @transform_2(%arg0: i32, %arg1: i32) -> (i32, i32, i32, i32) {
    %c1_i32 = arith.constant 1 : i32
    %0 = arith.addi %arg1, %c1_i32 : i32
    %c32_i32 = arith.constant 32 : i32
    %1 = arith.muli %0, %c32_i32 : i32
    %c31_i32 = arith.constant 31 : i32
    %2 = arith.minsi %1, %c31_i32 : i32
    %c0_i32 = arith.constant 0 : i32
    %c0_i32_0 = arith.constant 0 : i32
    %c0_i32_1 = arith.constant 0 : i32
    return %arg0, %2, %c0_i32, %c0_i32_0 : i32, i32, i32, i32
  }
  func.func @transform_3(%arg0: i32, %arg1: i32) -> (i32, i32, i32) {
    %c0_i32 = arith.constant 0 : i32
    %c0_i32_0 = arith.constant 0 : i32
    %c0_i32_1 = arith.constant 0 : i32
    %c0_i32_2 = arith.constant 0 : i32
    return %c0_i32, %c0_i32_0, %c0_i32_1 : i32, i32, i32
  }
  func.func @transform_4(%arg0: i32, %arg1: i32) -> (i32, i32) {
    %c0_i32 = arith.constant 0 : i32
    %c0_i32_0 = arith.constant 0 : i32
    %c0_i32_1 = arith.constant 0 : i32
    return %c0_i32, %c0_i32_0 : i32, i32
  }
  func.func @transform_5(%arg0: i32, %arg1: i32) -> (i32, i32, i32, i32) {
    %c0_i32 = arith.constant 0 : i32
    %c0_i32_0 = arith.constant 0 : i32
    %c0_i32_1 = arith.constant 0 : i32
    return %arg0, %arg1, %c0_i32, %c0_i32_0 : i32, i32, i32, i32
  }
}

</mosaic_0001>

<bundles_post_ra>
// kernel: tpu_custom_call.1
= control target key start
LH: loop header
LB: loop body
LE: loop exit
PB: predicated region body
PF: predicated region fallthrough
CT: control target
= control target key end

     0   :  { %10 = vsyncpa [#allocation3], 0  ;;  %s21717_s0 = inlined_call_operand.vmem [shape: bf16[2,32,40,3], index: 0, kind: input, shape index: {}]   ;;  %s21718_s1 = inlined_call_operand.vmem [shape: bf16[2,32,40,3], index: 1, kind: input, shape index: {}]   ;;  %s21719_s2 = inlined_call_operand.vmem [shape: bf16[2,32,40,3], index: 2, kind: input, shape index: {}]   ;;  %s21720_s3 = inlined_call_operand.vmem [shape: bf16[9,3,64], index: 3, kind: input, shape index: {}]   ;;  %s21721_s4 = inlined_call_operand.vmem [shape: f32[1,64], index: 4, kind: input, shape index: {}]   ;;  %s21722_s5 = inlined_call_operand.hbm [shape: bf16[2,32,40,64], index: 5, kind: output, shape index: {}]  }
   0x1   :  { %12 = vsyncpa [#allocation3 + $0x1], 0  ;;  %s16059_s18 = smov 0   ;;  %s16061_s0 = smov 0  }
   0x2   :  { %s16063_s19 = smov 0   ;;  %s16065_s20 = smov 0  }
   0x3   :  { %s16067_s2 = smov 0   ;;  %s16069_s21 = smov 0  }
   0x4 LB: > { %s12404_s22 = sadd.s32 4294967295, %s16022_s21   ;;  %s12405_s23 = sadd.s32 4294967294, %s16022_s21   ;;  %s16022_s21 = sphi %s16069_s21, %s18_s21   ;;  %s16018_s2 = sphi %s16067_s2, %s23562_s2   ;;  %s16014_s20 = sphi %s16065_s20, %s23561_s20   ;;  %s16010_s19 = sphi %s16063_s19, %s23560_s19   ;;  %s16006_s0 = sphi %s16061_s0, %s23559_s0   ;;  %s16002_s18 = sphi %s16059_s18, %s23558_s18  }
   0x5   : > { %s30_s24 = sadd.s32 1, %s16018_s2  ;;  %s181_s25 = sadd.s32 1, %s16010_s19 }
   0x6   : > { %p32_p0 = scmp.ge.s32.totalorder %s30_s24, 2  ;;  %p191_p1 = scmp.ne.s32.totalorder %s16010_s19, %s16006_s0 }
   0x7   : > { %p192_p2 = scmp.eq.s32.totalorder %s12404_s22, 1  ;;  %p197_p3 = scmp.ne.s32.totalorder %s16006_s0, %s16002_s18 }
   0x8   : > { %s23564_s24 = smov (%p32_p0, %s30_s24), 0  ;;  %p198_p5 = scmp.eq.s32.totalorder %s12405_s23, 1 }
   0x9   : > { %p16099_p4 = por %p192_p2, %p191_p1  ;;  %s176_s27 = ssub.s32 %s16018_s2, %s23564_s24 }
   0xa   : > { %p12408_p6 = scmp.ge.s32.totalorder %s16022_s21, 1  ;;  %p179_p7 = scmp.eq.s32.totalorder %s176_s27, 0 }
   0xb   : > { %p16106_p8 = por %p198_p5, %p197_p3  ;;  %p276_p9 = scmp.lt.s32.totalorder %s16022_s21, 3 }
   0xc   : > { %s16112_s29 = scalar_select %p179_p7, %s16010_s19, %s181_s25  }
   0xd   : > { %p277_p10 = pnand %p12408_p6, %p276_p9 }
   0xf   : > { %280 = sbr.rel (%p277_p10) target bundleno = 1702 (0x6a6), region = 40 }
  0x14   : > { %v12499_v0 = vld [vmem:[%s21720_s3 + $0x2] sm:$0x3]  ;;  %vm1888_vm0 = vcmask 1040384   ;;  %vm1889_vm1 = vcmask 1041408   ;;  %v16024_v1 = vmov 65535   ;;  %v21723_v3 = vmov 0  }
  0x15   : > { %v1890_v2 = vsel %vm1888_vm0, 4294967295, %v16024_v1  ;;  %v16120_v4 = vcombine.low %v21723_v3, %v21723_v3  ;;  %p353_p11 = scmp.lt.s32.totalorder %s16014_s20, 1  ;;  %v1000_v6 = vld [vmem:[%s21720_s3] sm:$0x3]  ;;  %v12660_v11 = vld [vmem:[%s21720_s3 + $0x4] sm:$0x3] }
  0x16   : > { %v16123_v5 = vsel %vm1889_vm1, %v1890_v2, 0  ;;  %vm1003_vm2 = vsmask.f32 7424  ;;  %vm1647_vm3 = vcmask 23552   ;;  %vm993_vm4 = vcmask 1043456   ;;  %s332_s13 = sand.u32 1, %s16006_s0  }
  0x17   : > { %22094 = vst [vmem:[#allocation5_spill] sm:$0xff] %v16120_v4  ;;  %22095 = vst [vmem:[#allocation6_spill] sm:$0xff] %v16123_v5  ;;  %v1893_v7 = vand.u32 %v12499_v0, %v16123_v5  ;;  %v1005_v8 = vshrl.u32 %v16120_v4, 16  ;;  %v1007_v9 = vshll.u32 %v16120_v4, 16  ;;  %s354_s9 = scalar_select %p353_p11, %s16014_s20, 1  ;;  %v16133_v10 = vand.u32 %v16123_v5, %v1000_v6 }
  0x18   : > { %v3746_v12 = vand.u32 %v12660_v11, %v16123_v5  ;;  %vm3343_vm5 = vcmask 1046528   ;;  %vm5696_vm6 = vsmask.f32 3328  ;;  %vm7045_vm7 = vcmask 1042432   ;;  %s20756_s14 = smul.u32 640, %s332_s13  ;;  %s16026_s11 = smov [#allocation2]  }
  0x19   : > { %14122 = vmatprep.subr.bf16.mxu0 %v1893_v7  ;;  %15580 = vmatprep.subr.bf16.mxu1 %v1893_v7  ;;  %v16139_v13 = vrot.slane %v1007_v9, 1  ;;  %s15583_s12 = smul.u32 640, %s354_s9  ;;  %vm10947_vm8 = vsmask.f32 256  ;;  %vm12102_vm10 = vcmask 519168   ;;  %s21672_s9 = scalar_lea.sflag [#allocation3], %s332_s13 }
  0x1a   : > { %14123 = vmatpush3.bf16.msra.mxu0 %v1893_v7  ;;  %15581 = vmatpush3.bf16.msra.mxu1 %v1893_v7  ;;  %vm20760_vm9 = vmand %vm1888_vm0, %vm10947_vm8  ;;  %s20783_s16 = scalar_lea.vmem [#allocation2], %s20756_s14  ;;  %s15584_s30 = smul.u32 10240, %s16014_s20 }
  0x1b   : > { %22096 = vst [vmem:[#allocation7_spill] sm:$0xff] %v16139_v13  ;;  %v16142_v14 = vor.u32 %v16139_v13, %v1005_v8  ;;  %s16147_s15 = scalar_lea.vmem %s21718_s1, %s15583_s12  ;;  %14284 = vmatprep.subr.bf16.mxu1 %v16133_v10  ;;  %14446 = vmatprep.subr.bf16.mxu0 %v3746_v12  ;;  %s12280_s6 = sshll.u32 %s20783_s16, 4  ;;  %s21664_s6 = int_to_ptr.vmem [resolvable:$true] %s12280_s6 }
  0x1c   : > { %v15644_v15 = vld [vmem:[%s16147_s15] ss:$0 sps:$4 sm:$0xff]   ;;  %v16163_v18 = vld [vmem:[%s16147_s15 + $0x12c] sm:$0xff]   ;;  %v16166_v19 = vld [vmem:[%s16147_s15 + $0x134] sm:$0xff]   ;;  %s21660_s8 = scalar_lea.hbm %s21722_s5, %s15584_s30  ;;  %s15946_s10 = scalar_lea.vmem %s21664_s6, 10240 }
  0x1d   : > { %22097 = vst [vmem:[#allocation8_spill] sm:$0xff] %v16142_v14  ;;  %v16154_v16 = vsel %vm1003_vm2, %v16142_v14, %v16139_v13  ;;  %v16160_v17 = vsel %vm993_vm4, %v16120_v4, %v15644_v15  ;;  %22100 = vst [vmem:[#allocation11_spill] sm:$0xff] %v16163_v18  ;;  %v16170_v21 = vld [vmem:[%s16147_s15 + $0x13c] sm:$0xff]   ;;  %v21738_v22 = vshll.u32 %v16163_v18, 16  ;;  %v21739_v23 = vshrl.u32 %v16163_v18, 16  ;;  %v16180_v28 = vld [vmem:[%s16147_s15 + $0x4] sm:$0xff]   ;;  %p15947_p12 = scmp.ne.s32.totalorder %s21664_s6, %s15946_s10 }
  0x1e   : > { %22098 = vst [vmem:[#allocation9_spill] sm:$0xff] %v16154_v16  ;;  %14124 = vmatprep.mubr.msk.bf16.mxu0 %vm1647_vm3, %v16154_v16  ;;  %22099 = vst [vmem:[#allocation10_spill] sm:$0xff] %v16160_v17  ;;  %v21753_v20 = vshll.u32 %v16160_v17, 16  ;;  %v21737_v24 = vshll.u32 %v16166_v19, 16  ;;  %v21733_v25 = vshrl.u32 %v16166_v19, 16  ;;  %v21735_v27 = vshll.u32 %v16170_v21, 16 }
  0x1f   : > { %22101 = vst [vmem:[#allocation12_spill] sm:$0xff] %v16166_v19  ;;  %22102 = vst [vmem:[#allocation13_spill] sm:$0xff] %v16170_v21  ;;  %v21754_v29 = vshrl.u32 %v16160_v17, 16  ;;  %v16185_v30 = vrot.slane %v21738_v22, 1  ;;  %v15649_v34 = vld [vmem:[%s16147_s15 + $0xc] sm:$0xff]   ;;  %v21748_v38 = vshll.u32 %v16180_v28, 16  ;;  %p15948_p13 = pnand %p15947_p12, %p16099_p4 }
  0x20   : > { %v1021_v26 = vrot.slane %v21753_v20, 1  ;;  %22103 = vst [vmem:[#allocation14_spill] sm:$0xff] %v16180_v28  ;;  %v1333_v31 = vrot.slane %v21737_v24, 1  ;;  %v1341_v33 = vrot.slane %v21735_v27, 1  ;;  %v16204_v39 = vld [vmem:[%s16147_s15 + $0x144] sm:$0xff]   ;;  %v21749_v40 = vshrl.u32 %v16180_v28, 16 }
  0x21   : > { %v1329_v35 = vor.u32 %v21739_v23, %v16185_v30  ;;  %22104 = vst [vmem:[#allocation15_spill] sm:$0xff] %v16204_v39  ;;  %v1035_v41 = vshll.u32 %v15649_v34, 16  ;;  %v21734_v42 = vshrl.u32 %v16170_v21, 16  ;;  %v16209_v43 = vld [vmem:[%s16147_s15 + $0x14c] sm:$0xff]   ;;  %v1029_v46 = vrot.slane %v21748_v38, 1  ;;  %v16225_v51 = vld [vmem:[%s16147_s15 + $0x14] sm:$0xff]   ;;  %p15949_p0 = pneg %p15948_p13 }
  0x22   : > { %v1022_v32 = vsel %vm1003_vm2, %v16142_v14, %v1021_v26  ;;  %v1337_v36 = vor.u32 %v21733_v25, %v1333_v31  ;;  %v1025_v37 = vor.u32 %v21754_v29, %v1021_v26  ;;  %22105 = vst [vmem:[#allocation16_spill] sm:$0xff] %v16209_v43  ;;  %v21726_v47 = vshll.u32 %v16204_v39, 16  ;;  %22108 = vst [vmem:[#allocation19_spill] sm:$0xff] %v16225_v51  ;;  %v16236_v56 = vld [vmem:[%s16147_s15 + $0x1c] sm:$0xff]   ;;  %v16239_v57 = vld [vmem:[%s16147_s15 + $0x154] sm:$0xff]   ;;  %s15950_s12 = sshll.u32 %s16026_s11, 4  ;;  %s15951_s12 = int_to_ptr.vmem [resolvable:$false] %s15950_s12 }
  0x23   : > { %14125 = vmatmul.mubr.msk.bf16.vlgmr.msra.gmra.mxu0 %vm1647_vm3, %v1022_v32  ;;  %v16212_v44 = vsel %vm1003_vm2, %v1329_v35, %v1333_v31  ;;  %v1037_v48 = vrot.slane %v1035_v41, 1  ;;  %v5705_v49 = vrot.slane %v1035_v41, 5  ;;  %v1345_v50 = vor.u32 %v21734_v42, %v1341_v33  ;;  %22109 = vst [vmem:[#allocation20_spill] sm:$0xff] %v16239_v57  ;;  %v16260_v8 = vld [vmem:[%s16147_s15 + $0x15c] sm:$0xff]   ;;  %s15952_s14 = scalar_lea.vmem %s15951_s12, 20480  ;;  %p15953_p1 = scmp.lt.s32.totalorder %s21664_s6, %s15951_s12 }
  0x24   : > { %14447 = vmatpush3.bf16.msra.mxu0 %v3746_v12  ;;  %22106 = vst [vmem:[#allocation17_spill] sm:$0xff] %v16212_v44  ;;  %v16215_v45 = vsel %vm1003_vm2, %v1337_v36, %v1341_v33  ;;  %14204 = vmatprep.mubr.msk.bf16.mxu1 %vm1647_vm3, %v16212_v44  ;;  %v1030_v52 = vsel %vm1003_vm2, %v1025_v37, %v1029_v46  ;;  %v1349_v54 = vrot.slane %v21726_v47, 1  ;;  %v21727_v55 = vshrl.u32 %v16204_v39, 16  ;;  %v16267_v12 = vld [vmem:[%s16147_s15 + $0x24] sm:$0xff]   ;;  %v16277_v33 = vld [vmem:[%s16147_s15 + $0x2c] sm:$0xff]   ;;  %p15954_p2 = scmp.lt.s32.totalorder %s15952_s14, %s15946_s10 }
  0x25   : > { %22107 = vst [vmem:[#allocation18_spill] sm:$0xff] %v16215_v45  ;;  %14205 = vmatmul.mubr.msk.bf16.vlgmr.msra.gmra.mxu1 %vm1647_vm3, %v16215_v45  ;;  %v1033_v53 = vor.u32 %v21749_v40, %v1029_v46  ;;  %14128 = vmatprep.mubr.msk.bf16.mxu0 %vm1647_vm3, %v1030_v52  ;;  %v21732_v58 = vshll.u32 %v16209_v43, 16  ;;  %v1039_v59 = vshrl.u32 %v15649_v34, 16  ;;  %v21746_v60 = vshll.u32 %v16225_v51, 16  ;;  %22111 = vst [vmem:[#allocation22_spill] sm:$0xff] %v16260_v8  ;;  %v16416_v40 = vld [vmem:[%s16147_s15 + $0x54] sm:$0xff]  }
  0x26   : > { %14285 = vmatpush3.bf16.msra.mxu1 %v16133_v10  ;;  %v21747_v61 = vshrl.u32 %v16225_v51, 16  ;;  %v16248_v63 = vsel %vm1003_vm2, %v1345_v50, %v1349_v54  ;;  %v1353_v0 = vor.u32 %v21727_v55, %v1349_v54  ;;  %v21763_v1 = vshll.u32 %v16236_v56, 16  ;;  %22112 = vst [vmem:[#allocation23_spill] sm:$0xff] %v16267_v12  ;;  %22131 = vst [vmem:[#allocation42_spill] sm:$0xff] %v16416_v40  ;;  %v16583_v44 = vld [vmem:[%s16147_s15 + $0x84] sm:$0xff]   ;;  %v16866_v39 = vld [vmem:[%s16147_s15 + $0x20c] sm:$0xff]   ;;  %p15955_p3 = por %p15954_p2, %p15953_p1 }
  0x27   : > { %v1038_v62 = vsel %vm1003_vm2, %v1033_v53, %v1037_v48  ;;  %22110 = vst [vmem:[#allocation21_spill] sm:$0xff] %v16248_v63  ;;  %14208 = vmatprep.mubr.msk.bf16.mxu1 %vm1647_vm3, %v16248_v63  ;;  %v1357_v2 = vrot.slane %v21732_v58, 1  ;;  %v1041_v6 = vor.u32 %v1039_v59, %v1037_v48  ;;  %v1045_v7 = vrot.slane %v21746_v60, 1  ;;  %v16290_v48 = vld [vmem:[%s16147_s15 + $0x164] sm:$0xff]   ;;  %22165 = vst [vmem:[#allocation63_spill] sm:$0xff] %v16583_v44 }
  0x28   : > { %v5704_v9 = vrot.slane %v1039_v59, 4  ;;  %v1053_v10 = vrot.slane %v21763_v1, 1  ;;  %v21730_v11 = vshrl.u32 %v16209_v43, 16  ;;  %v21724_v32 = vshll.u32 %v16239_v57, 16  ;;  %22115 = vst [vmem:[#allocation26_spill] sm:$0xff] %v16290_v48  ;;  %v16463_v1 = vld [vmem:[%s16147_s15 + $0x64] sm:$0xff]   ;;  %p15956_p5 = pnand %p15955_p3, %p15949_p0 }
  0x29   : > { %v16270_v15 = vsel %vm1003_vm2, %v1353_v0, %v1357_v2  ;;  %v1046_v26 = vsel %vm1003_vm2, %v1041_v6, %v1045_v7  ;;  %v1049_v31 = vor.u32 %v21747_v61, %v1045_v7  ;;  %v21725_v36 = vshrl.u32 %v16239_v57, 16  ;;  %v16312_v6 = vld [vmem:[%s16147_s15 + $0x34] sm:$0xff]   ;;  %22137 = vst [vmem:[#allocation48_spill] sm:$0xff] %v16463_v1  ;;  %22239 = vst [vmem:[#allocation101_spill] sm:$0xff] %v16866_v39  ;;  %v17185_v43 = vld [vmem:[%s16147_s15 + $0x264] sm:$0xff]  }
  0x2a   : > { %22113 = vst [vmem:[#allocation24_spill] sm:$0xff] %v16270_v15  ;;  %v16280_v34 = vor.u32 %v5705_v49, %v5704_v9  ;;  %v1361_v35 = vor.u32 %v21730_v11, %v1357_v2  ;;  %v1365_v37 = vrot.slane %v21724_v32, 1  ;;  %v21729_v41 = vshll.u32 %v16260_v8, 16  ;;  %v16309_v2 = vld [vmem:[%s16147_s15 + $0x16c] sm:$0xff]   ;;  %22119 = vst [vmem:[#allocation30_spill] sm:$0xff] %v16312_v6  ;;  %v16357_v11 = vld [vmem:[%s16147_s15 + $0x44] sm:$0xff]  }
  0x2b   : > { %14129 = vmatmul.mubr.msk.bf16.gmra.mxu0 %vm1647_vm3, %v1038_v62  ;;  %v21762_v46 = vshrl.u32 %v16236_v56, 16  ;;  %v21744_v49 = vshll.u32 %v16267_v12, 16  ;;  %v21745_v50 = vshrl.u32 %v16267_v12, 16  ;;  %v21761_v52 = vshll.u32 %v16277_v33, 16  ;;  %22118 = vst [vmem:[#allocation29_spill] sm:$0xff] %v16309_v2  ;;  %22125 = vst [vmem:[#allocation36_spill] sm:$0xff] %v16357_v11 }
  0x2c   : > { %14132 = vmatprep.mubr.msk.bf16.mxu0 %vm1647_vm3, %v1046_v26  ;;  %22114 = vst [vmem:[#allocation25_spill] sm:$0xff] %v16280_v34  ;;  %v21728_v53 = vshrl.u32 %v16260_v8, 16  ;;  %v16299_v54 = vsel %vm1003_vm2, %v1049_v31, %v1053_v10  ;;  %v16302_v59 = vsel %vm1003_vm2, %v1361_v35, %v1365_v37  ;;  %v1369_v62 = vor.u32 %v21725_v36, %v1365_v37  ;;  %v16337_v36 = vld [vmem:[%s16147_s15 + $0x3c] sm:$0xff]  }
  0x2d   : > { %14209 = vmatmul.mubr.msk.bf16.gmra.mxu1 %vm1647_vm3, %v16270_v15  ;;  %22116 = vst [vmem:[#allocation27_spill] sm:$0xff] %v16299_v54  ;;  %22117 = vst [vmem:[#allocation28_spill] sm:$0xff] %v16302_v59  ;;  %v1373_v0 = vrot.slane %v21729_v41, 1  ;;  %v1057_v7 = vor.u32 %v21762_v46, %v1053_v10  ;;  %v1061_v9 = vrot.slane %v21744_v49, 1  ;;  %v1069_v26 = vrot.slane %v21761_v52, 1  ;;  %v16354_v41 = vld [vmem:[%s16147_s15 + $0x17c] sm:$0xff]  }
  0x2e   : > { %14212 = vmatprep.mubr.msk.bf16.mxu1 %vm1647_vm3, %v16302_v59  ;;  %v21731_v35 = vshll.u32 %v16290_v48, 16  ;;  %v21741_v32 = vshrl.u32 %v16290_v48, 16  ;;  %v21736_v55 = vshll.u32 %v16309_v2, 16  ;;  %22124 = vst [vmem:[#allocation35_spill] sm:$0xff] %v16354_v41  ;;  %v21759_v60 = vshrl.u32 %v16354_v41, 16  ;;  %v16588_v59 = vld [vmem:[%s16147_s15 + $0x1bc] sm:$0xff]  }
  0x2f   : > { %v1377_v31 = vor.u32 %v21728_v53, %v1373_v0  ;;  %v16328_v37 = vsel %vm1003_vm2, %v1369_v62, %v1373_v0  ;;  %v16331_v10 = vsel %vm1003_vm2, %v1057_v7, %v1061_v9  ;;  %v1065_v3 = vor.u32 %v21745_v50, %v1061_v9  ;;  %v16347_v7 = vld [vmem:[%s16147_s15 + $0x174] sm:$0xff]   ;;  %22167 = vst [vmem:[#allocation64_spill] sm:$0xff] %v16588_v59 }
  0x30   : > { %22120 = vst [vmem:[#allocation31_spill] sm:$0xff] %v16328_v37  ;;  %22121 = vst [vmem:[#allocation32_spill] sm:$0xff] %v16331_v10  ;;  %v1381_v47 = vrot.slane %v21731_v35, 1  ;;  %v21757_v62 = vshrl.u32 %v16277_v33, 16  ;;  %v21740_v0 = vshll.u32 %v16312_v6, 16  ;;  %v21742_v9 = vshrl.u32 %v16309_v2, 16 }
  0x31   : > { %22122 = vst [vmem:[#allocation33_spill] sm:$0xff] %v16347_v7  ;;  %v1389_v35 = vrot.slane %v21736_v55, 1  ;;  %v16369_v42 = vsel %vm1003_vm2, %v1065_v3, %v1069_v26  ;;  %v21750_v55 = vshrl.u32 %v16312_v6, 16  ;;  %v21743_v24 = vshll.u32 %v16347_v7, 16  ;;  %22318 = vst [vmem:[#allocation144_spill] sm:$0xff] %v17185_v43 }
  0x32   : > { %v16351_v53 = vsel %vm1003_vm2, %v1377_v31, %v1381_v47  ;;  %v1073_v58 = vor.u32 %v21757_v62, %v1069_v26  ;;  %v1077_v25 = vrot.slane %v21740_v0, 1  ;;  %v21756_v31 = vshll.u32 %v16337_v36, 16  ;;  %22126 = vst [vmem:[#allocation37_spill] sm:$0xff] %v16369_v42  ;;  %v16443_v62 = vld [vmem:[%s16147_s15 + $0x194] sm:$0xff]  }
  0x33   : > { %14133 = vmatmul.mubr.msk.bf16.gmra.mxu0 %vm1647_vm3, %v16299_v54  ;;  %22123 = vst [vmem:[#allocation34_spill] sm:$0xff] %v16351_v53  ;;  %v1385_v27 = vor.u32 %v21741_v32, %v1381_v47  ;;  %v1393_v23 = vor.u32 %v21742_v9, %v1389_v35  ;;  %v1397_v3 = vrot.slane %v21743_v24, 1  ;;  %v21751_v26 = vshll.u32 %v16354_v41, 16  ;;  %v16392_v32 = vld [vmem:[%s16147_s15 + $0x4c] sm:$0xff]   ;;  %v16395_v9 = vld [vmem:[%s16147_s15 + $0x184] sm:$0xff]   ;;  %22135 = vst [vmem:[#allocation46_spill] sm:$0xff] %v16443_v62 }
  0x34   : > { %14136 = vmatprep.mubr.msk.bf16.mxu0 %vm1647_vm3, %v16331_v10  ;;  %v16378_v22 = vsel %vm1003_vm2, %v1073_v58, %v1077_v25  ;;  %v21755_v0 = vshrl.u32 %v16337_v36, 16  ;;  %v21752_v47 = vshll.u32 %v16357_v11, 16  ;;  %v1085_v58 = vrot.slane %v21756_v31, 1  ;;  %22128 = vst [vmem:[#allocation39_spill] sm:$0xff] %v16395_v9  ;;  %v16698_v10 = vld [vmem:[%s16147_s15 + $0x1dc] sm:$0xff]   ;;  %v16756_v54 = vld [vmem:[%s16147_s15 + $0x1ec] sm:$0xff]  }
  0x35   : > { %14213 = vmatmul.mubr.msk.bf16.gmra.mxu1 %vm1647_vm3, %v16328_v37  ;;  %22127 = vst [vmem:[#allocation38_spill] sm:$0xff] %v16378_v22  ;;  %v16398_v24 = vsel %vm1003_vm2, %v1385_v27, %v1389_v35  ;;  %v1081_v49 = vor.u32 %v21750_v55, %v1077_v25  ;;  %v21758_v50 = vshrl.u32 %v16347_v7, 16  ;;  %v16407_v61 = vsel %vm1003_vm2, %v1393_v23, %v1397_v3  ;;  %v16420_v55 = vld [vmem:[%s16147_s15 + $0x18c] sm:$0xff]   ;;  %v17037_v41 = vld [vmem:[%s16147_s15 + $0x104] sm:$0xff]  }
  0x36   : > { %14216 = vmatprep.mubr.msk.bf16.mxu1 %vm1647_vm3, %v16351_v53  ;;  %22129 = vst [vmem:[#allocation40_spill] sm:$0xff] %v16398_v24  ;;  %22130 = vst [vmem:[#allocation41_spill] sm:$0xff] %v16407_v61  ;;  %v1405_v38 = vrot.slane %v21751_v26, 1  ;;  %v1089_v27 = vor.u32 %v21755_v0, %v1085_v58  ;;  %v1093_v35 = vrot.slane %v21752_v47, 1  ;;  %v21760_v25 = vshll.u32 %v16395_v9, 16  ;;  %v16527_v53 = vld [vmem:[%s16147_s15 + $0x74] sm:$0xff]  }
  0x37   : > { %22132 = vst [vmem:[#allocation43_spill] sm:$0xff] %v16420_v55  ;;  %v21764_v23 = vshll.u32 %v16392_v32, 16  ;;  %v16426_v26 = vsel %vm1003_vm2, %v1081_v49, %v1085_v58  ;;  %v1401_v47 = vor.u32 %v21758_v50, %v1397_v3  ;;  %v21766_v20 = vshrl.u32 %v16357_v11, 16  ;;  %v16447_v50 = vld [vmem:[%s16147_s15 + $0x5c] sm:$0xff]   ;;  %22152 = vst [vmem:[#allocation56_spill] sm:$0xff] %v16527_v53  ;;  %v16530_v37 = vld [vmem:[%s16147_s15 + $0x1ac] sm:$0xff]  }
  0x38   : > { %22133 = vst [vmem:[#allocation44_spill] sm:$0xff] %v16426_v26  ;;  %v1409_v29 = vor.u32 %v21759_v60, %v1405_v38  ;;  %v16436_v0 = vsel %vm1003_vm2, %v1089_v27, %v1093_v35  ;;  %v1413_v31 = vrot.slane %v21760_v25, 1  ;;  %v21768_v49 = vshrl.u32 %v16392_v32, 16  ;;  %22153 = vst [vmem:[#allocation57_spill] sm:$0xff] %v16530_v37 }
  0x39   : > { %22134 = vst [vmem:[#allocation45_spill] sm:$0xff] %v16436_v0  ;;  %v21767_v58 = vshll.u32 %v16416_v40, 16  ;;  %v1101_v27 = vrot.slane %v21764_v23, 1  ;;  %v16455_v25 = vsel %vm1003_vm2, %v1401_v47, %v1405_v38  ;;  %v1097_v52 = vor.u32 %v21766_v20, %v1093_v35  ;;  %v16479_v20 = vld [vmem:[%s16147_s15 + $0x19c] sm:$0xff]   ;;  %v16492_v35 = vld [vmem:[%s16147_s15 + $0x1a4] sm:$0xff]   ;;  %v16507_v47 = vld [vmem:[%s16147_s15 + $0x6c] sm:$0xff]  }
  0x3a   : > { %22136 = vst [vmem:[#allocation47_spill] sm:$0xff] %v16455_v25  ;;  %v21772_v46 = vshrl.u32 %v16420_v55, 16  ;;  %v16466_v3 = vsel %vm1003_vm2, %v1409_v29, %v1413_v31  ;;  %v22139_v60 = vshll.u32 %v16420_v55, 16  ;;  %22140 = vst [vmem:[#allocation50_spill] sm:$0xff] %v16479_v20  ;;  %v22145_v13 = vshll.u32 %v16443_v62, 16 }
  0x3b   : > { %14137 = vmatmul.mubr.msk.bf16.gmra.mxu0 %vm1647_vm3, %v16369_v42  ;;  %22138 = vst [vmem:[#allocation49_spill] sm:$0xff] %v16466_v3  ;;  %v1105_v23 = vor.u32 %v21768_v49, %v1101_v27  ;;  %v1109_v38 = vrot.slane %v21767_v58, 1  ;;  %v16482_v29 = vsel %vm1003_vm2, %v1097_v52, %v1101_v27  ;;  %v22142_v58 = vshrl.u32 %v16395_v9, 16  ;;  %22143 = vst [vmem:[#allocation52_spill] sm:$0xff] %v16492_v35  ;;  %v16843_v9 = vld [vmem:[%s16147_s15 + $0xcc] sm:$0xff]  }
  0x3c   : > { %14140 = vmatprep.mubr.msk.bf16.mxu0 %vm1647_vm3, %v16378_v22  ;;  %v1421_v14 = vrot.slane %v22139_v60, 1  ;;  %22141 = vst [vmem:[#allocation51_spill] sm:$0xff] %v16482_v29  ;;  %v1429_v52 = vrot.slane %v22145_v13, 1  ;;  %v22148_v13 = vshrl.u32 %v16416_v40, 16  ;;  %v22164_v45 = vshll.u32 %v16527_v53, 16  ;;  %22195 = vst [vmem:[#allocation78_spill] sm:$0xff] %v16698_v10 }
  0x3d   : > { %14217 = vmatmul.mubr.msk.bf16.gmra.mxu1 %vm1647_vm3, %v16398_v24  ;;  %v1417_v49 = vor.u32 %v22142_v58, %v1413_v31  ;;  %v16495_v16 = vsel %vm1003_vm2, %v1105_v23, %v1109_v38  ;;  %v22146_v31 = vshll.u32 %v16447_v50, 16  ;;  %v22151_v24 = vshll.u32 %v16463_v1, 16  ;;  %22209 = vst [vmem:[#allocation85_spill] sm:$0xff] %v16756_v54  ;;  %22232 = vst [vmem:[#allocation97_spill] sm:$0xff] %v16843_v9 }
  0x3e   : > { %14220 = vmatprep.mubr.msk.bf16.mxu1 %vm1647_vm3, %v16407_v61  ;;  %v1425_v60 = vor.u32 %v21772_v46, %v1421_v14  ;;  %22144 = vst [vmem:[#allocation53_spill] sm:$0xff] %v16495_v16  ;;  %v1113_v27 = vor.u32 %v22148_v13, %v1109_v38  ;;  %v22150_v46 = vshrl.u32 %v16447_v50, 16  ;;  %v22154_v38 = vshll.u32 %v16479_v20, 16  ;;  %22282 = vst [vmem:[#allocation124_spill] sm:$0xff] %v17037_v41 }
  0x3f   : > { %v1117_v58 = vrot.slane %v22146_v31, 1  ;;  %v16510_v23 = vsel %vm1003_vm2, %v1417_v49, %v1421_v14  ;;  %v21781_v31 = vshll.u32 %v16492_v35, 16  ;;  %v1125_v14 = vrot.slane %v22151_v24, 1 }
  0x40   : > { %22147 = vst [vmem:[#allocation54_spill] sm:$0xff] %v16510_v23  ;;  %v22157_v13 = vshrl.u32 %v16479_v20, 16  ;;  %v17003_v20 = vld [vmem:[%s16147_s15 + $0x234] sm:$0xff]  }
  0x41   : > { %v1121_v61 = vor.u32 %v22150_v46, %v1117_v58  ;;  %v16539_v24 = vsel %vm1003_vm2, %v1113_v27, %v1117_v58  ;;  %v16555_v58 = vld [vmem:[%s16147_s15 + $0x1b4] sm:$0xff]   ;;  %22275 = vst [vmem:[#allocation120_spill] sm:$0xff] %v17003_v20 }
  0x42   : > { %22155 = vst [vmem:[#allocation58_spill] sm:$0xff] %v16539_v24  ;;  %22158 = vst [vmem:[#allocation60_spill] sm:$0xff] %v16555_v58 }
  0x43   : > { %14141 = vmatmul.mubr.msk.bf16.gmra.mxu0 %vm1647_vm3, %v16426_v26 }
  0x44   : > { %14144 = vmatprep.mubr.msk.bf16.mxu0 %vm1647_vm3, %v16436_v0 }
  0x45   : > { %14221 = vmatmul.mubr.msk.bf16.gmra.mxu1 %vm1647_vm3, %v16455_v25  ;;  %v16519_v25 = vsel %vm1003_vm2, %v1425_v60, %v1429_v52  ;;  %v1437_v60 = vrot.slane %v22154_v38, 1  ;;  %v16549_v38 = vsel %vm1003_vm2, %v1121_v61, %v1125_v14 }
  0x46   : > { %14224 = vmatprep.mubr.msk.bf16.mxu1 %vm1647_vm3, %v16466_v3  ;;  %v21782_v3 = vshrl.u32 %v16443_v62, 16  ;;  %22149 = vst [vmem:[#allocation55_spill] sm:$0xff] %v16519_v25  ;;  %22156 = vst [vmem:[#allocation59_spill] sm:$0xff] %v16549_v38 }
  0x47   : > { %v1441_v46 = vor.u32 %v22157_v13, %v1437_v60  ;;  %v22161_v13 = vshrl.u32 %v16463_v1, 16 }
  0x48   : > { %v1433_v49 = vor.u32 %v21782_v3, %v1429_v52  ;;  %v22159_v52 = vshll.u32 %v16507_v47, 16  ;;  %v16563_v3 = vld [vmem:[%s16147_s15 + $0x7c] sm:$0xff]  }
  0x49   : > { %v1129_v27 = vor.u32 %v22161_v13, %v1125_v14  ;;  %v22166_v14 = vshll.u32 %v16530_v37, 16 }
  0x4a   : > { %v16566_v61 = vsel %vm1003_vm2, %v1433_v49, %v1437_v60  ;;  %v1141_v49 = vrot.slane %v22164_v45, 1  ;;  %v22169_v45 = vshrl.u32 %v16492_v35, 16 }
  0x4b   : > { %14145 = vmatmul.mubr.msk.bf16.gmra.mxu0 %vm1647_vm3, %v16482_v29  ;;  %22160 = vst [vmem:[#allocation61_spill] sm:$0xff] %v16566_v61  ;;  %v1453_v13 = vrot.slane %v22166_v14, 1  ;;  %v22170_v14 = vshrl.u32 %v16530_v37, 16  ;;  %v16675_v29 = vld [vmem:[%s16147_s15 + $0x9c] sm:$0xff]  }
  0x4c   : > { %14148 = vmatprep.mubr.msk.bf16.mxu0 %vm1647_vm3, %v16495_v16  ;;  %v16631_v16 = vld [vmem:[%s16147_s15 + $0x94] sm:$0xff]  }
  0x4d   : > { %14225 = vmatmul.mubr.msk.bf16.gmra.mxu1 %vm1647_vm3, %v16510_v23  ;;  %v1445_v23 = vrot.slane %v21781_v31, 1  ;;  %v1133_v31 = vrot.slane %v22159_v52, 1  ;;  %v22163_v52 = vshrl.u32 %v16507_v47, 16  ;;  %22177 = vst [vmem:[#allocation69_spill] sm:$0xff] %v16631_v16  ;;  %v22193_v42 = vshll.u32 %v16631_v16, 16 }
  0x4e   : > { %14228 = vmatprep.mubr.msk.bf16.mxu1 %vm1647_vm3, %v16519_v25 }
  0x4f   : > { %v16575_v15 = vsel %vm1003_vm2, %v1441_v46, %v1445_v23  ;;  %v1137_v63 = vor.u32 %v22163_v52, %v1133_v31  ;;  %v16594_v52 = vsel %vm1003_vm2, %v1129_v27, %v1133_v31  ;;  %v1449_v60 = vor.u32 %v22169_v45, %v1445_v23  ;;  %v16615_v45 = vld [vmem:[%s16147_s15 + $0x8c] sm:$0xff]  }
  0x50   : > { %22162 = vst [vmem:[#allocation62_spill] sm:$0xff] %v16575_v15  ;;  %22168 = vst [vmem:[#allocation65_spill] sm:$0xff] %v16594_v52  ;;  %v22172_v46 = vshll.u32 %v16555_v58, 16  ;;  %v22176_v27 = vshrl.u32 %v16527_v53, 16  ;;  %v21799_v31 = vshrl.u32 %v16588_v59, 16 }
  0x52   : > { %v1145_v23 = vor.u32 %v22176_v27, %v1141_v49  ;;  %v16647_v27 = vld [vmem:[%s16147_s15 + $0x1cc] sm:$0xff]  }
  0x53   : > { %14149 = vmatmul.mubr.msk.bf16.gmra.mxu0 %vm1647_vm3, %v16539_v24  ;;  %v16604_v24 = vsel %vm1003_vm2, %v1137_v63, %v1141_v49  ;;  %v22174_v63 = vshll.u32 %v16563_v3, 16  ;;  %22182 = vst [vmem:[#allocation71_spill] sm:$0xff] %v16647_v27  ;;  %v16660_v49 = vld [vmem:[%s16147_s15 + $0x1d4] sm:$0xff]  }
  0x54   : > { %14152 = vmatprep.mubr.msk.bf16.mxu0 %vm1647_vm3, %v16549_v38  ;;  %v1457_v38 = vor.u32 %v22170_v14, %v1453_v13  ;;  %22171 = vst [vmem:[#allocation66_spill] sm:$0xff] %v16604_v24  ;;  %22185 = vst [vmem:[#allocation73_spill] sm:$0xff] %v16660_v49 }
  0x55   : > { %14229 = vmatmul.mubr.msk.bf16.gmra.mxu1 %vm1647_vm3, %v16566_v61  ;;  %v1461_v61 = vrot.slane %v22172_v46, 1  ;;  %v1149_v14 = vrot.slane %v22174_v63, 1  ;;  %v16623_v46 = vsel %vm1003_vm2, %v1449_v60, %v1453_v13  ;;  %v22179_v63 = vshrl.u32 %v16563_v3, 16 }
  0x56   : > { %14232 = vmatprep.mubr.msk.bf16.mxu1 %vm1647_vm3, %v16575_v15  ;;  %v16611_v15 = vld [vmem:[%s16147_s15 + $0x1c4] sm:$0xff]   ;;  %22175 = vst [vmem:[#allocation68_spill] sm:$0xff] %v16623_v46  ;;  %v22180_v60 = vshll.u32 %v16583_v44, 16 }
  0x57   : > { %22173 = vst [vmem:[#allocation67_spill] sm:$0xff] %v16611_v15  ;;  %v1153_v25 = vor.u32 %v22179_v63, %v1149_v14  ;;  %v22184_v63 = vshrl.u32 %v16555_v58, 16  ;;  %v22187_v26 = vshll.u32 %v16611_v15, 16 }
  0x58   : > { %v1157_v13 = vrot.slane %v22180_v60, 1 }
  0x59   : > { %v1465_v60 = vor.u32 %v22184_v63, %v1461_v61 }
  0x5b   : > { %14153 = vmatmul.mubr.msk.bf16.gmra.mxu0 %vm1647_vm3, %v16594_v52  ;;  %v16634_v52 = vsel %vm1003_vm2, %v1457_v38, %v1461_v61  ;;  %v16650_v38 = vsel %vm1003_vm2, %v1145_v23, %v1149_v14  ;;  %v1477_v23 = vrot.slane %v22187_v26, 1  ;;  %v22188_v61 = vshll.u32 %v16615_v45, 16 }
  0x5c   : > { %14156 = vmatprep.mubr.msk.bf16.mxu0 %vm1647_vm3, %v16604_v24  ;;  %22178 = vst [vmem:[#allocation70_spill] sm:$0xff] %v16634_v52  ;;  %v22181_v24 = vshll.u32 %v16588_v59, 16  ;;  %22183 = vst [vmem:[#allocation72_spill] sm:$0xff] %v16650_v38  ;;  %v22190_v26 = vshrl.u32 %v16583_v44, 16  ;;  %v22295_v44 = vshll.u32 %v17037_v41, 16 }
  0x5d   : > { %14233 = vmatmul.mubr.msk.bf16.gmra.mxu1 %vm1647_vm3, %v16623_v46  ;;  %v16663_v46 = vsel %vm1003_vm2, %v1153_v25, %v1157_v13  ;;  %v1165_v63 = vrot.slane %v22188_v61, 1  ;;  %v21808_v61 = vshll.u32 %v16660_v49, 16 }
  0x5e   : > { %v1469_v0 = vrot.slane %v22181_v24, 1  ;;  %14236 = vmatprep.mubr.msk.bf16.mxu1 %vm1647_vm3, %v16634_v52  ;;  %22186 = vst [vmem:[#allocation74_spill] sm:$0xff] %v16663_v46  ;;  %v1161_v14 = vor.u32 %v22190_v26, %v1157_v13  ;;  %v21809_v52 = vshrl.u32 %v16611_v15, 16  ;;  %v22196_v13 = vshll.u32 %v16647_v27, 16 }
  0x5f   : > { %v22199_v26 = vshrl.u32 %v16647_v27, 16 }
  0x60   : > { %v1473_v24 = vor.u32 %v21799_v31, %v1469_v0  ;;  %v16678_v25 = vsel %vm1003_vm2, %v1465_v60, %v1469_v0  ;;  %v22192_v31 = vshrl.u32 %v16615_v45, 16  ;;  %v1173_v0 = vrot.slane %v22193_v42, 1 }
  0x61   : > { %22189 = vst [vmem:[#allocation75_spill] sm:$0xff] %v16678_v25  ;;  %v16707_v42 = vsel %vm1003_vm2, %v1161_v14, %v1165_v63  ;;  %v1481_v60 = vor.u32 %v21809_v52, %v1477_v23  ;;  %v16731_v52 = vld [vmem:[%s16147_s15 + $0xac] sm:$0xff]  }
  0x62   : > { %v16687_v22 = vsel %vm1003_vm2, %v1473_v24, %v1477_v23  ;;  %v1485_v24 = vrot.slane %v22196_v13, 1  ;;  %22197 = vst [vmem:[#allocation79_spill] sm:$0xff] %v16707_v42  ;;  %v22201_v23 = vshll.u32 %v16675_v29, 16 }
  0x63   : > { %14157 = vmatmul.mubr.msk.bf16.gmra.mxu0 %vm1647_vm3, %v16650_v38  ;;  %22191 = vst [vmem:[#allocation76_spill] sm:$0xff] %v16687_v22  ;;  %v1169_v38 = vor.u32 %v22192_v31, %v1165_v63  ;;  %v16723_v63 = vld [vmem:[%s16147_s15 + $0x1e4] sm:$0xff]  }
  0x64   : > { %14160 = vmatprep.mubr.msk.bf16.mxu0 %vm1647_vm3, %v16663_v46  ;;  %v16695_v46 = vld [vmem:[%s16147_s15 + $0xa4] sm:$0xff]   ;;  %v1489_v31 = vor.u32 %v22199_v26, %v1485_v24  ;;  %22200 = vst [vmem:[#allocation81_spill] sm:$0xff] %v16723_v63  ;;  %v22203_v26 = vshrl.u32 %v16631_v16, 16 }
  0x65   : > { %22194 = vst [vmem:[#allocation77_spill] sm:$0xff] %v16695_v46  ;;  %14237 = vmatmul.mubr.msk.bf16.gmra.mxu1 %vm1647_vm3, %v16678_v25  ;;  %v1493_v25 = vrot.slane %v21808_v61, 1  ;;  %v16717_v13 = vsel %vm1003_vm2, %v1169_v38, %v1173_v0  ;;  %v1181_v61 = vrot.slane %v22201_v23, 1  ;;  %v16734_v38 = vsel %vm1003_vm2, %v1481_v60, %v1485_v24 }
  0x66   : > { %14240 = vmatprep.mubr.msk.bf16.mxu1 %vm1647_vm3, %v16687_v22  ;;  %22198 = vst [vmem:[#allocation80_spill] sm:$0xff] %v16717_v13  ;;  %22202 = vst [vmem:[#allocation82_spill] sm:$0xff] %v16734_v38  ;;  %v1177_v14 = vor.u32 %v22203_v26, %v1173_v0  ;;  %v22205_v23 = vshrl.u32 %v16675_v29, 16  ;;  %v22206_v58 = vshll.u32 %v16695_v46, 16  ;;  %v22208_v0 = vshll.u32 %v16698_v10, 16 }
  0x68   : > { %v1185_v15 = vor.u32 %v22205_v23, %v1181_v61  ;;  %v1189_v60 = vrot.slane %v22206_v58, 1  ;;  %v1501_v26 = vrot.slane %v22208_v0, 1  ;;  %v16762_v23 = vsel %vm1003_vm2, %v1177_v14, %v1181_v61 }
  0x69   : > { %22210 = vst [vmem:[#allocation86_spill] sm:$0xff] %v16762_v23  ;;  %v22211_v58 = vshrl.u32 %v16660_v49, 16  ;;  %v22212_v0 = vshrl.u32 %v16698_v10, 16  ;;  %v22219_v14 = vshrl.u32 %v16695_v46, 16  ;;  %v21834_v61 = vshrl.u32 %v16756_v54, 16  ;;  %v16799_v49 = vld [vmem:[%s16147_s15 + $0xc4] sm:$0xff]  }
  0x6a   : > { %v16772_v62 = vsel %vm1003_vm2, %v1185_v15, %v1189_v60  ;;  %v22217_v15 = vshll.u32 %v16731_v52, 16  ;;  %22220 = vst [vmem:[#allocation91_spill] sm:$0xff] %v16799_v49  ;;  %v22237_v57 = vshll.u32 %v16799_v49, 16  ;;  %v3397_v12 = vrot.slane %v16799_v49, 1 }
  0x6b   : > { %14161 = vmatmul.mubr.msk.bf16.gmra.mxu0 %vm1647_vm3, %v16707_v42  ;;  %v16743_v42 = vsel %vm1003_vm2, %v1489_v31, %v1493_v25  ;;  %v1497_v24 = vor.u32 %v22211_v58, %v1493_v25  ;;  %v1505_v35 = vor.u32 %v22212_v0, %v1501_v26  ;;  %22213 = vst [vmem:[#allocation87_spill] sm:$0xff] %v16772_v62  ;;  %v22214_v31 = vshll.u32 %v16723_v63, 16  ;;  %v16783_v58 = vld [vmem:[%s16147_s15 + $0xbc] sm:$0xff]  }
  0x6c   : > { %14164 = vmatprep.mubr.msk.bf16.mxu0 %vm1647_vm3, %v16717_v13  ;;  %22204 = vst [vmem:[#allocation83_spill] sm:$0xff] %v16743_v42  ;;  %v16751_v13 = vld [vmem:[%s16147_s15 + $0xb4] sm:$0xff]   ;;  %22216 = vst [vmem:[#allocation89_spill] sm:$0xff] %v16783_v58  ;;  %v1197_v0 = vrot.slane %v22217_v15, 1  ;;  %v1193_v25 = vor.u32 %v22219_v14, %v1189_v60  ;;  %v22222_v15 = vshrl.u32 %v16731_v52, 16  ;;  %v16815_v14 = vld [vmem:[%s16147_s15 + $0x1fc] sm:$0xff]  }
  0x6d   : > { %22207 = vst [vmem:[#allocation84_spill] sm:$0xff] %v16751_v13  ;;  %14241 = vmatmul.mubr.msk.bf16.gmra.mxu1 %vm1647_vm3, %v16734_v38  ;;  %v1509_v38 = vrot.slane %v22214_v31, 1  ;;  %v16791_v31 = vsel %vm1003_vm2, %v1497_v24, %v1501_v26  ;;  %v22223_v24 = vshll.u32 %v16751_v13, 16  ;;  %22225 = vst [vmem:[#allocation93_spill] sm:$0xff] %v16815_v14  ;;  %v16828_v60 = vld [vmem:[%s16147_s15 + $0x204] sm:$0xff]  }
  0x6e   : > { %14244 = vmatprep.mubr.msk.bf16.mxu1 %vm1647_vm3, %v16743_v42  ;;  %v16779_v42 = vld [vmem:[%s16147_s15 + $0x1f4] sm:$0xff]   ;;  %22218 = vst [vmem:[#allocation90_spill] sm:$0xff] %v16791_v31  ;;  %v1201_v22 = vor.u32 %v22222_v15, %v1197_v0  ;;  %v22227_v15 = vshrl.u32 %v16723_v63, 16  ;;  %22228 = vst [vmem:[#allocation95_spill] sm:$0xff] %v16828_v60 }
  0x6f   : > { %22215 = vst [vmem:[#allocation88_spill] sm:$0xff] %v16779_v42  ;;  %v1205_v26 = vrot.slane %v22223_v24, 1  ;;  %v22230_v48 = vshll.u32 %v16779_v42, 16 }
  0x70   : > { %v1513_v24 = vor.u32 %v22227_v15, %v1509_v38 }
  0x73   : > { %14165 = vmatmul.mubr.msk.bf16.gmra.mxu0 %vm1647_vm3, %v16762_v23  ;;  %v16802_v23 = vsel %vm1003_vm2, %v1505_v35, %v1509_v38  ;;  %v16818_v35 = vsel %vm1003_vm2, %v1193_v25, %v1197_v0  ;;  %v1525_v25 = vrot.slane %v22230_v48, 1  ;;  %v22231_v38 = vshll.u32 %v16783_v58, 16 }
  0x74   : > { %14168 = vmatprep.mubr.msk.bf16.mxu0 %vm1647_vm3, %v16772_v62  ;;  %22221 = vst [vmem:[#allocation92_spill] sm:$0xff] %v16802_v23  ;;  %v22224_v62 = vshll.u32 %v16756_v54, 16  ;;  %22226 = vst [vmem:[#allocation94_spill] sm:$0xff] %v16818_v35  ;;  %v22234_v48 = vshrl.u32 %v16751_v13, 16  ;;  %v16924_v54 = vld [vmem:[%s16147_s15 + $0x21c] sm:$0xff]  }
  0x75   : > { %14245 = vmatmul.mubr.msk.bf16.gmra.mxu1 %vm1647_vm3, %v16791_v31  ;;  %v16831_v31 = vsel %vm1003_vm2, %v1201_v22, %v1205_v26  ;;  %v1213_v15 = vrot.slane %v22231_v38, 1  ;;  %v21847_v38 = vshll.u32 %v16828_v60, 16  ;;  %22254 = vst [vmem:[#allocation109_spill] sm:$0xff] %v16924_v54 }
  0x76   : > { %v1517_v7 = vrot.slane %v22224_v62, 1  ;;  %14248 = vmatprep.mubr.msk.bf16.mxu1 %vm1647_vm3, %v16802_v23  ;;  %22229 = vst [vmem:[#allocation96_spill] sm:$0xff] %v16831_v31  ;;  %v1209_v0 = vor.u32 %v22234_v48, %v1205_v26  ;;  %v21848_v23 = vshrl.u32 %v16779_v42, 16  ;;  %v22240_v26 = vshll.u32 %v16815_v14, 16 }
  0x77   : > { %v22243_v48 = vshrl.u32 %v16815_v14, 16 }
  0x78   : > { %v1521_v62 = vor.u32 %v21834_v61, %v1517_v7  ;;  %v16846_v22 = vsel %vm1003_vm2, %v1513_v24, %v1517_v7  ;;  %v22236_v61 = vshrl.u32 %v16783_v58, 16  ;;  %v1221_v7 = vrot.slane %v22237_v57, 1 }
  0x79   : > { %22233 = vst [vmem:[#allocation98_spill] sm:$0xff] %v16846_v22  ;;  %v16875_v57 = vsel %vm1003_vm2, %v1209_v0, %v1213_v15  ;;  %v1529_v24 = vor.u32 %v21848_v23, %v1525_v25  ;;  %v16899_v23 = vld [vmem:[%s16147_s15 + $0xdc] sm:$0xff]  }
  0x7a   : > { %v16855_v63 = vsel %vm1003_vm2, %v1521_v62, %v1525_v25  ;;  %v1533_v62 = vrot.slane %v22240_v26, 1  ;;  %22241 = vst [vmem:[#allocation102_spill] sm:$0xff] %v16875_v57  ;;  %v22245_v25 = vshll.u32 %v16843_v9, 16  ;;  %22246 = vst [vmem:[#allocation105_spill] sm:$0xff] %v16899_v23 }
  0x7b   : > { %14169 = vmatmul.mubr.msk.bf16.gmra.mxu0 %vm1647_vm3, %v16818_v35  ;;  %22235 = vst [vmem:[#allocation99_spill] sm:$0xff] %v16855_v63  ;;  %v1217_v35 = vor.u32 %v22236_v61, %v1213_v15  ;;  %v16891_v15 = vld [vmem:[%s16147_s15 + $0x214] sm:$0xff]  }
  0x7c   : > { %14172 = vmatprep.mubr.msk.bf16.mxu0 %vm1647_vm3, %v16831_v31  ;;  %v16863_v31 = vld [vmem:[%s16147_s15 + $0xd4] sm:$0xff]   ;;  %v1537_v61 = vor.u32 %v22243_v48, %v1533_v62  ;;  %22244 = vst [vmem:[#allocation104_spill] sm:$0xff] %v16891_v15  ;;  %v22248_v48 = vshrl.u32 %v16799_v49, 16 }
  0x7d   : > { %22238 = vst [vmem:[#allocation100_spill] sm:$0xff] %v16863_v31  ;;  %14249 = vmatmul.mubr.msk.bf16.gmra.mxu1 %vm1647_vm3, %v16846_v22  ;;  %v1541_v22 = vrot.slane %v21847_v38, 1  ;;  %v16885_v26 = vsel %vm1003_vm2, %v1217_v35, %v1221_v7  ;;  %v1229_v38 = vrot.slane %v22245_v25, 1  ;;  %v16902_v35 = vsel %vm1003_vm2, %v1529_v24, %v1533_v62 }
  0x7e   : > { %14252 = vmatprep.mubr.msk.bf16.mxu1 %vm1647_vm3, %v16855_v63  ;;  %22242 = vst [vmem:[#allocation103_spill] sm:$0xff] %v16885_v26  ;;  %22247 = vst [vmem:[#allocation106_spill] sm:$0xff] %v16902_v35  ;;  %v1225_v0 = vor.u32 %v22248_v48, %v1221_v7  ;;  %v22250_v25 = vshrl.u32 %v16843_v9, 16  ;;  %v22251_v14 = vshll.u32 %v16863_v31, 16  ;;  %v22253_v7 = vshll.u32 %v16866_v39, 16  ;;  %v16956_v63 = vld [vmem:[%s16147_s15 + $0xec] sm:$0xff]  }
  0x7f   : > { %22262 = vst [vmem:[#allocation113_spill] sm:$0xff] %v16956_v63 }
  0x80   : > { %v1233_v42 = vor.u32 %v22250_v25, %v1229_v38  ;;  %v1237_v24 = vrot.slane %v22251_v14, 1  ;;  %v1549_v48 = vrot.slane %v22253_v7, 1  ;;  %v16930_v25 = vsel %vm1003_vm2, %v1225_v0, %v1229_v38 }
  0x81   : > { %22255 = vst [vmem:[#allocation110_spill] sm:$0xff] %v16930_v25  ;;  %v22256_v14 = vshrl.u32 %v16828_v60, 16  ;;  %v22257_v7 = vshrl.u32 %v16866_v39, 16  ;;  %v22264_v0 = vshrl.u32 %v16863_v31, 16  ;;  %v16967_v60 = vld [vmem:[%s16147_s15 + $0xf4] sm:$0xff]  }
  0x82   : > { %22265 = vst [vmem:[#allocation115_spill] sm:$0xff] %v16967_v60  ;;  %v22281_v55 = vshll.u32 %v16967_v60, 16 }
  0x83   : > { %14173 = vmatmul.mubr.msk.bf16.gmra.mxu0 %vm1647_vm3, %v16875_v57  ;;  %v16911_v57 = vsel %vm1003_vm2, %v1537_v61, %v1541_v22  ;;  %v1545_v62 = vor.u32 %v22256_v14, %v1541_v22  ;;  %v1553_v10 = vor.u32 %v22257_v7, %v1549_v48  ;;  %v22259_v61 = vshll.u32 %v16891_v15, 16 }
  0x84   : > { %14176 = vmatprep.mubr.msk.bf16.mxu0 %vm1647_vm3, %v16885_v26  ;;  %22249 = vst [vmem:[#allocation107_spill] sm:$0xff] %v16911_v57  ;;  %v16919_v26 = vld [vmem:[%s16147_s15 + $0xe4] sm:$0xff]   ;;  %v22261_v14 = vshll.u32 %v16899_v23, 16  ;;  %v1241_v38 = vor.u32 %v22264_v0, %v1237_v24  ;;  %v21874_v22 = vshrl.u32 %v16924_v54, 16 }
  0x85   : > { %22252 = vst [vmem:[#allocation108_spill] sm:$0xff] %v16919_v26  ;;  %14253 = vmatmul.mubr.msk.bf16.gmra.mxu1 %vm1647_vm3, %v16902_v35  ;;  %v16940_v35 = vsel %vm1003_vm2, %v1233_v42, %v1237_v24  ;;  %v1557_v27 = vrot.slane %v22259_v61, 1  ;;  %v16959_v61 = vsel %vm1003_vm2, %v1545_v62, %v1549_v48  ;;  %v22268_v39 = vshll.u32 %v16919_v26, 16  ;;  %v16980_v24 = vld [vmem:[%s16147_s15 + $0x22c] sm:$0xff]  }
  0x86   : > { %14256 = vmatprep.mubr.msk.bf16.mxu1 %vm1647_vm3, %v16911_v57  ;;  %22258 = vst [vmem:[#allocation111_spill] sm:$0xff] %v16940_v35  ;;  %v16947_v57 = vld [vmem:[%s16147_s15 + $0x224] sm:$0xff]   ;;  %v1245_v7 = vrot.slane %v22261_v14, 1  ;;  %22263 = vst [vmem:[#allocation114_spill] sm:$0xff] %v16959_v61  ;;  %v22267_v14 = vshrl.u32 %v16899_v23, 16  ;;  %v21886_v48 = vshrl.u32 %v16919_v26, 16 }
  0x87   : > { %22260 = vst [vmem:[#allocation112_spill] sm:$0xff] %v16947_v57  ;;  %v1253_v62 = vrot.slane %v22268_v39, 1  ;;  %22270 = vst [vmem:[#allocation117_spill] sm:$0xff] %v16980_v24  ;;  %v22272_v39 = vshrl.u32 %v16891_v15, 16  ;;  %v22280_v15 = vshrl.u32 %v16956_v63, 16 }
  0x88   : > { %v1249_v42 = vor.u32 %v22267_v14, %v1245_v7  ;;  %v16986_v0 = vsel %vm1003_vm2, %v1241_v38, %v1245_v7  ;;  %v12822_v7 = vld [vmem:[%s21720_s3 + $0x8] sm:$0x3] }
  0x89   : > { %22271 = vst [vmem:[#allocation118_spill] sm:$0xff] %v16986_v0  ;;  %v1561_v14 = vor.u32 %v22272_v39, %v1557_v27  ;;  %v22276_v39 = vshll.u32 %v16956_v63, 16 }
  0x8a   : > { %v16996_v37 = vsel %vm1003_vm2, %v1249_v42, %v1253_v62 }
  0x8b   : > { %14177 = vmatmul.mubr.msk.bf16.gmra.mxu0 %vm1647_vm3, %v16930_v25  ;;  %v16970_v25 = vsel %vm1003_vm2, %v1553_v10, %v1557_v27  ;;  %22273 = vst [vmem:[#allocation119_spill] sm:$0xff] %v16996_v37  ;;  %v1261_v42 = vrot.slane %v22276_v39, 1  ;;  %v1257_v27 = vor.u32 %v21886_v48, %v1253_v62  ;;  %v21891_v39 = vshrl.u32 %v16947_v57, 16  ;;  %v17042_v48 = vld [vmem:[%s16147_s15 + $0x23c] sm:$0xff]  }
  0x8c   : > { %14180 = vmatprep.mubr.msk.bf16.mxu0 %vm1647_vm3, %v16940_v35  ;;  %22266 = vst [vmem:[#allocation116_spill] sm:$0xff] %v16970_v25  ;;  %v22269_v35 = vshll.u32 %v16924_v54, 16  ;;  %22284 = vst [vmem:[#allocation125_spill] sm:$0xff] %v17042_v48 }
  0x8d   : > { %14257 = vmatmul.mubr.msk.bf16.gmra.mxu1 %vm1647_vm3, %v16959_v61  ;;  %v22274_v61 = vshll.u32 %v16947_v57, 16  ;;  %v1265_v54 = vor.u32 %v22280_v15, %v1261_v42  ;;  %v17054_v15 = vsel %vm1003_vm2, %v1257_v27, %v1261_v42  ;;  %v17072_v57 = vld [vmem:[%s16147_s15 + $0x244] sm:$0xff]   ;;  %v17106_v42 = vld [vmem:[%s16147_s15 + $0x24c] sm:$0xff]  }
  0x8e   : > { %v1565_v59 = vrot.slane %v22269_v35, 1  ;;  %14260 = vmatprep.mubr.msk.bf16.mxu1 %vm1647_vm3, %v16970_v25  ;;  %22285 = vst [vmem:[#allocation126_spill] sm:$0xff] %v17054_v15  ;;  %22289 = vst [vmem:[#allocation128_spill] sm:$0xff] %v17072_v57 }
  0x8f   : > { %v1573_v10 = vrot.slane %v22274_v61, 1  ;;  %v12741_v61 = vld [vmem:[%s21720_s3 + $0x6] sm:$0x3]  ;;  %22298 = vst [vmem:[#allocation133_spill] sm:$0xff] %v17106_v42 }
  0x90   : > { %v1569_v35 = vor.u32 %v21874_v22, %v1565_v59  ;;  %v17011_v22 = vld [vmem:[%s16147_s15 + $0xfc] sm:$0xff]   ;;  %v17020_v38 = vsel %vm1003_vm2, %v1561_v14, %v1565_v59  ;;  %v1269_v59 = vrot.slane %v22281_v55, 1  ;;  %v17045_v25 = vand.u32 %v12741_v61, %v16123_v5 }
  0x91   : > { %22277 = vst [vmem:[#allocation121_spill] sm:$0xff] %v17011_v22  ;;  %22278 = vst [vmem:[#allocation122_spill] sm:$0xff] %v17020_v38  ;;  %v21898_v61 = vshrl.u32 %v16967_v60, 16  ;;  %v22288_v55 = vshll.u32 %v17003_v20, 16 }
  0x92   : > { %14608 = vmatprep.subr.bf16.mxu1 %v17045_v25 }
  0x93   : > { %14181 = vmatmul.mubr.msk.bf16.gmra.mxu0 %vm1647_vm3, %v16986_v0  ;;  %v17029_v0 = vsel %vm1003_vm2, %v1569_v35, %v1573_v10  ;;  %v17048_v35 = vand.u32 %v12822_v7, %v16123_v5  ;;  %v22286_v7 = vshrl.u32 %v16980_v24, 16  ;;  %v1589_v27 = vrot.slane %v22288_v55, 1 }
  0x94   : > { %14184 = vmatprep.mubr.msk.bf16.mxu0 %vm1647_vm3, %v16996_v37  ;;  %22279 = vst [vmem:[#allocation123_spill] sm:$0xff] %v17029_v0  ;;  %v22283_v37 = vshll.u32 %v16980_v24, 16 }
  0x95   : > { %14261 = vmatmul.mubr.msk.bf16.gmra.mxu1 %vm1647_vm3, %v17020_v38  ;;  %v17065_v38 = vsel %vm1003_vm2, %v1265_v54, %v1269_v59  ;;  %14770 = vmatprep.subr.bf16.mxu0 %v17048_v35  ;;  %v22290_v54 = vshll.u32 %v17011_v22, 16 }
  0x96   : > { %v1581_v62 = vrot.slane %v22283_v37, 1  ;;  %14264 = vmatprep.mubr.msk.bf16.mxu1 %vm1647_vm3, %v17029_v0  ;;  %v1577_v37 = vor.u32 %v21891_v39, %v1573_v10  ;;  %22287 = vst [vmem:[#allocation127_spill] sm:$0xff] %v17065_v38  ;;  %v17081_v39 = vld [vmem:[%s16147_s15 + $0x10c] sm:$0xff]   ;;  %v1273_v0 = vor.u32 %v21898_v61, %v1269_v59  ;;  %v22297_v59 = vshll.u32 %v17042_v48, 16 }
  0x97   : > { %22291 = vst [vmem:[#allocation129_spill] sm:$0xff] %v17081_v39  ;;  %v21911_v10 = vshrl.u32 %v17037_v41, 16 }
  0x98   : > { %v1585_v14 = vor.u32 %v22286_v7, %v1581_v62  ;;  %v1277_v7 = vrot.slane %v22290_v54, 1  ;;  %v17084_v55 = vsel %vm1003_vm2, %v1577_v37, %v1581_v62  ;;  %v22294_v54 = vshrl.u32 %v17011_v22, 16 }
  0x99   : > { %22292 = vst [vmem:[#allocation130_spill] sm:$0xff] %v17084_v55  ;;  %v1285_v62 = vrot.slane %v22295_v44, 1  ;;  %v1597_v61 = vrot.slane %v22297_v59, 1  ;;  %v22300_v44 = vshrl.u32 %v17003_v20, 16  ;;  %v22301_v59 = vshrl.u32 %v17042_v48, 16 }
  0x9a   : > { %v1281_v24 = vor.u32 %v22294_v54, %v1277_v7  ;;  %v17112_v54 = vsel %vm1003_vm2, %v1273_v0, %v1277_v7  ;;  %v17165_v0 = vld [vmem:[%s16147_s15 + $0x25c] sm:$0xff]  }
  0x9b   : > { %14185 = vmatmul.mubr.msk.bf16.gmra.mxu0 %vm1647_vm3, %v17054_v15  ;;  %v17093_v15 = vsel %vm1003_vm2, %v1585_v14, %v1589_v27  ;;  %22299 = vst [vmem:[#allocation134_spill] sm:$0xff] %v17112_v54  ;;  %v1593_v37 = vor.u32 %v22300_v44, %v1589_v27  ;;  %v1601_v2 = vor.u32 %v22301_v59, %v1597_v61  ;;  %v22305_v44 = vshll.u32 %v17081_v39, 16  ;;  %v17137_v59 = vld [vmem:[%s16147_s15 + $0x11c] sm:$0xff]  }
  0x9c   : > { %14188 = vmatprep.mubr.msk.bf16.mxu0 %vm1647_vm3, %v17065_v38  ;;  %22293 = vst [vmem:[#allocation131_spill] sm:$0xff] %v17093_v15  ;;  %v17101_v38 = vld [vmem:[%s16147_s15 + $0x114] sm:$0xff]   ;;  %v17122_v53 = vsel %vm1003_vm2, %v1281_v24, %v1285_v62  ;;  %22306 = vst [vmem:[#allocation137_spill] sm:$0xff] %v17137_v59  ;;  %v1289_v7 = vor.u32 %v21911_v10, %v1285_v62  ;;  %v21919_v27 = vshrl.u32 %v17072_v57, 16  ;;  %v22312_v62 = vshll.u32 %v17106_v42, 16 }
  0x9d   : > { %22296 = vst [vmem:[#allocation132_spill] sm:$0xff] %v17101_v38  ;;  %14265 = vmatmul.mubr.msk.bf16.gmra.mxu1 %vm1647_vm3, %v17084_v55  ;;  %22302 = vst [vmem:[#allocation135_spill] sm:$0xff] %v17122_v53  ;;  %v22303_v55 = vshll.u32 %v17072_v57, 16  ;;  %v1293_v24 = vrot.slane %v22305_v44, 1  ;;  %v22309_v44 = vshrl.u32 %v17081_v39, 16  ;;  %v22310_v48 = vshll.u32 %v17101_v38, 16 }
  0x9e   : > { %14268 = vmatprep.mubr.msk.bf16.mxu1 %vm1647_vm3, %v17093_v15  ;;  %v17129_v15 = vld [vmem:[%s16147_s15 + $0x254] sm:$0xff]   ;;  %v1613_v10 = vrot.slane %v22312_v62, 1  ;;  %22313 = vst [vmem:[#allocation141_spill] sm:$0xff] %v17165_v0  ;;  %v22315_v62 = vshrl.u32 %v17106_v42, 16 }
  0x9f   : > { %v1605_v14 = vrot.slane %v22303_v55, 1  ;;  %22304 = vst [vmem:[#allocation136_spill] sm:$0xff] %v17129_v15  ;;  %v17140_v55 = vsel %vm1003_vm2, %v1593_v37, %v1597_v61  ;;  %v1297_v20 = vor.u32 %v22309_v44, %v1293_v24  ;;  %v1301_v61 = vrot.slane %v22310_v48, 1 }
  0xa0   : > { %22307 = vst [vmem:[#allocation138_spill] sm:$0xff] %v17140_v55  ;;  %v17168_v44 = vsel %vm1003_vm2, %v1289_v7, %v1293_v24  ;;  %v21922_v37 = vshrl.u32 %v17101_v38, 16  ;;  %v1617_v8 = vor.u32 %v22315_v62, %v1613_v10 }
  0xa1   : > { %22314 = vst [vmem:[#allocation142_spill] sm:$0xff] %v17168_v44  ;;  %v1609_v48 = vor.u32 %v21919_v27, %v1605_v14 }
  0xa3   : > { %14189 = vmatmul.mubr.msk.bf16.gmra.mxu0 %vm1647_vm3, %v17112_v54  ;;  %v17149_v54 = vsel %vm1003_vm2, %v1601_v2, %v1605_v14  ;;  %v22317_v2 = vshll.u32 %v17129_v15, 16  ;;  %v22319_v14 = vshll.u32 %v17137_v59, 16 }
  0xa4   : > { %14192 = vmatprep.mubr.msk.bf16.mxu0 %vm1647_vm3, %v17122_v53  ;;  %22308 = vst [vmem:[#allocation139_spill] sm:$0xff] %v17149_v54  ;;  %v17157_v53 = vld [vmem:[%s16147_s15 + $0x124] sm:$0xff]  }
  0xa5   : > { %22311 = vst [vmem:[#allocation140_spill] sm:$0xff] %v17157_v53  ;;  %14269 = vmatmul.mubr.msk.bf16.gmra.mxu1 %vm1647_vm3, %v17140_v55  ;;  %v17178_v55 = vsel %vm1003_vm2, %v1297_v20, %v1301_v61  ;;  %v1621_v1 = vrot.slane %v22317_v2, 1  ;;  %v1309_v27 = vrot.slane %v22319_v14, 1  ;;  %v17193_v20 = vsel %vm1003_vm2, %v1609_v48, %v1613_v10 }
  0xa6   : > { %14272 = vmatprep.mubr.msk.bf16.mxu1 %vm1647_vm3, %v17149_v54  ;;  %22316 = vst [vmem:[#allocation143_spill] sm:$0xff] %v17178_v55  ;;  %22320 = vst [vmem:[#allocation145_spill] sm:$0xff] %v17193_v20  ;;  %v1305_v2 = vor.u32 %v21922_v37, %v1301_v61  ;;  %v22322_v14 = vshrl.u32 %v17137_v59, 16  ;;  %v22324_v61 = vshll.u32 %v17165_v0, 16  ;;  %v21927_v7 = vshrl.u32 %v17157_v53, 16 }
  0xa7   : > { %v17202_v54 = vsel %vm1003_vm2, %v1617_v8, %v1621_v1  ;;  %v22326_v8 = vshrl.u32 %v17129_v15, 16 }
  0xa8   : > { %22321 = vst [vmem:[#allocation146_spill] sm:$0xff] %v17202_v54  ;;  %v1313_v62 = vor.u32 %v22322_v14, %v1309_v27  ;;  %v1629_v37 = vrot.slane %v22324_v61, 1  ;;  %v17214_v24 = vsel %vm1003_vm2, %v1305_v2, %v1309_v27  ;;  %v22330_v61 = vshll.u32 %v17185_v43, 16 }
  0xa9   : > { %22325 = vst [vmem:[#allocation147_spill] sm:$0xff] %v17214_v24  ;;  %v1625_v14 = vor.u32 %v22326_v8, %v1621_v1 }
  0xaa   : > { %v1637_v27 = vrot.slane %v22330_v61, 1  ;;  %v3347_v61 = vrot.slane %v16160_v17, 1 }
  0xab   : > { %14193 = vmatmul.mubr.msk.bf16.gmra.mxu0 %vm1647_vm3, %v17168_v44  ;;  %v22323_v44 = vshll.u32 %v17157_v53, 16  ;;  %v17234_v2 = vsel %vm1003_vm2, %v1625_v14, %v1629_v37 }
  0xac   : > { %14196 = vmatprep.mubr.msk.bf16.mxu0 %vm1647_vm3, %v17178_v55  ;;  %22331 = vst [vmem:[#allocation150_spill] sm:$0xff] %v17234_v2 }
  0xad   : > { %v1317_v10 = vrot.slane %v22323_v44, 1  ;;  %14273 = vmatmul.mubr.msk.bf16.gmra.mxu1 %vm1647_vm3, %v17193_v20  ;;  %v17222_v44 = vld [vmem:[%s16147_s15 + $0x26c] sm:$0xff]   ;;  %v22329_v20 = vshrl.u32 %v17165_v0, 16 }
  0xae   : > { %14276 = vmatprep.mubr.msk.bf16.mxu1 %vm1647_vm3, %v17202_v54  ;;  %22327 = vst [vmem:[#allocation148_spill] sm:$0xff] %v17222_v44 }
  0xaf   : > { %v17225_v48 = vsel %vm1003_vm2, %v1313_v62, %v1317_v10  ;;  %v1633_v55 = vor.u32 %v22329_v20, %v1629_v37  ;;  %v1321_v1 = vor.u32 %v21927_v7, %v1317_v10  ;;  %v21926_v62 = vshrl.u32 %v17185_v43, 16 }
  0xb0   : > { %22328 = vst [vmem:[#allocation149_spill] sm:$0xff] %v17225_v48  ;;  %v21925_v20 = vshll.u32 %v17222_v44, 16  ;;  %v15737_v44 = vld [vmem:[%s16147_s15 + $0x64] sm:$0xff]  }
  0xb1   : > { %v17243_v8 = vsel %vm1003_vm2, %v1633_v55, %v1637_v27  ;;  %v17249_v37 = vsel %vm1003_vm2, %v1321_v1, %v16185_v30  ;;  %v1641_v10 = vor.u32 %v21926_v62, %v1637_v27  ;;  %v17260_v55 = vrot.slane %v16120_v4, 1  ;;  %v15725_v27 = vld [vmem:[%s16147_s15 + $0x4] sm:$0xff]   ;;  %v15726_v62 = vld [vmem:[%s16147_s15 + $0xc] sm:$0xff]  }
  0xb2   : > { %22332 = vst [vmem:[#allocation151_spill] sm:$0xff] %v17243_v8  ;;  %22333 = vst [vmem:[#allocation152_spill] sm:$0xff] %v17249_v37  ;;  %v17257_v14 = vrot.slane %v21925_v20, 1  ;;  %v3349_v1 = vrot.slane %v15725_v27, 1  ;;  %v3351_v7 = vrot.slane %v15726_v62, 1  ;;  %v3373_v43 = vrot.slane %v15737_v44, 1 }
  0xb3   : > { %14197 = vmatmul.mubr.msk.bf16.gmra.mxu0 %vm1647_vm3, %v17214_v24  ;;  %22335 = vst [vmem:[#allocation154_spill] sm:$0xff] %v17260_v55  ;;  %v3348_v20 = vsel %vm3343_vm5, %v17260_v55, %v3347_v61 }
  0xb4   : > { %14200 = vmatprep.mubr.msk.bf16.mxu0 %vm1647_vm3, %v17225_v48  ;;  %22334 = vst [vmem:[#allocation153_spill] sm:$0xff] %v17257_v14  ;;  %v17266_v30 = vsel %vm1003_vm2, %v1641_v10, %v17257_v14  ;;  %v3350_v10 = vsel %vm3343_vm5, %v3347_v61, %v3349_v1  ;;  %v15733_v14 = vld [vmem:[%s16147_s15 + $0x44] sm:$0xff]  }
  0xb5   : > { %14277 = vmatmul.mubr.msk.bf16.gmra.mxu1 %vm1647_vm3, %v17234_v2  ;;  %22336 = vst [vmem:[#allocation155_spill] sm:$0xff] %v17266_v30 }
  0xb6   : > { %14280 = vmatprep.mubr.msk.bf16.mxu1 %vm1647_vm3, %v17243_v8  ;;  %v15727_v8 = vld [vmem:[%s16147_s15 + $0x14] sm:$0xff]  }
  0xbb   : > { %14201 = vmatmul.mubr.msk.bf16.gmra.mxu0 %vm1647_vm3, %v17249_v37  ;;  %v15734_v37 = vld [vmem:[%s16147_s15 + $0x4c] sm:$0xff]  }
  0xbc   : > { %14448 = vmatprep.mubr.msk.bf16.mxu0 %vm1647_vm3, %v17260_v55  ;;  %v3352_v55 = vsel %vm3343_vm5, %v3349_v1, %v3351_v7  ;;  %v3367_v48 = vrot.slane %v15734_v37, 1 }
  0xbd   : > { %14281 = vmatmul.mubr.msk.bf16.gmra.mxu1 %vm1647_vm3, %v17266_v30  ;;  %v3353_v30 = vrot.slane %v15727_v8, 1 }
  0xbe   : > { %14286 = vmatprep.mubr.msk.bf16.mxu1 %vm1647_vm3, %v16120_v4 }
  0xc3   : > { %14449 = vmatmul.mubr.msk.bf16.vlgmr.msra.gmra.mxu0 %vm1647_vm3, %v3348_v20  ;;  %v15728_v20 = vld [vmem:[%s16147_s15 + $0x1c] sm:$0xff]  }
  0xc4   : > { %14771 = vmatpush3.bf16.msra.mxu0 %v17048_v35  ;;  %14452 = vmatprep.mubr.msk.bf16.mxu0 %vm1647_vm3, %v3350_v10  ;;  %v3354_v35 = vsel %vm3343_vm5, %v3351_v7, %v3353_v30  ;;  %v3355_v61 = vrot.slane %v15728_v20, 1  ;;  %v15729_v10 = vld [vmem:[%s16147_s15 + $0x24] sm:$0xff]   ;;  %v15730_v7 = vld [vmem:[%s16147_s15 + $0x2c] sm:$0xff]  }
  0xc5   : > { %14287 = vmatmul.mubr.msk.bf16.vlgmr.msra.gmra.mxu1 %vm1647_vm3, %v16120_v4  ;;  %v3357_v2 = vrot.slane %v15729_v10, 1 }
  0xc6   : > { %14609 = vmatpush3.bf16.msra.mxu1 %v17045_v25  ;;  %14290 = vmatprep.mubr.msk.bf16.mxu1 %vm1647_vm3, %v16160_v17  ;;  %v17297_v25 = vsel %vm3343_vm5, %v3353_v30, %v3355_v61  ;;  %v3405_v17 = vrot.slane %v16919_v26, 1 }
  0xc7   : > { %22337 = vst [vmem:[#allocation156_spill] sm:$0xff] %v17297_v25  ;;  %v17301_v1 = vsel %vm3343_vm5, %v3355_v61, %v3357_v2  ;;  %v15732_v61 = vld [vmem:[%s16147_s15 + $0x3c] sm:$0xff]  }
  0xc8   : > { %22338 = vst [vmem:[#allocation157_spill] sm:$0xff] %v17301_v1  ;;  %v3363_v54 = vrot.slane %v15732_v61, 1 }
  0xcb   : > { %14453 = vmatmul.mubr.msk.bf16.gmra.mxu0 %vm1647_vm3, %v3352_v55  ;;  %v3359_v55 = vrot.slane %v15730_v7, 1 }
  0xcc   : > { %14456 = vmatprep.mubr.msk.bf16.mxu0 %vm1647_vm3, %v3354_v35  ;;  %v15731_v35 = vld [vmem:[%s16147_s15 + $0x34] sm:$0xff]  }
  0xcd   : > { %14291 = vmatmul.mubr.msk.bf16.gmra.mxu1 %vm1647_vm3, %v15725_v27  ;;  %v3361_v27 = vrot.slane %v15731_v35, 1  ;;  %v17311_v30 = vsel %vm3343_vm5, %v3357_v2, %v3359_v55 }
  0xce   : > { %14294 = vmatprep.mubr.msk.bf16.mxu1 %vm1647_vm3, %v15726_v62  ;;  %22339 = vst [vmem:[#allocation158_spill] sm:$0xff] %v17311_v30 }
  0xcf   : > { %v17315_v62 = vsel %vm3343_vm5, %v3359_v55, %v3361_v27  ;;  %v17325_v2 = vsel %vm3343_vm5, %v3361_v27, %v3363_v54  ;;  %v15735_v27 = vld [vmem:[%s16147_s15 + $0x54] sm:$0xff]  }
  0xd0   : > { %22340 = vst [vmem:[#allocation159_spill] sm:$0xff] %v17315_v62  ;;  %22341 = vst [vmem:[#allocation160_spill] sm:$0xff] %v17325_v2  ;;  %v3369_v24 = vrot.slane %v15735_v27, 1 }
  0xd3   : > { %14457 = vmatmul.mubr.msk.bf16.gmra.mxu0 %vm1647_vm3, %v17297_v25 }
  0xd4   : > { %14460 = vmatprep.mubr.msk.bf16.mxu0 %vm1647_vm3, %v17301_v1 }
  0xd5   : > { %14295 = vmatmul.mubr.msk.bf16.gmra.mxu1 %vm1647_vm3, %v15727_v8  ;;  %v3365_v8 = vrot.slane %v15733_v14, 1 }
  0xd6   : > { %14298 = vmatprep.mubr.msk.bf16.mxu1 %vm1647_vm3, %v15728_v20 }
  0xd7   : > { %v17329_v20 = vsel %vm3343_vm5, %v3363_v54, %v3365_v8 }
  0xd8   : > { %22342 = vst [vmem:[#allocation161_spill] sm:$0xff] %v17329_v20 }
  0xdb   : > { %14461 = vmatmul.mubr.msk.bf16.gmra.mxu0 %vm1647_vm3, %v17311_v30  ;;  %v17355_v30 = vsel %vm3343_vm5, %v3367_v48, %v3369_v24 }
  0xdc   : > { %14464 = vmatprep.mubr.msk.bf16.mxu0 %vm1647_vm3, %v17315_v62  ;;  %22346 = vst [vmem:[#allocation165_spill] sm:$0xff] %v17355_v30 }
  0xdd   : > { %14299 = vmatmul.mubr.msk.bf16.gmra.mxu1 %vm1647_vm3, %v15729_v10 }
  0xde   : > { %14302 = vmatprep.mubr.msk.bf16.mxu1 %vm1647_vm3, %v15730_v7  ;;  %v17347_v7 = vsel %vm3343_vm5, %v3365_v8, %v3367_v48 }
  0xdf   : > { %22344 = vst [vmem:[#allocation163_spill] sm:$0xff] %v17347_v7 }
  0xe3   : > { %v17331_v55 = vpop.f32.mrf.mxu0  ;;  %14465 = vmatmul.mubr.msk.bf16.gmra.mxu0 %vm1647_vm3, %v17325_v2 }
  0xe4   : > { %14468 = vmatprep.mubr.msk.bf16.mxu0 %vm1647_vm3, %v17329_v20 }
  0xe5   : > { %v17338_v10 = vpop.f32.mrf.mxu0  ;;  %v17341_v62 = vpop.f32.mrf.mxu1  ;;  %14303 = vmatmul.mubr.msk.bf16.gmra.mxu1 %vm1647_vm3, %v15731_v35  ;;  %v15736_v35 = vld [vmem:[%s16147_s15 + $0x5c] sm:$0xff]  }
  0xe6   : > { %22343 = vst [vmem:[#allocation162_spill] sm:$0xff] %v17341_v62  ;;  %14306 = vmatprep.mubr.msk.bf16.mxu1 %vm1647_vm3, %v15732_v61  ;;  %v3371_v8 = vrot.slane %v15736_v35, 1 }
  0xe7   : > { %v17344_v54 = vpop.f32.mrf.mxu0  ;;  %v17350_v20 = vpop.f32.mrf.mxu1 }
  0xe8   : > { %22345 = vst [vmem:[#allocation164_spill] sm:$0xff] %v17350_v20  ;;  %v17381_v0 = vsel %vm3343_vm5, %v3371_v8, %v3373_v43 }
  0xe9   : > { %v17352_v2 = vpop.f32.mrf.mxu0  ;;  %v17357_v1 = vpop.f32.mrf.mxu1  ;;  %22351 = vst [vmem:[#allocation170_spill] sm:$0xff] %v17381_v0 }
  0xea   : > { %22347 = vst [vmem:[#allocation166_spill] sm:$0xff] %v17357_v1 }
  0xeb   : > { %v17359_v25 = vpop.f32.mrf.mxu0  ;;  %14469 = vmatmul.mubr.msk.bf16.gmra.mxu0 %vm1647_vm3, %v17347_v7  ;;  %v17366_v61 = vpop.f32.mrf.mxu1  ;;  %v17375_v7 = vsel %vm3343_vm5, %v3369_v24, %v3371_v8  ;;  %v15738_v24 = vld [vmem:[%s16147_s15 + $0x6c] sm:$0xff]  }
  0xec   : > { %14472 = vmatprep.mubr.msk.bf16.mxu0 %vm1647_vm3, %v17355_v30  ;;  %22348 = vst [vmem:[#allocation167_spill] sm:$0xff] %v17366_v61  ;;  %22350 = vst [vmem:[#allocation169_spill] sm:$0xff] %v17375_v7 }
  0xed   : > { %v1945_v4 = vpop.f32.mrf.mxu0  ;;  %v17369_v48 = vpop.f32.mrf.mxu1  ;;  %14307 = vmatmul.mubr.msk.bf16.gmra.mxu1 %vm1647_vm3, %v15733_v14  ;;  %v3375_v14 = vrot.slane %v15738_v24, 1 }
  0xee   : > { %22349 = vst [vmem:[#allocation168_spill] sm:$0xff] %v17369_v48  ;;  %14310 = vmatprep.mubr.msk.bf16.mxu1 %vm1647_vm3, %v15734_v37 }
  0xef   : > { %v17372_v15 = vpop.f32.mrf.mxu0  ;;  %v2249_v30 = vpop.f32.mrf.mxu1 }
  0xf0   : > { %v15739_v30 = vld [vmem:[%s16147_s15 + $0x74] sm:$0xff]  }
  0xf1   : > { %v17378_v57 = vpop.f32.mrf.mxu0  ;;  %v17383_v4 = vpop.f32.mrf.mxu1  ;;  %v3377_v8 = vrot.slane %v15739_v30, 1 }
  0xf2   : > { %22352 = vst [vmem:[#allocation171_spill] sm:$0xff] %v17383_v4 }
  0xf3   : > { %v17385_v42 = vpop.f32.mrf.mxu0  ;;  %14473 = vmatmul.mubr.msk.bf16.gmra.mxu0 %vm1647_vm3, %v17375_v7  ;;  %v17392_v48 = vpop.f32.mrf.mxu1  ;;  %v17403_v7 = vsel %vm3343_vm5, %v3373_v43, %v3375_v14  ;;  %v17409_v1 = vsel %vm3343_vm5, %v3375_v14, %v3377_v8 }
  0xf4   : > { %14476 = vmatprep.mubr.msk.bf16.mxu0 %vm1647_vm3, %v17381_v0  ;;  %22353 = vst [vmem:[#allocation172_spill] sm:$0xff] %v17392_v48  ;;  %22355 = vst [vmem:[#allocation174_spill] sm:$0xff] %v17403_v7 }
  0xf5   : > { %v17394_v37 = vpop.f32.mrf.mxu0  ;;  %v17397_v61 = vpop.f32.mrf.mxu1  ;;  %14311 = vmatmul.mubr.msk.bf16.gmra.mxu1 %vm1647_vm3, %v15735_v27  ;;  %22357 = vst [vmem:[#allocation176_spill] sm:$0xff] %v17409_v1  ;;  %v15740_v27 = vld [vmem:[%s16147_s15 + $0x7c] sm:$0xff]  }
  0xf6   : > { %22354 = vst [vmem:[#allocation173_spill] sm:$0xff] %v17397_v61  ;;  %14314 = vmatprep.mubr.msk.bf16.mxu1 %vm1647_vm3, %v15736_v35  ;;  %v3379_v43 = vrot.slane %v15740_v27, 1  ;;  %v15741_v35 = vld [vmem:[%s16147_s15 + $0x84] sm:$0xff]  }
  0xf7   : > { %v17400_v4 = vpop.f32.mrf.mxu0  ;;  %v17406_v0 = vpop.f32.mrf.mxu1 }
  0xf8   : > { %22356 = vst [vmem:[#allocation175_spill] sm:$0xff] %v17406_v0  ;;  %v3381_v0 = vrot.slane %v15741_v35, 1 }
  0xf9   : > { %v1963_v48 = vpop.f32.mrf.mxu0  ;;  %v17411_v20 = vpop.f32.mrf.mxu1 }
  0xfa   : > { %22358 = vst [vmem:[#allocation177_spill] sm:$0xff] %v17411_v20 }
  0xfb   : > { %v14138_v62 = vpop.f32.mrf.mxu0  ;;  %14477 = vmatmul.mubr.msk.bf16.gmra.mxu0 %vm1647_vm3, %v17403_v7  ;;  %v2267_v61 = vpop.f32.mrf.mxu1 }
  0xfc   : > { %14480 = vmatprep.mubr.msk.bf16.mxu0 %vm1647_vm3, %v17409_v1  ;;  %v17425_v62 = vsel %vm3343_vm5, %v3377_v8, %v3379_v43  ;;  %v17433_v61 = vsel %vm3343_vm5, %v3379_v43, %v3381_v0 }
  0xfd   : > { %v17418_v40 = vpop.f32.mrf.mxu0  ;;  %v14218_v48 = vpop.f32.mrf.mxu1  ;;  %14315 = vmatmul.mubr.msk.bf16.gmra.mxu1 %vm1647_vm3, %v15737_v44  ;;  %22359 = vst [vmem:[#allocation178_spill] sm:$0xff] %v17425_v62  ;;  %22361 = vst [vmem:[#allocation180_spill] sm:$0xff] %v17433_v61  ;;  %v3383_v44 = vrot.slane %v16615_v45, 1 }
  0xfe   : > { %14318 = vmatprep.mubr.msk.bf16.mxu1 %vm1647_vm3, %v15738_v24  ;;  %v3385_v48 = vrot.slane %v16631_v16, 1 }
  0xff   : > { %v17422_v14 = vpop.f32.mrf.mxu0  ;;  %v17428_v7 = vpop.f32.mrf.mxu1 }
 0x100   : > { %22360 = vst [vmem:[#allocation179_spill] sm:$0xff] %v17428_v7  ;;  %v17453_v7 = vsel %vm3343_vm5, %v3381_v0, %v3383_v44  ;;  %v3387_v0 = vrot.slane %v16675_v29, 1 }
 0x101   : > { %v17430_v1 = vpop.f32.mrf.mxu0  ;;  %v17435_v20 = vpop.f32.mrf.mxu1  ;;  %22365 = vst [vmem:[#allocation184_spill] sm:$0xff] %v17453_v7 }
 0x102   : > { %22362 = vst [vmem:[#allocation181_spill] sm:$0xff] %v17435_v20 }
 0x103   : > { %v17437_v21 = vpop.f32.mrf.mxu0  ;;  %14481 = vmatmul.mubr.msk.bf16.gmra.mxu0 %vm1647_vm3, %v17425_v62  ;;  %v17444_v24 = vpop.f32.mrf.mxu1 }
 0x104   : > { %14484 = vmatprep.mubr.msk.bf16.mxu0 %vm1647_vm3, %v17433_v61  ;;  %22363 = vst [vmem:[#allocation182_spill] sm:$0xff] %v17444_v24  ;;  %v17461_v24 = vsel %vm3343_vm5, %v3383_v44, %v3385_v48  ;;  %v17481_v44 = vsel %vm3343_vm5, %v3385_v48, %v3387_v0 }
 0x105   : > { %v17446_v8 = vpop.f32.mrf.mxu0  ;;  %v17449_v43 = vpop.f32.mrf.mxu1  ;;  %14319 = vmatmul.mubr.msk.bf16.gmra.mxu1 %vm1647_vm3, %v15739_v30  ;;  %22367 = vst [vmem:[#allocation186_spill] sm:$0xff] %v17461_v24  ;;  %22370 = vst [vmem:[#allocation189_spill] sm:$0xff] %v17481_v44 }
 0x106   : > { %22364 = vst [vmem:[#allocation183_spill] sm:$0xff] %v17449_v43  ;;  %14322 = vmatprep.mubr.msk.bf16.mxu1 %vm1647_vm3, %v15740_v27  ;;  %v3389_v27 = vrot.slane %v16695_v46, 1 }
 0x107   : > { %v14143_v20 = vpop.f32.mrf.mxu0  ;;  %v17456_v61 = vpop.f32.mrf.mxu1 }
 0x108   : > { %22366 = vst [vmem:[#allocation185_spill] sm:$0xff] %v17456_v61  ;;  %v17490_v43 = vsel %vm3343_vm5, %v3387_v0, %v3389_v27  ;;  %v15743_v0 = vld [vmem:[%s16147_s15 + $0x94] sm:$0xff]  }
 0x109   : > { %v17458_v62 = vpop.f32.mrf.mxu0  ;;  %v14223_v19 = vpop.f32.mrf.mxu1  ;;  %22372 = vst [vmem:[#allocation191_spill] sm:$0xff] %v17490_v43 }
 0x10b   : > { %v17463_v16 = vpop.f32.mrf.mxu0  ;;  %14485 = vmatmul.mubr.msk.bf16.gmra.mxu0 %vm1647_vm3, %v17453_v7  ;;  %v17470_v20 = vpop.f32.mrf.mxu1  ;;  %v15742_v7 = vld [vmem:[%s16147_s15 + $0x8c] sm:$0xff]  }
 0x10c   : > { %14488 = vmatprep.mubr.msk.bf16.mxu0 %vm1647_vm3, %v17461_v24  ;;  %22368 = vst [vmem:[#allocation187_spill] sm:$0xff] %v17470_v20 }
 0x10d   : > { %v17472_v30 = vpop.f32.mrf.mxu0  ;;  %v17475_v61 = vpop.f32.mrf.mxu1  ;;  %14323 = vmatmul.mubr.msk.bf16.gmra.mxu1 %vm1647_vm3, %v15741_v35  ;;  %v3391_v35 = vrot.slane %v16731_v52, 1 }
 0x10e   : > { %22369 = vst [vmem:[#allocation188_spill] sm:$0xff] %v17475_v61  ;;  %14326 = vmatprep.mubr.msk.bf16.mxu1 %vm1647_vm3, %v15742_v7 }
 0x10f   : > { %v17478_v19 = vpop.f32.mrf.mxu0  ;;  %v17485_v24 = vpop.f32.mrf.mxu1  ;;  %v17511_v6 = vsel %vm3343_vm5, %v3389_v27, %v3391_v35  ;;  %v3395_v27 = vrot.slane %v16783_v58, 1 }
 0x110   : > { %22371 = vst [vmem:[#allocation190_spill] sm:$0xff] %v17485_v24  ;;  %v3393_v24 = vrot.slane %v16751_v13, 1  ;;  %22376 = vst [vmem:[#allocation195_spill] sm:$0xff] %v17511_v6 }
 0x111   : > { %v17487_v20 = vpop.f32.mrf.mxu0  ;;  %v17492_v11 = vpop.f32.mrf.mxu1  ;;  %v17548_v34 = vsel %vm3343_vm5, %v3395_v27, %v3397_v12 }
 0x112   : > { %22373 = vst [vmem:[#allocation192_spill] sm:$0xff] %v17492_v11  ;;  %22383 = vst [vmem:[#allocation202_spill] sm:$0xff] %v17548_v34 }
 0x113   : > { %v17494_v61 = vpop.f32.mrf.mxu0  ;;  %14489 = vmatmul.mubr.msk.bf16.gmra.mxu0 %vm1647_vm3, %v17481_v44  ;;  %v17501_v7 = vpop.f32.mrf.mxu1 }
 0x114   : > { %14492 = vmatprep.mubr.msk.bf16.mxu0 %vm1647_vm3, %v17490_v43  ;;  %22374 = vst [vmem:[#allocation193_spill] sm:$0xff] %v17501_v7 }
 0x115   : > { %v2021_v48 = vpop.f32.mrf.mxu0  ;;  %v17504_v18 = vpop.f32.mrf.mxu1  ;;  %14327 = vmatmul.mubr.msk.bf16.gmra.mxu1 %vm1647_vm3, %v15743_v0 }
 0x116   : > { %22375 = vst [vmem:[#allocation194_spill] sm:$0xff] %v17504_v18  ;;  %14330 = vmatprep.mubr.msk.bf16.mxu1 %vm1647_vm3, %v16675_v29  ;;  %v17518_v48 = vsel %vm3343_vm5, %v3391_v35, %v3393_v24 }
 0x117   : > { %v17508_v11 = vpop.f32.mrf.mxu0  ;;  %v2325_v43 = vpop.f32.mrf.mxu1  ;;  %22377 = vst [vmem:[#allocation196_spill] sm:$0xff] %v17518_v48 }
 0x119   : > { %v17515_v44 = vpop.f32.mrf.mxu0  ;;  %v17520_v7 = vpop.f32.mrf.mxu1 }
 0x11a   : > { %22378 = vst [vmem:[#allocation197_spill] sm:$0xff] %v17520_v7 }
 0x11b   : > { %v17522_v18 = vpop.f32.mrf.mxu0  ;;  %14493 = vmatmul.mubr.msk.bf16.gmra.mxu0 %vm1647_vm3, %v17511_v6  ;;  %v17529_v0 = vpop.f32.mrf.mxu1  ;;  %v17541_v6 = vsel %vm3343_vm5, %v3393_v24, %v3395_v27  ;;  %v3399_v24 = vrot.slane %v16843_v9, 1 }
 0x11c   : > { %14496 = vmatprep.mubr.msk.bf16.mxu0 %vm1647_vm3, %v17518_v48  ;;  %22379 = vst [vmem:[#allocation198_spill] sm:$0xff] %v17529_v0  ;;  %22381 = vst [vmem:[#allocation200_spill] sm:$0xff] %v17541_v6 }
 0x11d   : > { %v17531_v43 = vpop.f32.mrf.mxu0  ;;  %v17534_v35 = vpop.f32.mrf.mxu1  ;;  %14331 = vmatmul.mubr.msk.bf16.gmra.mxu1 %vm1647_vm3, %v16695_v46 }
 0x11e   : > { %22380 = vst [vmem:[#allocation199_spill] sm:$0xff] %v17534_v35  ;;  %14334 = vmatprep.mubr.msk.bf16.mxu1 %vm1647_vm3, %v16731_v52 }
 0x11f   : > { %v17538_v7 = vpop.f32.mrf.mxu0  ;;  %v17545_v48 = vpop.f32.mrf.mxu1 }
 0x120   : > { %22382 = vst [vmem:[#allocation201_spill] sm:$0xff] %v17545_v48  ;;  %v3401_v48 = vrot.slane %v16863_v31, 1 }
 0x121   : > { %v2039_v0 = vpop.f32.mrf.mxu0  ;;  %v17550_v51 = vpop.f32.mrf.mxu1 }
 0x122   : > { %22384 = vst [vmem:[#allocation203_spill] sm:$0xff] %v17550_v51 }
 0x123   : > { %v14158_v35 = vpop.f32.mrf.mxu0  ;;  %14497 = vmatmul.mubr.msk.bf16.gmra.mxu0 %vm1647_vm3, %v17541_v6  ;;  %v2343_v46 = vpop.f32.mrf.mxu1 }
 0x124   : > { %14500 = vmatprep.mubr.msk.bf16.mxu0 %vm1647_vm3, %v17548_v34  ;;  %v17565_v35 = vsel %vm3343_vm5, %v3397_v12, %v3399_v24  ;;  %v17574_v46 = vsel %vm3343_vm5, %v3399_v24, %v3401_v48  ;;  %v3403_v12 = vrot.slane %v16899_v23, 1 }
 0x125   : > { %v17557_v28 = vpop.f32.mrf.mxu0  ;;  %v14238_v0 = vpop.f32.mrf.mxu1  ;;  %14335 = vmatmul.mubr.msk.bf16.gmra.mxu1 %vm1647_vm3, %v16751_v13  ;;  %22385 = vst [vmem:[#allocation204_spill] sm:$0xff] %v17565_v35  ;;  %22387 = vst [vmem:[#allocation206_spill] sm:$0xff] %v17574_v46 }
 0x126   : > { %14338 = vmatprep.mubr.msk.bf16.mxu1 %vm1647_vm3, %v16783_v58  ;;  %v17595_v58 = vsel %vm3343_vm5, %v3401_v48, %v3403_v12 }
 0x127   : > { %v17562_v27 = vpop.f32.mrf.mxu0  ;;  %v17569_v34 = vpop.f32.mrf.mxu1  ;;  %22393 = vst [vmem:[#allocation212_spill] sm:$0xff] %v17595_v58 }
 0x128   : > { %22386 = vst [vmem:[#allocation205_spill] sm:$0xff] %v17569_v34 }
 0x129   : > { %v17571_v6 = vpop.f32.mrf.mxu0  ;;  %v17576_v51 = vpop.f32.mrf.mxu1 }
 0x12a   : > { %22388 = vst [vmem:[#allocation207_spill] sm:$0xff] %v17576_v51 }
 0x12b   : > { %v17578_v0 = vpop.f32.mrf.mxu0  ;;  %14501 = vmatmul.mubr.msk.bf16.gmra.mxu0 %vm1647_vm3, %v17565_v35  ;;  %v17585_v13 = vpop.f32.mrf.mxu1 }
 0x12c   : > { %22389 = vst [vmem:[#allocation208_spill] sm:$0xff] %v17578_v0  ;;  %14504 = vmatprep.mubr.msk.bf16.mxu0 %vm1647_vm3, %v17574_v46  ;;  %22390 = vst [vmem:[#allocation209_spill] sm:$0xff] %v17585_v13  ;;  %v17604_v13 = vsel %vm3343_vm5, %v3403_v12, %v3405_v17 }
 0x12d   : > { %v17587_v34 = vpop.f32.mrf.mxu0  ;;  %v17590_v24 = vpop.f32.mrf.mxu1  ;;  %14339 = vmatmul.mubr.msk.bf16.gmra.mxu1 %vm1647_vm3, %v16799_v49  ;;  %22395 = vst [vmem:[#allocation214_spill] sm:$0xff] %v17604_v13 }
 0x12e   : > { %22391 = vst [vmem:[#allocation210_spill] sm:$0xff] %v17587_v34  ;;  %22392 = vst [vmem:[#allocation211_spill] sm:$0xff] %v17590_v24  ;;  %14342 = vmatprep.mubr.msk.bf16.mxu1 %vm1647_vm3, %v16843_v9 }
 0x12f   : > { %v14163_v51 = vpop.f32.mrf.mxu0  ;;  %v17599_v46 = vpop.f32.mrf.mxu1 }
 0x130   : > { %22394 = vst [vmem:[#allocation213_spill] sm:$0xff] %v17599_v46  ;;  %v3407_v51 = vrot.slane %v16956_v63, 1  ;;  %v3409_v46 = vrot.slane %v16967_v60, 1 }
 0x131   : > { %v17601_v35 = vpop.f32.mrf.mxu0  ;;  %v14243_v34 = vpop.f32.mrf.mxu1 }
 0x132   : > { %v17625_v12 = vsel %vm3343_vm5, %v3405_v17, %v3407_v51  ;;  %v3411_v17 = vrot.slane %v17011_v22, 1 }
 0x133   : > { %v17606_v0 = vpop.f32.mrf.mxu0  ;;  %14505 = vmatmul.mubr.msk.bf16.gmra.mxu0 %vm1647_vm3, %v17595_v58  ;;  %v17613_v48 = vpop.f32.mrf.mxu1  ;;  %22399 = vst [vmem:[#allocation218_spill] sm:$0xff] %v17625_v12 }
 0x134   : > { %14508 = vmatprep.mubr.msk.bf16.mxu0 %vm1647_vm3, %v17604_v13  ;;  %22396 = vst [vmem:[#allocation215_spill] sm:$0xff] %v17613_v48  ;;  %v17634_v48 = vsel %vm3343_vm5, %v3407_v51, %v3409_v46 }
 0x135   : > { %v17615_v24 = vpop.f32.mrf.mxu0  ;;  %v17618_v49 = vpop.f32.mrf.mxu1  ;;  %14343 = vmatmul.mubr.msk.bf16.gmra.mxu1 %vm1647_vm3, %v16863_v31  ;;  %22402 = vst [vmem:[#allocation221_spill] sm:$0xff] %v17634_v48 }
 0x136   : > { %22397 = vst [vmem:[#allocation216_spill] sm:$0xff] %v17618_v49  ;;  %14346 = vmatprep.mubr.msk.bf16.mxu1 %vm1647_vm3, %v16899_v23  ;;  %v3413_v23 = vrot.slane %v17037_v41, 1 }
 0x137   : > { %v17622_v34 = vpop.f32.mrf.mxu0  ;;  %v17629_v13 = vpop.f32.mrf.mxu1 }
 0x138   : > { %22398 = vst [vmem:[#allocation217_spill] sm:$0xff] %v17622_v34  ;;  %22400 = vst [vmem:[#allocation219_spill] sm:$0xff] %v17629_v13 }
 0x139   : > { %v17631_v58 = vpop.f32.mrf.mxu0  ;;  %v17636_v9 = vpop.f32.mrf.mxu1 }
 0x13a   : > { %22401 = vst [vmem:[#allocation220_spill] sm:$0xff] %v17631_v58  ;;  %22403 = vst [vmem:[#allocation222_spill] sm:$0xff] %v17636_v9  ;;  %v17655_v9 = vsel %vm3343_vm5, %v3409_v46, %v3411_v17  ;;  %v3415_v46 = vrot.slane %v17081_v39, 1 }
 0x13b   : > { %v17638_v49 = vpop.f32.mrf.mxu0  ;;  %14509 = vmatmul.mubr.msk.bf16.gmra.mxu0 %vm1647_vm3, %v17625_v12  ;;  %v17645_v31 = vpop.f32.mrf.mxu1  ;;  %22408 = vst [vmem:[#allocation227_spill] sm:$0xff] %v17655_v9 }
 0x13c   : > { %22404 = vst [vmem:[#allocation223_spill] sm:$0xff] %v17638_v49  ;;  %14512 = vmatprep.mubr.msk.bf16.mxu0 %vm1647_vm3, %v17634_v48  ;;  %22405 = vst [vmem:[#allocation224_spill] sm:$0xff] %v17645_v31 }
 0x13d   : > { %v2097_v13 = vpop.f32.mrf.mxu0  ;;  %v17648_v58 = vpop.f32.mrf.mxu1  ;;  %14347 = vmatmul.mubr.msk.bf16.gmra.mxu1 %vm1647_vm3, %v16919_v26 }
 0x13e   : > { %22406 = vst [vmem:[#allocation225_spill] sm:$0xff] %v17648_v58  ;;  %14350 = vmatprep.mubr.msk.bf16.mxu1 %vm1647_vm3, %v16956_v63  ;;  %v17662_v13 = vsel %vm3343_vm5, %v3411_v17, %v3413_v23  ;;  %v3417_v63 = vrot.slane %v17101_v38, 1 }
 0x13f   : > { %v17652_v51 = vpop.f32.mrf.mxu0  ;;  %v2401_v48 = vpop.f32.mrf.mxu1  ;;  %22410 = vst [vmem:[#allocation229_spill] sm:$0xff] %v17662_v13 }
 0x140   : > { %22407 = vst [vmem:[#allocation226_spill] sm:$0xff] %v17652_v51 }
 0x141   : > { %v17659_v12 = vpop.f32.mrf.mxu0  ;;  %v17664_v31 = vpop.f32.mrf.mxu1 }
 0x142   : > { %22409 = vst [vmem:[#allocation228_spill] sm:$0xff] %v17659_v12  ;;  %22411 = vst [vmem:[#allocation230_spill] sm:$0xff] %v17664_v31 }
 0x143   : > { %v17666_v58 = vpop.f32.mrf.mxu0  ;;  %14513 = vmatmul.mubr.msk.bf16.gmra.mxu0 %vm1647_vm3, %v17655_v9  ;;  %v17673_v26 = vpop.f32.mrf.mxu1  ;;  %v17685_v9 = vsel %vm3343_vm5, %v3413_v23, %v3415_v46  ;;  %v3419_v23 = vrot.slane %v17137_v59, 1 }
 0x144   : > { %22412 = vst [vmem:[#allocation231_spill] sm:$0xff] %v17666_v58  ;;  %14516 = vmatprep.mubr.msk.bf16.mxu0 %vm1647_vm3, %v17662_v13  ;;  %22413 = vst [vmem:[#allocation232_spill] sm:$0xff] %v17673_v26 }
 0x145   : > { %v17675_v48 = vpop.f32.mrf.mxu0  ;;  %v17678_v17 = vpop.f32.mrf.mxu1  ;;  %14351 = vmatmul.mubr.msk.bf16.gmra.mxu1 %vm1647_vm3, %v16967_v60  ;;  %22417 = vst [vmem:[#allocation236_spill] sm:$0xff] %v17685_v9 }
 0x146   : > { %22414 = vst [vmem:[#allocation233_spill] sm:$0xff] %v17675_v48  ;;  %22415 = vst [vmem:[#allocation234_spill] sm:$0xff] %v17678_v17  ;;  %14354 = vmatprep.mubr.msk.bf16.mxu1 %vm1647_vm3, %v17011_v22  ;;  %v17692_v48 = vsel %vm3343_vm5, %v3415_v46, %v3417_v63 }
 0x147   : > { %v17682_v31 = vpop.f32.mrf.mxu0  ;;  %v17689_v13 = vpop.f32.mrf.mxu1  ;;  %22419 = vst [vmem:[#allocation238_spill] sm:$0xff] %v17692_v48 }
 0x148   : > { %22416 = vst [vmem:[#allocation235_spill] sm:$0xff] %v17682_v31  ;;  %22418 = vst [vmem:[#allocation237_spill] sm:$0xff] %v17689_v13 }
 0x149   : > { %v2115_v26 = vpop.f32.mrf.mxu0  ;;  %v17694_v58 = vpop.f32.mrf.mxu1 }
 0x14a   : > { %22420 = vst [vmem:[#allocation239_spill] sm:$0xff] %v17694_v58  ;;  %v3421_v26 = vrot.slane %v17157_v53, 1 }
 0x14b   : > { %v14178_v17 = vpop.f32.mrf.mxu0  ;;  %14517 = vmatmul.mubr.msk.bf16.gmra.mxu0 %vm1647_vm3, %v17685_v9  ;;  %v2419_v60 = vpop.f32.mrf.mxu1 }
 0x14c   : > { %14520 = vmatprep.mubr.msk.bf16.mxu0 %vm1647_vm3, %v17692_v48  ;;  %v17709_v17 = vsel %vm3343_vm5, %v3417_v63, %v3419_v23  ;;  %v17718_v9 = vsel %vm3343_vm5, %v3419_v23, %v3421_v26  ;;  %v15744_v63 = vld [vmem:[%s16147_s15 + $0x12c] sm:$0xff]  }
 0x14d   : > { %v17701_v22 = vpop.f32.mrf.mxu0  ;;  %v14258_v13 = vpop.f32.mrf.mxu1  ;;  %14355 = vmatmul.mubr.msk.bf16.gmra.mxu1 %vm1647_vm3, %v17037_v41  ;;  %22423 = vst [vmem:[#allocation242_spill] sm:$0xff] %v17709_v17  ;;  %22426 = vst [vmem:[#allocation245_spill] sm:$0xff] %v17718_v9  ;;  %v3423_v41 = vrot.slane %v15744_v63, 1 }
 0x14e   : > { %22421 = vst [vmem:[#allocation240_spill] sm:$0xff] %v17701_v22  ;;  %14358 = vmatprep.mubr.msk.bf16.mxu1 %vm1647_vm3, %v17081_v39 }
 0x14f   : > { %v17706_v46 = vpop.f32.mrf.mxu0  ;;  %v17713_v48 = vpop.f32.mrf.mxu1 }
 0x150   : > { %22422 = vst [vmem:[#allocation241_spill] sm:$0xff] %v17706_v46  ;;  %22424 = vst [vmem:[#allocation243_spill] sm:$0xff] %v17713_v48 }
 0x151   : > { %v17715_v60 = vpop.f32.mrf.mxu0  ;;  %v17720_v13 = vpop.f32.mrf.mxu1 }
 0x152   : > { %22425 = vst [vmem:[#allocation244_spill] sm:$0xff] %v17715_v60  ;;  %22427 = vst [vmem:[#allocation246_spill] sm:$0xff] %v17720_v13  ;;  %v15745_v60 = vld [vmem:[%s16147_s15 + $0x134] sm:$0xff]  }
 0x153   : > { %v17722_v58 = vpop.f32.mrf.mxu0  ;;  %14521 = vmatmul.mubr.msk.bf16.gmra.mxu0 %vm1647_vm3, %v17709_v17  ;;  %v17729_v39 = vpop.f32.mrf.mxu1  ;;  %v3425_v23 = vrot.slane %v15745_v60, 1  ;;  %v17739_v17 = vsel %vm3343_vm5, %v3421_v26, %v3423_v41  ;;  %v15746_v26 = vld [vmem:[%s16147_s15 + $0x13c] sm:$0xff]  }
 0x154   : > { %22428 = vst [vmem:[#allocation247_spill] sm:$0xff] %v17722_v58  ;;  %14524 = vmatprep.mubr.msk.bf16.mxu0 %vm1647_vm3, %v17718_v9  ;;  %22429 = vst [vmem:[#allocation248_spill] sm:$0xff] %v17729_v39 }
 0x155   : > { %v17731_v48 = vpop.f32.mrf.mxu0  ;;  %v17734_v46 = vpop.f32.mrf.mxu1  ;;  %14359 = vmatmul.mubr.msk.bf16.gmra.mxu1 %vm1647_vm3, %v17101_v38  ;;  %22432 = vst [vmem:[#allocation251_spill] sm:$0xff] %v17739_v17 }
 0x156   : > { %22430 = vst [vmem:[#allocation249_spill] sm:$0xff] %v17731_v48  ;;  %22431 = vst [vmem:[#allocation250_spill] sm:$0xff] %v17734_v46  ;;  %14362 = vmatprep.mubr.msk.bf16.mxu1 %vm1647_vm3, %v17137_v59  ;;  %v17748_v48 = vsel %vm3343_vm5, %v3423_v41, %v3425_v23  ;;  %v15747_v59 = vld [vmem:[%s16147_s15 + $0x144] sm:$0xff]  }
 0x157   : > { %v14183_v13 = vpop.f32.mrf.mxu0  ;;  %v17743_v9 = vpop.f32.mrf.mxu1  ;;  %22435 = vst [vmem:[#allocation254_spill] sm:$0xff] %v17748_v48 }
 0x158   : > { %22433 = vst [vmem:[#allocation252_spill] sm:$0xff] %v17743_v9  ;;  %v3427_v13 = vrot.slane %v15746_v26, 1 }
 0x159   : > { %v17745_v39 = vpop.f32.mrf.mxu0  ;;  %v14263_v58 = vpop.f32.mrf.mxu1 }
 0x15a   : > { %22434 = vst [vmem:[#allocation253_spill] sm:$0xff] %v17745_v39  ;;  %v3429_v39 = vrot.slane %v15747_v59, 1 }
 0x15b   : > { %v17750_v46 = vpop.f32.mrf.mxu0  ;;  %14525 = vmatmul.mubr.msk.bf16.gmra.mxu0 %vm1647_vm3, %v17739_v17  ;;  %v17757_v38 = vpop.f32.mrf.mxu1  ;;  %v17769_v17 = vsel %vm3343_vm5, %v3425_v23, %v3427_v13  ;;  %v15748_v23 = vld [vmem:[%s16147_s15 + $0x14c] sm:$0xff]  }
 0x15c   : > { %22436 = vst [vmem:[#allocation255_spill] sm:$0xff] %v17750_v46  ;;  %14528 = vmatprep.mubr.msk.bf16.mxu0 %vm1647_vm3, %v17748_v48  ;;  %22437 = vst [vmem:[#allocation256_spill] sm:$0xff] %v17757_v38 }
 0x15d   : > { %v17759_v9 = vpop.f32.mrf.mxu0  ;;  %v17762_v41 = vpop.f32.mrf.mxu1  ;;  %14363 = vmatmul.mubr.msk.bf16.gmra.mxu1 %vm1647_vm3, %v17157_v53  ;;  %22441 = vst [vmem:[#allocation260_spill] sm:$0xff] %v17769_v17  ;;  %v3431_v53 = vrot.slane %v15748_v23, 1 }
 0x15e   : > { %22438 = vst [vmem:[#allocation257_spill] sm:$0xff] %v17759_v9  ;;  %22439 = vst [vmem:[#allocation258_spill] sm:$0xff] %v17762_v41  ;;  %14366 = vmatprep.mubr.msk.bf16.mxu1 %vm1647_vm3, %v15744_v63  ;;  %v17777_v9 = vsel %vm3343_vm5, %v3427_v13, %v3429_v39 }
 0x15f   : > { %v17766_v58 = vpop.f32.mrf.mxu0  ;;  %v17772_v48 = vpop.f32.mrf.mxu1  ;;  %22444 = vst [vmem:[#allocation263_spill] sm:$0xff] %v17777_v9 }
 0x160   : > { %22440 = vst [vmem:[#allocation259_spill] sm:$0xff] %v17766_v58  ;;  %22442 = vst [vmem:[#allocation261_spill] sm:$0xff] %v17772_v48 }
 0x161   : > { %v17774_v38 = vpop.f32.mrf.mxu0  ;;  %v17779_v46 = vpop.f32.mrf.mxu1 }
 0x162   : > { %22443 = vst [vmem:[#allocation262_spill] sm:$0xff] %v17774_v38  ;;  %22445 = vst [vmem:[#allocation264_spill] sm:$0xff] %v17779_v46  ;;  %v15749_v38 = vld [vmem:[%s16147_s15 + $0x154] sm:$0xff]  }
 0x163   : > { %v17781_v41 = vpop.f32.mrf.mxu0  ;;  %14529 = vmatmul.mubr.msk.bf16.gmra.mxu0 %vm1647_vm3, %v17769_v17  ;;  %v17788_v63 = vpop.f32.mrf.mxu1  ;;  %v3433_v58 = vrot.slane %v15749_v38, 1  ;;  %v17797_v17 = vsel %vm3343_vm5, %v3429_v39, %v3431_v53  ;;  %v15750_v39 = vld [vmem:[%s16147_s15 + $0x15c] sm:$0xff]  }
 0x164   : > { %22446 = vst [vmem:[#allocation265_spill] sm:$0xff] %v17781_v41  ;;  %14532 = vmatprep.mubr.msk.bf16.mxu0 %vm1647_vm3, %v17777_v9  ;;  %22447 = vst [vmem:[#allocation266_spill] sm:$0xff] %v17788_v63 }
 0x165   : > { %v2173_v48 = vpop.f32.mrf.mxu0  ;;  %v17791_v13 = vpop.f32.mrf.mxu1  ;;  %14367 = vmatmul.mubr.msk.bf16.gmra.mxu1 %vm1647_vm3, %v15745_v60  ;;  %22450 = vst [vmem:[#allocation269_spill] sm:$0xff] %v17797_v17  ;;  %v17803_v63 = vsel %vm3343_vm5, %v3431_v53, %v3433_v58  ;;  %v3435_v60 = vrot.slane %v15750_v39, 1 }
 0x166   : > { %22448 = vst [vmem:[#allocation267_spill] sm:$0xff] %v17791_v13  ;;  %14370 = vmatprep.mubr.msk.bf16.mxu1 %vm1647_vm3, %v15746_v26  ;;  %22452 = vst [vmem:[#allocation271_spill] sm:$0xff] %v17803_v63  ;;  %v15751_v26 = vld [vmem:[%s16147_s15 + $0x164] sm:$0xff]  }
 0x167   : > { %v17794_v46 = vpop.f32.mrf.mxu0  ;;  %v2477_v9 = vpop.f32.mrf.mxu1  ;;  %v3437_v53 = vrot.slane %v15751_v26, 1 }
 0x168   : > { %22449 = vst [vmem:[#allocation268_spill] sm:$0xff] %v17794_v46 }
 0x169   : > { %v17800_v41 = vpop.f32.mrf.mxu0  ;;  %v17805_v48 = vpop.f32.mrf.mxu1 }
 0x16a   : > { %22451 = vst [vmem:[#allocation270_spill] sm:$0xff] %v17800_v41  ;;  %22453 = vst [vmem:[#allocation272_spill] sm:$0xff] %v17805_v48 }
 0x16b   : > { %v17807_v22 = vpop.f32.mrf.mxu0  ;;  %14533 = vmatmul.mubr.msk.bf16.gmra.mxu0 %vm1647_vm3, %v17797_v17  ;;  %v17814_v13 = vpop.f32.mrf.mxu1  ;;  %v17825_v17 = vsel %vm3343_vm5, %v3433_v58, %v3435_v60 }
 0x16c   : > { %22454 = vst [vmem:[#allocation273_spill] sm:$0xff] %v17807_v22  ;;  %14536 = vmatprep.mubr.msk.bf16.mxu0 %vm1647_vm3, %v17803_v63  ;;  %22455 = vst [vmem:[#allocation274_spill] sm:$0xff] %v17814_v13  ;;  %v17831_v22 = vsel %vm3343_vm5, %v3435_v60, %v3437_v53 }
 0x16d   : > { %v17816_v9 = vpop.f32.mrf.mxu0  ;;  %v17819_v41 = vpop.f32.mrf.mxu1  ;;  %14371 = vmatmul.mubr.msk.bf16.gmra.mxu1 %vm1647_vm3, %v15747_v59  ;;  %22459 = vst [vmem:[#allocation278_spill] sm:$0xff] %v17825_v17  ;;  %22461 = vst [vmem:[#allocation280_spill] sm:$0xff] %v17831_v22  ;;  %v15752_v59 = vld [vmem:[%s16147_s15 + $0x16c] sm:$0xff]  }
 0x16e   : > { %22456 = vst [vmem:[#allocation275_spill] sm:$0xff] %v17816_v9  ;;  %22457 = vst [vmem:[#allocation276_spill] sm:$0xff] %v17819_v41  ;;  %14374 = vmatprep.mubr.msk.bf16.mxu1 %vm1647_vm3, %v15748_v23  ;;  %v3439_v58 = vrot.slane %v15752_v59, 1 }
 0x16f   : > { %v17822_v48 = vpop.f32.mrf.mxu0  ;;  %v17828_v63 = vpop.f32.mrf.mxu1 }
 0x170   : > { %22458 = vst [vmem:[#allocation277_spill] sm:$0xff] %v17822_v48  ;;  %22460 = vst [vmem:[#allocation279_spill] sm:$0xff] %v17828_v63  ;;  %v15753_v63 = vld [vmem:[%s16147_s15 + $0x174] sm:$0xff]  }
 0x171   : > { %v2191_v13 = vpop.f32.mrf.mxu0  ;;  %v17833_v9 = vpop.f32.mrf.mxu1 }
 0x172   : > { %22462 = vst [vmem:[#allocation281_spill] sm:$0xff] %v17833_v9  ;;  %v3441_v13 = vrot.slane %v15753_v63, 1 }
 0x173   : > { %v14198_v46 = vpop.f32.mrf.mxu0  ;;  %14537 = vmatmul.mubr.msk.bf16.gmra.mxu0 %vm1647_vm3, %v17825_v17  ;;  %v2495_v41 = vpop.f32.mrf.mxu1 }
 0x174   : > { %14540 = vmatprep.mubr.msk.bf16.mxu0 %vm1647_vm3, %v17831_v22  ;;  %v17847_v46 = vsel %vm3343_vm5, %v3437_v53, %v3439_v58  ;;  %v17855_v41 = vsel %vm3343_vm5, %v3439_v58, %v3441_v13 }
 0x175   : > { %v17840_v23 = vpop.f32.mrf.mxu0  ;;  %v14278_v48 = vpop.f32.mrf.mxu1  ;;  %14375 = vmatmul.mubr.msk.bf16.gmra.mxu1 %vm1647_vm3, %v15749_v38  ;;  %22465 = vst [vmem:[#allocation284_spill] sm:$0xff] %v17847_v46  ;;  %22468 = vst [vmem:[#allocation287_spill] sm:$0xff] %v17855_v41  ;;  %v15754_v38 = vld [vmem:[%s16147_s15 + $0x17c] sm:$0xff]  }
 0x176   : > { %22463 = vst [vmem:[#allocation282_spill] sm:$0xff] %v17840_v23  ;;  %14378 = vmatprep.mubr.msk.bf16.mxu1 %vm1647_vm3, %v15750_v39  ;;  %v3443_v53 = vrot.slane %v15754_v38, 1 }
 0x177   : > { %v17844_v60 = vpop.f32.mrf.mxu0  ;;  %v17850_v22 = vpop.f32.mrf.mxu1 }
 0x178   : > { %22464 = vst [vmem:[#allocation283_spill] sm:$0xff] %v17844_v60  ;;  %22466 = vst [vmem:[#allocation285_spill] sm:$0xff] %v17850_v22 }
 0x179   : > { %v17852_v17 = vpop.f32.mrf.mxu0  ;;  %v17857_v9 = vpop.f32.mrf.mxu1 }
 0x17a   : > { %22467 = vst [vmem:[#allocation286_spill] sm:$0xff] %v17852_v17  ;;  %22469 = vst [vmem:[#allocation288_spill] sm:$0xff] %v17857_v9  ;;  %v15755_v17 = vld [vmem:[%s16147_s15 + $0x184] sm:$0xff]  }
 0x17b   : > { %v17859_v48 = vpop.f32.mrf.mxu0  ;;  %14541 = vmatmul.mubr.msk.bf16.gmra.mxu0 %vm1647_vm3, %v17847_v46  ;;  %v17866_v39 = vpop.f32.mrf.mxu1  ;;  %v3445_v58 = vrot.slane %v15755_v17, 1  ;;  %v17875_v46 = vsel %vm3343_vm5, %v3441_v13, %v3443_v53 }
 0x17c   : > { %22470 = vst [vmem:[#allocation289_spill] sm:$0xff] %v17859_v48  ;;  %14544 = vmatprep.mubr.msk.bf16.mxu0 %vm1647_vm3, %v17855_v41  ;;  %22471 = vst [vmem:[#allocation290_spill] sm:$0xff] %v17866_v39 }
 0x17d   : > { %v17868_v22 = vpop.f32.mrf.mxu0  ;;  %v17871_v60 = vpop.f32.mrf.mxu1  ;;  %14379 = vmatmul.mubr.msk.bf16.gmra.mxu1 %vm1647_vm3, %v15751_v26  ;;  %22474 = vst [vmem:[#allocation293_spill] sm:$0xff] %v17875_v46  ;;  %v17883_v39 = vsel %vm3343_vm5, %v3443_v53, %v3445_v58  ;;  %v22479_v53 = vshll.u32 %v16236_v56, 16 }
 0x17e   : > { %22472 = vst [vmem:[#allocation291_spill] sm:$0xff] %v17868_v22  ;;  %22473 = vst [vmem:[#allocation292_spill] sm:$0xff] %v17871_v60  ;;  %14382 = vmatprep.mubr.msk.bf16.mxu1 %vm1647_vm3, %v15752_v59  ;;  %v17893_v60 = vld [vmem:[%s16147_s15 + $0x194] sm:$0xff]  }
 0x17f   : > { %v14203_v9 = vpop.f32.mrf.mxu0  ;;  %v17878_v41 = vpop.f32.mrf.mxu1  ;;  %22477 = vst [vmem:[#allocation296_spill] sm:$0xff] %v17883_v39 }
 0x180   : > { %22475 = vst [vmem:[#allocation294_spill] sm:$0xff] %v17878_v41  ;;  %v15756_v9 = vld [vmem:[%s16147_s15 + $0x18c] sm:$0xff]   ;;  %v3449_v41 = vrot.slane %v17893_v60, 1 }
 0x181   : > { %v17880_v48 = vpop.f32.mrf.mxu0  ;;  %v14283_v22 = vpop.f32.mrf.mxu1  ;;  %v3447_v26 = vrot.slane %v15756_v9, 1 }
 0x182   : > { %22476 = vst [vmem:[#allocation295_spill] sm:$0xff] %v17880_v48  ;;  %v5713_v48 = vrot.slane %v22479_v53, 5  ;;  %v22480_v22 = vshrl.u32 %v16236_v56, 16  ;;  %v12984_v56 = vld [vmem:[%s21720_s3 + $0xc] sm:$0x3] }
 0x183   : > { %v14450_v23 = vpop.f32.mrf.mxu0  ;;  %14545 = vmatmul.mubr.msk.bf16.gmra.mxu0 %vm1647_vm3, %v17875_v46  ;;  %v17890_v13 = vpop.f32.mrf.mxu1  ;;  %v12903_v46 = vld [vmem:[%s21720_s3 + $0xa] sm:$0x3]  ;;  %v17909_v49 = vsel %vm3343_vm5, %v3445_v58, %v3447_v26 }
 0x184   : > { %14548 = vmatprep.mubr.msk.bf16.mxu0 %vm1647_vm3, %v17883_v39  ;;  %22478 = vst [vmem:[#allocation297_spill] sm:$0xff] %v17890_v13  ;;  %v5712_v31 = vrot.slane %v22480_v22, 4  ;;  %v17905_v13 = vand.u32 %v12903_v46, %v16123_v5  ;;  %22482 = vst [vmem:[#allocation299_spill] sm:$0xff] %v17909_v49 }
 0x185   : > { %v3782_v59 = vpop.f32.mrf.mxu0  ;;  %v14288_v39 = vpop.f32.mrf.mxu1  ;;  %14383 = vmatmul.mubr.msk.bf16.gmra.mxu1 %vm1647_vm3, %v15753_v63  ;;  %v17916_v63 = vsel %vm3343_vm5, %v3447_v26, %v3449_v41 }
 0x186   : > { %22481 = vst [vmem:[#allocation298_spill] sm:$0xff] %v17905_v13  ;;  %v2742_v51 = vadd.f32 %v14288_v39, %v17331_v55  ;;  %14386 = vmatprep.mubr.msk.bf16.mxu1 %vm1647_vm3, %v15754_v38  ;;  %22483 = vst [vmem:[#allocation300_spill] sm:$0xff] %v17916_v63  ;;  %14932 = vmatprep.subr.bf16.mxu1 %v17905_v13  ;;  %v17920_v55 = vand.u32 %v12984_v56, %v16123_v5  ;;  %v15758_v56 = vld [vmem:[%s16147_s15 + $0x19c] sm:$0xff]  }
 0x187   : > { %v14451_v12 = vpop.f32.mrf.mxu0  ;;  %v2733_v53 = vpop.f32.mrf.mxu1  ;;  %v17923_v39 = vor.u32 %v5713_v48, %v5712_v31  ;;  %v3451_v5 = vrot.slane %v15758_v56, 1  ;;  %v22486_v48 = vshll.u32 %v16277_v33, 16 }
 0x188   : > { %v2734_v46 = vadd.f32 %v2733_v53, %v17338_v10  ;;  %v17925_v38 = vadd.f32 %v14450_v23, %v2742_v51  ;;  %15094 = vmatprep.subr.bf16.mxu0 %v17920_v55  ;;  %v15759_v51 = vld [vmem:[%s16147_s15 + $0x1a4] sm:$0xff]  }
 0x189   : > { %v3785_v22 = vpop.f32.mrf.mxu0  ;;  %22484 = vst [vmem:[#allocation301_spill] sm:$0xff] %v17923_v39  ;;  %v14289_v58 = vpop.f32.mrf.mxu1  ;;  %v3453_v23 = vrot.slane %v15759_v51, 1  ;;  %v5721_v53 = vrot.slane %v22486_v48, 5 }
 0x18a   : > { %22485 = vst [vmem:[#allocation302_spill] sm:$0xff] %v17925_v38  ;;  %v2745_v26 = vadd.f32 %v14289_v58, %v17344_v54  ;;  %v17934_v13 = vadd.f32 %v3782_v59, %v2734_v46 }
 0x18b   : > { %v14454_v34 = vpop.f32.mrf.mxu0  ;;  %14549 = vmatmul.mubr.msk.bf16.gmra.mxu0 %vm1647_vm3, %v17909_v49  ;;  %v2736_v31 = vpop.f32.mrf.mxu1  ;;  %v22487_v49 = vshrl.u32 %v16277_v33, 16 }
 0x18c   : > { %14552 = vmatprep.mubr.msk.bf16.mxu0 %vm1647_vm3, %v17916_v63  ;;  %v2737_v39 = vadd.f32 %v2736_v31, %v17352_v2  ;;  %v17942_v54 = vadd.f32 %v14451_v12, %v2745_v26  ;;  %v17953_v2 = vsel %vm3343_vm5, %v3451_v5, %v3453_v23 }
 0x18d   : > { %v3798_v10 = vpop.f32.mrf.mxu0  ;;  %v5720_v38 = vrot.slane %v22487_v49, 4  ;;  %v14292_v58 = vpop.f32.mrf.mxu1  ;;  %14387 = vmatmul.mubr.msk.bf16.gmra.mxu1 %vm1647_vm3, %v15755_v17  ;;  %22489 = vst [vmem:[#allocation304_spill] sm:$0xff] %v17953_v2 }
 0x18e   : > { %v2757_v46 = vadd.f32 %v14292_v58, %v17359_v25  ;;  %v17947_v10 = vsel %vm3343_vm5, %v3449_v41, %v3451_v5  ;;  %14390 = vmatprep.mubr.msk.bf16.mxu1 %vm1647_vm3, %v15756_v9  ;;  %v17950_v48 = vadd.f32 %v3785_v22, %v2737_v39  ;;  %v15760_v41 = vld [vmem:[%s16147_s15 + $0x1ac] sm:$0xff]   ;;  %v15761_v5 = vld [vmem:[%s16147_s15 + $0x1b4] sm:$0xff]  }
 0x18f   : > { %v14455_v59 = vpop.f32.mrf.mxu0  ;;  %22488 = vst [vmem:[#allocation303_spill] sm:$0xff] %v17947_v10  ;;  %v2749_v33 = vpop.f32.mrf.mxu1  ;;  %v17955_v12 = vor.u32 %v5721_v53, %v5720_v38  ;;  %v3455_v9 = vrot.slane %v15760_v41, 1  ;;  %v3457_v58 = vrot.slane %v15761_v5, 1  ;;  %v22490_v38 = vshll.u32 %v16337_v36, 16 }
 0x190   : > { %v17957_v17 = vadd.f32 %v14454_v34, %v2757_v46  ;;  %v22491_v53 = vshrl.u32 %v16337_v36, 16 }
 0x191   : > { %v3800_v49 = vpop.f32.mrf.mxu0  ;;  %v14293_v26 = vpop.f32.mrf.mxu1  ;;  %v5729_v34 = vrot.slane %v22490_v38, 5  ;;  %v17977_v63 = vsel %vm3343_vm5, %v3453_v23, %v3455_v9  ;;  %v15762_v23 = vld [vmem:[%s16147_s15 + $0x1bc] sm:$0xff]  }
 0x192   : > { %v2760_v25 = vadd.f32 %v14293_v26, %v17372_v15  ;;  %v5728_v46 = vrot.slane %v22491_v53, 4  ;;  %22492 = vst [vmem:[#allocation305_spill] sm:$0xff] %v17977_v63 }
 0x193   : > { %v14458_v31 = vpop.f32.mrf.mxu0  ;;  %14553 = vmatmul.mubr.msk.bf16.gmra.mxu0 %vm1647_vm3, %v17947_v10  ;;  %v2751_v22 = vpop.f32.mrf.mxu1 }
 0x194   : > { %14556 = vmatprep.mubr.msk.bf16.mxu0 %vm1647_vm3, %v17953_v2  ;;  %v2752_v33 = vadd.f32 %v2751_v22, %v17378_v57  ;;  %v17971_v10 = vadd.f32 %v14455_v59, %v2760_v25  ;;  %v17983_v59 = vsel %vm3343_vm5, %v3455_v9, %v3457_v58 }
 0x195   : > { %v3813_v39 = vpop.f32.mrf.mxu0  ;;  %v14296_v15 = vpop.f32.mrf.mxu1  ;;  %14391 = vmatmul.mubr.msk.bf16.gmra.mxu1 %vm1647_vm3, %v17893_v60  ;;  %22493 = vst [vmem:[#allocation306_spill] sm:$0xff] %v17983_v59  ;;  %v17986_v60 = vor.u32 %v5729_v34, %v5728_v46  ;;  %v15763_v34 = vld [vmem:[%s16147_s15 + $0x1c4] sm:$0xff]  }
 0x196   : > { %v2772_v2 = vadd.f32 %v14296_v15, %v17385_v42  ;;  %14394 = vmatprep.mubr.msk.bf16.mxu1 %vm1647_vm3, %v15758_v56  ;;  %v17980_v38 = vadd.f32 %v3800_v49, %v2752_v33  ;;  %v3459_v49 = vrot.slane %v15762_v23, 1  ;;  %v3461_v46 = vrot.slane %v15763_v34, 1 }
 0x197   : > { %v14459_v26 = vpop.f32.mrf.mxu0  ;;  %v2764_v36 = vpop.f32.mrf.mxu1  ;;  %v22495_v15 = vshrl.u32 %v16392_v32, 16 }
 0x198   : > { %v2765_v25 = vadd.f32 %v2764_v36, %v17394_v37  ;;  %v17988_v22 = vadd.f32 %v14458_v31, %v2772_v2  ;;  %v22494_v2 = vshll.u32 %v16392_v32, 16 }
 0x199   : > { %v3816_v57 = vpop.f32.mrf.mxu0  ;;  %v14297_v42 = vpop.f32.mrf.mxu1  ;;  %v5736_v36 = vrot.slane %v22495_v15, 4 }
 0x19a   : > { %v2775_v56 = vadd.f32 %v14297_v42, %v17400_v4  ;;  %v17996_v9 = vadd.f32 %v3813_v39, %v2765_v25  ;;  %v5737_v31 = vrot.slane %v22494_v2, 5  ;;  %v18007_v39 = vsel %vm3343_vm5, %v3457_v58, %v3459_v49 }
 0x19b   : > { %v14462_v53 = vpop.f32.mrf.mxu0  ;;  %14557 = vmatmul.mubr.msk.bf16.gmra.mxu0 %vm1647_vm3, %v17977_v63  ;;  %v2767_v33 = vpop.f32.mrf.mxu1  ;;  %22496 = vst [vmem:[#allocation307_spill] sm:$0xff] %v18007_v39 }
 0x19c   : > { %14560 = vmatprep.mubr.msk.bf16.mxu0 %vm1647_vm3, %v17983_v59  ;;  %v18003_v57 = vadd.f32 %v14459_v26, %v2775_v56  ;;  %v18011_v33 = vsel %vm3343_vm5, %v3459_v49, %v3461_v46  ;;  %v18014_v26 = vor.u32 %v5737_v31, %v5736_v36  ;;  %v18025_v59 = vld [vmem:[%s16147_s15 + $0x1d4] sm:$0xff]   ;;  %v22498_v31 = vshll.u32 %v16447_v50, 16 }
 0x19d   : > { %v3828_v37 = vpop.f32.mrf.mxu0  ;;  %v14300_v4 = vpop.f32.mrf.mxu1  ;;  %14395 = vmatmul.mubr.msk.bf16.gmra.mxu1 %vm1647_vm3, %v15759_v51  ;;  %22497 = vst [vmem:[#allocation308_spill] sm:$0xff] %v18011_v33 }
 0x19e   : > { %14398 = vmatprep.mubr.msk.bf16.mxu1 %vm1647_vm3, %v15760_v41  ;;  %v15764_v41 = vld [vmem:[%s16147_s15 + $0x1cc] sm:$0xff]   ;;  %v5745_v36 = vrot.slane %v22498_v31, 5 }
 0x19f   : > { %v14463_v42 = vpop.f32.mrf.mxu0  ;;  %v2779_v25 = vpop.f32.mrf.mxu1  ;;  %v3463_v58 = vrot.slane %v15764_v41, 1 }
 0x1a0   : > { %v2780_v32 = vadd.f32 %v2779_v25, %v17418_v40  ;;  %v3465_v40 = vrot.slane %v18025_v59, 1  ;;  %v22499_v25 = vshrl.u32 %v16447_v50, 16 }
 0x1a1   : > { %v3831_v53 = vpop.f32.mrf.mxu0  ;;  %v14301_v56 = vpop.f32.mrf.mxu1  ;;  %v18038_v63 = vsel %vm3343_vm5, %v3461_v46, %v3463_v58 }
 0x1a2   : > { %v2790_v51 = vadd.f32 %v14301_v56, %v17422_v14  ;;  %v18022_v15 = vadd.f32 %v3828_v37, %v2780_v32  ;;  %22500 = vst [vmem:[#allocation309_spill] sm:$0xff] %v18038_v63 }
 0x1a3   : > { %v14466_v2 = vpop.f32.mrf.mxu0  ;;  %14561 = vmatmul.mubr.msk.bf16.gmra.mxu0 %vm1647_vm3, %v18007_v39  ;;  %v2782_v49 = vpop.f32.mrf.mxu1  ;;  %v5744_v39 = vrot.slane %v22499_v25, 4 }
 0x1a4   : > { %14564 = vmatprep.mubr.msk.bf16.mxu0 %vm1647_vm3, %v18011_v33  ;;  %v2783_v14 = vadd.f32 %v2782_v49, %v17430_v1  ;;  %v18033_v56 = vadd.f32 %v14463_v42, %v2790_v51  ;;  %v18044_v1 = vsel %vm3343_vm5, %v3463_v58, %v3465_v40 }
 0x1a5   : > { %v3843_v4 = vpop.f32.mrf.mxu0  ;;  %v14304_v33 = vpop.f32.mrf.mxu1  ;;  %14399 = vmatmul.mubr.msk.bf16.gmra.mxu1 %vm1647_vm3, %v15761_v5  ;;  %22501 = vst [vmem:[#allocation310_spill] sm:$0xff] %v18044_v1  ;;  %v18047_v5 = vor.u32 %v5745_v36, %v5744_v39  ;;  %v22502_v39 = vshll.u32 %v16507_v47, 16  ;;  %v22503_v36 = vshrl.u32 %v16507_v47, 16 }
 0x1a6   : > { %v2803_v32 = vadd.f32 %v14304_v33, %v17437_v21  ;;  %14402 = vmatprep.mubr.msk.bf16.mxu1 %vm1647_vm3, %v15762_v23  ;;  %v18041_v31 = vadd.f32 %v3831_v53, %v2783_v14  ;;  %v15766_v23 = vld [vmem:[%s16147_s15 + $0x1dc] sm:$0xff]   ;;  %v15767_v14 = vld [vmem:[%s16147_s15 + $0x1e4] sm:$0xff]  }
 0x1a7   : > { %v14467_v37 = vpop.f32.mrf.mxu0  ;;  %v2794_v50 = vpop.f32.mrf.mxu1  ;;  %v3467_v46 = vrot.slane %v15766_v23, 1 }
 0x1a8   : > { %v2795_v42 = vadd.f32 %v2794_v50, %v17446_v8  ;;  %v18049_v51 = vadd.f32 %v14466_v2, %v2803_v32  ;;  %v3469_v8 = vrot.slane %v15767_v14, 1  ;;  %v5753_v2 = vrot.slane %v22502_v39, 5 }
 0x1a9   : > { %v3846_v25 = vpop.f32.mrf.mxu0  ;;  %v14305_v21 = vpop.f32.mrf.mxu1  ;;  %v5752_v37 = vrot.slane %v22503_v36, 4 }
 0x1aa   : > { %v18056_v53 = vadd.f32 %v3843_v4, %v2795_v42  ;;  %v18067_v42 = vsel %vm3343_vm5, %v3465_v40, %v3467_v46  ;;  %v18073_v36 = vsel %vm3343_vm5, %v3467_v46, %v3469_v8  ;;  %v15768_v40 = vld [vmem:[%s16147_s15 + $0x1ec] sm:$0xff]  }
 0x1ab   : > { %v14470_v33 = vpop.f32.mrf.mxu0  ;;  %14565 = vmatmul.mubr.msk.bf16.gmra.mxu0 %vm1647_vm3, %v18038_v63  ;;  %v2797_v58 = vpop.f32.mrf.mxu1  ;;  %22504 = vst [vmem:[#allocation311_spill] sm:$0xff] %v18067_v42  ;;  %22505 = vst [vmem:[#allocation312_spill] sm:$0xff] %v18073_v36 }
 0x1ac   : > { %14568 = vmatprep.mubr.msk.bf16.mxu0 %vm1647_vm3, %v18044_v1  ;;  %v2798_v32 = vadd.f32 %v2797_v58, %v17458_v62 }
 0x1ad   : > { %v3858_v49 = vpop.f32.mrf.mxu0  ;;  %v14308_v50 = vpop.f32.mrf.mxu1  ;;  %14403 = vmatmul.mubr.msk.bf16.gmra.mxu1 %vm1647_vm3, %v15763_v34  ;;  %v18076_v34 = vor.u32 %v5753_v2, %v5752_v37  ;;  %v15769_v2 = vld [vmem:[%s16147_s15 + $0x1f4] sm:$0xff]  }
 0x1ae   : > { %v2818_v4 = vadd.f32 %v14308_v50, %v17463_v16  ;;  %14406 = vmatprep.mubr.msk.bf16.mxu1 %vm1647_vm3, %v15764_v41  ;;  %v18070_v1 = vadd.f32 %v3846_v25, %v2798_v32  ;;  %v3471_v25 = vrot.slane %v15768_v40, 1  ;;  %v3473_v37 = vrot.slane %v15769_v2, 1 }
 0x1af   : > { %v14471_v21 = vpop.f32.mrf.mxu0  ;;  %v2809_v39 = vpop.f32.mrf.mxu1 }
 0x1b0   : > { %v2810_v62 = vadd.f32 %v2809_v39, %v17472_v30  ;;  %v18078_v58 = vadd.f32 %v14470_v33, %v2818_v4  ;;  %v22506_v33 = vshll.u32 %v16563_v3, 16  ;;  %v22507_v39 = vshrl.u32 %v16563_v3, 16 }
 0x1b1   : > { %v3861_v47 = vpop.f32.mrf.mxu0  ;;  %v14309_v16 = vpop.f32.mrf.mxu1 }
 0x1b2   : > { %v2821_v41 = vadd.f32 %v14309_v16, %v17478_v19  ;;  %v18086_v46 = vadd.f32 %v3858_v49, %v2810_v62  ;;  %v5761_v4 = vrot.slane %v22506_v33, 5  ;;  %v5760_v63 = vrot.slane %v22507_v39, 4 }
 0x1b3   : > { %v14474_v50 = vpop.f32.mrf.mxu0  ;;  %14569 = vmatmul.mubr.msk.bf16.gmra.mxu0 %vm1647_vm3, %v18067_v42  ;;  %v2812_v32 = vpop.f32.mrf.mxu1 }
 0x1b4   : > { %14572 = vmatprep.mubr.msk.bf16.mxu0 %vm1647_vm3, %v18073_v36  ;;  %v2813_v42 = vadd.f32 %v2812_v32, %v17487_v20  ;;  %v18094_v19 = vadd.f32 %v14471_v21, %v2821_v41  ;;  %v18106_v21 = vsel %vm3343_vm5, %v3471_v25, %v3473_v37  ;;  %v18108_v41 = vor.u32 %v5761_v4, %v5760_v63 }
 0x1b5   : > { %v3874_v30 = vpop.f32.mrf.mxu0  ;;  %v14312_v16 = vpop.f32.mrf.mxu1  ;;  %14407 = vmatmul.mubr.msk.bf16.gmra.mxu1 %vm1647_vm3, %v18025_v59  ;;  %22509 = vst [vmem:[#allocation314_spill] sm:$0xff] %v18106_v21  ;;  %v22511_v63 = vshll.u32 %v16615_v45, 16  ;;  %v22512_v4 = vshrl.u32 %v16615_v45, 16 }
 0x1b6   : > { %v2833_v62 = vadd.f32 %v14312_v16, %v17494_v61  ;;  %v18100_v30 = vsel %vm3343_vm5, %v3469_v8, %v3471_v25  ;;  %14410 = vmatprep.mubr.msk.bf16.mxu1 %vm1647_vm3, %v15766_v23  ;;  %v18103_v3 = vadd.f32 %v3861_v47, %v2813_v42  ;;  %v15770_v23 = vld [vmem:[%s16147_s15 + $0x1fc] sm:$0xff]   ;;  %v15771_v25 = vld [vmem:[%s16147_s15 + $0x204] sm:$0xff]  }
 0x1b7   : > { %v14475_v49 = vpop.f32.mrf.mxu0  ;;  %22508 = vst [vmem:[#allocation313_spill] sm:$0xff] %v18100_v30  ;;  %v2825_v33 = vpop.f32.mrf.mxu1  ;;  %v3475_v8 = vrot.slane %v15770_v23, 1  ;;  %v3477_v16 = vrot.slane %v15771_v25, 1 }
 0x1b8   : > { %v18110_v59 = vadd.f32 %v14474_v50, %v2833_v62  ;;  %v5769_v50 = vrot.slane %v22511_v63, 5  ;;  %v5768_v62 = vrot.slane %v22512_v4, 4 }
 0x1b9   : > { %v3876_v20 = vpop.f32.mrf.mxu0  ;;  %v14313_v32 = vpop.f32.mrf.mxu1  ;;  %v18129_v36 = vsel %vm3343_vm5, %v3473_v37, %v3475_v8  ;;  %v15772_v37 = vld [vmem:[%s16147_s15 + $0x20c] sm:$0xff]  }
 0x1ba   : > { %22510 = vst [vmem:[#allocation315_spill] sm:$0xff] %v18110_v59  ;;  %v2836_v61 = vadd.f32 %v14313_v32, %v17508_v11  ;;  %22514 = vst [vmem:[#allocation317_spill] sm:$0xff] %v18129_v36 }
 0x1bb   : > { %v14478_v39 = vpop.f32.mrf.mxu0  ;;  %14573 = vmatmul.mubr.msk.bf16.gmra.mxu0 %vm1647_vm3, %v18100_v30  ;;  %v2827_v42 = vpop.f32.mrf.mxu1 }
 0x1bc   : > { %14576 = vmatprep.mubr.msk.bf16.mxu0 %vm1647_vm3, %v18106_v21  ;;  %v2828_v33 = vadd.f32 %v2827_v42, %v17515_v44  ;;  %v18124_v30 = vadd.f32 %v14475_v49, %v2836_v61  ;;  %v18135_v44 = vsel %vm3343_vm5, %v3475_v8, %v3477_v16 }
 0x1bd   : > { %v3889_v47 = vpop.f32.mrf.mxu0  ;;  %v14316_v11 = vpop.f32.mrf.mxu1  ;;  %14411 = vmatmul.mubr.msk.bf16.gmra.mxu1 %vm1647_vm3, %v15767_v14  ;;  %22516 = vst [vmem:[#allocation319_spill] sm:$0xff] %v18135_v44  ;;  %v18138_v14 = vor.u32 %v5769_v50, %v5768_v62  ;;  %v15773_v50 = vld [vmem:[%s16147_s15 + $0x214] sm:$0xff]  }
 0x1be   : > { %22513 = vst [vmem:[#allocation316_spill] sm:$0xff] %v18124_v30  ;;  %v2848_v21 = vadd.f32 %v14316_v11, %v17522_v18  ;;  %14414 = vmatprep.mubr.msk.bf16.mxu1 %vm1647_vm3, %v15768_v40  ;;  %v18132_v63 = vadd.f32 %v3876_v20, %v2828_v33  ;;  %v3479_v20 = vrot.slane %v15772_v37, 1  ;;  %v3481_v62 = vrot.slane %v15773_v50, 1 }
 0x1bf   : > { %v14479_v32 = vpop.f32.mrf.mxu0  ;;  %v2840_v45 = vpop.f32.mrf.mxu1  ;;  %v22520_v11 = vshrl.u32 %v16675_v29, 16 }
 0x1c0   : > { %22515 = vst [vmem:[#allocation318_spill] sm:$0xff] %v18132_v63  ;;  %v2841_v49 = vadd.f32 %v2840_v45, %v17531_v43  ;;  %v18140_v61 = vadd.f32 %v14478_v39, %v2848_v21  ;;  %v22519_v21 = vshll.u32 %v16675_v29, 16 }
 0x1c1   : > { %v3892_v4 = vpop.f32.mrf.mxu0  ;;  %v14317_v18 = vpop.f32.mrf.mxu1  ;;  %v5776_v45 = vrot.slane %v22520_v11, 4 }
 0x1c2   : > { %22517 = vst [vmem:[#allocation320_spill] sm:$0xff] %v18140_v61  ;;  %v2851_v40 = vadd.f32 %v14317_v18, %v17538_v7  ;;  %v18148_v8 = vadd.f32 %v3889_v47, %v2841_v49  ;;  %v5777_v39 = vrot.slane %v22519_v21, 5  ;;  %v18159_v47 = vsel %vm3343_vm5, %v3477_v16, %v3479_v20 }
 0x1c3   : > { %v14482_v42 = vpop.f32.mrf.mxu0  ;;  %14577 = vmatmul.mubr.msk.bf16.gmra.mxu0 %vm1647_vm3, %v18129_v36  ;;  %v2843_v33 = vpop.f32.mrf.mxu1  ;;  %22522 = vst [vmem:[#allocation323_spill] sm:$0xff] %v18159_v47 }
 0x1c4   : > { %14580 = vmatprep.mubr.msk.bf16.mxu0 %vm1647_vm3, %v18135_v44  ;;  %22518 = vst [vmem:[#allocation321_spill] sm:$0xff] %v18148_v8  ;;  %v18155_v4 = vadd.f32 %v14479_v32, %v2851_v40  ;;  %v18163_v33 = vsel %vm3343_vm5, %v3479_v20, %v3481_v62  ;;  %v18166_v32 = vor.u32 %v5777_v39, %v5776_v45  ;;  %v18177_v44 = vld [vmem:[%s16147_s15 + $0x224] sm:$0xff]   ;;  %v22525_v39 = vshll.u32 %v16731_v52, 16 }
 0x1c5   : > { %v3904_v43 = vpop.f32.mrf.mxu0  ;;  %v14320_v7 = vpop.f32.mrf.mxu1  ;;  %14415 = vmatmul.mubr.msk.bf16.gmra.mxu1 %vm1647_vm3, %v15769_v2  ;;  %22523 = vst [vmem:[#allocation324_spill] sm:$0xff] %v18163_v33 }
 0x1c6   : > { %22521 = vst [vmem:[#allocation322_spill] sm:$0xff] %v18155_v4  ;;  %14418 = vmatprep.mubr.msk.bf16.mxu1 %vm1647_vm3, %v15770_v23  ;;  %v15774_v23 = vld [vmem:[%s16147_s15 + $0x21c] sm:$0xff]   ;;  %v5785_v45 = vrot.slane %v22525_v39, 5 }
 0x1c7   : > { %v14483_v18 = vpop.f32.mrf.mxu0  ;;  %v2855_v49 = vpop.f32.mrf.mxu1  ;;  %v3483_v16 = vrot.slane %v15774_v23, 1 }
 0x1c8   : > { %v2856_v29 = vadd.f32 %v2855_v49, %v17557_v28  ;;  %v3485_v28 = vrot.slane %v18177_v44, 1  ;;  %v22526_v49 = vshrl.u32 %v16731_v52, 16 }
 0x1c9   : > { %v3907_v42 = vpop.f32.mrf.mxu0  ;;  %v14321_v40 = vpop.f32.mrf.mxu1 }
 0x1ca   : > { %v2866_v2 = vadd.f32 %v14321_v40, %v17562_v27  ;;  %v18174_v11 = vadd.f32 %v3904_v43, %v2856_v29  ;;  %v22528_v29 = vld [vmem:[#allocation208_spill] sm:$0xff] }
 0x1cb   : > { %v14486_v21 = vpop.f32.mrf.mxu0  ;;  %14581 = vmatmul.mubr.msk.bf16.gmra.mxu0 %vm1647_vm3, %v18159_v47  ;;  %v2858_v20 = vpop.f32.mrf.mxu1  ;;  %v5784_v47 = vrot.slane %v22526_v49, 4 }
 0x1cc   : > { %14584 = vmatprep.mubr.msk.bf16.mxu0 %vm1647_vm3, %v18163_v33  ;;  %22524 = vst [vmem:[#allocation325_spill] sm:$0xff] %v18174_v11  ;;  %v2859_v27 = vadd.f32 %v2858_v20, %v17571_v6  ;;  %v18185_v40 = vadd.f32 %v14483_v18, %v2866_v2  ;;  %v18190_v11 = vsel %vm3343_vm5, %v3481_v62, %v3483_v16  ;;  %v22532_v18 = vld [vmem:[#allocation210_spill] sm:$0xff] }
 0x1cd   : > { %v3919_v7 = vpop.f32.mrf.mxu0  ;;  %v14324_v33 = vpop.f32.mrf.mxu1  ;;  %14419 = vmatmul.mubr.msk.bf16.gmra.mxu1 %vm1647_vm3, %v15771_v25  ;;  %22529 = vst [vmem:[#allocation208_spill] sm:$0xff] %v18190_v11  ;;  %v18196_v6 = vsel %vm3343_vm5, %v3483_v16, %v3485_v28  ;;  %v18199_v25 = vor.u32 %v5785_v45, %v5784_v47  ;;  %v22535_v47 = vld [vmem:[#allocation89_spill] sm:$0xff] }
 0x1ce   : > { %22527 = vst [vmem:[#allocation326_spill] sm:$0xff] %v18185_v40  ;;  %v2879_v36 = vadd.f32 %v14324_v33, %v22528_v29  ;;  %14422 = vmatprep.mubr.msk.bf16.mxu1 %vm1647_vm3, %v15772_v37  ;;  %v18193_v39 = vadd.f32 %v3907_v42, %v2859_v27  ;;  %22531 = vst [vmem:[#allocation328_spill] sm:$0xff] %v18196_v6  ;;  %v15776_v37 = vld [vmem:[%s16147_s15 + $0x22c] sm:$0xff]   ;;  %v15777_v29 = vld [vmem:[%s16147_s15 + $0x234] sm:$0xff]   ;;  %v22536_v45 = vshll.u32 %v22535_v47, 16 }
 0x1cf   : > { %v14487_v43 = vpop.f32.mrf.mxu0  ;;  %v2870_v52 = vpop.f32.mrf.mxu1  ;;  %v3487_v62 = vrot.slane %v15776_v37, 1 }
 0x1d0   : > { %22530 = vst [vmem:[#allocation327_spill] sm:$0xff] %v18193_v39  ;;  %v2871_v2 = vadd.f32 %v2870_v52, %v22532_v18  ;;  %v18201_v20 = vadd.f32 %v14486_v21, %v2879_v36  ;;  %v3489_v52 = vrot.slane %v15777_v29, 1  ;;  %v5793_v36 = vrot.slane %v22536_v45, 5 }
 0x1d1   : > { %v3922_v49 = vpop.f32.mrf.mxu0  ;;  %v14325_v33 = vpop.f32.mrf.mxu1  ;;  %v22537_v21 = vshrl.u32 %v22535_v47, 16 }
 0x1d2   : > { %22533 = vst [vmem:[#allocation210_spill] sm:$0xff] %v18201_v20  ;;  %v18208_v42 = vadd.f32 %v3919_v7, %v2871_v2  ;;  %v18219_v2 = vsel %vm3343_vm5, %v3485_v28, %v3487_v62 }
 0x1d3   : > { %v14490_v43 = vpop.f32.mrf.mxu0  ;;  %14585 = vmatmul.mubr.msk.bf16.gmra.mxu0 %vm1647_vm3, %v18190_v11  ;;  %v2873_v16 = vpop.f32.mrf.mxu1  ;;  %v5792_v18 = vrot.slane %v22537_v21, 4  ;;  %22538 = vst [vmem:[#allocation89_spill] sm:$0xff] %v18219_v2  ;;  %v18225_v21 = vsel %vm3343_vm5, %v3487_v62, %v3489_v52 }
 0x1d4   : > { %14588 = vmatprep.mubr.msk.bf16.mxu0 %vm1647_vm3, %v18196_v6  ;;  %22534 = vst [vmem:[#allocation329_spill] sm:$0xff] %v18208_v42  ;;  %v2874_v33 = vadd.f32 %v2873_v16, %v17601_v35  ;;  %22540 = vst [vmem:[#allocation331_spill] sm:$0xff] %v18225_v21 }
 0x1d5   : > { %v3934_v27 = vpop.f32.mrf.mxu0  ;;  %v14328_v11 = vpop.f32.mrf.mxu1  ;;  %14423 = vmatmul.mubr.msk.bf16.gmra.mxu1 %vm1647_vm3, %v15773_v50  ;;  %v18228_v50 = vor.u32 %v5793_v36, %v5792_v18  ;;  %v15779_v36 = vld [vmem:[%s16147_s15 + $0x244] sm:$0xff]  }
 0x1d6   : > { %v2894_v7 = vadd.f32 %v14328_v11, %v17606_v0  ;;  %14426 = vmatprep.mubr.msk.bf16.mxu1 %vm1647_vm3, %v15774_v23  ;;  %v18222_v42 = vadd.f32 %v3922_v49, %v2874_v33  ;;  %v22542_v23 = vld [vmem:[#allocation217_spill] sm:$0xff]  ;;  %v3493_v18 = vrot.slane %v15779_v36, 1 }
 0x1d7   : > { %v14491_v6 = vpop.f32.mrf.mxu0  ;;  %v2885_v45 = vpop.f32.mrf.mxu1  ;;  %v15778_v49 = vld [vmem:[%s16147_s15 + $0x23c] sm:$0xff]  }
 0x1d8   : > { %22539 = vst [vmem:[#allocation330_spill] sm:$0xff] %v18222_v42  ;;  %v2886_v35 = vadd.f32 %v2885_v45, %v17615_v24  ;;  %v18230_v16 = vadd.f32 %v14490_v43, %v2894_v7  ;;  %v3491_v33 = vrot.slane %v15778_v49, 1  ;;  %v22544_v43 = vld [vmem:[#allocation97_spill] sm:$0xff] }
 0x1d9   : > { %v3937_v47 = vpop.f32.mrf.mxu0  ;;  %v14329_v0 = vpop.f32.mrf.mxu1  ;;  %v22545_v7 = vshll.u32 %v22544_v43, 16 }
 0x1da   : > { %22541 = vst [vmem:[#allocation332_spill] sm:$0xff] %v18230_v16  ;;  %v2897_v28 = vadd.f32 %v14329_v0, %v22542_v23  ;;  %v18238_v62 = vadd.f32 %v3934_v27, %v2886_v35  ;;  %v22546_v16 = vshrl.u32 %v22544_v43, 16  ;;  %v22549_v35 = vld [vmem:[#allocation223_spill] sm:$0xff] }
 0x1db   : > { %v14494_v11 = vpop.f32.mrf.mxu0  ;;  %14589 = vmatmul.mubr.msk.bf16.gmra.mxu0 %vm1647_vm3, %v18219_v2  ;;  %v2888_v42 = vpop.f32.mrf.mxu1  ;;  %v5801_v45 = vrot.slane %v22545_v7, 5  ;;  %v22547_v2 = vld [vmem:[#allocation220_spill] sm:$0xff] }
 0x1dc   : > { %14592 = vmatprep.mubr.msk.bf16.mxu0 %vm1647_vm3, %v18225_v21  ;;  %22543 = vst [vmem:[#allocation217_spill] sm:$0xff] %v18238_v62  ;;  %v5800_v20 = vrot.slane %v22546_v16, 4  ;;  %v2889_v39 = vadd.f32 %v2888_v42, %v22547_v2  ;;  %v18246_v0 = vadd.f32 %v14491_v6, %v2897_v28  ;;  %v18252_v21 = vsel %vm3343_vm5, %v3489_v52, %v3491_v33  ;;  %v22554_v52 = vld [vmem:[#allocation226_spill] sm:$0xff] }
 0x1dd   : > { %v3950_v24 = vpop.f32.mrf.mxu0  ;;  %v14332_v23 = vpop.f32.mrf.mxu1  ;;  %14427 = vmatmul.mubr.msk.bf16.gmra.mxu1 %vm1647_vm3, %v18177_v44  ;;  %22550 = vst [vmem:[#allocation220_spill] sm:$0xff] %v18252_v21  ;;  %v18258_v6 = vsel %vm3343_vm5, %v3491_v33, %v3493_v18  ;;  %v18271_v33 = vld [vmem:[%s16147_s15 + $0x254] sm:$0xff]  }
 0x1de   : > { %22548 = vst [vmem:[#allocation97_spill] sm:$0xff] %v18246_v0  ;;  %v2909_v24 = vadd.f32 %v14332_v23, %v22549_v35  ;;  %14430 = vmatprep.mubr.msk.bf16.mxu1 %vm1647_vm3, %v15776_v37  ;;  %v18255_v43 = vadd.f32 %v3937_v47, %v2889_v39  ;;  %22552 = vst [vmem:[#allocation333_spill] sm:$0xff] %v18258_v6  ;;  %v18260_v2 = vor.u32 %v5801_v45, %v5800_v20  ;;  %v15780_v39 = vld [vmem:[%s16147_s15 + $0x24c] sm:$0xff]  }
 0x1df   : > { %v14495_v27 = vpop.f32.mrf.mxu0  ;;  %v2901_v16 = vpop.f32.mrf.mxu1  ;;  %v3495_v37 = vrot.slane %v15780_v39, 1  ;;  %v3497_v20 = vrot.slane %v18271_v33, 1  ;;  %v22560_v0 = vld [vmem:[#allocation231_spill] sm:$0xff] }
 0x1e0   : > { %22551 = vst [vmem:[#allocation223_spill] sm:$0xff] %v18255_v43  ;;  %v18262_v44 = vadd.f32 %v14494_v11, %v2909_v24  ;;  %v22555_v11 = vld [vmem:[#allocation105_spill] sm:$0xff] }
 0x1e1   : > { %v3952_v42 = vpop.f32.mrf.mxu0  ;;  %v14333_v28 = vpop.f32.mrf.mxu1  ;;  %v22556_v45 = vshll.u32 %v22555_v11, 16  ;;  %v22557_v16 = vshrl.u32 %v22555_v11, 16  ;;  %v18284_v40 = vsel %vm3343_vm5, %v3493_v18, %v3495_v37 }
 0x1e2   : > { %22553 = vst [vmem:[#allocation334_spill] sm:$0xff] %v18262_v44  ;;  %v2912_v23 = vadd.f32 %v14333_v28, %v22554_v52  ;;  %22561 = vst [vmem:[#allocation105_spill] sm:$0xff] %v18284_v40 }
 0x1e3   : > { %v14498_v7 = vpop.f32.mrf.mxu0  ;;  %14593 = vmatmul.mubr.msk.bf16.gmra.mxu0 %vm1647_vm3, %v18252_v21  ;;  %v2903_v47 = vpop.f32.mrf.mxu1  ;;  %v5809_v24 = vrot.slane %v22556_v45, 5  ;;  %v5808_v44 = vrot.slane %v22557_v16, 4  ;;  %v22558_v21 = vld [vmem:[#allocation228_spill] sm:$0xff] }
 0x1e4   : > { %14596 = vmatprep.mubr.msk.bf16.mxu0 %vm1647_vm3, %v18258_v6  ;;  %v2904_v43 = vadd.f32 %v2903_v47, %v22558_v21  ;;  %v18279_v28 = vadd.f32 %v14495_v27, %v2912_v23  ;;  %v18290_v21 = vsel %vm3343_vm5, %v3495_v37, %v3497_v20  ;;  %v22564_v27 = vld [vmem:[#allocation233_spill] sm:$0xff] }
 0x1e5   : > { %v3965_v35 = vpop.f32.mrf.mxu0  ;;  %v14336_v52 = vpop.f32.mrf.mxu1  ;;  %14431 = vmatmul.mubr.msk.bf16.gmra.mxu1 %vm1647_vm3, %v15777_v29  ;;  %22563 = vst [vmem:[#allocation231_spill] sm:$0xff] %v18290_v21  ;;  %v18293_v47 = vor.u32 %v5809_v24, %v5808_v44  ;;  %v18306_v44 = vld [vmem:[%s16147_s15 + $0x264] sm:$0xff]  }
 0x1e6   : > { %22559 = vst [vmem:[#allocation226_spill] sm:$0xff] %v18279_v28  ;;  %v2924_v62 = vadd.f32 %v14336_v52, %v22560_v0  ;;  %14434 = vmatprep.mubr.msk.bf16.mxu1 %vm1647_vm3, %v15778_v49  ;;  %v18287_v45 = vadd.f32 %v3952_v42, %v2904_v43  ;;  %v15782_v49 = vld [vmem:[%s16147_s15 + $0x25c] sm:$0xff]   ;;  %v22566_v43 = vld [vmem:[#allocation235_spill] sm:$0xff] }
 0x1e7   : > { %v14499_v6 = vpop.f32.mrf.mxu0  ;;  %v2916_v11 = vpop.f32.mrf.mxu1  ;;  %v3499_v18 = vrot.slane %v15782_v49, 1 }
 0x1e8   : > { %22562 = vst [vmem:[#allocation228_spill] sm:$0xff] %v18287_v45  ;;  %v2917_v23 = vadd.f32 %v2916_v11, %v22564_v27  ;;  %v18295_v29 = vadd.f32 %v14498_v7, %v2924_v62  ;;  %v3501_v62 = vrot.slane %v18306_v44, 1  ;;  %v22568_v7 = vld [vmem:[#allocation113_spill] sm:$0xff] }
 0x1e9   : > { %v3968_v16 = vpop.f32.mrf.mxu0  ;;  %v14337_v0 = vpop.f32.mrf.mxu1  ;;  %v22569_v24 = vshll.u32 %v22568_v7, 16 }
 0x1ea   : > { %22565 = vst [vmem:[#allocation233_spill] sm:$0xff] %v18295_v29  ;;  %v2927_v42 = vadd.f32 %v14337_v0, %v22566_v43  ;;  %v18303_v37 = vadd.f32 %v3965_v35, %v2917_v23  ;;  %v18317_v23 = vsel %vm3343_vm5, %v3497_v20, %v3499_v18  ;;  %v22573_v43 = vld [vmem:[#allocation10_spill] sm:$0xff]  ;;  %v18329_v45 = vsel %vm3343_vm5, %v3499_v18, %v3501_v62  ;;  %v22580_v20 = vld [vmem:[#allocation240_spill] sm:$0xff] }
 0x1eb   : > { %v14502_v52 = vpop.f32.mrf.mxu0  ;;  %14597 = vmatmul.mubr.msk.bf16.gmra.mxu0 %vm1647_vm3, %v18284_v40  ;;  %v2919_v16 = vpop.f32.mrf.mxu1  ;;  %v5817_v27 = vrot.slane %v22569_v24, 5  ;;  %22572 = vst [vmem:[#allocation335_spill] sm:$0xff] %v18317_v23  ;;  %v22575_v24 = vshll.u32 %v22573_v43, 16 }
 0x1ec   : > { %14600 = vmatprep.mubr.msk.bf16.mxu0 %vm1647_vm3, %v18290_v21  ;;  %22567 = vst [vmem:[#allocation235_spill] sm:$0xff] %v18303_v37  ;;  %v22570_v52 = vshrl.u32 %v22568_v7, 16  ;;  %v18313_v29 = vadd.f32 %v14499_v6, %v2927_v42  ;;  %v22574_v16 = vshrl.u32 %v22573_v43, 16  ;;  %v22576_v7 = vld [vmem:[#allocation14_spill] sm:$0xff] }
 0x1ed   : > { %v3980_v11 = vpop.f32.mrf.mxu0  ;;  %v14340_v0 = vpop.f32.mrf.mxu1  ;;  %14435 = vmatmul.mubr.msk.bf16.gmra.mxu1 %vm1647_vm3, %v15779_v36  ;;  %v5698_v37 = vrot.slane %v22575_v24, 5  ;;  %v22578_v42 = vshll.u32 %v22576_v7, 16  ;;  %22579 = vst [vmem:[#allocation14_spill] sm:$0xff] %v18329_v45  ;;  %v18337_v24 = vld [vmem:[%s16147_s15 + $0x26c] sm:$0xff]  }
 0x1ee   : > { %v5816_v40 = vrot.slane %v22570_v52, 4  ;;  %22571 = vst [vmem:[#allocation113_spill] sm:$0xff] %v18313_v29  ;;  %14438 = vmatprep.mubr.msk.bf16.mxu1 %vm1647_vm3, %v15780_v39  ;;  %v5697_v21 = vrot.slane %v22574_v16, 4  ;;  %v22577_v52 = vshrl.u32 %v22576_v7, 16  ;;  %22581 = vst [vmem:[#allocation240_spill] sm:$0xff] %v18337_v24  ;;  %v22582_v7 = vld [vmem:[#allocation241_spill] sm:$0xff] }
 0x1ef   : > { %v14503_v35 = vpop.f32.mrf.mxu0  ;;  %v5701_v0 = vrot.slane %v22578_v42, 5  ;;  %v2931_v36 = vpop.f32.mrf.mxu1 }
 0x1f0   : > { %v5700_v6 = vrot.slane %v22577_v52, 4  ;;  %v2932_v28 = vadd.f32 %v2931_v36, %v22580_v20  ;;  %v18332_v39 = vor.u32 %v5817_v27, %v5816_v40  ;;  %v5699_v18 = vor.u32 %v5698_v37, %v5697_v21  ;;  %v22584_v36 = vld [vmem:[#allocation121_spill] sm:$0xff]  ;;  %v22587_v52 = vld [vmem:[#allocation244_spill] sm:$0xff]  ;;  %v22589_v21 = vld [vmem:[#allocation247_spill] sm:$0xff] }
 0x1f1   : > { %v3983_v29 = vpop.f32.mrf.mxu0  ;;  %v14341_v4 = vpop.f32.mrf.mxu1  ;;  %v22585_v20 = vshll.u32 %v22584_v36, 16  ;;  %v22586_v63 = vshrl.u32 %v22584_v36, 16  ;;  %v22593_v36 = vld [vmem:[#allocation19_spill] sm:$0xff] }
 0x1f2   : > { %v2942_v42 = vadd.f32 %v14341_v4, %v22582_v7  ;;  %v5702_v8 = vor.u32 %v5701_v0, %v5700_v6  ;;  %v18343_v61 = vadd.f32 %v3980_v11, %v2932_v28  ;;  %v22590_v11 = vrot.slane %v18337_v24, 1 }
 0x1f3   : > { %v14506_v16 = vpop.f32.mrf.mxu0  ;;  %14601 = vmatmul.mubr.msk.bf16.gmra.mxu0 %vm1647_vm3, %v18317_v23  ;;  %v2934_v40 = vpop.f32.mrf.mxu1  ;;  %v5825_v23 = vrot.slane %v22585_v20, 5  ;;  %v5824_v30 = vrot.slane %v22586_v63, 4  ;;  %v22594_v20 = vshrl.u32 %v22593_v36, 16 }
 0x1f4   : > { %14604 = vmatprep.mubr.msk.bf16.mxu0 %vm1647_vm3, %v18329_v45  ;;  %22583 = vst [vmem:[#allocation241_spill] sm:$0xff] %v18343_v61  ;;  %v2935_v59 = vadd.f32 %v2934_v40, %v22587_v52  ;;  %v18350_v4 = vadd.f32 %v14503_v35, %v2942_v42  ;;  %v18358_v6 = vsel %vm3343_vm5, %v3501_v62, %v22590_v11  ;;  %v4521_v42 = vrot.slane %v22573_v43, 4  ;;  %v15785_v40 = vld [vmem:[%s16147_s15 + $0x4] sm:$0xff]  }
 0x1f5   : > { %v3995_v27 = vpop.f32.mrf.mxu0  ;;  %v14344_v7 = vpop.f32.mrf.mxu1  ;;  %14439 = vmatmul.mubr.msk.bf16.gmra.mxu1 %vm1647_vm3, %v18271_v33  ;;  %22591 = vst [vmem:[#allocation244_spill] sm:$0xff] %v18358_v6  ;;  %v5703_v63 = vsel %vm5696_vm6, %v5699_v18, %v5702_v8  ;;  %v4522_v33 = vrot.slane %v15785_v40, 4  ;;  %v22596_v62 = vld [vmem:[#allocation249_spill] sm:$0xff]  ;;  %v18371_v24 = vor.u32 %v5825_v23, %v5824_v30 }
 0x1f6   : > { %22588 = vst [vmem:[#allocation121_spill] sm:$0xff] %v18350_v4  ;;  %v2955_v37 = vadd.f32 %v14344_v7, %v22589_v21  ;;  %14442 = vmatprep.mubr.msk.bf16.mxu1 %vm1647_vm3, %v15782_v49  ;;  %v18362_v0 = vadd.f32 %v3983_v29, %v2935_v59  ;;  %v5708_v7 = vrot.slane %v22594_v20, 4  ;;  %v22604_v45 = vld [vmem:[#allocation25_spill] sm:$0xff] }
 0x1f7   : > { %v14507_v28 = vpop.f32.mrf.mxu0  ;;  %v2946_v35 = vpop.f32.mrf.mxu1 }
 0x1f8   : > { %22592 = vst [vmem:[#allocation247_spill] sm:$0xff] %v18362_v0  ;;  %v22595_v28 = vshll.u32 %v22593_v36, 16  ;;  %v2947_v11 = vadd.f32 %v2946_v35, %v22596_v62  ;;  %v18373_v49 = vadd.f32 %v14506_v16, %v2955_v37  ;;  %v4523_v36 = vsel %vm993_vm4, %v4521_v42, %v4522_v33  ;;  %v22599_v35 = vld [vmem:[#allocation129_spill] sm:$0xff] }
 0x1f9   : > { %v3998_v52 = vpop.f32.mrf.mxu0  ;;  %v14345_v59 = vpop.f32.mrf.mxu1  ;;  %v22600_v30 = vshll.u32 %v22599_v35, 16  ;;  %v22601_v16 = vshrl.u32 %v22599_v35, 16  ;;  %v22602_v62 = vld [vmem:[#allocation253_spill] sm:$0xff]  ;;  %v5707_v42 = vsel %vm5696_vm6, %v5702_v8, %v22604_v45 }
 0x1fa   : > { %v5709_v21 = vrot.slane %v22595_v28, 5  ;;  %22597 = vst [vmem:[#allocation19_spill] sm:$0xff] %v18373_v49  ;;  %v18378_v18 = vadd.f32 %v3995_v27, %v2947_v11  ;;  %v22609_v8 = vld [vmem:[#allocation257_spill] sm:$0xff] }
 0x1fb   : > { %v14510_v29 = vpop.f32.mrf.mxu0  ;;  %14605 = vmatmul.mubr.msk.bf16.gmra.mxu0 %vm1647_vm3, %v18358_v6  ;;  %v2949_v40 = vpop.f32.mrf.mxu1  ;;  %v5833_v23 = vrot.slane %v22600_v30, 5  ;;  %v5832_v37 = vrot.slane %v22601_v16, 4 }
 0x1fc   : > { %14772 = vmatprep.mubr.msk.bf16.mxu0 %vm1647_vm3, %v5703_v63  ;;  %22598 = vst [vmem:[#allocation249_spill] sm:$0xff] %v18378_v18  ;;  %v5710_v28 = vor.u32 %v5709_v21, %v5708_v7  ;;  %v2950_v59 = vadd.f32 %v2949_v40, %v22602_v62  ;;  %v22603_v63 = vld [vmem:[#allocation255_spill] sm:$0xff] }
 0x1fd   : > { %v4010_v20 = vpop.f32.mrf.mxu0  ;;  %v14348_v6 = vpop.f32.mrf.mxu1  ;;  %14443 = vmatmul.mubr.msk.bf16.gmra.mxu1 %vm1647_vm3, %v18306_v44  ;;  %v15786_v7 = vld [vmem:[%s16147_s15 + $0xc] sm:$0xff]   ;;  %v15787_v62 = vld [vmem:[%s16147_s15 + $0x14] sm:$0xff]  }
 0x1fe   : > { %v2970_v11 = vadd.f32 %v14348_v6, %v22603_v63  ;;  %14610 = vmatprep.mubr.msk.bf16.mxu1 %vm1647_vm3, %v4523_v36  ;;  %v4524_v21 = vrot.slane %v15786_v7, 4  ;;  %v18393_v30 = vadd.f32 %v3998_v52, %v2950_v59  ;;  %v5711_v40 = vsel %vm5696_vm6, %v22604_v45, %v5710_v28  ;;  %v22606_v44 = vld [vmem:[#allocation23_spill] sm:$0xff] }
 0x1ff   : > { %v14511_v27 = vpop.f32.mrf.mxu0  ;;  %v2961_v35 = vpop.f32.mrf.mxu1  ;;  %v4526_v18 = vrot.slane %v15787_v62, 4  ;;  %v22607_v43 = vshrl.u32 %v22606_v44, 16  ;;  %v22608_v6 = vshll.u32 %v22606_v44, 16  ;;  %v18403_v36 = vor.u32 %v5833_v23, %v5832_v37 }
 0x200   : > { %22605 = vst [vmem:[#allocation129_spill] sm:$0xff] %v18393_v30  ;;  %v2962_v0 = vadd.f32 %v2961_v35, %v22609_v8  ;;  %v18405_v7 = vadd.f32 %v14510_v29, %v2970_v11  ;;  %v22611_v30 = vld [vmem:[#allocation259_spill] sm:$0xff]  ;;  %v4525_v62 = vsel %vm993_vm4, %v4522_v33, %v4524_v21  ;;  %v22613_v11 = vld [vmem:[#allocation137_spill] sm:$0xff]  ;;  %v22616_v8 = vld [vmem:[#allocation262_spill] sm:$0xff] }
 0x201   : > { %v4013_v16 = vpop.f32.mrf.mxu0  ;;  %v5716_v49 = vrot.slane %v22607_v43, 4  ;;  %v5717_v63 = vrot.slane %v22608_v6, 5  ;;  %v14349_v52 = vpop.f32.mrf.mxu1  ;;  %v4527_v29 = vsel %vm993_vm4, %v4524_v21, %v4526_v18  ;;  %v22614_v44 = vshll.u32 %v22613_v11, 16 }
 0x202   : > { %22610 = vst [vmem:[#allocation253_spill] sm:$0xff] %v18405_v7  ;;  %v2973_v45 = vadd.f32 %v14349_v52, %v22611_v30  ;;  %v18412_v43 = vadd.f32 %v4010_v20, %v2962_v0  ;;  %v22618_v20 = vld [vmem:[#allocation265_spill] sm:$0xff] }
 0x203   : > { %v14514_v59 = vpop.f32.mrf.mxu0  ;;  %14773 = vmatmul.mubr.msk.bf16.vlgmr.msra.gmra.mxu0 %vm1647_vm3, %v5707_v42  ;;  %v2964_v35 = vpop.f32.mrf.mxu1  ;;  %v5718_v37 = vor.u32 %v5717_v63, %v5716_v49  ;;  %v5841_v6 = vrot.slane %v22614_v44, 5  ;;  %v22615_v42 = vshrl.u32 %v22613_v11, 16  ;;  %v22620_v49 = vld [vmem:[#allocation301_spill] sm:$0xff] }
 0x204   : > { %15095 = vmatpush3.bf16.msra.mxu0 %v17920_v55  ;;  %14776 = vmatprep.mubr.msk.bf16.mxu0 %vm1647_vm3, %v5711_v40  ;;  %22612 = vst [vmem:[#allocation255_spill] sm:$0xff] %v18412_v43  ;;  %v2965_v33 = vadd.f32 %v2964_v35, %v22616_v8  ;;  %v18420_v55 = vadd.f32 %v14511_v27, %v2973_v45  ;;  %v15788_v63 = vld [vmem:[%s16147_s15 + $0x1c] sm:$0xff]   ;;  %v22622_v8 = vld [vmem:[#allocation30_spill] sm:$0xff] }
 0x205   : > { %v4026_v23 = vpop.f32.mrf.mxu0  ;;  %v5840_v30 = vrot.slane %v22615_v42, 4  ;;  %v14352_v40 = vpop.f32.mrf.mxu1  ;;  %14611 = vmatmul.mubr.msk.bf16.vlgmr.msra.gmra.mxu1 %vm1647_vm3, %v4525_v62  ;;  %v5715_v21 = vsel %vm5696_vm6, %v5710_v28, %v22620_v49  ;;  %v4528_v11 = vrot.slane %v15788_v63, 4  ;;  %v5719_v45 = vsel %vm5696_vm6, %v22620_v49, %v5718_v37  ;;  %v15789_v62 = vld [vmem:[%s16147_s15 + $0x24] sm:$0xff]  }
 0x206   : > { %22617 = vst [vmem:[#allocation25_spill] sm:$0xff] %v18420_v55  ;;  %v2985_v52 = vadd.f32 %v14352_v40, %v22618_v20  ;;  %v22619_v23 = vld [vmem:[#allocation298_spill] sm:$0xff]  ;;  %14614 = vmatprep.mubr.msk.bf16.mxu1 %vm1647_vm3, %v4527_v29  ;;  %v18429_v44 = vadd.f32 %v4013_v16, %v2965_v33  ;;  %v4530_v42 = vrot.slane %v15789_v62, 4  ;;  %v22623_v40 = vshrl.u32 %v22622_v8, 16  ;;  %v22626_v33 = vld [vmem:[#allocation268_spill] sm:$0xff] }
 0x207   : > { %v14515_v0 = vpop.f32.mrf.mxu0  ;;  %14933 = vmatpush3.bf16.msra.mxu1 %v22619_v23  ;;  %v2977_v35 = vpop.f32.mrf.mxu1  ;;  %v22624_v23 = vshll.u32 %v22622_v8, 16  ;;  %v18438_v28 = vor.u32 %v5841_v6, %v5840_v30  ;;  %v4529_v49 = vsel %vm993_vm4, %v4526_v18, %v4528_v11  ;;  %v22627_v6 = vld [vmem:[#allocation11_spill] sm:$0xff] }
 0x208   : > { %22621 = vst [vmem:[#allocation23_spill] sm:$0xff] %v18429_v44  ;;  %v5724_v20 = vrot.slane %v22623_v40, 4  ;;  %v18440_v29 = vadd.f32 %v14514_v59, %v2985_v52  ;;  %v4531_v8 = vsel %vm993_vm4, %v4528_v11, %v4530_v42  ;;  %v22628_v30 = vshrl.u32 %v22627_v6, 16  ;;  %v22630_v44 = vld [vmem:[#allocation270_spill] sm:$0xff] }
 0x209   : > { %v4028_v27 = vpop.f32.mrf.mxu0  ;;  %v5725_v55 = vrot.slane %v22624_v23, 5  ;;  %v14353_v63 = vpop.f32.mrf.mxu1  ;;  %v22629_v52 = vshll.u32 %v22627_v6, 16  ;;  %v15790_v11 = vld [vmem:[%s16147_s15 + $0x2c] sm:$0xff]   ;;  %v22633_v6 = vld [vmem:[#allocation36_spill] sm:$0xff] }
 0x20a   : > { %22625 = vst [vmem:[#allocation257_spill] sm:$0xff] %v18440_v29  ;;  %v2988_v35 = vadd.f32 %v14353_v63, %v22626_v33  ;;  %v5848_v59 = vrot.slane %v22628_v30, 4  ;;  %v22634_v30 = vshrl.u32 %v22633_v6, 16 }
 0x20b   : > { %v14518_v16 = vpop.f32.mrf.mxu0  ;;  %14777 = vmatmul.mubr.msk.bf16.gmra.mxu0 %vm1647_vm3, %v5715_v21  ;;  %v2979_v62 = vpop.f32.mrf.mxu1  ;;  %v5726_v23 = vor.u32 %v5725_v55, %v5724_v20  ;;  %v5849_v29 = vrot.slane %v22629_v52, 5  ;;  %v4532_v55 = vrot.slane %v15790_v11, 4  ;;  %v22632_v20 = vld [vmem:[#allocation273_spill] sm:$0xff]  ;;  %v22637_v11 = vld [vmem:[#allocation275_spill] sm:$0xff] }
 0x20c   : > { %14780 = vmatprep.mubr.msk.bf16.mxu0 %vm1647_vm3, %v5719_v45  ;;  %v2980_v21 = vadd.f32 %v2979_v62, %v22630_v44  ;;  %v18452_v43 = vadd.f32 %v14515_v0, %v2988_v35  ;;  %v5723_v45 = vsel %vm5696_vm6, %v5718_v37, %v17955_v12  ;;  %v5732_v52 = vrot.slane %v22634_v30, 4  ;;  %v15791_v37 = vld [vmem:[%s16147_s15 + $0x34] sm:$0xff]  }
 0x20d   : > { %v4041_v40 = vpop.f32.mrf.mxu0  ;;  %v14356_v63 = vpop.f32.mrf.mxu1  ;;  %14615 = vmatmul.mubr.msk.bf16.gmra.mxu1 %vm1647_vm3, %v4529_v49  ;;  %v22635_v44 = vshll.u32 %v22633_v6, 16  ;;  %v4534_v7 = vrot.slane %v15791_v37, 4  ;;  %v22639_v6 = vld [vmem:[#allocation277_spill] sm:$0xff] }
 0x20e   : > { %22631 = vst [vmem:[#allocation259_spill] sm:$0xff] %v18452_v43  ;;  %v3000_v33 = vadd.f32 %v14356_v63, %v22632_v20  ;;  %14618 = vmatprep.mubr.msk.bf16.mxu1 %vm1647_vm3, %v4531_v8  ;;  %v18464_v35 = vadd.f32 %v4028_v27, %v2980_v21  ;;  %v5727_v43 = vsel %vm5696_vm6, %v17955_v12, %v5726_v23  ;;  %v22643_v37 = vld [vmem:[#allocation13_spill] sm:$0xff] }
 0x20f   : > { %v14519_v18 = vpop.f32.mrf.mxu0  ;;  %v5733_v0 = vrot.slane %v22635_v44, 5  ;;  %v2992_v62 = vpop.f32.mrf.mxu1  ;;  %v18470_v63 = vor.u32 %v5849_v29, %v5848_v59  ;;  %v4533_v21 = vsel %vm993_vm4, %v4530_v42, %v4532_v55 }
 0x210   : > { %22636 = vst [vmem:[#allocation137_spill] sm:$0xff] %v18464_v35  ;;  %v2993_v4 = vadd.f32 %v2992_v62, %v22637_v11  ;;  %v18472_v8 = vadd.f32 %v14518_v16, %v3000_v33  ;;  %v4535_v33 = vsel %vm993_vm4, %v4532_v55, %v4534_v7  ;;  %v15792_v55 = vld [vmem:[%s16147_s15 + $0x3c] sm:$0xff]  }
 0x211   : > { %v4044_v49 = vpop.f32.mrf.mxu0  ;;  %v14357_v20 = vpop.f32.mrf.mxu1  ;;  %v5734_v12 = vor.u32 %v5733_v0, %v5732_v52  ;;  %v5731_v0 = vsel %vm5696_vm6, %v5726_v23, %v17986_v60 }
 0x212   : > { %22638 = vst [vmem:[#allocation262_spill] sm:$0xff] %v18472_v8  ;;  %v3003_v27 = vadd.f32 %v14357_v20, %v22639_v6  ;;  %v18478_v44 = vadd.f32 %v4041_v40, %v2993_v4  ;;  %v22641_v49 = vld [vmem:[#allocation12_spill] sm:$0xff]  ;;  %v22645_v20 = vshrl.u32 %v22643_v37, 16  ;;  %v4536_v6 = vrot.slane %v15792_v55, 4 }
 0x213   : > { %v14522_v30 = vpop.f32.mrf.mxu0  ;;  %14781 = vmatmul.mubr.msk.bf16.gmra.mxu0 %vm1647_vm3, %v5723_v45  ;;  %v22642_v62 = vshll.u32 %v22641_v49, 16  ;;  %v2995_v59 = vpop.f32.mrf.mxu1  ;;  %v22644_v45 = vshll.u32 %v22643_v37, 16  ;;  %v22647_v40 = vshrl.u32 %v22641_v49, 16 }
 0x214   : > { %14784 = vmatprep.mubr.msk.bf16.mxu0 %vm1647_vm3, %v5727_v43  ;;  %22640 = vst [vmem:[#allocation265_spill] sm:$0xff] %v18478_v44  ;;  %v5856_v42 = vrot.slane %v22645_v20, 4  ;;  %v18487_v30 = vadd.f32 %v14519_v18, %v3003_v27  ;;  %v15793_v27 = vld [vmem:[%s16147_s15 + $0x44] sm:$0xff]  }
 0x215   : > { %v5853_v29 = vrot.slane %v22642_v62, 5  ;;  %v4056_v16 = vpop.f32.mrf.mxu0  ;;  %v5857_v11 = vrot.slane %v22644_v45, 5  ;;  %v14360_v43 = vpop.f32.mrf.mxu1  ;;  %14619 = vmatmul.mubr.msk.bf16.gmra.mxu1 %vm1647_vm3, %v4533_v21  ;;  %v5852_v52 = vrot.slane %v22647_v40, 4  ;;  %v5735_v62 = vsel %vm5696_vm6, %v17986_v60, %v5734_v12  ;;  %v22648_v45 = vld [vmem:[#allocation42_spill] sm:$0xff] }
 0x216   : > { %22646 = vst [vmem:[#allocation298_spill] sm:$0xff] %v18487_v30  ;;  %14622 = vmatprep.mubr.msk.bf16.mxu1 %vm1647_vm3, %v4535_v33  ;;  %v4538_v37 = vrot.slane %v15793_v27, 4  ;;  %v22649_v21 = vshrl.u32 %v22648_v45, 16  ;;  %v22650_v49 = vshll.u32 %v22648_v45, 16  ;;  %v22651_v30 = vld [vmem:[#allocation282_spill] sm:$0xff]  ;;  %v22652_v27 = vld [vmem:[#allocation283_spill] sm:$0xff] }
 0x217   : > { %v14523_v4 = vpop.f32.mrf.mxu0  ;;  %v3007_v59 = vpop.f32.mrf.mxu1  ;;  %v5854_v40 = vor.u32 %v5853_v29, %v5852_v52  ;;  %v18504_v44 = vor.u32 %v5857_v11, %v5856_v42 }
 0x218   : > { %v5740_v20 = vrot.slane %v22649_v21, 4  ;;  %v5741_v43 = vrot.slane %v22650_v49, 5  ;;  %v3008_v23 = vadd.f32 %v3007_v59, %v22651_v30  ;;  %v4537_v21 = vsel %vm993_vm4, %v4534_v7, %v4536_v6  ;;  %v22654_v59 = vld [vmem:[#allocation16_spill] sm:$0xff] }
 0x219   : > { %v4059_v18 = vpop.f32.mrf.mxu0  ;;  %v14361_v33 = vpop.f32.mrf.mxu1  ;;  %v18509_v60 = vsel %vm5696_vm6, %v18470_v63, %v5854_v40  ;;  %v18516_v29 = vsel %vm5696_vm6, %v5854_v40, %v18504_v44  ;;  %v4539_v52 = vsel %vm993_vm4, %v4536_v6, %v4538_v37  ;;  %v22655_v45 = vshll.u32 %v22654_v59, 16 }
 0x21a   : > { %v3018_v8 = vadd.f32 %v14361_v33, %v22652_v27  ;;  %v18518_v11 = vadd.f32 %v4056_v16, %v3008_v23  ;;  %v22656_v33 = vshrl.u32 %v22654_v59, 16  ;;  %v22659_v23 = vld [vmem:[#allocation289_spill] sm:$0xff]  ;;  %v5739_v6 = vsel %vm5696_vm6, %v5734_v12, %v18014_v26  ;;  %v22664_v12 = vld [vmem:[#allocation291_spill] sm:$0xff] }
 0x21b   : > { %v14526_v55 = vpop.f32.mrf.mxu0  ;;  %14785 = vmatmul.mubr.msk.bf16.gmra.mxu0 %vm1647_vm3, %v5731_v0  ;;  %v3010_v42 = vpop.f32.mrf.mxu1  ;;  %v5742_v0 = vor.u32 %v5741_v43, %v5740_v20  ;;  %v5865_v49 = vrot.slane %v22655_v45, 5  ;;  %v15794_v20 = vld [vmem:[%s16147_s15 + $0x4c] sm:$0xff]  }
 0x21c   : > { %14788 = vmatprep.mubr.msk.bf16.mxu0 %vm1647_vm3, %v5735_v62  ;;  %22653 = vst [vmem:[#allocation301_spill] sm:$0xff] %v18518_v11  ;;  %v5864_v7 = vrot.slane %v22656_v33, 4  ;;  %v22657_v62 = vld [vmem:[#allocation286_spill] sm:$0xff]  ;;  %v18526_v35 = vadd.f32 %v14523_v4, %v3018_v8  ;;  %v4540_v43 = vrot.slane %v15794_v20, 4  ;;  %v15795_v4 = vld [vmem:[%s16147_s15 + $0x54] sm:$0xff]  }
 0x21d   : > { %v4071_v30 = vpop.f32.mrf.mxu0  ;;  %v3011_v27 = vadd.f32 %v3010_v42, %v22657_v62  ;;  %v14364_v40 = vpop.f32.mrf.mxu1  ;;  %14623 = vmatmul.mubr.msk.bf16.gmra.mxu1 %vm1647_vm3, %v4537_v21  ;;  %v5743_v8 = vsel %vm5696_vm6, %v18014_v26, %v5742_v0  ;;  %v4542_v42 = vrot.slane %v15795_v4, 4  ;;  %v22661_v21 = vld [vmem:[#allocation48_spill] sm:$0xff] }
 0x21e   : > { %22658 = vst [vmem:[#allocation30_spill] sm:$0xff] %v18526_v35  ;;  %v3031_v11 = vadd.f32 %v14364_v40, %v22659_v23  ;;  %14626 = vmatprep.mubr.msk.bf16.mxu1 %vm1647_vm3, %v4539_v52  ;;  %v22662_v62 = vshrl.u32 %v22661_v21, 16  ;;  %v22663_v40 = vshll.u32 %v22661_v21, 16  ;;  %v18544_v52 = vor.u32 %v5865_v49, %v5864_v7  ;;  %v22667_v49 = vld [vmem:[#allocation22_spill] sm:$0xff] }
 0x21f   : > { %v14527_v16 = vpop.f32.mrf.mxu0  ;;  %v18534_v59 = vadd.f32 %v4059_v18, %v3011_v27  ;;  %v3022_v45 = vpop.f32.mrf.mxu1  ;;  %v4541_v26 = vsel %vm993_vm4, %v4538_v37, %v4540_v43  ;;  %v22668_v7 = vshll.u32 %v22667_v49, 16 }
 0x220   : > { %v5748_v16 = vrot.slane %v22662_v62, 4  ;;  %v5749_v23 = vrot.slane %v22663_v40, 5  ;;  %v3023_v35 = vadd.f32 %v3022_v45, %v22664_v12  ;;  %v18546_v20 = vadd.f32 %v14526_v55, %v3031_v11 }
 0x221   : > { %22660 = vst [vmem:[#allocation268_spill] sm:$0xff] %v18534_v59  ;;  %v4074_v33 = vpop.f32.mrf.mxu0  ;;  %v14365_v18 = vpop.f32.mrf.mxu1  ;;  %v4543_v40 = vsel %vm993_vm4, %v4540_v43, %v4542_v42  ;;  %v5873_v55 = vrot.slane %v22668_v7, 5  ;;  %v22669_v11 = vshrl.u32 %v22667_v49, 16  ;;  %v15796_v43 = vld [vmem:[%s16147_s15 + $0x5c] sm:$0xff]  }
 0x222   : > { %22665 = vst [vmem:[#allocation11_spill] sm:$0xff] %v18546_v20  ;;  %v18551_v4 = vadd.f32 %v4071_v30, %v3023_v35  ;;  %v5750_v45 = vor.u32 %v5749_v23, %v5748_v16  ;;  %v22671_v35 = vld [vmem:[#allocation162_spill] sm:$0xff]  ;;  %v4544_v16 = vrot.slane %v15796_v43, 4 }
 0x223   : > { %v14530_v27 = vpop.f32.mrf.mxu0  ;;  %14789 = vmatmul.mubr.msk.bf16.gmra.mxu0 %vm1647_vm3, %v5739_v6  ;;  %v3025_v62 = vpop.f32.mrf.mxu1  ;;  %v5872_v12 = vrot.slane %v22669_v11, 4  ;;  %v22670_v6 = vld [vmem:[#allocation295_spill] sm:$0xff]  ;;  %v15797_v11 = vld [vmem:[%s16147_s15 + $0x64] sm:$0xff]  }
 0x224   : > { %14792 = vmatprep.mubr.msk.bf16.mxu0 %vm1647_vm3, %v5743_v8  ;;  %22666 = vst [vmem:[#allocation270_spill] sm:$0xff] %v18551_v4  ;;  %v3026_v18 = vadd.f32 %v3025_v62, %v22670_v6  ;;  %v5747_v4 = vsel %vm5696_vm6, %v5742_v0, %v18047_v5  ;;  %v5751_v62 = vsel %vm5696_vm6, %v18047_v5, %v5750_v45  ;;  %v4546_v6 = vrot.slane %v15797_v11, 4  ;;  %v22676_v0 = vld [vmem:[#allocation164_spill] sm:$0xff] }
 0x225   : > { %v4086_v21 = vpop.f32.mrf.mxu0  ;;  %v14368_v37 = vpop.f32.mrf.mxu1  ;;  %14627 = vmatmul.mubr.msk.bf16.gmra.mxu1 %vm1647_vm3, %v4541_v26  ;;  %v22673_v26 = vld [vmem:[#allocation56_spill] sm:$0xff]  ;;  %v4545_v11 = vsel %vm993_vm4, %v4542_v42, %v4544_v16 }
 0x226   : > { %v3046_v30 = vadd.f32 %v14368_v37, %v22671_v35  ;;  %14630 = vmatprep.mubr.msk.bf16.mxu1 %vm1647_vm3, %v4543_v40  ;;  %v18565_v23 = vadd.f32 %v4074_v33, %v3026_v18  ;;  %v22674_v20 = vshrl.u32 %v22673_v26, 16  ;;  %v22675_v37 = vshll.u32 %v22673_v26, 16 }
 0x227   : > { %v14531_v8 = vpop.f32.mrf.mxu0  ;;  %v3037_v7 = vpop.f32.mrf.mxu1  ;;  %v18575_v40 = vor.u32 %v5873_v55, %v5872_v12  ;;  %v4547_v55 = vsel %vm993_vm4, %v4544_v16, %v4546_v6  ;;  %v15798_v16 = vld [vmem:[%s16147_s15 + $0x6c] sm:$0xff]  }
 0x228   : > { %22672 = vst [vmem:[#allocation273_spill] sm:$0xff] %v18565_v23  ;;  %v5756_v59 = vrot.slane %v22674_v20, 4  ;;  %v5757_v35 = vrot.slane %v22675_v37, 5  ;;  %v3038_v61 = vadd.f32 %v3037_v7, %v22676_v0  ;;  %v18577_v43 = vadd.f32 %v14530_v27, %v3046_v30  ;;  %v22678_v23 = vld [vmem:[#allocation166_spill] sm:$0xff]  ;;  %v22680_v27 = vld [vmem:[#allocation29_spill] sm:$0xff] }
 0x229   : > { %v4089_v49 = vpop.f32.mrf.mxu0  ;;  %v14369_v33 = vpop.f32.mrf.mxu1  ;;  %v22681_v30 = vshll.u32 %v22680_v27, 16  ;;  %v22682_v0 = vshrl.u32 %v22680_v27, 16 }
 0x22a   : > { %22677 = vst [vmem:[#allocation36_spill] sm:$0xff] %v18577_v43  ;;  %v3049_v5 = vadd.f32 %v14369_v33, %v22678_v23  ;;  %v18583_v20 = vadd.f32 %v4086_v21, %v3038_v61  ;;  %v5758_v12 = vor.u32 %v5757_v35, %v5756_v59  ;;  %v22683_v23 = vld [vmem:[#allocation167_spill] sm:$0xff]  ;;  %v22685_v21 = vld [vmem:[#allocation168_spill] sm:$0xff]  ;;  %v5755_v59 = vsel %vm5696_vm6, %v5750_v45, %v18076_v34 }
 0x22b   : > { %v14534_v18 = vpop.f32.mrf.mxu0  ;;  %14793 = vmatmul.mubr.msk.bf16.gmra.mxu0 %vm1647_vm3, %v5747_v4  ;;  %v3040_v26 = vpop.f32.mrf.mxu1  ;;  %v5881_v7 = vrot.slane %v22681_v30, 5  ;;  %v5880_v4 = vrot.slane %v22682_v0, 4  ;;  %v4548_v35 = vrot.slane %v15798_v16, 4 }
 0x22c   : > { %14796 = vmatprep.mubr.msk.bf16.mxu0 %vm1647_vm3, %v5751_v62  ;;  %22679 = vst [vmem:[#allocation275_spill] sm:$0xff] %v18583_v20  ;;  %v3041_v33 = vadd.f32 %v3040_v26, %v22683_v23  ;;  %v18591_v42 = vadd.f32 %v14531_v8, %v3049_v5  ;;  %v5759_v8 = vsel %vm5696_vm6, %v18076_v34, %v5758_v12  ;;  %v15799_v5 = vld [vmem:[%s16147_s15 + $0x74] sm:$0xff]  }
 0x22d   : > { %v4102_v37 = vpop.f32.mrf.mxu0  ;;  %v14372_v62 = vpop.f32.mrf.mxu1  ;;  %14631 = vmatmul.mubr.msk.bf16.gmra.mxu1 %vm1647_vm3, %v4545_v11  ;;  %v4550_v26 = vrot.slane %v15799_v5, 4  ;;  %v22687_v11 = vld [vmem:[#allocation63_spill] sm:$0xff]  ;;  %v18608_v45 = vor.u32 %v5881_v7, %v5880_v4  ;;  %v4549_v34 = vsel %vm993_vm4, %v4546_v6, %v4548_v35 }
 0x22e   : > { %22684 = vst [vmem:[#allocation277_spill] sm:$0xff] %v18591_v42  ;;  %v3061_v37 = vadd.f32 %v14372_v62, %v22685_v21  ;;  %14634 = vmatprep.mubr.msk.bf16.mxu1 %vm1647_vm3, %v4547_v55  ;;  %v18599_v27 = vadd.f32 %v4089_v49, %v3041_v33  ;;  %v22688_v23 = vshrl.u32 %v22687_v11, 16  ;;  %v22689_v62 = vshll.u32 %v22687_v11, 16  ;;  %v22691_v33 = vld [vmem:[#allocation171_spill] sm:$0xff] }
 0x22f   : > { %v14535_v61 = vpop.f32.mrf.mxu0  ;;  %v3053_v30 = vpop.f32.mrf.mxu1  ;;  %v4551_v11 = vsel %vm993_vm4, %v4548_v35, %v4550_v26  ;;  %v22692_v7 = vld [vmem:[#allocation35_spill] sm:$0xff]  ;;  %v15800_v35 = vld [vmem:[%s16147_s15 + $0x7c] sm:$0xff]  }
 0x230   : > { %22686 = vst [vmem:[#allocation12_spill] sm:$0xff] %v18599_v27  ;;  %v5764_v42 = vrot.slane %v22688_v23, 4  ;;  %v5765_v21 = vrot.slane %v22689_v62, 5  ;;  %v18610_v55 = vadd.f32 %v14534_v18, %v3061_v37  ;;  %v22693_v4 = vshll.u32 %v22692_v7, 16 }
 0x231   : > { %v4104_v0 = vpop.f32.mrf.mxu0  ;;  %v14373_v16 = vpop.f32.mrf.mxu1  ;;  %v22694_v37 = vshrl.u32 %v22692_v7, 16 }
 0x232   : > { %22690 = vst [vmem:[#allocation13_spill] sm:$0xff] %v18610_v55  ;;  %v3064_v30 = vadd.f32 %v14373_v16, %v22691_v33  ;;  %v5766_v62 = vor.u32 %v5765_v21, %v5764_v42  ;;  %v5889_v18 = vrot.slane %v22693_v4, 5  ;;  %v22697_v33 = vld [vmem:[#allocation173_spill] sm:$0xff]  ;;  %v5763_v42 = vsel %vm5696_vm6, %v5758_v12, %v18108_v41  ;;  %v22702_v12 = vld [vmem:[#allocation175_spill] sm:$0xff] }
 0x233   : > { %v14538_v49 = vpop.f32.mrf.mxu0  ;;  %14797 = vmatmul.mubr.msk.bf16.gmra.mxu0 %vm1647_vm3, %v5755_v59  ;;  %v3055_v5 = vpop.f32.mrf.mxu1  ;;  %v5888_v55 = vrot.slane %v22694_v37, 4  ;;  %v22695_v59 = vld [vmem:[#allocation172_spill] sm:$0xff]  ;;  %v4552_v21 = vrot.slane %v15800_v35, 4 }
 0x234   : > { %14800 = vmatprep.mubr.msk.bf16.mxu0 %vm1647_vm3, %v5759_v8  ;;  %v3056_v27 = vadd.f32 %v3055_v5, %v22695_v59  ;;  %v18622_v16 = vadd.f32 %v14535_v61, %v3064_v30  ;;  %v5767_v61 = vsel %vm5696_vm6, %v18108_v41, %v5766_v62  ;;  %v15801_v30 = vld [vmem:[%s16147_s15 + $0x84] sm:$0xff]  }
 0x235   : > { %v4117_v23 = vpop.f32.mrf.mxu0  ;;  %v14376_v6 = vpop.f32.mrf.mxu1  ;;  %14635 = vmatmul.mubr.msk.bf16.gmra.mxu1 %vm1647_vm3, %v4549_v34  ;;  %v4554_v5 = vrot.slane %v15801_v30, 4  ;;  %v22699_v34 = vld [vmem:[#allocation69_spill] sm:$0xff]  ;;  %v4553_v30 = vsel %vm993_vm4, %v4550_v26, %v4552_v21 }
 0x236   : > { %22696 = vst [vmem:[#allocation42_spill] sm:$0xff] %v18622_v16  ;;  %v3076_v20 = vadd.f32 %v14376_v6, %v22697_v33  ;;  %14638 = vmatprep.mubr.msk.bf16.mxu1 %vm1647_vm3, %v4551_v11  ;;  %v18630_v7 = vadd.f32 %v4104_v0, %v3056_v27  ;;  %v22700_v59 = vshrl.u32 %v22699_v34, 16  ;;  %v22701_v6 = vshll.u32 %v22699_v34, 16 }
 0x237   : > { %v14539_v8 = vpop.f32.mrf.mxu0  ;;  %v3068_v4 = vpop.f32.mrf.mxu1  ;;  %v18640_v11 = vor.u32 %v5889_v18, %v5888_v55  ;;  %v4555_v55 = vsel %vm993_vm4, %v4552_v21, %v4554_v5 }
 0x238   : > { %22698 = vst [vmem:[#allocation282_spill] sm:$0xff] %v18630_v7  ;;  %v5772_v16 = vrot.slane %v22700_v59, 4  ;;  %v5773_v33 = vrot.slane %v22701_v6, 5  ;;  %v3069_v43 = vadd.f32 %v3068_v4, %v22702_v12  ;;  %v18642_v35 = vadd.f32 %v14538_v49, %v3076_v20  ;;  %v22706_v49 = vld [vmem:[#allocation43_spill] sm:$0xff] }
 0x239   : > { %v4120_v37 = vpop.f32.mrf.mxu0  ;;  %v14377_v27 = vpop.f32.mrf.mxu1  ;;  %v22707_v18 = vshll.u32 %v22706_v49, 16 }
 0x23a   : > { %22703 = vst [vmem:[#allocation283_spill] sm:$0xff] %v18642_v35  ;;  %v22704_v37 = vld [vmem:[#allocation177_spill] sm:$0xff]  ;;  %v18648_v59 = vadd.f32 %v4117_v23, %v3069_v43  ;;  %v5774_v20 = vor.u32 %v5773_v33, %v5772_v16  ;;  %v5771_v43 = vsel %vm5696_vm6, %v5766_v62, %v18138_v14  ;;  %v15802_v23 = vld [vmem:[%s16147_s15 + $0x8c] sm:$0xff]  }
 0x23b   : > { %v14542_v0 = vpop.f32.mrf.mxu0  ;;  %14801 = vmatmul.mubr.msk.bf16.gmra.mxu0 %vm1647_vm3, %v5763_v42  ;;  %v3079_v41 = vadd.f32 %v14377_v27, %v22704_v37  ;;  %v3071_v34 = vpop.f32.mrf.mxu1  ;;  %v5897_v4 = vrot.slane %v22707_v18, 5  ;;  %v22708_v42 = vshrl.u32 %v22706_v49, 16  ;;  %v4556_v21 = vrot.slane %v15802_v23, 4  ;;  %v15803_v37 = vld [vmem:[%s16147_s15 + $0x94] sm:$0xff]   ;;  %v22714_v23 = vld [vmem:[#allocation181_spill] sm:$0xff] }
 0x23c   : > { %14804 = vmatprep.mubr.msk.bf16.mxu0 %vm1647_vm3, %v5767_v61  ;;  %22705 = vst [vmem:[#allocation16_spill] sm:$0xff] %v18648_v59  ;;  %v5775_v33 = vsel %vm5696_vm6, %v18138_v14, %v5774_v20  ;;  %v4558_v34 = vrot.slane %v15803_v37, 4 }
 0x23d   : > { %v4132_v6 = vpop.f32.mrf.mxu0  ;;  %v5896_v12 = vrot.slane %v22708_v42, 4  ;;  %v18655_v27 = vadd.f32 %v14539_v8, %v3079_v41  ;;  %v14380_v0 = vpop.f32.mrf.mxu1  ;;  %14639 = vmatmul.mubr.msk.bf16.gmra.mxu1 %vm1647_vm3, %v4553_v30  ;;  %v22710_v8 = vld [vmem:[#allocation77_spill] sm:$0xff]  ;;  %v22713_v42 = vld [vmem:[#allocation179_spill] sm:$0xff]  ;;  %v4557_v14 = vsel %vm993_vm4, %v4554_v5, %v4556_v21 }
 0x23e   : > { %14642 = vmatprep.mubr.msk.bf16.mxu1 %vm1647_vm3, %v4555_v55  ;;  %v22711_v41 = vshrl.u32 %v22710_v8, 16  ;;  %v22712_v30 = vshll.u32 %v22710_v8, 16 }
 0x23f   : > { %22709 = vst [vmem:[#allocation286_spill] sm:$0xff] %v18655_v27  ;;  %v14543_v26 = vpop.f32.mrf.mxu0  ;;  %v3083_v16 = vpop.f32.mrf.mxu1  ;;  %v18670_v62 = vor.u32 %v5897_v4, %v5896_v12  ;;  %v22716_v4 = vld [vmem:[#allocation50_spill] sm:$0xff] }
 0x240   : > { %v5780_v49 = vrot.slane %v22711_v41, 4  ;;  %v5781_v18 = vrot.slane %v22712_v30, 5  ;;  %v3084_v0 = vadd.f32 %v3083_v16, %v22713_v42  ;;  %v4559_v30 = vsel %vm993_vm4, %v4556_v21, %v4558_v34 }
 0x241   : > { %v4135_v61 = vpop.f32.mrf.mxu0  ;;  %v14381_v55 = vpop.f32.mrf.mxu1  ;;  %v22717_v12 = vshll.u32 %v22716_v4, 16  ;;  %v22718_v35 = vshrl.u32 %v22716_v4, 16  ;;  %v5779_v21 = vsel %vm5696_vm6, %v5774_v20, %v18166_v32  ;;  %v22726_v20 = vld [vmem:[#allocation185_spill] sm:$0xff] }
 0x242   : > { %v3094_v59 = vadd.f32 %v14381_v55, %v22714_v23  ;;  %v18676_v37 = vadd.f32 %v4132_v6, %v3084_v0  ;;  %v5782_v16 = vor.u32 %v5781_v18, %v5780_v49  ;;  %v22719_v55 = vld [vmem:[#allocation182_spill] sm:$0xff]  ;;  %v22721_v0 = vld [vmem:[#allocation183_spill] sm:$0xff]  ;;  %v15804_v49 = vld [vmem:[%s16147_s15 + $0x9c] sm:$0xff]  }
 0x243   : > { %v14546_v27 = vpop.f32.mrf.mxu0  ;;  %14805 = vmatmul.mubr.msk.bf16.gmra.mxu0 %vm1647_vm3, %v5771_v43  ;;  %v3086_v41 = vpop.f32.mrf.mxu1  ;;  %v5905_v42 = vrot.slane %v22717_v12, 5  ;;  %v5904_v43 = vrot.slane %v22718_v35, 4  ;;  %v4560_v18 = vrot.slane %v15804_v49, 4 }
 0x244   : > { %14808 = vmatprep.mubr.msk.bf16.mxu0 %vm1647_vm3, %v5775_v33  ;;  %22715 = vst [vmem:[#allocation289_spill] sm:$0xff] %v18676_v37  ;;  %v3087_v23 = vadd.f32 %v3086_v41, %v22719_v55  ;;  %v18684_v5 = vadd.f32 %v14543_v26, %v3094_v59  ;;  %v5783_v59 = vsel %vm5696_vm6, %v18166_v32, %v5782_v16  ;;  %v15805_v26 = vld [vmem:[%s16147_s15 + $0xa4] sm:$0xff]  }
 0x245   : > { %v4147_v8 = vpop.f32.mrf.mxu0  ;;  %v14384_v33 = vpop.f32.mrf.mxu1  ;;  %14643 = vmatmul.mubr.msk.bf16.gmra.mxu1 %vm1647_vm3, %v4557_v14  ;;  %v4562_v41 = vrot.slane %v15805_v26, 4  ;;  %v22723_v14 = vld [vmem:[#allocation84_spill] sm:$0xff]  ;;  %v4561_v32 = vsel %vm993_vm4, %v4558_v34, %v4560_v18 }
 0x246   : > { %22720 = vst [vmem:[#allocation48_spill] sm:$0xff] %v18684_v5  ;;  %v3107_v37 = vadd.f32 %v14384_v33, %v22721_v0  ;;  %14646 = vmatprep.mubr.msk.bf16.mxu1 %vm1647_vm3, %v4559_v30  ;;  %v18692_v4 = vadd.f32 %v4135_v61, %v3087_v23  ;;  %v22724_v55 = vshrl.u32 %v22723_v14, 16  ;;  %v22725_v33 = vshll.u32 %v22723_v14, 16 }
 0x247   : > { %v14547_v6 = vpop.f32.mrf.mxu0  ;;  %v3098_v35 = vpop.f32.mrf.mxu1  ;;  %v18702_v30 = vor.u32 %v5905_v42, %v5904_v43  ;;  %v22729_v42 = vld [vmem:[#allocation57_spill] sm:$0xff] }
 0x248   : > { %22722 = vst [vmem:[#allocation291_spill] sm:$0xff] %v18692_v4  ;;  %v5788_v6 = vrot.slane %v22724_v55, 4  ;;  %v5789_v0 = vrot.slane %v22725_v33, 5  ;;  %v3099_v5 = vadd.f32 %v3098_v35, %v22726_v20  ;;  %v18704_v49 = vadd.f32 %v14546_v27, %v3107_v37 }
 0x249   : > { %v4150_v12 = vpop.f32.mrf.mxu0  ;;  %v14385_v61 = vpop.f32.mrf.mxu1  ;;  %v4563_v33 = vsel %vm993_vm4, %v4560_v18, %v4562_v41  ;;  %v22730_v43 = vshll.u32 %v22729_v42, 16  ;;  %v22731_v37 = vshrl.u32 %v22729_v42, 16  ;;  %v15806_v18 = vld [vmem:[%s16147_s15 + $0xac] sm:$0xff]  }
 0x24a   : > { %22727 = vst [vmem:[#allocation22_spill] sm:$0xff] %v18704_v49  ;;  %v18709_v26 = vadd.f32 %v4147_v8, %v3099_v5  ;;  %v5790_v35 = vor.u32 %v5789_v0, %v5788_v6  ;;  %v22733_v8 = vld [vmem:[#allocation188_spill] sm:$0xff]  ;;  %v4564_v6 = vrot.slane %v15806_v18, 4 }
 0x24b   : > { %v14550_v23 = vpop.f32.mrf.mxu0  ;;  %14809 = vmatmul.mubr.msk.bf16.gmra.mxu0 %vm1647_vm3, %v5779_v21  ;;  %v3101_v55 = vpop.f32.mrf.mxu1  ;;  %v5913_v27 = vrot.slane %v22730_v43, 5  ;;  %v5912_v20 = vrot.slane %v22731_v37, 4  ;;  %v22732_v21 = vld [vmem:[#allocation187_spill] sm:$0xff] }
 0x24c   : > { %14812 = vmatprep.mubr.msk.bf16.mxu0 %vm1647_vm3, %v5783_v59  ;;  %22728 = vst [vmem:[#allocation295_spill] sm:$0xff] %v18709_v26  ;;  %v3102_v61 = vadd.f32 %v3101_v55, %v22732_v21  ;;  %v5787_v26 = vsel %vm5696_vm6, %v5782_v16, %v18199_v25  ;;  %v5791_v55 = vsel %vm5696_vm6, %v18199_v25, %v5790_v35  ;;  %v15807_v37 = vld [vmem:[%s16147_s15 + $0xb4] sm:$0xff]   ;;  %v22738_v16 = vld [vmem:[#allocation190_spill] sm:$0xff] }
 0x24d   : > { %v4162_v14 = vpop.f32.mrf.mxu0  ;;  %v14388_v34 = vpop.f32.mrf.mxu1  ;;  %14647 = vmatmul.mubr.msk.bf16.gmra.mxu1 %vm1647_vm3, %v4561_v32  ;;  %v4566_v21 = vrot.slane %v15807_v37, 4  ;;  %v22735_v32 = vld [vmem:[#allocation91_spill] sm:$0xff]  ;;  %v4565_v37 = vsel %vm993_vm4, %v4562_v41, %v4564_v6 }
 0x24e   : > { %v3122_v5 = vadd.f32 %v14388_v34, %v22733_v8  ;;  %14650 = vmatprep.mubr.msk.bf16.mxu1 %vm1647_vm3, %v4563_v33  ;;  %v18723_v0 = vadd.f32 %v4150_v12, %v3102_v61  ;;  %v22736_v49 = vshrl.u32 %v22735_v32, 16  ;;  %v22737_v34 = vshll.u32 %v22735_v32, 16 }
 0x24f   : > { %v14551_v59 = vpop.f32.mrf.mxu0  ;;  %v3113_v43 = vpop.f32.mrf.mxu1  ;;  %v18733_v33 = vor.u32 %v5913_v27, %v5912_v20  ;;  %v4567_v27 = vsel %vm993_vm4, %v4564_v6, %v4566_v21  ;;  %v15808_v6 = vld [vmem:[%s16147_s15 + $0xbc] sm:$0xff]  }
 0x250   : > { %22734 = vst [vmem:[#allocation162_spill] sm:$0xff] %v18723_v0  ;;  %v5796_v4 = vrot.slane %v22736_v49, 4  ;;  %v5797_v8 = vrot.slane %v22737_v34, 5  ;;  %v3114_v7 = vadd.f32 %v3113_v43, %v22738_v16  ;;  %v18735_v18 = vadd.f32 %v14550_v23, %v3122_v5  ;;  %v22740_v0 = vld [vmem:[#allocation192_spill] sm:$0xff] }
 0x251   : > { %v4165_v42 = vpop.f32.mrf.mxu0  ;;  %v14389_v12 = vpop.f32.mrf.mxu1  ;;  %v22742_v23 = vld [vmem:[#allocation64_spill] sm:$0xff] }
 0x252   : > { %22739 = vst [vmem:[#allocation56_spill] sm:$0xff] %v18735_v18  ;;  %v3125_v25 = vadd.f32 %v14389_v12, %v22740_v0  ;;  %v18741_v49 = vadd.f32 %v4162_v14, %v3114_v7  ;;  %v5798_v20 = vor.u32 %v5797_v8, %v5796_v4  ;;  %v22743_v5 = vshll.u32 %v22742_v23, 16  ;;  %v22745_v0 = vld [vmem:[#allocation193_spill] sm:$0xff]  ;;  %v22747_v14 = vld [vmem:[#allocation194_spill] sm:$0xff] }
 0x253   : > { %v14554_v61 = vpop.f32.mrf.mxu0  ;;  %14813 = vmatmul.mubr.msk.bf16.gmra.mxu0 %vm1647_vm3, %v5787_v26  ;;  %v3116_v32 = vpop.f32.mrf.mxu1  ;;  %v22744_v16 = vshrl.u32 %v22742_v23, 16  ;;  %v5795_v4 = vsel %vm5696_vm6, %v5790_v35, %v18228_v50  ;;  %v4568_v8 = vrot.slane %v15808_v6, 4 }
 0x254   : > { %14816 = vmatprep.mubr.msk.bf16.mxu0 %vm1647_vm3, %v5791_v55  ;;  %22741 = vst [vmem:[#allocation164_spill] sm:$0xff] %v18741_v49  ;;  %v5921_v43 = vrot.slane %v22743_v5, 5  ;;  %v3117_v12 = vadd.f32 %v3116_v32, %v22745_v0  ;;  %v18749_v41 = vadd.f32 %v14551_v59, %v3125_v25  ;;  %v5799_v59 = vsel %vm5696_vm6, %v18228_v50, %v5798_v20  ;;  %v15809_v25 = vld [vmem:[%s16147_s15 + $0xc4] sm:$0xff]  }
 0x255   : > { %v4178_v34 = vpop.f32.mrf.mxu0  ;;  %v5920_v26 = vrot.slane %v22744_v16, 4  ;;  %v14392_v55 = vpop.f32.mrf.mxu1  ;;  %14651 = vmatmul.mubr.msk.bf16.gmra.mxu1 %vm1647_vm3, %v4565_v37  ;;  %v4570_v32 = vrot.slane %v15809_v25, 4  ;;  %v22749_v37 = vld [vmem:[#allocation100_spill] sm:$0xff]  ;;  %v4569_v50 = vsel %vm993_vm4, %v4566_v21, %v4568_v8 }
 0x256   : > { %22746 = vst [vmem:[#allocation166_spill] sm:$0xff] %v18749_v41  ;;  %v3137_v34 = vadd.f32 %v14392_v55, %v22747_v14  ;;  %14654 = vmatprep.mubr.msk.bf16.mxu1 %vm1647_vm3, %v4567_v27  ;;  %v18757_v23 = vadd.f32 %v4165_v42, %v3117_v12  ;;  %v22750_v0 = vshrl.u32 %v22749_v37, 16  ;;  %v22751_v55 = vshll.u32 %v22749_v37, 16  ;;  %v22753_v12 = vld [vmem:[#allocation197_spill] sm:$0xff] }
 0x257   : > { %v14555_v7 = vpop.f32.mrf.mxu0  ;;  %v3129_v5 = vpop.f32.mrf.mxu1  ;;  %v18766_v35 = vor.u32 %v5921_v43, %v5920_v26  ;;  %v4571_v37 = vsel %vm993_vm4, %v4568_v8, %v4570_v32  ;;  %v22754_v43 = vld [vmem:[#allocation71_spill] sm:$0xff] }
 0x258   : > { %22748 = vst [vmem:[#allocation29_spill] sm:$0xff] %v18757_v23  ;;  %v5804_v41 = vrot.slane %v22750_v0, 4  ;;  %v5805_v14 = vrot.slane %v22751_v55, 5  ;;  %v18768_v27 = vadd.f32 %v14554_v61, %v3137_v34  ;;  %v22755_v26 = vshll.u32 %v22754_v43, 16  ;;  %v15810_v8 = vld [vmem:[%s16147_s15 + $0xcc] sm:$0xff]  }
 0x259   : > { %v4180_v16 = vpop.f32.mrf.mxu0  ;;  %v14393_v6 = vpop.f32.mrf.mxu1  ;;  %v22756_v34 = vshrl.u32 %v22754_v43, 16 }
 0x25a   : > { %22752 = vst [vmem:[#allocation167_spill] sm:$0xff] %v18768_v27  ;;  %v3140_v5 = vadd.f32 %v14393_v6, %v22753_v12  ;;  %v5806_v55 = vor.u32 %v5805_v14, %v5804_v41  ;;  %v5929_v61 = vrot.slane %v22755_v26, 5  ;;  %v22759_v12 = vld [vmem:[#allocation199_spill] sm:$0xff]  ;;  %v5803_v41 = vsel %vm5696_vm6, %v5798_v20, %v18260_v2  ;;  %v22764_v20 = vld [vmem:[#allocation201_spill] sm:$0xff] }
 0x25b   : > { %v14558_v42 = vpop.f32.mrf.mxu0  ;;  %14817 = vmatmul.mubr.msk.bf16.gmra.mxu0 %vm1647_vm3, %v5795_v4  ;;  %v3131_v25 = vpop.f32.mrf.mxu1  ;;  %v5928_v27 = vrot.slane %v22756_v34, 4  ;;  %v22757_v4 = vld [vmem:[#allocation198_spill] sm:$0xff]  ;;  %v4572_v14 = vrot.slane %v15810_v8, 4 }
 0x25c   : > { %14820 = vmatprep.mubr.msk.bf16.mxu0 %vm1647_vm3, %v5799_v59  ;;  %v3132_v23 = vadd.f32 %v3131_v25, %v22757_v4  ;;  %v18780_v6 = vadd.f32 %v14555_v7, %v3140_v5  ;;  %v5807_v7 = vsel %vm5696_vm6, %v18260_v2, %v5806_v55  ;;  %v15811_v5 = vld [vmem:[%s16147_s15 + $0xd4] sm:$0xff]  }
 0x25d   : > { %v4193_v0 = vpop.f32.mrf.mxu0  ;;  %v14396_v21 = vpop.f32.mrf.mxu1  ;;  %14655 = vmatmul.mubr.msk.bf16.gmra.mxu1 %vm1647_vm3, %v4569_v50  ;;  %v4574_v25 = vrot.slane %v15811_v5, 4  ;;  %v22761_v50 = vld [vmem:[#allocation108_spill] sm:$0xff]  ;;  %v4573_v5 = vsel %vm993_vm4, %v4570_v32, %v4572_v14 }
 0x25e   : > { %22758 = vst [vmem:[#allocation168_spill] sm:$0xff] %v18780_v6  ;;  %v3152_v49 = vadd.f32 %v14396_v21, %v22759_v12  ;;  %14658 = vmatprep.mubr.msk.bf16.mxu1 %vm1647_vm3, %v4571_v37  ;;  %v18788_v43 = vadd.f32 %v4180_v16, %v3132_v23  ;;  %v22762_v4 = vshrl.u32 %v22761_v50, 16  ;;  %v22763_v21 = vshll.u32 %v22761_v50, 16 }
 0x25f   : > { %v14559_v59 = vpop.f32.mrf.mxu0  ;;  %v3144_v26 = vpop.f32.mrf.mxu1  ;;  %v18798_v37 = vor.u32 %v5929_v61, %v5928_v27  ;;  %v4575_v27 = vsel %vm993_vm4, %v4572_v14, %v4574_v25 }
 0x260   : > { %22760 = vst [vmem:[#allocation63_spill] sm:$0xff] %v18788_v43  ;;  %v5812_v6 = vrot.slane %v22762_v4, 4  ;;  %v5813_v12 = vrot.slane %v22763_v21, 5  ;;  %v3145_v18 = vadd.f32 %v3144_v26, %v22764_v20  ;;  %v18800_v8 = vadd.f32 %v14558_v42, %v3152_v49  ;;  %v22768_v42 = vld [vmem:[#allocation78_spill] sm:$0xff] }
 0x261   : > { %v4196_v34 = vpop.f32.mrf.mxu0  ;;  %v14397_v23 = vpop.f32.mrf.mxu1  ;;  %v22769_v61 = vshll.u32 %v22768_v42, 16 }
 0x262   : > { %22765 = vst [vmem:[#allocation171_spill] sm:$0xff] %v18800_v8  ;;  %v22766_v34 = vld [vmem:[#allocation203_spill] sm:$0xff]  ;;  %v18806_v4 = vadd.f32 %v4193_v0, %v3145_v18  ;;  %v5814_v49 = vor.u32 %v5813_v12, %v5812_v6  ;;  %v5811_v18 = vsel %vm5696_vm6, %v5806_v55, %v18293_v47  ;;  %v15812_v0 = vld [vmem:[%s16147_s15 + $0xdc] sm:$0xff]  }
 0x263   : > { %v14562_v16 = vpop.f32.mrf.mxu0  ;;  %14821 = vmatmul.mubr.msk.bf16.gmra.mxu0 %vm1647_vm3, %v5803_v41  ;;  %v3155_v2 = vadd.f32 %v14397_v23, %v22766_v34  ;;  %v3147_v50 = vpop.f32.mrf.mxu1  ;;  %v5937_v26 = vrot.slane %v22769_v61, 5  ;;  %v22770_v41 = vshrl.u32 %v22768_v42, 16  ;;  %v4576_v14 = vrot.slane %v15812_v0, 4  ;;  %v15813_v34 = vld [vmem:[%s16147_s15 + $0xe4] sm:$0xff]   ;;  %v22776_v0 = vld [vmem:[#allocation207_spill] sm:$0xff] }
 0x264   : > { %14824 = vmatprep.mubr.msk.bf16.mxu0 %vm1647_vm3, %v5807_v7  ;;  %22767 = vst [vmem:[#allocation35_spill] sm:$0xff] %v18806_v4  ;;  %v5815_v12 = vsel %vm5696_vm6, %v18293_v47, %v5814_v49  ;;  %v4578_v50 = vrot.slane %v15813_v34, 4 }
 0x265   : > { %v4208_v21 = vpop.f32.mrf.mxu0  ;;  %v5936_v20 = vrot.slane %v22770_v41, 4  ;;  %v18813_v23 = vadd.f32 %v14559_v59, %v3155_v2  ;;  %v14400_v16 = vpop.f32.mrf.mxu1  ;;  %14659 = vmatmul.mubr.msk.bf16.gmra.mxu1 %vm1647_vm3, %v4573_v5  ;;  %v22772_v59 = vld [vmem:[#allocation115_spill] sm:$0xff]  ;;  %v22775_v41 = vld [vmem:[#allocation205_spill] sm:$0xff]  ;;  %v4577_v47 = vsel %vm993_vm4, %v4574_v25, %v4576_v14 }
 0x266   : > { %14662 = vmatprep.mubr.msk.bf16.mxu1 %vm1647_vm3, %v4575_v27  ;;  %v22773_v2 = vshrl.u32 %v22772_v59, 16  ;;  %v22774_v5 = vshll.u32 %v22772_v59, 16 }
 0x267   : > { %22771 = vst [vmem:[#allocation172_spill] sm:$0xff] %v18813_v23  ;;  %v14563_v32 = vpop.f32.mrf.mxu0  ;;  %v3159_v6 = vpop.f32.mrf.mxu1  ;;  %v18828_v55 = vor.u32 %v5937_v26, %v5936_v20  ;;  %v22778_v26 = vld [vmem:[#allocation85_spill] sm:$0xff] }
 0x268   : > { %v5820_v42 = vrot.slane %v22773_v2, 4  ;;  %v5821_v61 = vrot.slane %v22774_v5, 5  ;;  %v3160_v16 = vadd.f32 %v3159_v6, %v22775_v41  ;;  %v4579_v5 = vsel %vm993_vm4, %v4576_v14, %v4578_v50 }
 0x269   : > { %v4211_v7 = vpop.f32.mrf.mxu0  ;;  %v14401_v27 = vpop.f32.mrf.mxu1  ;;  %v22779_v20 = vshll.u32 %v22778_v26, 16  ;;  %v22780_v8 = vshrl.u32 %v22778_v26, 16  ;;  %v5819_v14 = vsel %vm5696_vm6, %v5814_v49, %v18332_v39  ;;  %v22788_v49 = vld [vmem:[#allocation213_spill] sm:$0xff] }
 0x26a   : > { %v3170_v4 = vadd.f32 %v14401_v27, %v22776_v0  ;;  %v18834_v34 = vadd.f32 %v4208_v21, %v3160_v16  ;;  %v5822_v6 = vor.u32 %v5821_v61, %v5820_v42  ;;  %v22781_v27 = vld [vmem:[#allocation209_spill] sm:$0xff]  ;;  %v22783_v16 = vld [vmem:[#allocation211_spill] sm:$0xff] }
 0x26b   : > { %v14566_v23 = vpop.f32.mrf.mxu0  ;;  %14825 = vmatmul.mubr.msk.bf16.gmra.mxu0 %vm1647_vm3, %v5811_v18  ;;  %v3162_v2 = vpop.f32.mrf.mxu1  ;;  %v5945_v41 = vrot.slane %v22779_v20, 5  ;;  %v5944_v18 = vrot.slane %v22780_v8, 4  ;;  %v15814_v42 = vld [vmem:[%s16147_s15 + $0xec] sm:$0xff]  }
 0x26c   : > { %14828 = vmatprep.mubr.msk.bf16.mxu0 %vm1647_vm3, %v5815_v12  ;;  %22777 = vst [vmem:[#allocation173_spill] sm:$0xff] %v18834_v34  ;;  %v3163_v0 = vadd.f32 %v3162_v2, %v22781_v27  ;;  %v18842_v25 = vadd.f32 %v14563_v32, %v3170_v4  ;;  %v4580_v61 = vrot.slane %v15814_v42, 4  ;;  %v5823_v4 = vsel %vm5696_vm6, %v18332_v39, %v5822_v6  ;;  %v15815_v32 = vld [vmem:[%s16147_s15 + $0xf4] sm:$0xff]  }
 0x26d   : > { %v4223_v59 = vpop.f32.mrf.mxu0  ;;  %v14404_v12 = vpop.f32.mrf.mxu1  ;;  %14663 = vmatmul.mubr.msk.bf16.gmra.mxu1 %vm1647_vm3, %v4577_v47  ;;  %v4582_v2 = vrot.slane %v15815_v32, 4  ;;  %v22785_v47 = vld [vmem:[#allocation124_spill] sm:$0xff] }
 0x26e   : > { %22782 = vst [vmem:[#allocation69_spill] sm:$0xff] %v18842_v25  ;;  %v3183_v34 = vadd.f32 %v14404_v12, %v22783_v16  ;;  %14666 = vmatprep.mubr.msk.bf16.mxu1 %vm1647_vm3, %v4579_v5  ;;  %v18850_v26 = vadd.f32 %v4211_v7, %v3163_v0  ;;  %v22786_v27 = vshrl.u32 %v22785_v47, 16  ;;  %v22787_v12 = vshll.u32 %v22785_v47, 16 }
 0x26f   : > { %v14567_v21 = vpop.f32.mrf.mxu0  ;;  %v3174_v8 = vpop.f32.mrf.mxu1  ;;  %v18860_v5 = vor.u32 %v5945_v41, %v5944_v18  ;;  %v4581_v39 = vsel %vm993_vm4, %v4578_v50, %v4580_v61  ;;  %v22791_v41 = vld [vmem:[#allocation93_spill] sm:$0xff] }
 0x270   : > { %22784 = vst [vmem:[#allocation175_spill] sm:$0xff] %v18850_v26  ;;  %v5828_v21 = vrot.slane %v22786_v27, 4  ;;  %v5829_v16 = vrot.slane %v22787_v12, 5  ;;  %v3175_v25 = vadd.f32 %v3174_v8, %v22788_v49  ;;  %v18862_v42 = vadd.f32 %v14566_v23, %v3183_v34 }
 0x271   : > { %v4226_v20 = vpop.f32.mrf.mxu0  ;;  %v14405_v7 = vpop.f32.mrf.mxu1  ;;  %v4583_v12 = vsel %vm993_vm4, %v4580_v61, %v4582_v2  ;;  %v22792_v18 = vshll.u32 %v22791_v41, 16  ;;  %v22793_v34 = vshrl.u32 %v22791_v41, 16  ;;  %v15816_v61 = vld [vmem:[%s16147_s15 + $0xfc] sm:$0xff]  }
 0x272   : > { %22789 = vst [vmem:[#allocation177_spill] sm:$0xff] %v18862_v42  ;;  %v18867_v32 = vadd.f32 %v4223_v59, %v3175_v25  ;;  %v5830_v8 = vor.u32 %v5829_v16, %v5828_v21  ;;  %v22795_v59 = vld [vmem:[#allocation216_spill] sm:$0xff]  ;;  %v4584_v21 = vrot.slane %v15816_v61, 4 }
 0x273   : > { %v14570_v0 = vpop.f32.mrf.mxu0  ;;  %14829 = vmatmul.mubr.msk.bf16.gmra.mxu0 %vm1647_vm3, %v5819_v14  ;;  %v3177_v27 = vpop.f32.mrf.mxu1  ;;  %v5953_v23 = vrot.slane %v22792_v18, 5  ;;  %v5952_v49 = vrot.slane %v22793_v34, 4  ;;  %v22794_v14 = vld [vmem:[#allocation215_spill] sm:$0xff]  ;;  %v15817_v34 = vld [vmem:[%s16147_s15 + $0x104] sm:$0xff]  }
 0x274   : > { %14832 = vmatprep.mubr.msk.bf16.mxu0 %vm1647_vm3, %v5823_v4  ;;  %22790 = vst [vmem:[#allocation43_spill] sm:$0xff] %v18867_v32  ;;  %v3178_v7 = vadd.f32 %v3177_v27, %v22794_v14  ;;  %v5827_v32 = vsel %vm5696_vm6, %v5822_v6, %v18371_v24  ;;  %v5831_v27 = vsel %vm5696_vm6, %v18371_v24, %v5830_v8  ;;  %v4586_v14 = vrot.slane %v15817_v34, 4  ;;  %v22800_v6 = vld [vmem:[#allocation219_spill] sm:$0xff] }
 0x275   : > { %v4238_v47 = vpop.f32.mrf.mxu0  ;;  %v14408_v50 = vpop.f32.mrf.mxu1  ;;  %14667 = vmatmul.mubr.msk.bf16.gmra.mxu1 %vm1647_vm3, %v4581_v39  ;;  %v22797_v39 = vld [vmem:[#allocation132_spill] sm:$0xff]  ;;  %v4585_v34 = vsel %vm993_vm4, %v4582_v2, %v4584_v21 }
 0x276   : > { %v3198_v25 = vadd.f32 %v14408_v50, %v22795_v59  ;;  %14670 = vmatprep.mubr.msk.bf16.mxu1 %vm1647_vm3, %v4583_v12  ;;  %v18881_v16 = vadd.f32 %v4226_v20, %v3178_v7  ;;  %v22798_v42 = vshrl.u32 %v22797_v39, 16  ;;  %v22799_v50 = vshll.u32 %v22797_v39, 16 }
 0x277   : > { %v14571_v4 = vpop.f32.mrf.mxu0  ;;  %v3189_v18 = vpop.f32.mrf.mxu1  ;;  %v18891_v12 = vor.u32 %v5953_v23, %v5952_v49  ;;  %v4587_v23 = vsel %vm993_vm4, %v4584_v21, %v4586_v14  ;;  %v15818_v21 = vld [vmem:[%s16147_s15 + $0x10c] sm:$0xff]  }
 0x278   : > { %22796 = vst [vmem:[#allocation77_spill] sm:$0xff] %v18881_v16  ;;  %v5836_v26 = vrot.slane %v22798_v42, 4  ;;  %v5837_v59 = vrot.slane %v22799_v50, 5  ;;  %v3190_v43 = vadd.f32 %v3189_v18, %v22800_v6  ;;  %v18893_v61 = vadd.f32 %v14570_v0, %v3198_v25  ;;  %v22801_v16 = vld [vmem:[#allocation222_spill] sm:$0xff]  ;;  %v22803_v0 = vld [vmem:[#allocation101_spill] sm:$0xff] }
 0x279   : > { %v4241_v41 = vpop.f32.mrf.mxu0  ;;  %v14409_v20 = vpop.f32.mrf.mxu1  ;;  %v22804_v25 = vshll.u32 %v22803_v0, 16  ;;  %v22805_v6 = vshrl.u32 %v22803_v0, 16 }
 0x27a   : > { %v3201_v24 = vadd.f32 %v14409_v20, %v22801_v16  ;;  %v18899_v42 = vadd.f32 %v4238_v47, %v3190_v43  ;;  %v5838_v49 = vor.u32 %v5837_v59, %v5836_v26  ;;  %v22806_v16 = vld [vmem:[#allocation224_spill] sm:$0xff]  ;;  %v22808_v47 = vld [vmem:[#allocation225_spill] sm:$0xff]  ;;  %v5835_v26 = vsel %vm5696_vm6, %v5830_v8, %v18403_v36 }
 0x27b   : > { %v14574_v7 = vpop.f32.mrf.mxu0  ;;  %14833 = vmatmul.mubr.msk.bf16.gmra.mxu0 %vm1647_vm3, %v5827_v32  ;;  %v3192_v39 = vpop.f32.mrf.mxu1  ;;  %v5961_v18 = vrot.slane %v22804_v25, 5  ;;  %v5960_v32 = vrot.slane %v22805_v6, 4  ;;  %v4588_v59 = vrot.slane %v15818_v21, 4 }
 0x27c   : > { %14836 = vmatprep.mubr.msk.bf16.mxu0 %vm1647_vm3, %v5831_v27  ;;  %22802 = vst [vmem:[#allocation179_spill] sm:$0xff] %v18899_v42  ;;  %v3193_v20 = vadd.f32 %v3192_v39, %v22806_v16  ;;  %v18907_v2 = vadd.f32 %v14571_v4, %v3201_v24  ;;  %v5839_v4 = vsel %vm5696_vm6, %v18403_v36, %v5838_v49  ;;  %v15819_v24 = vld [vmem:[%s16147_s15 + $0x114] sm:$0xff]  }
 0x27d   : > { %v4254_v50 = vpop.f32.mrf.mxu0  ;;  %v14412_v27 = vpop.f32.mrf.mxu1  ;;  %14671 = vmatmul.mubr.msk.bf16.gmra.mxu1 %vm1647_vm3, %v4585_v34  ;;  %v4590_v39 = vrot.slane %v15819_v24, 4  ;;  %v22810_v34 = vld [vmem:[#allocation140_spill] sm:$0xff]  ;;  %v18924_v8 = vor.u32 %v5961_v18, %v5960_v32  ;;  %v4589_v36 = vsel %vm993_vm4, %v4586_v14, %v4588_v59  ;;  %v22815_v18 = vld [vmem:[#allocation109_spill] sm:$0xff] }
 0x27e   : > { %22807 = vst [vmem:[#allocation181_spill] sm:$0xff] %v18907_v2  ;;  %v3213_v50 = vadd.f32 %v14412_v27, %v22808_v47  ;;  %14674 = vmatprep.mubr.msk.bf16.mxu1 %vm1647_vm3, %v4587_v23  ;;  %v18915_v0 = vadd.f32 %v4241_v41, %v3193_v20  ;;  %v22811_v16 = vshrl.u32 %v22810_v34, 16  ;;  %v22812_v27 = vshll.u32 %v22810_v34, 16  ;;  %v22814_v20 = vld [vmem:[#allocation230_spill] sm:$0xff] }
 0x27f   : > { %v14575_v43 = vpop.f32.mrf.mxu0  ;;  %v3205_v25 = vpop.f32.mrf.mxu1  ;;  %v4591_v34 = vsel %vm993_vm4, %v4588_v59, %v4590_v39  ;;  %v22816_v32 = vshll.u32 %v22815_v18, 16  ;;  %v15820_v59 = vld [vmem:[%s16147_s15 + $0x11c] sm:$0xff]  }
 0x280   : > { %22809 = vst [vmem:[#allocation50_spill] sm:$0xff] %v18915_v0  ;;  %v5844_v2 = vrot.slane %v22811_v16, 4  ;;  %v5845_v47 = vrot.slane %v22812_v27, 5  ;;  %v18926_v23 = vadd.f32 %v14574_v7, %v3213_v50  ;;  %v22817_v50 = vshrl.u32 %v22815_v18, 16 }
 0x281   : > { %v4256_v6 = vpop.f32.mrf.mxu0  ;;  %v14413_v21 = vpop.f32.mrf.mxu1  ;;  %v5969_v7 = vrot.slane %v22816_v32, 5 }
 0x282   : > { %22813 = vst [vmem:[#allocation182_spill] sm:$0xff] %v18926_v23  ;;  %v3216_v25 = vadd.f32 %v14413_v21, %v22814_v20  ;;  %v5846_v27 = vor.u32 %v5845_v47, %v5844_v2  ;;  %v5968_v23 = vrot.slane %v22817_v50, 4  ;;  %v22820_v20 = vld [vmem:[#allocation234_spill] sm:$0xff]  ;;  %v5843_v2 = vsel %vm5696_vm6, %v5838_v49, %v18438_v28 }
 0x283   : > { %v14578_v41 = vpop.f32.mrf.mxu0  ;;  %14837 = vmatmul.mubr.msk.bf16.gmra.mxu0 %vm1647_vm3, %v5835_v26  ;;  %v3207_v24 = vpop.f32.mrf.mxu1  ;;  %v22818_v26 = vld [vmem:[#allocation232_spill] sm:$0xff]  ;;  %v4592_v47 = vrot.slane %v15820_v59, 4 }
 0x284   : > { %14840 = vmatprep.mubr.msk.bf16.mxu0 %vm1647_vm3, %v5839_v4  ;;  %v3208_v0 = vadd.f32 %v3207_v24, %v22818_v26  ;;  %v18938_v21 = vadd.f32 %v14575_v43, %v3216_v25  ;;  %v5847_v43 = vsel %vm5696_vm6, %v18438_v28, %v5846_v27  ;;  %v15821_v25 = vld [vmem:[%s16147_s15 + $0x124] sm:$0xff]  }
 0x285   : > { %v4269_v16 = vpop.f32.mrf.mxu0  ;;  %v14416_v14 = vpop.f32.mrf.mxu1  ;;  %14675 = vmatmul.mubr.msk.bf16.gmra.mxu1 %vm1647_vm3, %v4589_v36  ;;  %v4594_v24 = vrot.slane %v15821_v25, 4  ;;  %v22821_v36 = vld [vmem:[#allocation237_spill] sm:$0xff] }
 0x286   : > { %22819 = vst [vmem:[#allocation183_spill] sm:$0xff] %v18938_v21  ;;  %v3228_v42 = vadd.f32 %v14416_v14, %v22820_v20  ;;  %14678 = vmatprep.mubr.msk.bf16.mxu1 %vm1647_vm3, %v4591_v34  ;;  %v18946_v18 = vadd.f32 %v4256_v6, %v3208_v0  ;;  %v18952_v21 = vor.u32 %v5969_v7, %v5968_v23  ;;  %v22823_v34 = vld [vmem:[#allocation239_spill] sm:$0xff] }
 0x287   : > { %v14579_v4 = vpop.f32.mrf.mxu0  ;;  %v3220_v32 = vpop.f32.mrf.mxu1  ;;  %v4593_v6 = vsel %vm993_vm4, %v4590_v39, %v4592_v47  ;;  %v4595_v23 = vsel %vm993_vm4, %v4592_v47, %v4594_v24 }
 0x288   : > { %v3221_v26 = vadd.f32 %v3220_v32, %v22821_v36  ;;  %v18954_v14 = vadd.f32 %v14578_v41, %v3228_v42  ;;  %v22825_v42 = vld [vmem:[#allocation117_spill] sm:$0xff] }
 0x289   : > { %v4272_v50 = vpop.f32.mrf.mxu0  ;;  %v14417_v49 = vpop.f32.mrf.mxu1  ;;  %v22826_v41 = vshll.u32 %v22825_v42, 16 }
 0x28a   : > { %22822 = vst [vmem:[#allocation84_spill] sm:$0xff] %v18954_v14  ;;  %v3231_v0 = vadd.f32 %v14417_v49, %v22823_v34  ;;  %v18960_v28 = vadd.f32 %v4269_v16, %v3221_v26  ;;  %v22827_v50 = vshrl.u32 %v22825_v42, 16  ;;  %v5851_v16 = vsel %vm5696_vm6, %v5846_v27, %v18470_v63  ;;  %v22833_v27 = vld [vmem:[#allocation246_spill] sm:$0xff] }
 0x28b   : > { %v14582_v20 = vpop.f32.mrf.mxu0  ;;  %14841 = vmatmul.mubr.msk.bf16.gmra.mxu0 %vm1647_vm3, %v5843_v2  ;;  %v3223_v59 = vpop.f32.mrf.mxu1  ;;  %v5977_v7 = vrot.slane %v22826_v41, 5 }
 0x28c   : > { %14844 = vmatprep.mubr.msk.bf16.mxu0 %vm1647_vm3, %v5847_v43  ;;  %22824 = vst [vmem:[#allocation185_spill] sm:$0xff] %v18960_v28  ;;  %v5976_v2 = vrot.slane %v22827_v50, 4  ;;  %v18967_v25 = vadd.f32 %v14579_v4, %v3231_v0  ;;  %v15822_v43 = vld [vmem:[%s16147_s15 + $0x12c] sm:$0xff]   ;;  %v15823_v20 = vld [vmem:[%s16147_s15 + $0x134] sm:$0xff]  }
 0x28d   : > { %v4284_v32 = vpop.f32.mrf.mxu0  ;;  %v14420_v36 = vpop.f32.mrf.mxu1  ;;  %14679 = vmatmul.mubr.msk.bf16.gmra.mxu1 %vm1647_vm3, %v4593_v6  ;;  %v4596_v26 = vrot.slane %v15822_v43, 4  ;;  %v4598_v34 = vrot.slane %v15823_v20, 4  ;;  %v22829_v59 = vld [vmem:[#allocation15_spill] sm:$0xff] }
 0x28e   : > { %22828 = vst [vmem:[#allocation57_spill] sm:$0xff] %v18967_v25  ;;  %14682 = vmatprep.mubr.msk.bf16.mxu1 %vm1647_vm3, %v4595_v23  ;;  %v22830_v42 = vshrl.u32 %v22829_v59, 16  ;;  %v22831_v4 = vshll.u32 %v22829_v59, 16  ;;  %v22832_v50 = vld [vmem:[#allocation243_spill] sm:$0xff]  ;;  %v18980_v36 = vor.u32 %v5977_v7, %v5976_v2  ;;  %v22835_v2 = vld [vmem:[#allocation125_spill] sm:$0xff] }
 0x28f   : > { %v14583_v39 = vpop.f32.mrf.mxu0  ;;  %v3235_v47 = vpop.f32.mrf.mxu1  ;;  %v4597_v43 = vsel %vm993_vm4, %v4594_v24, %v4596_v26 }
 0x290   : > { %v5860_v41 = vrot.slane %v22830_v42, 4  ;;  %v5861_v0 = vrot.slane %v22831_v4, 5  ;;  %v3236_v6 = vadd.f32 %v3235_v47, %v22832_v50  ;;  %v4599_v47 = vsel %vm993_vm4, %v4596_v26, %v4598_v34  ;;  %v15824_v26 = vld [vmem:[%s16147_s15 + $0x13c] sm:$0xff]  }
 0x291   : > { %v4287_v49 = vpop.f32.mrf.mxu0  ;;  %v14421_v25 = vpop.f32.mrf.mxu1  ;;  %v22836_v4 = vshll.u32 %v22835_v2, 16 }
 0x292   : > { %v3246_v23 = vadd.f32 %v14421_v25, %v22833_v27  ;;  %v18987_v20 = vadd.f32 %v4284_v32, %v3236_v6  ;;  %v5862_v7 = vor.u32 %v5861_v0, %v5860_v41  ;;  %v22838_v27 = vld [vmem:[#allocation248_spill] sm:$0xff]  ;;  %v22840_v32 = vld [vmem:[#allocation250_spill] sm:$0xff]  ;;  %v4600_v41 = vrot.slane %v15824_v26, 4 }
 0x293   : > { %v14586_v63 = vpop.f32.mrf.mxu0  ;;  %14845 = vmatmul.mubr.msk.bf16.gmra.mxu0 %vm1647_vm3, %v5851_v16  ;;  %v3238_v59 = vpop.f32.mrf.mxu1  ;;  %v5985_v50 = vrot.slane %v22836_v4, 5  ;;  %v22837_v16 = vshrl.u32 %v22835_v2, 16 }
 0x294   : > { %14848 = vmatprep.mubr.msk.bf16.mxu0 %vm1647_vm3, %v18509_v60  ;;  %22834 = vst [vmem:[#allocation187_spill] sm:$0xff] %v18987_v20  ;;  %v3239_v24 = vadd.f32 %v3238_v59, %v22838_v27  ;;  %v18995_v28 = vadd.f32 %v14583_v39, %v3246_v23  ;;  %v5863_v2 = vsel %vm5696_vm6, %v18504_v44, %v5862_v7  ;;  %v15825_v59 = vld [vmem:[%s16147_s15 + $0x144] sm:$0xff]   ;;  %v22842_v23 = vld [vmem:[#allocation20_spill] sm:$0xff] }
 0x295   : > { %v4299_v42 = vpop.f32.mrf.mxu0  ;;  %v5984_v25 = vrot.slane %v22837_v16, 4  ;;  %v14424_v14 = vpop.f32.mrf.mxu1  ;;  %14683 = vmatmul.mubr.msk.bf16.gmra.mxu1 %vm1647_vm3, %v4597_v43  ;;  %v4602_v39 = vrot.slane %v15825_v59, 4  ;;  %v22843_v16 = vshrl.u32 %v22842_v23, 16  ;;  %v22844_v43 = vshll.u32 %v22842_v23, 16 }
 0x296   : > { %22839 = vst [vmem:[#allocation188_spill] sm:$0xff] %v18995_v28  ;;  %v3259_v6 = vadd.f32 %v14424_v14, %v22840_v32  ;;  %14686 = vmatprep.mubr.msk.bf16.mxu1 %vm1647_vm3, %v4599_v47  ;;  %v19001_v0 = vadd.f32 %v4287_v49, %v3239_v24  ;;  %v22845_v14 = vld [vmem:[#allocation252_spill] sm:$0xff]  ;;  %v4601_v44 = vsel %vm993_vm4, %v4598_v34, %v4600_v41 }
 0x297   : > { %v14587_v60 = vpop.f32.mrf.mxu0  ;;  %v3250_v4 = vpop.f32.mrf.mxu1  ;;  %v5868_v27 = vrot.slane %v22843_v16, 4  ;;  %v19011_v47 = vor.u32 %v5985_v50, %v5984_v25  ;;  %v22848_v25 = vld [vmem:[#allocation133_spill] sm:$0xff] }
 0x298   : > { %22841 = vst [vmem:[#allocation91_spill] sm:$0xff] %v19001_v0  ;;  %v5869_v60 = vrot.slane %v22844_v43, 5  ;;  %v3251_v32 = vadd.f32 %v3250_v4, %v22845_v14  ;;  %v19013_v26 = vadd.f32 %v14586_v63, %v3259_v6  ;;  %v4603_v4 = vsel %vm993_vm4, %v4600_v41, %v4602_v39  ;;  %v15826_v41 = vld [vmem:[%s16147_s15 + $0x14c] sm:$0xff]  }
 0x299   : > { %v4302_v20 = vpop.f32.mrf.mxu0  ;;  %v14425_v49 = vpop.f32.mrf.mxu1  ;;  %v22849_v63 = vshll.u32 %v22848_v25, 16  ;;  %v22850_v43 = vshrl.u32 %v22848_v25, 16 }
 0x29a   : > { %22846 = vst [vmem:[#allocation190_spill] sm:$0xff] %v19013_v26  ;;  %v19019_v59 = vadd.f32 %v4299_v42, %v3251_v32  ;;  %v5870_v50 = vor.u32 %v5869_v60, %v5868_v27  ;;  %v22852_v42 = vld [vmem:[#allocation258_spill] sm:$0xff]  ;;  %v4604_v27 = vrot.slane %v15826_v41, 4 }
 0x29b   : > { %v14590_v24 = vpop.f32.mrf.mxu0  ;;  %14849 = vmatmul.mubr.msk.bf16.gmra.mxu0 %vm1647_vm3, %v18516_v29  ;;  %v3253_v23 = vpop.f32.mrf.mxu1  ;;  %v5993_v6 = vrot.slane %v22849_v63, 5  ;;  %v5992_v14 = vrot.slane %v22850_v43, 4  ;;  %v22851_v29 = vld [vmem:[#allocation256_spill] sm:$0xff] }
 0x29c   : > { %14852 = vmatprep.mubr.msk.bf16.mxu0 %vm1647_vm3, %v5863_v2  ;;  %22847 = vst [vmem:[#allocation192_spill] sm:$0xff] %v19019_v59  ;;  %v3254_v49 = vadd.f32 %v3253_v23, %v22851_v29  ;;  %v5867_v59 = vsel %vm5696_vm6, %v5862_v7, %v18544_v52  ;;  %v5871_v23 = vsel %vm5696_vm6, %v18544_v52, %v5870_v50  ;;  %v15827_v43 = vld [vmem:[%s16147_s15 + $0x154] sm:$0xff]   ;;  %v22857_v7 = vld [vmem:[#allocation261_spill] sm:$0xff] }
 0x29d   : > { %v4314_v16 = vpop.f32.mrf.mxu0  ;;  %v14428_v34 = vpop.f32.mrf.mxu1  ;;  %14687 = vmatmul.mubr.msk.bf16.gmra.mxu1 %vm1647_vm3, %v4601_v44  ;;  %v4606_v29 = vrot.slane %v15827_v43, 4  ;;  %v22854_v44 = vld [vmem:[#allocation26_spill] sm:$0xff]  ;;  %v4605_v43 = vsel %vm993_vm4, %v4602_v39, %v4604_v27 }
 0x29e   : > { %v3274_v32 = vadd.f32 %v14428_v34, %v22852_v42  ;;  %14690 = vmatprep.mubr.msk.bf16.mxu1 %vm1647_vm3, %v4603_v4  ;;  %v19033_v60 = vadd.f32 %v4302_v20, %v3254_v49  ;;  %v22855_v26 = vshrl.u32 %v22854_v44, 16  ;;  %v22856_v34 = vshll.u32 %v22854_v44, 16 }
 0x29f   : > { %v14591_v2 = vpop.f32.mrf.mxu0  ;;  %v3265_v63 = vpop.f32.mrf.mxu1  ;;  %v19043_v4 = vor.u32 %v5993_v6, %v5992_v14  ;;  %v4607_v6 = vsel %vm993_vm4, %v4604_v27, %v4606_v29  ;;  %v15828_v27 = vld [vmem:[%s16147_s15 + $0x15c] sm:$0xff]  }
 0x2a0   : > { %22853 = vst [vmem:[#allocation64_spill] sm:$0xff] %v19033_v60  ;;  %v5876_v0 = vrot.slane %v22855_v26, 4  ;;  %v5877_v42 = vrot.slane %v22856_v34, 5  ;;  %v3266_v28 = vadd.f32 %v3265_v63, %v22857_v7  ;;  %v19045_v41 = vadd.f32 %v14590_v24, %v3274_v32  ;;  %v22858_v60 = vld [vmem:[#allocation264_spill] sm:$0xff]  ;;  %v22859_v24 = vld [vmem:[#allocation141_spill] sm:$0xff] }
 0x2a1   : > { %v4317_v25 = vpop.f32.mrf.mxu0  ;;  %v14429_v20 = vpop.f32.mrf.mxu1  ;;  %v22860_v32 = vshll.u32 %v22859_v24, 16  ;;  %v22861_v7 = vshrl.u32 %v22859_v24, 16 }
 0x2a2   : > { %v3277_v52 = vadd.f32 %v14429_v20, %v22858_v60  ;;  %v19051_v26 = vadd.f32 %v4314_v16, %v3266_v28  ;;  %v5878_v14 = vor.u32 %v5877_v42, %v5876_v0  ;;  %v22862_v60 = vld [vmem:[#allocation266_spill] sm:$0xff]  ;;  %v22864_v16 = vld [vmem:[#allocation267_spill] sm:$0xff]  ;;  %v5875_v0 = vsel %vm5696_vm6, %v5870_v50, %v18575_v40 }
 0x2a3   : > { %v14594_v49 = vpop.f32.mrf.mxu0  ;;  %14853 = vmatmul.mubr.msk.bf16.gmra.mxu0 %vm1647_vm3, %v5867_v59  ;;  %v3268_v44 = vpop.f32.mrf.mxu1  ;;  %v6001_v63 = vrot.slane %v22860_v32, 5  ;;  %v6000_v59 = vrot.slane %v22861_v7, 4  ;;  %v4608_v42 = vrot.slane %v15828_v27, 4 }
 0x2a4   : > { %14856 = vmatprep.mubr.msk.bf16.mxu0 %vm1647_vm3, %v5871_v23  ;;  %v3269_v20 = vadd.f32 %v3268_v44, %v22862_v60  ;;  %v19059_v39 = vadd.f32 %v14591_v2, %v3277_v52  ;;  %v5879_v2 = vsel %vm5696_vm6, %v18575_v40, %v5878_v14  ;;  %v15829_v52 = vld [vmem:[%s16147_s15 + $0x164] sm:$0xff]  }
 0x2a5   : > { %v4330_v34 = vpop.f32.mrf.mxu0  ;;  %v14432_v23 = vpop.f32.mrf.mxu1  ;;  %14691 = vmatmul.mubr.msk.bf16.gmra.mxu1 %vm1647_vm3, %v4605_v43  ;;  %v4610_v44 = vrot.slane %v15829_v52, 4  ;;  %v22866_v43 = vld [vmem:[#allocation33_spill] sm:$0xff]  ;;  %v19076_v50 = vor.u32 %v6001_v63, %v6000_v59  ;;  %v4609_v40 = vsel %vm993_vm4, %v4606_v29, %v4608_v42  ;;  %v22871_v59 = vld [vmem:[#allocation274_spill] sm:$0xff]  ;;  %v5883_v29 = vsel %vm5696_vm6, %v5878_v14, %v18608_v45  ;;  %v22877_v14 = vld [vmem:[#allocation279_spill] sm:$0xff] }
 0x2a6   : > { %22863 = vst [vmem:[#allocation193_spill] sm:$0xff] %v19059_v39  ;;  %v3289_v34 = vadd.f32 %v14432_v23, %v22864_v16  ;;  %14694 = vmatprep.mubr.msk.bf16.mxu1 %vm1647_vm3, %v4607_v6  ;;  %v19067_v24 = vadd.f32 %v4317_v25, %v3269_v20  ;;  %v22867_v60 = vshrl.u32 %v22866_v43, 16  ;;  %v22868_v23 = vshll.u32 %v22866_v43, 16  ;;  %v22870_v20 = vld [vmem:[#allocation272_spill] sm:$0xff] }
 0x2a7   : > { %v14595_v28 = vpop.f32.mrf.mxu0  ;;  %v3281_v32 = vpop.f32.mrf.mxu1  ;;  %v4611_v43 = vsel %vm993_vm4, %v4608_v42, %v4610_v44 }
 0x2a8   : > { %22865 = vst [vmem:[#allocation194_spill] sm:$0xff] %v19067_v24  ;;  %v5884_v39 = vrot.slane %v22867_v60, 4  ;;  %v5885_v16 = vrot.slane %v22868_v23, 5  ;;  %v19078_v6 = vadd.f32 %v14594_v49, %v3289_v34 }
 0x2a9   : > { %v4332_v7 = vpop.f32.mrf.mxu0  ;;  %v14433_v27 = vpop.f32.mrf.mxu1 }
 0x2aa   : > { %22869 = vst [vmem:[#allocation100_spill] sm:$0xff] %v19078_v6  ;;  %v3292_v32 = vadd.f32 %v14433_v27, %v22870_v20  ;;  %v5886_v63 = vor.u32 %v5885_v16, %v5884_v39  ;;  %v22873_v6 = vld [vmem:[#allocation276_spill] sm:$0xff] }
 0x2ab   : > { %v14598_v25 = vpop.f32.mrf.mxu0  ;;  %14857 = vmatmul.mubr.msk.bf16.gmra.mxu0 %vm1647_vm3, %v5875_v0  ;;  %v3283_v52 = vpop.f32.mrf.mxu1 }
 0x2ac   : > { %14860 = vmatprep.mubr.msk.bf16.mxu0 %vm1647_vm3, %v5879_v2  ;;  %v3284_v49 = vadd.f32 %v3283_v52, %v22871_v59  ;;  %v19086_v34 = vadd.f32 %v14595_v28, %v3292_v32  ;;  %v15830_v2 = vld [vmem:[%s16147_s15 + $0x16c] sm:$0xff]   ;;  %v5887_v28 = vsel %vm5696_vm6, %v18608_v45, %v5886_v63  ;;  %v15831_v32 = vld [vmem:[%s16147_s15 + $0x174] sm:$0xff]  }
 0x2ad   : > { %v4345_v60 = vpop.f32.mrf.mxu0  ;;  %v14436_v23 = vpop.f32.mrf.mxu1  ;;  %14695 = vmatmul.mubr.msk.bf16.gmra.mxu1 %vm1647_vm3, %v4609_v40  ;;  %v4612_v20 = vrot.slane %v15830_v2, 4  ;;  %v4614_v52 = vrot.slane %v15831_v32, 4  ;;  %v22874_v40 = vld [vmem:[#allocation39_spill] sm:$0xff] }
 0x2ae   : > { %22872 = vst [vmem:[#allocation197_spill] sm:$0xff] %v19086_v34  ;;  %v3304_v27 = vadd.f32 %v14436_v23, %v22873_v6  ;;  %14698 = vmatprep.mubr.msk.bf16.mxu1 %vm1647_vm3, %v4611_v43  ;;  %v19094_v42 = vadd.f32 %v4332_v7, %v3284_v49  ;;  %v22875_v59 = vshrl.u32 %v22874_v40, 16  ;;  %v22876_v6 = vshll.u32 %v22874_v40, 16  ;;  %v22879_v49 = vld [vmem:[#allocation281_spill] sm:$0xff] }
 0x2af   : > { %v14599_v0 = vpop.f32.mrf.mxu0  ;;  %v3296_v39 = vpop.f32.mrf.mxu1  ;;  %v4613_v45 = vsel %vm993_vm4, %v4610_v44, %v4612_v20  ;;  %v15832_v44 = vld [vmem:[%s16147_s15 + $0x17c] sm:$0xff]  }
 0x2b0   : > { %v5892_v34 = vrot.slane %v22875_v59, 4  ;;  %v5893_v23 = vrot.slane %v22876_v6, 5  ;;  %v3297_v24 = vadd.f32 %v3296_v39, %v22877_v14  ;;  %v19104_v43 = vadd.f32 %v14598_v25, %v3304_v27 }
 0x2b1   : > { %v4348_v16 = vpop.f32.mrf.mxu0  ;;  %v14437_v2 = vpop.f32.mrf.mxu1  ;;  %v4615_v39 = vsel %vm993_vm4, %v4612_v20, %v4614_v52  ;;  %v5891_v14 = vsel %vm5696_vm6, %v5886_v63, %v18640_v11  ;;  %v15833_v20 = vld [vmem:[%s16147_s15 + $0x184] sm:$0xff]  }
 0x2b2   : > { %22878 = vst [vmem:[#allocation71_spill] sm:$0xff] %v19104_v43  ;;  %v3307_v16 = vadd.f32 %v14437_v2, %v22879_v49  ;;  %v19110_v32 = vadd.f32 %v4345_v60, %v3297_v24  ;;  %v5894_v25 = vor.u32 %v5893_v23, %v5892_v34  ;;  %v4616_v24 = vrot.slane %v15832_v44, 4 }
 0x2b3   : > { %v14602_v7 = vpop.f32.mrf.mxu0  ;;  %14861 = vmatmul.mubr.msk.bf16.gmra.mxu0 %vm1647_vm3, %v5883_v29  ;;  %v3299_v40 = vpop.f32.mrf.mxu1  ;;  %v4618_v34 = vrot.slane %v15833_v20, 4 }
 0x2b4   : > { %14864 = vmatprep.mubr.msk.bf16.mxu0 %vm1647_vm3, %v5887_v28  ;;  %22880 = vst [vmem:[#allocation198_spill] sm:$0xff] %v19110_v32  ;;  %v19113_v27 = vadd.f32 %v14599_v0, %v3307_v16  ;;  %v5895_v2 = vsel %vm5696_vm6, %v18640_v11, %v5894_v25  ;;  %v22882_v0 = vld [vmem:[#allocation46_spill] sm:$0xff] }
 0x2b5   : > { %v4360_v59 = vpop.f32.mrf.mxu0  ;;  %v14440_v6 = vpop.f32.mrf.mxu1  ;;  %14699 = vmatmul.mubr.msk.bf16.gmra.mxu1 %vm1647_vm3, %v4613_v45  ;;  %v22883_v23 = vshrl.u32 %v22882_v0, 16  ;;  %v22884_v49 = vshll.u32 %v22882_v0, 16  ;;  %v22885_v45 = vld [vmem:[#allocation285_spill] sm:$0xff]  ;;  %v4619_v0 = vsel %vm993_vm4, %v4616_v24, %v4618_v34  ;;  %v22887_v32 = vld [vmem:[#allocation290_spill] sm:$0xff] }
 0x2b6   : > { %22881 = vst [vmem:[#allocation199_spill] sm:$0xff] %v19113_v27  ;;  %14702 = vmatprep.mubr.msk.bf16.mxu1 %vm1647_vm3, %v4615_v39  ;;  %v22886_v39 = vld [vmem:[#allocation288_spill] sm:$0xff]  ;;  %v4617_v27 = vsel %vm993_vm4, %v4614_v52, %v4616_v24  ;;  %v5899_v52 = vsel %vm5696_vm6, %v5894_v25, %v18670_v62 }
 0x2b7   : > { %v14603_v29 = vpop.f32.mrf.mxu0  ;;  %v3311_v60 = vpop.f32.mrf.mxu1  ;;  %v5900_v7 = vrot.slane %v22883_v23, 4  ;;  %v5901_v16 = vrot.slane %v22884_v49, 5  ;;  %v22890_v24 = vld [vmem:[#allocation52_spill] sm:$0xff] }
 0x2b8   : > { %v3312_v40 = vadd.f32 %v3311_v60, %v22885_v45  ;;  %v15835_v25 = vld [vmem:[%s16147_s15 + $0x194] sm:$0xff]  }
 0x2b9   : > { %v4363_v28 = vpop.f32.mrf.mxu0  ;;  %v14441_v63 = vpop.f32.mrf.mxu1  ;;  %v5902_v49 = vor.u32 %v5901_v16, %v5900_v7  ;;  %v22891_v7 = vshrl.u32 %v22890_v24, 16 }
 0x2ba   : > { %v3322_v44 = vadd.f32 %v14441_v63, %v22886_v39  ;;  %v19132_v11 = vadd.f32 %v4360_v59, %v3312_v40  ;;  %v22889_v40 = vld [vmem:[#allocation292_spill] sm:$0xff] }
 0x2bb   : > { %v14606_v6 = vpop.f32.mrf.mxu0  ;;  %14865 = vmatmul.mubr.msk.bf16.gmra.mxu0 %vm1647_vm3, %v5891_v14  ;;  %v3314_v20 = vpop.f32.mrf.mxu1  ;;  %v5908_v16 = vrot.slane %v22891_v7, 4 }
 0x2bc   : > { %14868 = vmatprep.mubr.msk.bf16.mxu0 %vm1647_vm3, %v5895_v2  ;;  %v3315_v60 = vadd.f32 %v3314_v20, %v22887_v32  ;;  %v19136_v45 = vadd.f32 %v14603_v29, %v3322_v44  ;;  %v15834_v2 = vld [vmem:[%s16147_s15 + $0x18c] sm:$0xff]   ;;  %v22892_v32 = vshll.u32 %v22890_v24, 16  ;;  %v5903_v20 = vsel %vm5696_vm6, %v18670_v62, %v5902_v49 }
 0x2bd   : > { %v4375_v23 = vpop.f32.mrf.mxu0  ;;  %v14444_v43 = vpop.f32.mrf.mxu1  ;;  %14703 = vmatmul.mubr.msk.bf16.gmra.mxu1 %vm1647_vm3, %v4617_v27  ;;  %v4620_v59 = vrot.slane %v15834_v2, 4  ;;  %v22894_v2 = vld [vmem:[#allocation294_spill] sm:$0xff] }
 0x2be   : > { %22888 = vst [vmem:[#allocation108_spill] sm:$0xff] %v19136_v45  ;;  %v3335_v63 = vadd.f32 %v14444_v43, %v22889_v40  ;;  %14706 = vmatprep.mubr.msk.bf16.mxu1 %vm1647_vm3, %v4619_v0  ;;  %v5909_v29 = vrot.slane %v22892_v32, 5  ;;  %v19148_v39 = vadd.f32 %v4363_v28, %v3315_v60 }
 0x2bf   : > { %v14607_v14 = vpop.f32.mrf.mxu0  ;;  %v3326_v44 = vpop.f32.mrf.mxu1  ;;  %v4621_v24 = vsel %vm993_vm4, %v4618_v34, %v4620_v59 }
 0x2c0   : > { %22893 = vst [vmem:[#allocation201_spill] sm:$0xff] %v19148_v39  ;;  %v4622_v14 = vrot.slane %v15835_v25, 4  ;;  %v3327_v45 = vadd.f32 %v3326_v44, %v22894_v2  ;;  %v19154_v43 = vadd.f32 %v14606_v6, %v3335_v63  ;;  %v5910_v28 = vor.u32 %v5909_v29, %v5908_v16  ;;  %v22897_v25 = vld [vmem:[#allocation297_spill] sm:$0xff]  ;;  %v13065_v6 = vld [vmem:[%s21720_s3 + $0xe] sm:$0x3] }
 0x2c1   : > { %v4378_v27 = vpop.f32.mrf.mxu0  ;;  %v14445_v0 = vpop.f32.mrf.mxu1  ;;  %v5907_v63 = vsel %vm5696_vm6, %v5902_v49, %v18702_v30  ;;  %v22899_v16 = vld [vmem:[#allocation302_spill] sm:$0xff] }
 0x2c2   : > { %22895 = vst [vmem:[#allocation203_spill] sm:$0xff] %v19154_v43  ;;  %v19159_v60 = vadd.f32 %v4375_v23, %v3327_v45  ;;  %v4623_v32 = vsel %vm993_vm4, %v4620_v59, %v4622_v14  ;;  %v22898_v23 = vld [vmem:[#allocation6_spill] sm:$0xff]  ;;  %v15836_v59 = vld [vmem:[%s16147_s15 + $0x19c] sm:$0xff]   ;;  %v5911_v2 = vsel %vm5696_vm6, %v18702_v30, %v5910_v28  ;;  %v13146_v0 = vld [vmem:[%s21720_s3 + $0x10] sm:$0x3] }
 0x2c3   : > { %v14774_v40 = vpop.f32.mrf.mxu0  ;;  %14869 = vmatmul.mubr.msk.bf16.gmra.mxu0 %vm1647_vm3, %v5899_v52  ;;  %v3329_v7 = vpop.f32.mrf.mxu1  ;;  %v19170_v45 = vand.u32 %v13065_v6, %v22898_v23  ;;  %v19189_v30 = vand.u32 %v13146_v0, %v22898_v23 }
 0x2c4   : > { %14872 = vmatprep.mubr.msk.bf16.mxu0 %vm1647_vm3, %v5903_v20  ;;  %22896 = vst [vmem:[#allocation78_spill] sm:$0xff] %v19159_v60  ;;  %v3330_v44 = vadd.f32 %v3329_v7, %v22897_v25  ;;  %v4624_v20 = vrot.slane %v15836_v59, 4  ;;  %v15837_v25 = vld [vmem:[%s16147_s15 + $0x1a4] sm:$0xff]   ;;  %v22900_v60 = vld [vmem:[#allocation60_spill] sm:$0xff] }
 0x2c5   : > { %v6308_v62 = vpop.f32.mrf.mxu0  ;;  %v14612_v52 = vpop.f32.mrf.mxu1  ;;  %14707 = vmatmul.mubr.msk.bf16.gmra.mxu1 %vm1647_vm3, %v4621_v24  ;;  %v4626_v6 = vrot.slane %v15837_v25, 4  ;;  %v22901_v43 = vshrl.u32 %v22900_v60, 16  ;;  %15256 = vmatprep.subr.bf16.mxu1 %v19170_v45 }
 0x2c6   : > { %v5568_v29 = vadd.f32 %v14612_v52, %v22899_v16  ;;  %14710 = vmatprep.mubr.msk.bf16.mxu1 %vm1647_vm3, %v4623_v32  ;;  %v19180_v24 = vadd.f32 %v4378_v27, %v3330_v44  ;;  %v22902_v32 = vshll.u32 %v22900_v60, 16  ;;  %15418 = vmatprep.subr.bf16.mxu0 %v19189_v30  ;;  %v4625_v60 = vsel %vm993_vm4, %v4622_v14, %v4624_v20 }
 0x2c7   : > { %v14775_v34 = vpop.f32.mrf.mxu0  ;;  %v4959_v7 = vpop.f32.mrf.mxu1  ;;  %v5916_v52 = vrot.slane %v22901_v43, 4 }
 0x2c8   : > { %v5917_v16 = vrot.slane %v22902_v32, 5  ;;  %v5566_v59 = vadd.f32 %v4959_v7, %v17934_v13  ;;  %v19192_v39 = vadd.f32 %v14774_v40, %v5568_v29  ;;  %v4627_v13 = vsel %vm993_vm4, %v4624_v20, %v4626_v6 }
 0x2c9   : > { %v6311_v49 = vpop.f32.mrf.mxu0  ;;  %v14613_v27 = vpop.f32.mrf.mxu1 }
 0x2ca   : > { %v5569_v43 = vadd.f32 %v14613_v27, %v17942_v54  ;;  %v19199_v25 = vadd.f32 %v6308_v62, %v5566_v59  ;;  %v5918_v40 = vor.u32 %v5917_v16, %v5916_v52  ;;  %v5915_v62 = vsel %vm5696_vm6, %v5910_v28, %v18733_v33  ;;  %v22903_v27 = vld [vmem:[#allocation67_spill] sm:$0xff] }
 0x2cb   : > { %v14778_v44 = vpop.f32.mrf.mxu0  ;;  %14873 = vmatmul.mubr.msk.bf16.gmra.mxu0 %vm1647_vm3, %v5907_v63  ;;  %v4962_v23 = vpop.f32.mrf.mxu1 }
 0x2cc   : > { %14876 = vmatprep.mubr.msk.bf16.mxu0 %vm1647_vm3, %v5911_v2  ;;  %v5567_v29 = vadd.f32 %v4962_v23, %v17950_v48  ;;  %v19203_v63 = vadd.f32 %v14775_v34, %v5569_v43  ;;  %v15838_v2 = vld [vmem:[%s16147_s15 + $0x1ac] sm:$0xff]   ;;  %v5919_v48 = vsel %vm5696_vm6, %v18733_v33, %v5918_v40  ;;  %v15839_v34 = vld [vmem:[%s16147_s15 + $0x1b4] sm:$0xff]   ;;  %v22904_v43 = vshrl.u32 %v22903_v27, 16 }
 0x2cd   : > { %v6324_v0 = vpop.f32.mrf.mxu0  ;;  %v14616_v7 = vpop.f32.mrf.mxu1  ;;  %14711 = vmatmul.mubr.msk.bf16.gmra.mxu1 %vm1647_vm3, %v4625_v60  ;;  %v4628_v32 = vrot.slane %v15838_v2, 4  ;;  %v4630_v59 = vrot.slane %v15839_v34, 4 }
 0x2ce   : > { %v5571_v14 = vadd.f32 %v14616_v7, %v17957_v17  ;;  %14714 = vmatprep.mubr.msk.bf16.mxu1 %vm1647_vm3, %v4627_v13  ;;  %v19211_v20 = vadd.f32 %v6311_v49, %v5567_v29  ;;  %v5924_v60 = vrot.slane %v22904_v43, 4  ;;  %v22905_v17 = vshll.u32 %v22903_v27, 16 }
 0x2cf   : > { %v14779_v54 = vpop.f32.mrf.mxu0  ;;  %v4975_v52 = vpop.f32.mrf.mxu1  ;;  %v4629_v29 = vsel %vm993_vm4, %v4626_v6, %v4628_v32  ;;  %v4631_v2 = vsel %vm993_vm4, %v4628_v32, %v4630_v59  ;;  %v5923_v6 = vsel %vm5696_vm6, %v5918_v40, %v18766_v35 }
 0x2d0   : > { %v5925_v23 = vrot.slane %v22905_v17, 5  ;;  %v19220_v28 = vadd.f32 %v14778_v44, %v5571_v14 }
 0x2d1   : > { %v6326_v16 = vpop.f32.mrf.mxu0  ;;  %v14617_v0 = vpop.f32.mrf.mxu1 }
 0x2d2   : > { %v5572_v49 = vadd.f32 %v14617_v0, %v17971_v10  ;;  %v5926_v52 = vor.u32 %v5925_v23, %v5924_v60  ;;  %v22906_v23 = vld [vmem:[#allocation73_spill] sm:$0xff] }
 0x2d3   : > { %v14782_v13 = vpop.f32.mrf.mxu0  ;;  %14877 = vmatmul.mubr.msk.bf16.gmra.mxu0 %vm1647_vm3, %v5915_v62  ;;  %v4977_v33 = vpop.f32.mrf.mxu1  ;;  %v22907_v0 = vshrl.u32 %v22906_v23, 16 }
 0x2d4   : > { %14880 = vmatprep.mubr.msk.bf16.mxu0 %vm1647_vm3, %v5919_v48  ;;  %v5570_v44 = vadd.f32 %v4977_v33, %v17980_v38  ;;  %v19228_v14 = vadd.f32 %v14779_v54, %v5572_v49  ;;  %v15840_v48 = vld [vmem:[%s16147_s15 + $0x1bc] sm:$0xff]   ;;  %v5927_v38 = vsel %vm5696_vm6, %v18766_v35, %v5926_v52  ;;  %v15841_v54 = vld [vmem:[%s16147_s15 + $0x1c4] sm:$0xff]  }
 0x2d5   : > { %v6339_v7 = vpop.f32.mrf.mxu0  ;;  %v14620_v34 = vpop.f32.mrf.mxu1  ;;  %14715 = vmatmul.mubr.msk.bf16.gmra.mxu1 %vm1647_vm3, %v4629_v29  ;;  %v4632_v27 = vrot.slane %v15840_v48, 4  ;;  %v4634_v17 = vrot.slane %v15841_v54, 4  ;;  %v5932_v49 = vrot.slane %v22907_v0, 4 }
 0x2d6   : > { %v5574_v10 = vadd.f32 %v14620_v34, %v17988_v22  ;;  %14718 = vmatprep.mubr.msk.bf16.mxu1 %vm1647_vm3, %v4631_v2  ;;  %v19236_v32 = vadd.f32 %v6326_v16, %v5570_v44  ;;  %v22908_v22 = vshll.u32 %v22906_v23, 16 }
 0x2d7   : > { %v14783_v62 = vpop.f32.mrf.mxu0  ;;  %v4990_v43 = vpop.f32.mrf.mxu1  ;;  %v4633_v35 = vsel %vm993_vm4, %v4630_v59, %v4632_v27  ;;  %v15842_v59 = vld [vmem:[%s16147_s15 + $0x1cc] sm:$0xff]  }
 0x2d8   : > { %v5933_v29 = vrot.slane %v22908_v22, 5  ;;  %v5573_v40 = vadd.f32 %v4990_v43, %v17996_v9  ;;  %v19246_v33 = vadd.f32 %v14782_v13, %v5574_v10  ;;  %v4635_v9 = vsel %vm993_vm4, %v4632_v27, %v4634_v17  ;;  %v15843_v27 = vld [vmem:[%s16147_s15 + $0x1d4] sm:$0xff]  }
 0x2d9   : > { %v6342_v60 = vpop.f32.mrf.mxu0  ;;  %v14621_v2 = vpop.f32.mrf.mxu1  ;;  %v4638_v0 = vrot.slane %v15843_v27, 4 }
 0x2da   : > { %v5575_v44 = vadd.f32 %v14621_v2, %v18003_v57  ;;  %v19252_v34 = vadd.f32 %v6339_v7, %v5573_v40  ;;  %v5934_v13 = vor.u32 %v5933_v29, %v5932_v49  ;;  %v5931_v57 = vsel %vm5696_vm6, %v5926_v52, %v18798_v37 }
 0x2db   : > { %v14786_v16 = vpop.f32.mrf.mxu0  ;;  %14881 = vmatmul.mubr.msk.bf16.gmra.mxu0 %vm1647_vm3, %v5923_v6  ;;  %v4993_v48 = vpop.f32.mrf.mxu1  ;;  %v4636_v7 = vrot.slane %v15842_v59, 4 }
 0x2dc   : > { %14884 = vmatprep.mubr.msk.bf16.mxu0 %vm1647_vm3, %v5927_v38  ;;  %v19255_v10 = vadd.f32 %v14783_v62, %v5575_v44  ;;  %v5935_v23 = vsel %vm5696_vm6, %v18798_v37, %v5934_v13  ;;  %v22909_v62 = vld [vmem:[#allocation81_spill] sm:$0xff] }
 0x2dd   : > { %v6354_v60 = vpop.f32.mrf.mxu0  ;;  %v14624_v43 = vpop.f32.mrf.mxu1  ;;  %14719 = vmatmul.mubr.msk.bf16.gmra.mxu1 %vm1647_vm3, %v4633_v35  ;;  %v22910_v49 = vshrl.u32 %v22909_v62, 16  ;;  %v22911_v29 = vshll.u32 %v22909_v62, 16  ;;  %v4637_v35 = vsel %vm993_vm4, %v4634_v17, %v4636_v7 }
 0x2de   : > { %14722 = vmatprep.mubr.msk.bf16.mxu1 %vm1647_vm3, %v4635_v9  ;;  %v4639_v43 = vsel %vm993_vm4, %v4636_v7, %v4638_v0 }
 0x2df   : > { %v14787_v6 = vpop.f32.mrf.mxu0  ;;  %v5005_v38 = vpop.f32.mrf.mxu1  ;;  %v5940_v22 = vrot.slane %v22910_v49, 4  ;;  %v5941_v40 = vrot.slane %v22911_v29, 5  ;;  %v22912_v29 = vld [vmem:[#allocation88_spill] sm:$0xff] }
 0x2e0   : > { %v5576_v2 = vadd.f32 %v5005_v38, %v18022_v15 }
 0x2e1   : > { %v6357_v54 = vpop.f32.mrf.mxu0  ;;  %v14625_v52 = vpop.f32.mrf.mxu1  ;;  %v5942_v59 = vor.u32 %v5941_v40, %v5940_v22  ;;  %v22913_v40 = vshrl.u32 %v22912_v29, 16 }
 0x2e2   : > { %v5578_v44 = vadd.f32 %v14625_v52, %v18033_v56  ;;  %v19274_v37 = vadd.f32 %v6354_v60, %v5576_v2  ;;  %v5939_v60 = vsel %vm5696_vm6, %v5934_v13, %v18828_v55 }
 0x2e3   : > { %v14790_v16 = vpop.f32.mrf.mxu0  ;;  %14885 = vmatmul.mubr.msk.bf16.gmra.mxu0 %vm1647_vm3, %v5931_v57  ;;  %v5008_v48 = vpop.f32.mrf.mxu1  ;;  %v5948_v2 = vrot.slane %v22913_v40, 4  ;;  %v22915_v40 = vld [vmem:[#allocation95_spill] sm:$0xff] }
 0x2e4   : > { %14888 = vmatprep.mubr.msk.bf16.mxu0 %vm1647_vm3, %v5935_v23  ;;  %v5577_v15 = vadd.f32 %v5008_v48, %v18041_v31  ;;  %v19278_v38 = vadd.f32 %v14787_v6, %v5578_v44  ;;  %v15844_v23 = vld [vmem:[%s16147_s15 + $0x1dc] sm:$0xff]   ;;  %v5943_v31 = vsel %vm5696_vm6, %v18828_v55, %v5942_v59  ;;  %v15845_v6 = vld [vmem:[%s16147_s15 + $0x1e4] sm:$0xff]  }
 0x2e5   : > { %v6369_v9 = vpop.f32.mrf.mxu0  ;;  %v14628_v57 = vpop.f32.mrf.mxu1  ;;  %14723 = vmatmul.mubr.msk.bf16.gmra.mxu1 %vm1647_vm3, %v4637_v35  ;;  %v4640_v27 = vrot.slane %v15844_v23, 4  ;;  %v4642_v22 = vrot.slane %v15845_v6, 4  ;;  %v15847_v6 = vld [vmem:[%s16147_s15 + $0x1f4] sm:$0xff]  }
 0x2e6   : > { %v5581_v17 = vadd.f32 %v14628_v57, %v18049_v51  ;;  %14726 = vmatprep.mubr.msk.bf16.mxu1 %vm1647_vm3, %v4639_v43  ;;  %v19286_v7 = vadd.f32 %v6357_v54, %v5577_v15  ;;  %v22914_v51 = vshll.u32 %v22912_v29, 16  ;;  %v4646_v29 = vrot.slane %v15847_v6, 4 }
 0x2e7   : > { %v14791_v56 = vpop.f32.mrf.mxu0  ;;  %v5020_v62 = vpop.f32.mrf.mxu1  ;;  %v4641_v48 = vsel %vm993_vm4, %v4638_v0, %v4640_v27  ;;  %v4643_v57 = vsel %vm993_vm4, %v4640_v27, %v4642_v22  ;;  %v5947_v0 = vsel %vm5696_vm6, %v5942_v59, %v18860_v5 }
 0x2e8   : > { %v5949_v52 = vrot.slane %v22914_v51, 5  ;;  %v5579_v13 = vadd.f32 %v5020_v62, %v18056_v53  ;;  %v19296_v44 = vadd.f32 %v14790_v16, %v5581_v17 }
 0x2e9   : > { %v6372_v49 = vpop.f32.mrf.mxu0  ;;  %v14629_v35 = vpop.f32.mrf.mxu1 }
 0x2ea   : > { %v19301_v55 = vadd.f32 %v6369_v9, %v5579_v13  ;;  %v5950_v56 = vor.u32 %v5949_v52, %v5948_v2  ;;  %v15846_v9 = vld [vmem:[%s16147_s15 + $0x1ec] sm:$0xff]   ;;  %v22916_v2 = vshrl.u32 %v22915_v40, 16 }
 0x2eb   : > { %v14794_v54 = vpop.f32.mrf.mxu0  ;;  %14889 = vmatmul.mubr.msk.bf16.gmra.mxu0 %vm1647_vm3, %v5939_v60  ;;  %v5023_v43 = vpop.f32.mrf.mxu1  ;;  %v4644_v23 = vrot.slane %v15846_v9, 4  ;;  %v22918_v9 = vld [vmem:[#allocation315_spill] sm:$0xff] }
 0x2ec   : > { %14892 = vmatprep.mubr.msk.bf16.mxu0 %vm1647_vm3, %v5943_v31  ;;  %v5580_v53 = vadd.f32 %v5023_v43, %v18070_v1  ;;  %v5951_v1 = vsel %vm5696_vm6, %v18860_v5, %v5950_v56  ;;  %v5956_v51 = vrot.slane %v22916_v2, 4 }
 0x2ed   : > { %v6384_v15 = vpop.f32.mrf.mxu0  ;;  %v14632_v16 = vpop.f32.mrf.mxu1  ;;  %14727 = vmatmul.mubr.msk.bf16.gmra.mxu1 %vm1647_vm3, %v4641_v48  ;;  %v4645_v5 = vsel %vm993_vm4, %v4642_v22, %v4644_v23 }
 0x2ee   : > { %v5584_v60 = vadd.f32 %v14632_v16, %v18078_v58  ;;  %14730 = vmatprep.mubr.msk.bf16.mxu1 %vm1647_vm3, %v4643_v57  ;;  %v19311_v62 = vadd.f32 %v6372_v49, %v5580_v53  ;;  %v22917_v58 = vshll.u32 %v22915_v40, 16  ;;  %v4647_v16 = vsel %vm993_vm4, %v4644_v23, %v4646_v29 }
 0x2ef   : > { %v14795_v17 = vpop.f32.mrf.mxu0  ;;  %v5035_v31 = vpop.f32.mrf.mxu1 }
 0x2f0   : > { %v5957_v52 = vrot.slane %v22917_v58, 5  ;;  %v5582_v59 = vadd.f32 %v5035_v31, %v18086_v46  ;;  %v19321_v13 = vadd.f32 %v14794_v54, %v5584_v60  ;;  %v15848_v31 = vld [vmem:[%s16147_s15 + $0x1fc] sm:$0xff]  }
 0x2f1   : > { %v6387_v27 = vpop.f32.mrf.mxu0  ;;  %v14633_v35 = vpop.f32.mrf.mxu1 }
 0x2f2   : > { %v5585_v48 = vadd.f32 %v14633_v35, %v18094_v19  ;;  %v19327_v43 = vadd.f32 %v6384_v15, %v5582_v59  ;;  %v5958_v46 = vor.u32 %v5957_v52, %v5956_v51  ;;  %v5955_v15 = vsel %vm5696_vm6, %v5950_v56, %v18891_v12  ;;  %v22919_v51 = vld [vmem:[#allocation104_spill] sm:$0xff] }
 0x2f3   : > { %v14798_v49 = vpop.f32.mrf.mxu0  ;;  %14893 = vmatmul.mubr.msk.bf16.gmra.mxu0 %vm1647_vm3, %v5947_v0  ;;  %v5038_v57 = vpop.f32.mrf.mxu1  ;;  %v22920_v58 = vshrl.u32 %v22919_v51, 16  ;;  %v22921_v59 = vshll.u32 %v22919_v51, 16 }
 0x2f4   : > { %14896 = vmatprep.mubr.msk.bf16.mxu0 %vm1647_vm3, %v5951_v1  ;;  %v5583_v54 = vadd.f32 %v5038_v57, %v18103_v3  ;;  %v19331_v60 = vadd.f32 %v14795_v17, %v5585_v48  ;;  %v4648_v1 = vrot.slane %v15848_v31, 4  ;;  %v5959_v3 = vsel %vm5696_vm6, %v18891_v12, %v5958_v46  ;;  %v15849_v17 = vld [vmem:[%s16147_s15 + $0x204] sm:$0xff]  }
 0x2f5   : > { %v6400_v53 = vpop.f32.mrf.mxu0  ;;  %v14636_v0 = vpop.f32.mrf.mxu1  ;;  %14731 = vmatmul.mubr.msk.bf16.gmra.mxu1 %vm1647_vm3, %v4645_v5  ;;  %v4650_v2 = vrot.slane %v15849_v17, 4  ;;  %v5964_v52 = vrot.slane %v22920_v58, 4  ;;  %v5965_v35 = vrot.slane %v22921_v59, 5  ;;  %v15851_v59 = vld [vmem:[%s16147_s15 + $0x214] sm:$0xff]  }
 0x2f6   : > { %v5587_v22 = vadd.f32 %v14636_v0, %v22918_v9  ;;  %14734 = vmatprep.mubr.msk.bf16.mxu1 %vm1647_vm3, %v4647_v16  ;;  %v19339_v23 = vadd.f32 %v6387_v27, %v5583_v54  ;;  %v22922_v27 = vld [vmem:[#allocation316_spill] sm:$0xff]  ;;  %v4649_v53 = vsel %vm993_vm4, %v4646_v29, %v4648_v1  ;;  %v22923_v9 = vld [vmem:[#allocation318_spill] sm:$0xff]  ;;  %v5963_v29 = vsel %vm5696_vm6, %v5958_v46, %v18924_v8  ;;  %v22928_v46 = vld [vmem:[#allocation321_spill] sm:$0xff] }
 0x2f7   : > { %v14799_v19 = vpop.f32.mrf.mxu0  ;;  %v5051_v6 = vpop.f32.mrf.mxu1  ;;  %v4651_v54 = vsel %vm993_vm4, %v4648_v1, %v4650_v2  ;;  %v5966_v0 = vor.u32 %v5965_v35, %v5964_v52  ;;  %v4654_v35 = vrot.slane %v15851_v59, 4 }
 0x2f8   : > { %v19348_v56 = vadd.f32 %v14798_v49, %v5587_v22  ;;  %v22924_v6 = vld [vmem:[#allocation320_spill] sm:$0xff] }
 0x2f9   : > { %v6402_v40 = vpop.f32.mrf.mxu0  ;;  %v14637_v48 = vpop.f32.mrf.mxu1 }
 0x2fa   : > { %v5588_v57 = vadd.f32 %v14637_v48, %v22922_v27  ;;  %v22925_v48 = vld [vmem:[#allocation112_spill] sm:$0xff] }
 0x2fb   : > { %v14802_v5 = vpop.f32.mrf.mxu0  ;;  %14897 = vmatmul.mubr.msk.bf16.gmra.mxu0 %vm1647_vm3, %v5955_v15  ;;  %v5053_v12 = vpop.f32.mrf.mxu1  ;;  %v22926_v27 = vshrl.u32 %v22925_v48, 16 }
 0x2fc   : > { %14900 = vmatprep.mubr.msk.bf16.mxu0 %vm1647_vm3, %v5959_v3  ;;  %v5586_v49 = vadd.f32 %v5053_v12, %v22923_v9  ;;  %v19356_v22 = vadd.f32 %v14799_v19, %v5588_v57  ;;  %v15850_v3 = vld [vmem:[%s16147_s15 + $0x20c] sm:$0xff]   ;;  %v5967_v19 = vsel %vm5696_vm6, %v18924_v8, %v5966_v0 }
 0x2fd   : > { %v6415_v16 = vpop.f32.mrf.mxu0  ;;  %v14640_v31 = vpop.f32.mrf.mxu1  ;;  %14735 = vmatmul.mubr.msk.bf16.gmra.mxu1 %vm1647_vm3, %v4649_v53  ;;  %v4652_v51 = vrot.slane %v15850_v3, 4  ;;  %v5972_v57 = vrot.slane %v22926_v27, 4  ;;  %v22927_v53 = vshll.u32 %v22925_v48, 16  ;;  %v5971_v27 = vsel %vm5696_vm6, %v5966_v0, %v18952_v21 }
 0x2fe   : > { %v5590_v17 = vadd.f32 %v14640_v31, %v22924_v6  ;;  %14738 = vmatprep.mubr.msk.bf16.mxu1 %vm1647_vm3, %v4651_v54  ;;  %v19364_v1 = vadd.f32 %v6402_v40, %v5586_v49  ;;  %v22929_v49 = vld [vmem:[#allocation322_spill] sm:$0xff] }
 0x2ff   : > { %v14803_v15 = vpop.f32.mrf.mxu0  ;;  %v5066_v58 = vpop.f32.mrf.mxu1  ;;  %v5973_v12 = vrot.slane %v22927_v53, 5  ;;  %v4653_v8 = vsel %vm993_vm4, %v4650_v2, %v4652_v51  ;;  %v15852_v2 = vld [vmem:[%s16147_s15 + $0x21c] sm:$0xff]  }
 0x300   : > { %v5589_v9 = vadd.f32 %v5066_v58, %v22928_v46  ;;  %v19374_v54 = vadd.f32 %v14802_v5, %v5590_v17  ;;  %v4655_v58 = vsel %vm993_vm4, %v4652_v51, %v4654_v35  ;;  %v15853_v51 = vld [vmem:[%s16147_s15 + $0x224] sm:$0xff]  }
 0x301   : > { %v6418_v52 = vpop.f32.mrf.mxu0  ;;  %v14641_v31 = vpop.f32.mrf.mxu1  ;;  %v5974_v5 = vor.u32 %v5973_v12, %v5972_v57  ;;  %v4658_v57 = vrot.slane %v15853_v51, 4 }
 0x302   : > { %v5591_v6 = vadd.f32 %v14641_v31, %v22929_v49  ;;  %v19380_v3 = vadd.f32 %v6415_v16, %v5589_v9  ;;  %v4656_v16 = vrot.slane %v15852_v2, 4  ;;  %v22935_v49 = vld [vmem:[#allocation325_spill] sm:$0xff] }
 0x303   : > { %v14806_v40 = vpop.f32.mrf.mxu0  ;;  %14901 = vmatmul.mubr.msk.bf16.gmra.mxu0 %vm1647_vm3, %v5963_v29  ;;  %v5069_v52 = vpop.f32.mrf.mxu1  ;;  %v5975_v46 = vsel %vm5696_vm6, %v18952_v21, %v5974_v5 }
 0x304   : > { %14904 = vmatprep.mubr.msk.bf16.mxu0 %vm1647_vm3, %v5967_v19  ;;  %22930 = vst [vmem:[#allocation115_spill] sm:$0xff] %v19380_v3  ;;  %v19383_v17 = vadd.f32 %v14803_v15, %v5591_v6  ;;  %v22932_v15 = vld [vmem:[#allocation120_spill] sm:$0xff]  ;;  %v22936_v52 = vld [vmem:[#allocation326_spill] sm:$0xff] }
 0x305   : > { %v6430_v59 = vpop.f32.mrf.mxu0  ;;  %v14644_v48 = vpop.f32.mrf.mxu1  ;;  %14739 = vmatmul.mubr.msk.bf16.gmra.mxu1 %vm1647_vm3, %v4653_v8  ;;  %v22933_v12 = vshrl.u32 %v22932_v15, 16  ;;  %v22934_v31 = vshll.u32 %v22932_v15, 16  ;;  %v4659_v15 = vsel %vm993_vm4, %v4656_v16, %v4658_v57 }
 0x306   : > { %22931 = vst [vmem:[#allocation205_spill] sm:$0xff] %v19383_v17  ;;  %14742 = vmatprep.mubr.msk.bf16.mxu1 %vm1647_vm3, %v4655_v58  ;;  %v4657_v48 = vsel %vm993_vm4, %v4654_v35, %v4656_v16 }
 0x307   : > { %v14807_v29 = vpop.f32.mrf.mxu0  ;;  %v5081_v19 = vpop.f32.mrf.mxu1  ;;  %v5980_v9 = vrot.slane %v22933_v12, 4  ;;  %v5981_v40 = vrot.slane %v22934_v31, 5 }
 0x308   : > { %v5592_v6 = vadd.f32 %v5081_v19, %v22935_v49  ;;  %v22938_v19 = vld [vmem:[#allocation327_spill] sm:$0xff] }
 0x309   : > { %v6433_v53 = vpop.f32.mrf.mxu0  ;;  %v14645_v0 = vpop.f32.mrf.mxu1  ;;  %v5982_v12 = vor.u32 %v5981_v40, %v5980_v9 }
 0x30a   : > { %v5594_v58 = vadd.f32 %v14645_v0, %v22936_v52  ;;  %v19402_v21 = vadd.f32 %v6430_v59, %v5592_v6  ;;  %v22940_v52 = vld [vmem:[#allocation210_spill] sm:$0xff]  ;;  %v5979_v59 = vsel %vm5696_vm6, %v5974_v5, %v18980_v36  ;;  %v22945_v5 = vld [vmem:[#allocation329_spill] sm:$0xff] }
 0x30b   : > { %v14810_v8 = vpop.f32.mrf.mxu0  ;;  %14905 = vmatmul.mubr.msk.bf16.gmra.mxu0 %vm1647_vm3, %v5971_v27  ;;  %v5084_v2 = vpop.f32.mrf.mxu1 }
 0x30c   : > { %14908 = vmatprep.mubr.msk.bf16.mxu0 %vm1647_vm3, %v5975_v46  ;;  %22937 = vst [vmem:[#allocation207_spill] sm:$0xff] %v19402_v21  ;;  %v5593_v31 = vadd.f32 %v5084_v2, %v22938_v19  ;;  %v19406_v49 = vadd.f32 %v14807_v29, %v5594_v58  ;;  %v15854_v46 = vld [vmem:[%s16147_s15 + $0x22c] sm:$0xff]   ;;  %v5983_v29 = vsel %vm5696_vm6, %v18980_v36, %v5982_v12  ;;  %v15855_v58 = vld [vmem:[%s16147_s15 + $0x234] sm:$0xff]   ;;  %v22974_v21 = vld [vmem:[#allocation233_spill] sm:$0xff] }
 0x30d   : > { %v6445_v51 = vpop.f32.mrf.mxu0  ;;  %v14648_v27 = vpop.f32.mrf.mxu1  ;;  %14743 = vmatmul.mubr.msk.bf16.gmra.mxu1 %vm1647_vm3, %v4657_v48  ;;  %v4660_v6 = vrot.slane %v15854_v46, 4  ;;  %v4662_v2 = vrot.slane %v15855_v58, 4  ;;  %v22942_v48 = vld [vmem:[#allocation128_spill] sm:$0xff] }
 0x30e   : > { %22939 = vst [vmem:[#allocation85_spill] sm:$0xff] %v19406_v49  ;;  %v5597_v35 = vadd.f32 %v14648_v27, %v22940_v52  ;;  %14746 = vmatprep.mubr.msk.bf16.mxu1 %vm1647_vm3, %v4659_v15  ;;  %v19414_v16 = vadd.f32 %v6433_v53, %v5593_v31  ;;  %v22943_v19 = vshrl.u32 %v22942_v48, 16  ;;  %v22944_v27 = vshll.u32 %v22942_v48, 16 }
 0x30f   : > { %v14811_v0 = vpop.f32.mrf.mxu0  ;;  %v5096_v9 = vpop.f32.mrf.mxu1  ;;  %v4661_v31 = vsel %vm993_vm4, %v4658_v57, %v4660_v6  ;;  %v4663_v48 = vsel %vm993_vm4, %v4660_v6, %v4662_v2  ;;  %v5987_v57 = vsel %vm5696_vm6, %v5982_v12, %v19011_v47  ;;  %v22954_v12 = vld [vmem:[#allocation217_spill] sm:$0xff] }
 0x310   : > { %22941 = vst [vmem:[#allocation209_spill] sm:$0xff] %v19414_v16  ;;  %v5988_v0 = vrot.slane %v22943_v19, 4  ;;  %v5989_v52 = vrot.slane %v22944_v27, 5  ;;  %v5595_v49 = vadd.f32 %v5096_v9, %v22945_v5  ;;  %v19424_v15 = vadd.f32 %v14810_v8, %v5597_v35  ;;  %v22948_v9 = vld [vmem:[#allocation330_spill] sm:$0xff] }
 0x311   : > { %v6448_v40 = vpop.f32.mrf.mxu0  ;;  %v14649_v46 = vpop.f32.mrf.mxu1 }
 0x312   : > { %22946 = vst [vmem:[#allocation211_spill] sm:$0xff] %v19424_v15  ;;  %v19429_v36 = vadd.f32 %v6445_v51, %v5595_v49  ;;  %v5990_v27 = vor.u32 %v5989_v52, %v5988_v0  ;;  %v22949_v46 = vld [vmem:[#allocation332_spill] sm:$0xff]  ;;  %v15857_v52 = vld [vmem:[%s16147_s15 + $0x244] sm:$0xff]  }
 0x313   : > { %v14814_v53 = vpop.f32.mrf.mxu0  ;;  %14909 = vmatmul.mubr.msk.bf16.gmra.mxu0 %vm1647_vm3, %v5979_v59  ;;  %v5099_v58 = vpop.f32.mrf.mxu1  ;;  %v15856_v51 = vld [vmem:[%s16147_s15 + $0x23c] sm:$0xff]  }
 0x314   : > { %14912 = vmatprep.mubr.msk.bf16.mxu0 %vm1647_vm3, %v5983_v29  ;;  %22947 = vst [vmem:[#allocation124_spill] sm:$0xff] %v19429_v36  ;;  %v5596_v8 = vadd.f32 %v5099_v58, %v22948_v9  ;;  %v4664_v49 = vrot.slane %v15856_v51, 4  ;;  %v5991_v0 = vsel %vm5696_vm6, %v19011_v47, %v5990_v27  ;;  %v4666_v58 = vrot.slane %v15857_v52, 4 }
 0x315   : > { %v6460_v19 = vpop.f32.mrf.mxu0  ;;  %v14652_v35 = vpop.f32.mrf.mxu1  ;;  %14747 = vmatmul.mubr.msk.bf16.gmra.mxu1 %vm1647_vm3, %v4661_v31  ;;  %v22951_v31 = vld [vmem:[#allocation136_spill] sm:$0xff] }
 0x316   : > { %v5600_v59 = vadd.f32 %v14652_v35, %v22949_v46  ;;  %14750 = vmatprep.mubr.msk.bf16.mxu1 %vm1647_vm3, %v4663_v48  ;;  %v19439_v29 = vadd.f32 %v6448_v40, %v5596_v8  ;;  %v22952_v9 = vshrl.u32 %v22951_v31, 16  ;;  %v22953_v35 = vshll.u32 %v22951_v31, 16  ;;  %v22956_v8 = vld [vmem:[#allocation97_spill] sm:$0xff] }
 0x317   : > { %v14815_v5 = vpop.f32.mrf.mxu0  ;;  %v5111_v36 = vpop.f32.mrf.mxu1  ;;  %v4665_v47 = vsel %vm993_vm4, %v4662_v2, %v4664_v49  ;;  %v15858_v2 = vld [vmem:[%s16147_s15 + $0x24c] sm:$0xff]  }
 0x318   : > { %22950 = vst [vmem:[#allocation213_spill] sm:$0xff] %v19439_v29  ;;  %v5996_v15 = vrot.slane %v22952_v9, 4  ;;  %v5997_v46 = vrot.slane %v22953_v35, 5  ;;  %v5598_v16 = vadd.f32 %v5111_v36, %v22954_v12  ;;  %v19449_v48 = vadd.f32 %v14814_v53, %v5600_v59  ;;  %v22958_v53 = vld [vmem:[#allocation223_spill] sm:$0xff] }
 0x319   : > { %v6463_v6 = vpop.f32.mrf.mxu0  ;;  %v14653_v51 = vpop.f32.mrf.mxu1  ;;  %v4667_v35 = vsel %vm993_vm4, %v4664_v49, %v4666_v58 }
 0x31a   : > { %22955 = vst [vmem:[#allocation93_spill] sm:$0xff] %v19449_v48  ;;  %v5601_v29 = vadd.f32 %v14653_v51, %v22956_v8  ;;  %v19455_v52 = vadd.f32 %v6460_v19, %v5598_v16  ;;  %v5998_v36 = vor.u32 %v5997_v46, %v5996_v15  ;;  %v5995_v16 = vsel %vm5696_vm6, %v5990_v27, %v19043_v4  ;;  %v22961_v15 = vld [vmem:[#allocation144_spill] sm:$0xff] }
 0x31b   : > { %v14818_v40 = vpop.f32.mrf.mxu0  ;;  %14913 = vmatmul.mubr.msk.bf16.gmra.mxu0 %vm1647_vm3, %v5987_v57  ;;  %v5114_v9 = vpop.f32.mrf.mxu1  ;;  %v4668_v19 = vrot.slane %v15858_v2, 4  ;;  %v22962_v49 = vshrl.u32 %v22961_v15, 16  ;;  %v15859_v27 = vld [vmem:[%s16147_s15 + $0x254] sm:$0xff]  }
 0x31c   : > { %14916 = vmatprep.mubr.msk.bf16.mxu0 %vm1647_vm3, %v5991_v0  ;;  %22957 = vst [vmem:[#allocation215_spill] sm:$0xff] %v19455_v52  ;;  %v5599_v59 = vadd.f32 %v5114_v9, %v22958_v53  ;;  %v19459_v12 = vadd.f32 %v14815_v5, %v5601_v29  ;;  %v22960_v0 = vld [vmem:[#allocation334_spill] sm:$0xff]  ;;  %v22963_v5 = vshll.u32 %v22961_v15, 16  ;;  %v4670_v53 = vrot.slane %v15859_v27, 4  ;;  %v19477_v2 = vld [vmem:[%s16147_s15 + $0x274] sm:$0xff]  }
 0x31d   : > { %v6476_v31 = vpop.f32.mrf.mxu0  ;;  %v14656_v48 = vpop.f32.mrf.mxu1  ;;  %14751 = vmatmul.mubr.msk.bf16.gmra.mxu1 %vm1647_vm3, %v4665_v47  ;;  %v6004_v46 = vrot.slane %v22962_v49, 4  ;;  %22965 = vst [vmem:[#allocation219_spill] sm:$0xff] %v19477_v2 }
 0x31e   : > { %22959 = vst [vmem:[#allocation216_spill] sm:$0xff] %v19459_v12  ;;  %v5603_v51 = vadd.f32 %v14656_v48, %v22960_v0  ;;  %14754 = vmatprep.mubr.msk.bf16.mxu1 %vm1647_vm3, %v4667_v35  ;;  %v6005_v29 = vrot.slane %v22963_v5, 5  ;;  %v19471_v8 = vadd.f32 %v6463_v6, %v5599_v59  ;;  %v5999_v31 = vsel %vm5696_vm6, %v19043_v4, %v5998_v36  ;;  %v19482_v35 = vld [vmem:[%s16147_s15 + $0x26c] sm:$0xff]  }
 0x31f   : > { %v14819_v57 = vpop.f32.mrf.mxu0  ;;  %v5127_v47 = vpop.f32.mrf.mxu1  ;;  %22967 = vst [vmem:[#allocation101_spill] sm:$0xff] %v19482_v35  ;;  %v22968_v6 = vld [vmem:[#allocation226_spill] sm:$0xff]  ;;  %v4669_v4 = vsel %vm993_vm4, %v4666_v58, %v4668_v19 }
 0x320   : > { %22964 = vst [vmem:[#allocation132_spill] sm:$0xff] %v19471_v8  ;;  %v19479_v48 = vadd.f32 %v14818_v40, %v5603_v51  ;;  %v6006_v5 = vor.u32 %v6005_v29, %v6004_v46  ;;  %v4671_v40 = vsel %vm993_vm4, %v4668_v19, %v4670_v53  ;;  %v22969_v8 = vld [vmem:[#allocation228_spill] sm:$0xff]  ;;  %v22973_v19 = vshrl.u32 %v19482_v35, 16 }
 0x321   : > { %v6478_v9 = vpop.f32.mrf.mxu0  ;;  %v14657_v15 = vpop.f32.mrf.mxu1  ;;  %v15861_v29 = vld [vmem:[%s16147_s15 + $0x25c] sm:$0xff]  }
 0x322   : > { %22966 = vst [vmem:[#allocation222_spill] sm:$0xff] %v19479_v48  ;;  %v5604_v59 = vadd.f32 %v14657_v15, %v22968_v6  ;;  %v15724_v48 = vld [vmem:[%s16147_s15 + $0x27c] ss:$0 sps:$4 sm:$0xff]   ;;  %v6010_v51 = vrot.slane %v22973_v19, 4  ;;  %v22976_v19 = vshll.u32 %v19477_v2, 16 }
 0x323   : > { %v14822_v49 = vpop.f32.mrf.mxu0  ;;  %14917 = vmatmul.mubr.msk.bf16.gmra.mxu0 %vm1647_vm3, %v5995_v16  ;;  %v5129_v47 = vpop.f32.mrf.mxu1  ;;  %v22971_v15 = vld [vmem:[#allocation148_spill] sm:$0xff] }
 0x324   : > { %14920 = vmatprep.mubr.msk.bf16.mxu0 %vm1647_vm3, %v5999_v31  ;;  %v5602_v12 = vadd.f32 %v5129_v47, %v22969_v8  ;;  %v19494_v16 = vadd.f32 %v14819_v57, %v5604_v59  ;;  %v22972_v6 = vshll.u32 %v22971_v15, 16  ;;  %v4672_v31 = vrot.slane %v15861_v29, 4  ;;  %v15862_v15 = vld [vmem:[%s16147_s15 + $0x264] sm:$0xff]  }
 0x325   : > { %v6491_v27 = vpop.f32.mrf.mxu0  ;;  %v14660_v52 = vpop.f32.mrf.mxu1  ;;  %14755 = vmatmul.mubr.msk.bf16.gmra.mxu1 %vm1647_vm3, %v4669_v4  ;;  %v6003_v8 = vsel %vm5696_vm6, %v5998_v36, %v19076_v50  ;;  %v6007_v57 = vsel %vm5696_vm6, %v19076_v50, %v6006_v5  ;;  %v22975_v29 = vshrl.u32 %v19477_v2, 16 }
 0x326   : > { %22970 = vst [vmem:[#allocation224_spill] sm:$0xff] %v19494_v16  ;;  %v6011_v58 = vrot.slane %v22972_v6, 5  ;;  %v5606_v0 = vadd.f32 %v14660_v52, %v22974_v21  ;;  %14758 = vmatprep.mubr.msk.bf16.mxu1 %vm1647_vm3, %v4671_v40  ;;  %v19508_v59 = vadd.f32 %v6478_v9, %v5602_v12  ;;  %v4674_v6 = vrot.slane %v15862_v15, 4  ;;  %v22977_v52 = vld [vmem:[#allocation5_spill] sm:$0xff]  ;;  %v22978_v40 = vld [vmem:[#allocation235_spill] sm:$0xff] }
 0x327   : > { %v14823_v46 = vpop.f32.mrf.mxu0  ;;  %v5142_v47 = vpop.f32.mrf.mxu1  ;;  %v6017_v16 = vrot.slane %v22975_v29, 4  ;;  %v6020_v21 = vrot.slane %v22976_v19, 5  ;;  %v19517_v36 = vsel %vm993_vm4, %v15724_v48, %v22977_v52  ;;  %v4673_v9 = vsel %vm993_vm4, %v4670_v53, %v4672_v31  ;;  %v22979_v15 = vld [vmem:[#allocation113_spill] sm:$0xff] }
 0x328   : > { %v5605_v17 = vadd.f32 %v5142_v47, %v22978_v40  ;;  %v19520_v3 = vadd.f32 %v14822_v49, %v5606_v0  ;;  %v22087_v19 = vshrl.u32 %v19517_v36, 16  ;;  %v22088_v48 = vshll.u32 %v19517_v36, 16 }
 0x329   : > { %v6494_v4 = vpop.f32.mrf.mxu0  ;;  %v14661_v50 = vpop.f32.mrf.mxu1  ;;  %v4675_v49 = vsel %vm993_vm4, %v4672_v31, %v4674_v6  ;;  %v6021_v40 = vor.u32 %v6020_v21, %v6017_v16  ;;  %v22980_v21 = vld [vmem:[#allocation241_spill] sm:$0xff] }
 0x32a   : > { %v6012_v4 = vor.u32 %v6011_v58, %v6010_v51  ;;  %v5607_v29 = vadd.f32 %v14661_v50, %v22979_v15  ;;  %v19528_v52 = vadd.f32 %v6491_v27, %v5605_v17  ;;  %v4676_v58 = vrot.slane %v19482_v35, 4  ;;  %v22981_v15 = vld [vmem:[#allocation121_spill] sm:$0xff] }
 0x32b   : > { %v14826_v12 = vpop.f32.mrf.mxu0  ;;  %14921 = vmatmul.mubr.msk.bf16.gmra.mxu0 %vm1647_vm3, %v6003_v8  ;;  %v5145_v47 = vpop.f32.mrf.mxu1  ;;  %v6025_v17 = vrot.slane %v22087_v19, 4  ;;  %v6028_v27 = vrot.slane %v22088_v48, 5 }
 0x32c   : > { %14924 = vmatprep.mubr.msk.bf16.mxu0 %vm1647_vm3, %v6007_v57  ;;  %v19531_v12 = vadd.f32 %v14823_v46, %v5607_v29  ;;  %v6013_v51 = vsel %vm5696_vm6, %v6006_v5, %v6012_v4  ;;  %v6022_v46 = vsel %vm5696_vm6, %v6012_v4, %v6021_v40  ;;  %v4678_v57 = vrot.slane %v19477_v2, 4  ;;  %v22982_v2 = vld [vmem:[#allocation247_spill] sm:$0xff] }
 0x32d   : > { %v6506_v0 = vpop.f32.mrf.mxu0  ;;  %v14664_v8 = vpop.f32.mrf.mxu1  ;;  %14759 = vmatmul.mubr.msk.bf16.gmra.mxu1 %vm1647_vm3, %v4673_v9  ;;  %v4677_v47 = vsel %vm993_vm4, %v4674_v6, %v4676_v58 }
 0x32e   : > { %14762 = vmatprep.mubr.msk.bf16.mxu1 %vm1647_vm3, %v4675_v49  ;;  %v6029_v49 = vor.u32 %v6028_v27, %v6025_v17  ;;  %v4679_v48 = vsel %vm993_vm4, %v4676_v58, %v4678_v57 }
 0x32f   : > { %v14827_v53 = vpop.f32.mrf.mxu0  ;;  %v5157_v31 = vpop.f32.mrf.mxu1 }
 0x330   : > { %v5608_v50 = vadd.f32 %v5157_v31, %v22980_v21 }
 0x331   : > { %v6509_v16 = vpop.f32.mrf.mxu0  ;;  %v14665_v9 = vpop.f32.mrf.mxu1 }
 0x332   : > { %v5610_v29 = vadd.f32 %v14665_v9, %v22981_v15  ;;  %v19548_v8 = vadd.f32 %v6506_v0, %v5608_v50  ;;  %v22983_v9 = vld [vmem:[#allocation19_spill] sm:$0xff]  ;;  %v4680_v0 = vrot.slane %v19517_v36, 4  ;;  %v22985_v15 = vld [vmem:[#allocation249_spill] sm:$0xff] }
 0x333   : > { %v14830_v5 = vpop.f32.mrf.mxu0  ;;  %14925 = vmatmul.mubr.msk.bf16.gmra.mxu0 %vm1647_vm3, %v6013_v51  ;;  %v5160_v19 = vpop.f32.mrf.mxu1 }
 0x334   : > { %14928 = vmatprep.mubr.msk.bf16.mxu0 %vm1647_vm3, %v6022_v46  ;;  %v5609_v31 = vadd.f32 %v5160_v19, %v22982_v2  ;;  %v19552_v21 = vadd.f32 %v14827_v53, %v5610_v29  ;;  %v6030_v46 = vsel %vm5696_vm6, %v6021_v40, %v6029_v49  ;;  %v22984_v2 = vld [vmem:[#allocation10_spill] sm:$0xff] }
 0x335   : > { %v6521_v4 = vpop.f32.mrf.mxu0  ;;  %v14668_v35 = vpop.f32.mrf.mxu1  ;;  %14763 = vmatmul.mubr.msk.bf16.gmra.mxu1 %vm1647_vm3, %v4677_v47  ;;  %v7046_v19 = vrot.slane %v22984_v2, 5  ;;  %v15863_v53 = vld [vmem:[%s16147_s15 + $0x4] sm:$0xff]  }
 0x336   : > { %v5613_v6 = vadd.f32 %v14668_v35, %v22983_v9  ;;  %14766 = vmatprep.mubr.msk.bf16.mxu1 %vm1647_vm3, %v4679_v48  ;;  %v19559_v17 = vadd.f32 %v6509_v16, %v5609_v31  ;;  %v7047_v50 = vrot.slane %v15863_v53, 5  ;;  %v4681_v48 = vsel %vm993_vm4, %v4678_v57, %v4680_v0  ;;  %v15864_v16 = vld [vmem:[%s16147_s15 + $0x14] sm:$0xff]   ;;  %v22989_v53 = vld [vmem:[#allocation253_spill] sm:$0xff]  ;;  %v15865_v57 = vld [vmem:[%s16147_s15 + $0xc] sm:$0xff]  }
 0x337   : > { %v14831_v51 = vpop.f32.mrf.mxu0  ;;  %v5172_v58 = vpop.f32.mrf.mxu1  ;;  %v7049_v0 = vrot.slane %v15865_v57, 5 }
 0x338   : > { %v5611_v29 = vadd.f32 %v5172_v58, %v22985_v15  ;;  %v19564_v47 = vadd.f32 %v14830_v5, %v5613_v6  ;;  %v7048_v9 = vsel %vm7045_vm7, %v7046_v19, %v7047_v50  ;;  %v22988_v58 = vld [vmem:[#allocation129_spill] sm:$0xff]  ;;  %v22991_v19 = vld [vmem:[#allocation255_spill] sm:$0xff] }
 0x339   : > { %v6524_v27 = vpop.f32.mrf.mxu0  ;;  %v14669_v35 = vpop.f32.mrf.mxu1 }
 0x33a   : > { %22986 = vst [vmem:[#allocation225_spill] sm:$0xff] %v19564_v47  ;;  %v19570_v49 = vadd.f32 %v6521_v4, %v5611_v29  ;;  %v7051_v35 = vrot.slane %v15864_v16, 5 }
 0x33b   : > { %v14834_v40 = vpop.f32.mrf.mxu0  ;;  %14929 = vmatmul.mubr.msk.bf16.gmra.mxu0 %vm1647_vm3, %v6030_v46  ;;  %v5175_v31 = vpop.f32.mrf.mxu1 }
 0x33c   : > { %15096 = vmatprep.mubr.msk.bf16.mxu0 %vm1647_vm3, %v15864_v16  ;;  %22987 = vst [vmem:[#allocation140_spill] sm:$0xff] %v19570_v49  ;;  %v5612_v2 = vadd.f32 %v5175_v31, %v22988_v58 }
 0x33d   : > { %v6536_v51 = vpop.f32.mrf.mxu0  ;;  %v14672_v5 = vpop.f32.mrf.mxu1  ;;  %14767 = vmatmul.mubr.msk.bf16.gmra.mxu1 %vm1647_vm3, %v4681_v48  ;;  %v15866_v48 = vld [vmem:[%s16147_s15 + $0x1c] sm:$0xff]  }
 0x33e   : > { %v5616_v46 = vadd.f32 %v14672_v5, %v22989_v53  ;;  %14934 = vmatprep.mubr.msk.bf16.mxu1 %vm1647_vm3, %v7048_v9  ;;  %v19578_v4 = vadd.f32 %v6524_v27, %v5612_v2  ;;  %v22993_v5 = vld [vmem:[#allocation25_spill] sm:$0xff]  ;;  %v7050_v9 = vsel %vm7045_vm7, %v7047_v50, %v7049_v0 }
 0x33f   : > { %v14835_v6 = vpop.f32.mrf.mxu0  ;;  %v5187_v15 = vpop.f32.mrf.mxu1  ;;  %v15867_v27 = vld [vmem:[%s16147_s15 + $0x24] sm:$0xff]  }
 0x340   : > { %22990 = vst [vmem:[#allocation230_spill] sm:$0xff] %v19578_v4  ;;  %v5614_v49 = vadd.f32 %v5187_v15, %v22991_v19  ;;  %v19581_v31 = vadd.f32 %v14834_v40, %v5616_v46  ;;  %v7052_v40 = vsel %vm7045_vm7, %v7049_v0, %v7051_v35  ;;  %v22995_v46 = vld [vmem:[#allocation23_spill] sm:$0xff] }
 0x341   : > { %v6539_v29 = vpop.f32.mrf.mxu0  ;;  %v14673_v58 = vpop.f32.mrf.mxu1 }
 0x342   : > { %22992 = vst [vmem:[#allocation109_spill] sm:$0xff] %v19581_v31  ;;  %v5617_v53 = vadd.f32 %v14673_v58, %v22993_v5  ;;  %v19590_v2 = vadd.f32 %v6536_v51, %v5614_v49  ;;  %v22997_v58 = vld [vmem:[#allocation257_spill] sm:$0xff]  ;;  %v7053_v49 = vrot.slane %v15866_v48, 5 }
 0x343   : > { %v14838_v47 = vpop.f32.mrf.mxu0  ;;  %15097 = vmatmul.mubr.msk.bf16.vlgmr.msra.gmra.mxu0 %vm1647_vm3, %v15866_v48  ;;  %v5190_v16 = vpop.f32.mrf.mxu1 }
 0x344   : > { %15419 = vmatpush3.bf16.msra.mxu0 %v19189_v30  ;;  %15100 = vmatprep.mubr.msk.bf16.mxu0 %vm1647_vm3, %v15867_v27  ;;  %22994 = vst [vmem:[#allocation232_spill] sm:$0xff] %v19590_v2  ;;  %v5615_v15 = vadd.f32 %v5190_v16, %v22995_v46  ;;  %v19594_v19 = vadd.f32 %v14835_v6, %v5617_v53  ;;  %v7055_v16 = vrot.slane %v15867_v27, 5  ;;  %v15868_v46 = vld [vmem:[%s16147_s15 + $0x2c] sm:$0xff]   ;;  %v23005_v2 = vld [vmem:[#allocation265_spill] sm:$0xff] }
 0x345   : > { %v6552_v57 = vpop.f32.mrf.mxu0  ;;  %v14676_v31 = vpop.f32.mrf.mxu1  ;;  %14935 = vmatmul.mubr.msk.bf16.vlgmr.msra.gmra.mxu1 %vm1647_vm3, %v7050_v9  ;;  %v23000_v9 = vld [vmem:[#allocation259_spill] sm:$0xff] }
 0x346   : > { %22996 = vst [vmem:[#allocation234_spill] sm:$0xff] %v19594_v19  ;;  %v5619_v30 = vadd.f32 %v14676_v31, %v22997_v58  ;;  %15257 = vmatpush3.bf16.msra.mxu1 %v19170_v45  ;;  %14938 = vmatprep.mubr.msk.bf16.mxu1 %vm1647_vm3, %v7052_v40  ;;  %v19600_v51 = vadd.f32 %v6539_v29, %v5615_v15  ;;  %v15869_v45 = vld [vmem:[%s16147_s15 + $0x34] sm:$0xff]   ;;  %v23001_v15 = vld [vmem:[#allocation137_spill] sm:$0xff] }
 0x347   : > { %v14839_v50 = vpop.f32.mrf.mxu0  ;;  %v5203_v0 = vpop.f32.mrf.mxu1  ;;  %v7054_v31 = vsel %vm7045_vm7, %v7051_v35, %v7053_v49  ;;  %v7056_v40 = vsel %vm7045_vm7, %v7053_v49, %v7055_v16  ;;  %v7057_v35 = vrot.slane %v15868_v46, 5  ;;  %v7059_v49 = vrot.slane %v15869_v45, 5 }
 0x348   : > { %22998 = vst [vmem:[#allocation237_spill] sm:$0xff] %v19600_v51  ;;  %v19602_v57 = vadd.f32 %v14838_v47, %v5619_v30  ;;  %v23003_v0 = vld [vmem:[#allocation262_spill] sm:$0xff] }
 0x349   : > { %v6554_v5 = vpop.f32.mrf.mxu0  ;;  %v14677_v6 = vpop.f32.mrf.mxu1 }
 0x34a   : > { %22999 = vst [vmem:[#allocation239_spill] sm:$0xff] %v19602_v57  ;;  %v5620_v19 = vadd.f32 %v14677_v6, %v23000_v9 }
 0x34b   : > { %v14842_v53 = vpop.f32.mrf.mxu0  ;;  %15101 = vmatmul.mubr.msk.bf16.gmra.mxu0 %vm1647_vm3, %v15868_v46  ;;  %v5205_v48 = vpop.f32.mrf.mxu1 }
 0x34c   : > { %15104 = vmatprep.mubr.msk.bf16.mxu0 %vm1647_vm3, %v15869_v45  ;;  %v5618_v27 = vadd.f32 %v5205_v48, %v23001_v15  ;;  %v19612_v47 = vadd.f32 %v14839_v50, %v5620_v19 }
 0x34d   : > { %v6567_v29 = vpop.f32.mrf.mxu0  ;;  %v14680_v58 = vpop.f32.mrf.mxu1  ;;  %14939 = vmatmul.mubr.msk.bf16.gmra.mxu1 %vm1647_vm3, %v7054_v31  ;;  %v23007_v31 = vld [vmem:[#allocation298_spill] sm:$0xff] }
 0x34e   : > { %23002 = vst [vmem:[#allocation117_spill] sm:$0xff] %v19612_v47  ;;  %v5622_v6 = vadd.f32 %v14680_v58, %v23003_v0  ;;  %14942 = vmatprep.mubr.msk.bf16.mxu1 %vm1647_vm3, %v7056_v40  ;;  %v19617_v9 = vadd.f32 %v6554_v5, %v5618_v27  ;;  %v15870_v47 = vld [vmem:[%s16147_s15 + $0x3c] sm:$0xff]   ;;  %v7058_v58 = vsel %vm7045_vm7, %v7055_v16, %v7057_v35  ;;  %v15871_v40 = vld [vmem:[%s16147_s15 + $0x44] sm:$0xff]  }
 0x34f   : > { %v14843_v30 = vpop.f32.mrf.mxu0  ;;  %v5218_v57 = vpop.f32.mrf.mxu1  ;;  %v7061_v16 = vrot.slane %v15870_v47, 5 }
 0x350   : > { %23004 = vst [vmem:[#allocation15_spill] sm:$0xff] %v19617_v9  ;;  %v5621_v48 = vadd.f32 %v5218_v57, %v23005_v2  ;;  %v19620_v15 = vadd.f32 %v14842_v53, %v5622_v6  ;;  %v7060_v2 = vsel %vm7045_vm7, %v7057_v35, %v7059_v49  ;;  %v7063_v6 = vrot.slane %v15871_v40, 5 }
 0x351   : > { %v6570_v51 = vpop.f32.mrf.mxu0  ;;  %v14681_v19 = vpop.f32.mrf.mxu1  ;;  %v7062_v35 = vsel %vm7045_vm7, %v7059_v49, %v7061_v16  ;;  %v23015_v49 = vld [vmem:[#allocation11_spill] sm:$0xff] }
 0x352   : > { %23006 = vst [vmem:[#allocation243_spill] sm:$0xff] %v19620_v15  ;;  %v5623_v4 = vadd.f32 %v14681_v19, %v23007_v31  ;;  %v19628_v5 = vadd.f32 %v6567_v29, %v5621_v48  ;;  %v23010_v29 = vld [vmem:[#allocation301_spill] sm:$0xff]  ;;  %v15872_v31 = vld [vmem:[%s16147_s15 + $0x4c] sm:$0xff]  }
 0x353   : > { %v14846_v50 = vpop.f32.mrf.mxu0  ;;  %15105 = vmatmul.mubr.msk.bf16.gmra.mxu0 %vm1647_vm3, %v15870_v47  ;;  %v5221_v51 = vpop.f32.mrf.mxu1  ;;  %v23017_v15 = vld [vmem:[#allocation270_spill] sm:$0xff] }
 0x354   : > { %15108 = vmatprep.mubr.msk.bf16.mxu0 %vm1647_vm3, %v15871_v40  ;;  %23008 = vst [vmem:[#allocation246_spill] sm:$0xff] %v19628_v5  ;;  %v19631_v57 = vadd.f32 %v14843_v30, %v5623_v4  ;;  %v23011_v4 = vld [vmem:[#allocation30_spill] sm:$0xff]  ;;  %v15873_v51 = vld [vmem:[%s16147_s15 + $0x54] sm:$0xff]   ;;  %v7064_v40 = vsel %vm7045_vm7, %v7061_v16, %v7063_v6 }
 0x355   : > { %v6582_v46 = vpop.f32.mrf.mxu0  ;;  %v14684_v53 = vpop.f32.mrf.mxu1  ;;  %14943 = vmatmul.mubr.msk.bf16.gmra.mxu1 %vm1647_vm3, %v7058_v58  ;;  %v7067_v16 = vrot.slane %v15873_v51, 5 }
 0x356   : > { %23009 = vst [vmem:[#allocation125_spill] sm:$0xff] %v19631_v57  ;;  %14946 = vmatprep.mubr.msk.bf16.mxu1 %vm1647_vm3, %v7060_v2  ;;  %v23013_v53 = vld [vmem:[#allocation268_spill] sm:$0xff] }
 0x357   : > { %v14847_v45 = vpop.f32.mrf.mxu0  ;;  %v5233_v27 = vpop.f32.mrf.mxu1 }
 0x358   : > { %v5624_v48 = vadd.f32 %v5233_v27, %v23010_v29 }
 0x359   : > { %v6585_v0 = vpop.f32.mrf.mxu0  ;;  %v14685_v19 = vpop.f32.mrf.mxu1 }
 0x35a   : > { %v5626_v30 = vadd.f32 %v14685_v19, %v23011_v4  ;;  %v19642_v58 = vadd.f32 %v6582_v46, %v5624_v48  ;;  %v7065_v46 = vrot.slane %v15872_v31, 5 }
 0x35b   : > { %v14850_v50 = vpop.f32.mrf.mxu0  ;;  %15109 = vmatmul.mubr.msk.bf16.gmra.mxu0 %vm1647_vm3, %v15872_v31  ;;  %v5236_v47 = vpop.f32.mrf.mxu1 }
 0x35c   : > { %15112 = vmatprep.mubr.msk.bf16.mxu0 %vm1647_vm3, %v15873_v51  ;;  %23012 = vst [vmem:[#allocation248_spill] sm:$0xff] %v19642_v58  ;;  %v5625_v27 = vadd.f32 %v5236_v47, %v23013_v53  ;;  %v19646_v29 = vadd.f32 %v14847_v45, %v5626_v30  ;;  %v7068_v51 = vsel %vm7045_vm7, %v7065_v46, %v7067_v16 }
 0x35d   : > { %v6597_v2 = vpop.f32.mrf.mxu0  ;;  %v14688_v57 = vpop.f32.mrf.mxu1  ;;  %14947 = vmatmul.mubr.msk.bf16.gmra.mxu1 %vm1647_vm3, %v7062_v35  ;;  %v7066_v35 = vsel %vm7045_vm7, %v7063_v6, %v7065_v46 }
 0x35e   : > { %23014 = vst [vmem:[#allocation250_spill] sm:$0xff] %v19646_v29  ;;  %v5629_v4 = vadd.f32 %v14688_v57, %v23015_v49  ;;  %14950 = vmatprep.mubr.msk.bf16.mxu1 %vm1647_vm3, %v7064_v40  ;;  %v19651_v48 = vadd.f32 %v6585_v0, %v5625_v27  ;;  %v15874_v29 = vld [vmem:[%s16147_s15 + $0x5c] sm:$0xff]   ;;  %v15875_v57 = vld [vmem:[%s16147_s15 + $0x64] sm:$0xff]  }
 0x35f   : > { %v14851_v19 = vpop.f32.mrf.mxu0  ;;  %v5248_v58 = vpop.f32.mrf.mxu1  ;;  %v23020_v27 = vld [vmem:[#allocation273_spill] sm:$0xff]  ;;  %v7069_v6 = vrot.slane %v15874_v29, 5 }
 0x360   : > { %23016 = vst [vmem:[#allocation20_spill] sm:$0xff] %v19651_v48  ;;  %v5627_v47 = vadd.f32 %v5248_v58, %v23017_v15  ;;  %v19654_v53 = vadd.f32 %v14850_v50, %v5629_v4  ;;  %v23021_v19 = vld [vmem:[#allocation36_spill] sm:$0xff]  ;;  %v15876_v48 = vld [vmem:[%s16147_s15 + $0x6c] sm:$0xff]  }
 0x361   : > { %v6600_v5 = vpop.f32.mrf.mxu0  ;;  %v14689_v45 = vpop.f32.mrf.mxu1 }
 0x362   : > { %23018 = vst [vmem:[#allocation252_spill] sm:$0xff] %v19654_v53  ;;  %v19661_v31 = vadd.f32 %v6597_v2, %v5627_v47  ;;  %v7071_v45 = vrot.slane %v15875_v57, 5 }
 0x363   : > { %v14854_v30 = vpop.f32.mrf.mxu0  ;;  %15113 = vmatmul.mubr.msk.bf16.gmra.mxu0 %vm1647_vm3, %v15874_v29  ;;  %v5251_v0 = vpop.f32.mrf.mxu1 }
 0x364   : > { %15116 = vmatprep.mubr.msk.bf16.mxu0 %vm1647_vm3, %v15875_v57  ;;  %23019 = vst [vmem:[#allocation133_spill] sm:$0xff] %v19661_v31  ;;  %v5628_v15 = vadd.f32 %v5251_v0, %v23020_v27  ;;  %v23023_v31 = vld [vmem:[#allocation275_spill] sm:$0xff] }
 0x365   : > { %v6612_v40 = vpop.f32.mrf.mxu0  ;;  %v14692_v50 = vpop.f32.mrf.mxu1  ;;  %14951 = vmatmul.mubr.msk.bf16.gmra.mxu1 %vm1647_vm3, %v7066_v35  ;;  %v23025_v35 = vld [vmem:[#allocation277_spill] sm:$0xff] }
 0x366   : > { %v5632_v49 = vadd.f32 %v14692_v50, %v23021_v19  ;;  %14954 = vmatprep.mubr.msk.bf16.mxu1 %vm1647_vm3, %v7068_v51  ;;  %v19668_v4 = vadd.f32 %v6600_v5, %v5628_v15  ;;  %v7070_v50 = vsel %vm7045_vm7, %v7067_v16, %v7069_v6  ;;  %v15877_v51 = vld [vmem:[%s16147_s15 + $0x74] sm:$0xff]   ;;  %v23029_v16 = vld [vmem:[#allocation13_spill] sm:$0xff] }
 0x367   : > { %v14855_v58 = vpop.f32.mrf.mxu0  ;;  %v5263_v2 = vpop.f32.mrf.mxu1 }
 0x368   : > { %23022 = vst [vmem:[#allocation256_spill] sm:$0xff] %v19668_v4  ;;  %v5630_v46 = vadd.f32 %v5263_v2, %v23023_v31  ;;  %v19671_v53 = vadd.f32 %v14854_v30, %v5632_v49  ;;  %v7072_v31 = vsel %vm7045_vm7, %v7069_v6, %v7071_v45  ;;  %v23027_v30 = vld [vmem:[#allocation12_spill] sm:$0xff]  ;;  %v7075_v6 = vrot.slane %v15877_v51, 5 }
 0x369   : > { %v6615_v47 = vpop.f32.mrf.mxu0  ;;  %v14693_v0 = vpop.f32.mrf.mxu1 }
 0x36a   : > { %23024 = vst [vmem:[#allocation258_spill] sm:$0xff] %v19671_v53  ;;  %v5633_v9 = vadd.f32 %v14693_v0, %v23025_v35  ;;  %v19679_v5 = vadd.f32 %v6612_v40, %v5630_v46  ;;  %v7073_v40 = vrot.slane %v15876_v48, 5  ;;  %v23037_v53 = vld [vmem:[#allocation16_spill] sm:$0xff] }
 0x36b   : > { %v14858_v27 = vpop.f32.mrf.mxu0  ;;  %15117 = vmatmul.mubr.msk.bf16.gmra.mxu0 %vm1647_vm3, %v15876_v48  ;;  %v5266_v29 = vpop.f32.mrf.mxu1 }
 0x36c   : > { %15120 = vmatprep.mubr.msk.bf16.mxu0 %vm1647_vm3, %v15877_v51  ;;  %23026 = vst [vmem:[#allocation26_spill] sm:$0xff] %v19679_v5  ;;  %v5631_v15 = vadd.f32 %v5266_v29, %v23027_v30  ;;  %v19683_v19 = vadd.f32 %v14855_v58, %v5633_v9  ;;  %v15878_v58 = vld [vmem:[%s16147_s15 + $0x7c] sm:$0xff]  }
 0x36d   : > { %v6628_v57 = vpop.f32.mrf.mxu0  ;;  %v14696_v49 = vpop.f32.mrf.mxu1  ;;  %14955 = vmatmul.mubr.msk.bf16.gmra.mxu1 %vm1647_vm3, %v7070_v50  ;;  %v23032_v50 = vld [vmem:[#allocation42_spill] sm:$0xff] }
 0x36e   : > { %23028 = vst [vmem:[#allocation261_spill] sm:$0xff] %v19683_v19  ;;  %v5635_v0 = vadd.f32 %v14696_v49, %v23029_v16  ;;  %14958 = vmatprep.mubr.msk.bf16.mxu1 %vm1647_vm3, %v7072_v31  ;;  %v19688_v46 = vadd.f32 %v6615_v47, %v5631_v15  ;;  %v7074_v19 = vsel %vm7045_vm7, %v7071_v45, %v7073_v40  ;;  %v15879_v49 = vld [vmem:[%s16147_s15 + $0x84] sm:$0xff]   ;;  %v7077_v45 = vrot.slane %v15878_v58, 5 }
 0x36f   : > { %v14859_v2 = vpop.f32.mrf.mxu0  ;;  %v5279_v35 = vpop.f32.mrf.mxu1  ;;  %v7076_v31 = vsel %vm7045_vm7, %v7073_v40, %v7075_v6  ;;  %v23033_v15 = vld [vmem:[#allocation282_spill] sm:$0xff]  ;;  %v7079_v40 = vrot.slane %v15879_v49, 5 }
 0x370   : > { %23030 = vst [vmem:[#allocation264_spill] sm:$0xff] %v19688_v46  ;;  %v19690_v5 = vadd.f32 %v14858_v27, %v5635_v0  ;;  %v23035_v35 = vld [vmem:[#allocation283_spill] sm:$0xff] }
 0x371   : > { %v6630_v57 = vpop.f32.mrf.mxu0  ;;  %v14697_v29 = vpop.f32.mrf.mxu1 }
 0x372   : > { %23031 = vst [vmem:[#allocation141_spill] sm:$0xff] %v19690_v5  ;;  %v5636_v30 = vadd.f32 %v14697_v29, %v23032_v50 }
 0x373   : > { %v14862_v9 = vpop.f32.mrf.mxu0  ;;  %15121 = vmatmul.mubr.msk.bf16.gmra.mxu0 %vm1647_vm3, %v15878_v58  ;;  %v5281_v48 = vpop.f32.mrf.mxu1 }
 0x374   : > { %15124 = vmatprep.mubr.msk.bf16.mxu0 %vm1647_vm3, %v15879_v49  ;;  %v5634_v51 = vadd.f32 %v5281_v48, %v23033_v15  ;;  %v19700_v27 = vadd.f32 %v14859_v2, %v5636_v30 }
 0x375   : > { %v6643_v47 = vpop.f32.mrf.mxu0  ;;  %v14700_v16 = vpop.f32.mrf.mxu1  ;;  %14959 = vmatmul.mubr.msk.bf16.gmra.mxu1 %vm1647_vm3, %v7074_v19  ;;  %v23039_v19 = vld [vmem:[#allocation286_spill] sm:$0xff] }
 0x376   : > { %23034 = vst [vmem:[#allocation266_spill] sm:$0xff] %v19700_v27  ;;  %v5638_v29 = vadd.f32 %v14700_v16, %v23035_v35  ;;  %14962 = vmatprep.mubr.msk.bf16.mxu1 %vm1647_vm3, %v7076_v31  ;;  %v19705_v50 = vadd.f32 %v6630_v57, %v5634_v51  ;;  %v15880_v27 = vld [vmem:[%s16147_s15 + $0x8c] sm:$0xff]   ;;  %v7078_v16 = vsel %vm7045_vm7, %v7075_v6, %v7077_v45  ;;  %v15881_v31 = vld [vmem:[%s16147_s15 + $0x94] sm:$0xff]  }
 0x377   : > { %v14863_v0 = vpop.f32.mrf.mxu0  ;;  %v5294_v5 = vpop.f32.mrf.mxu1  ;;  %v7081_v6 = vrot.slane %v15880_v27, 5 }
 0x378   : > { %23036 = vst [vmem:[#allocation267_spill] sm:$0xff] %v19705_v50  ;;  %v5637_v48 = vadd.f32 %v5294_v5, %v23037_v53  ;;  %v19708_v15 = vadd.f32 %v14862_v9, %v5638_v29  ;;  %v7080_v53 = vsel %vm7045_vm7, %v7077_v45, %v7079_v40  ;;  %v7083_v29 = vrot.slane %v15881_v31, 5 }
 0x379   : > { %v6646_v46 = vpop.f32.mrf.mxu0  ;;  %v14701_v2 = vpop.f32.mrf.mxu1  ;;  %v7082_v45 = vsel %vm7045_vm7, %v7079_v40, %v7081_v6  ;;  %v23047_v40 = vld [vmem:[#allocation22_spill] sm:$0xff] }
 0x37a   : > { %23038 = vst [vmem:[#allocation33_spill] sm:$0xff] %v19708_v15  ;;  %v5639_v4 = vadd.f32 %v14701_v2, %v23039_v19  ;;  %v19716_v57 = vadd.f32 %v6643_v47, %v5637_v48  ;;  %v23042_v47 = vld [vmem:[#allocation289_spill] sm:$0xff]  ;;  %v23049_v15 = vld [vmem:[#allocation295_spill] sm:$0xff] }
 0x37b   : > { %v14866_v30 = vpop.f32.mrf.mxu0  ;;  %15125 = vmatmul.mubr.msk.bf16.gmra.mxu0 %vm1647_vm3, %v15880_v27  ;;  %v5297_v46 = vpop.f32.mrf.mxu1  ;;  %v15882_v19 = vld [vmem:[%s16147_s15 + $0x9c] sm:$0xff]  }
 0x37c   : > { %15128 = vmatprep.mubr.msk.bf16.mxu0 %vm1647_vm3, %v15881_v31  ;;  %23040 = vst [vmem:[#allocation272_spill] sm:$0xff] %v19716_v57  ;;  %v19719_v5 = vadd.f32 %v14863_v0, %v5639_v4  ;;  %v23043_v4 = vld [vmem:[#allocation48_spill] sm:$0xff]  ;;  %v15883_v46 = vld [vmem:[%s16147_s15 + $0xa4] sm:$0xff]   ;;  %v7084_v31 = vsel %vm7045_vm7, %v7081_v6, %v7083_v29 }
 0x37d   : > { %v6658_v58 = vpop.f32.mrf.mxu0  ;;  %v14704_v9 = vpop.f32.mrf.mxu1  ;;  %14963 = vmatmul.mubr.msk.bf16.gmra.mxu1 %vm1647_vm3, %v7078_v16  ;;  %v7087_v6 = vrot.slane %v15883_v46, 5 }
 0x37e   : > { %23041 = vst [vmem:[#allocation274_spill] sm:$0xff] %v19719_v5  ;;  %14966 = vmatprep.mubr.msk.bf16.mxu1 %vm1647_vm3, %v7080_v53  ;;  %v23045_v9 = vld [vmem:[#allocation291_spill] sm:$0xff] }
 0x37f   : > { %v14867_v49 = vpop.f32.mrf.mxu0  ;;  %v5309_v51 = vpop.f32.mrf.mxu1 }
 0x380   : > { %v5640_v48 = vadd.f32 %v5309_v51, %v23042_v47 }
 0x381   : > { %v6661_v35 = vpop.f32.mrf.mxu0  ;;  %v14705_v2 = vpop.f32.mrf.mxu1 }
 0x382   : > { %v5642_v0 = vadd.f32 %v14705_v2, %v23043_v4  ;;  %v19730_v16 = vadd.f32 %v6658_v58, %v5640_v48  ;;  %v7085_v58 = vrot.slane %v15882_v19, 5 }
 0x383   : > { %v14870_v30 = vpop.f32.mrf.mxu0  ;;  %15129 = vmatmul.mubr.msk.bf16.gmra.mxu0 %vm1647_vm3, %v15882_v19  ;;  %v5312_v27 = vpop.f32.mrf.mxu1 }
 0x384   : > { %15132 = vmatprep.mubr.msk.bf16.mxu0 %vm1647_vm3, %v15883_v46  ;;  %23044 = vst [vmem:[#allocation276_spill] sm:$0xff] %v19730_v16  ;;  %v5641_v51 = vadd.f32 %v5312_v27, %v23045_v9  ;;  %v19734_v47 = vadd.f32 %v14867_v49, %v5642_v0  ;;  %v7088_v46 = vsel %vm7045_vm7, %v7085_v58, %v7087_v6 }
 0x385   : > { %v6673_v53 = vpop.f32.mrf.mxu0  ;;  %v14708_v5 = vpop.f32.mrf.mxu1  ;;  %14967 = vmatmul.mubr.msk.bf16.gmra.mxu1 %vm1647_vm3, %v7082_v45  ;;  %v7086_v45 = vsel %vm7045_vm7, %v7083_v29, %v7085_v58 }
 0x386   : > { %23046 = vst [vmem:[#allocation39_spill] sm:$0xff] %v19734_v47  ;;  %v5645_v4 = vadd.f32 %v14708_v5, %v23047_v40  ;;  %14970 = vmatprep.mubr.msk.bf16.mxu1 %vm1647_vm3, %v7084_v31  ;;  %v19739_v48 = vadd.f32 %v6661_v35, %v5641_v51  ;;  %v15884_v47 = vld [vmem:[%s16147_s15 + $0xac] sm:$0xff]   ;;  %v15885_v5 = vld [vmem:[%s16147_s15 + $0xb4] sm:$0xff]  }
 0x387   : > { %v14871_v2 = vpop.f32.mrf.mxu0  ;;  %v5324_v16 = vpop.f32.mrf.mxu1  ;;  %v23052_v51 = vld [vmem:[#allocation162_spill] sm:$0xff]  ;;  %v7089_v29 = vrot.slane %v15884_v47, 5 }
 0x388   : > { %23048 = vst [vmem:[#allocation279_spill] sm:$0xff] %v19739_v48  ;;  %v5643_v27 = vadd.f32 %v5324_v16, %v23049_v15  ;;  %v19742_v9 = vadd.f32 %v14870_v30, %v5645_v4  ;;  %v23053_v2 = vld [vmem:[#allocation56_spill] sm:$0xff] }
 0x389   : > { %v6676_v57 = vpop.f32.mrf.mxu0  ;;  %v14709_v49 = vpop.f32.mrf.mxu1  ;;  %v15886_v48 = vld [vmem:[%s16147_s15 + $0xbc] sm:$0xff]  }
 0x38a   : > { %23050 = vst [vmem:[#allocation281_spill] sm:$0xff] %v19742_v9  ;;  %v19749_v19 = vadd.f32 %v6673_v53, %v5643_v27  ;;  %v7091_v49 = vrot.slane %v15885_v5, 5 }
 0x38b   : > { %v14874_v0 = vpop.f32.mrf.mxu0  ;;  %15133 = vmatmul.mubr.msk.bf16.gmra.mxu0 %vm1647_vm3, %v15884_v47  ;;  %v5327_v35 = vpop.f32.mrf.mxu1 }
 0x38c   : > { %15136 = vmatprep.mubr.msk.bf16.mxu0 %vm1647_vm3, %v15885_v5  ;;  %23051 = vst [vmem:[#allocation46_spill] sm:$0xff] %v19749_v19  ;;  %v5644_v15 = vadd.f32 %v5327_v35, %v23052_v51  ;;  %v23055_v19 = vld [vmem:[#allocation164_spill] sm:$0xff] }
 0x38d   : > { %v6688_v31 = vpop.f32.mrf.mxu0  ;;  %v14712_v30 = vpop.f32.mrf.mxu1  ;;  %14971 = vmatmul.mubr.msk.bf16.gmra.mxu1 %vm1647_vm3, %v7086_v45  ;;  %v23057_v45 = vld [vmem:[#allocation166_spill] sm:$0xff] }
 0x38e   : > { %v5648_v40 = vadd.f32 %v14712_v30, %v23053_v2  ;;  %14974 = vmatprep.mubr.msk.bf16.mxu1 %vm1647_vm3, %v7088_v46  ;;  %v19756_v4 = vadd.f32 %v6676_v57, %v5644_v15  ;;  %v7090_v30 = vsel %vm7045_vm7, %v7087_v6, %v7089_v29  ;;  %v15887_v46 = vld [vmem:[%s16147_s15 + $0xc4] sm:$0xff]   ;;  %v23061_v6 = vld [vmem:[#allocation167_spill] sm:$0xff] }
 0x38f   : > { %v14875_v16 = vpop.f32.mrf.mxu0  ;;  %v5339_v53 = vpop.f32.mrf.mxu1 }
 0x390   : > { %23054 = vst [vmem:[#allocation285_spill] sm:$0xff] %v19756_v4  ;;  %v5646_v58 = vadd.f32 %v5339_v53, %v23055_v19  ;;  %v19759_v9 = vadd.f32 %v14874_v0, %v5648_v40  ;;  %v7092_v19 = vsel %vm7045_vm7, %v7089_v29, %v7091_v49  ;;  %v23059_v0 = vld [vmem:[#allocation29_spill] sm:$0xff]  ;;  %v7095_v29 = vrot.slane %v15887_v46, 5 }
 0x391   : > { %v6691_v27 = vpop.f32.mrf.mxu0  ;;  %v14713_v35 = vpop.f32.mrf.mxu1 }
 0x392   : > { %23056 = vst [vmem:[#allocation288_spill] sm:$0xff] %v19759_v9  ;;  %v5649_v50 = vadd.f32 %v14713_v35, %v23057_v45  ;;  %v19767_v57 = vadd.f32 %v6688_v31, %v5646_v58  ;;  %v7093_v31 = vrot.slane %v15886_v48, 5  ;;  %v23068_v9 = vld [vmem:[#allocation35_spill] sm:$0xff] }
 0x393   : > { %v14878_v51 = vpop.f32.mrf.mxu0  ;;  %15137 = vmatmul.mubr.msk.bf16.gmra.mxu0 %vm1647_vm3, %v15886_v48  ;;  %v5342_v47 = vpop.f32.mrf.mxu1 }
 0x394   : > { %15140 = vmatprep.mubr.msk.bf16.mxu0 %vm1647_vm3, %v15887_v46  ;;  %23058 = vst [vmem:[#allocation290_spill] sm:$0xff] %v19767_v57  ;;  %v5647_v15 = vadd.f32 %v5342_v47, %v23059_v0  ;;  %v19771_v2 = vadd.f32 %v14875_v16, %v5649_v50  ;;  %v15888_v16 = vld [vmem:[%s16147_s15 + $0xcc] sm:$0xff]  }
 0x395   : > { %v6704_v5 = vpop.f32.mrf.mxu0  ;;  %v14716_v40 = vpop.f32.mrf.mxu1  ;;  %14975 = vmatmul.mubr.msk.bf16.gmra.mxu1 %vm1647_vm3, %v7090_v30  ;;  %v23064_v30 = vld [vmem:[#allocation168_spill] sm:$0xff] }
 0x396   : > { %23060 = vst [vmem:[#allocation292_spill] sm:$0xff] %v19771_v2  ;;  %v5651_v35 = vadd.f32 %v14716_v40, %v23061_v6  ;;  %14978 = vmatprep.mubr.msk.bf16.mxu1 %vm1647_vm3, %v7092_v19  ;;  %v19776_v58 = vadd.f32 %v6691_v27, %v5647_v15  ;;  %v7094_v2 = vsel %vm7045_vm7, %v7091_v49, %v7093_v31  ;;  %v15889_v40 = vld [vmem:[%s16147_s15 + $0xd4] sm:$0xff]   ;;  %v7097_v49 = vrot.slane %v15888_v16, 5 }
 0x397   : > { %v14879_v53 = vpop.f32.mrf.mxu0  ;;  %v5355_v45 = vpop.f32.mrf.mxu1  ;;  %v7096_v19 = vsel %vm7045_vm7, %v7093_v31, %v7095_v29  ;;  %v23065_v15 = vld [vmem:[#allocation63_spill] sm:$0xff]  ;;  %v7099_v31 = vrot.slane %v15889_v40, 5 }
 0x398   : > { %23062 = vst [vmem:[#allocation52_spill] sm:$0xff] %v19776_v58  ;;  %v19778_v57 = vadd.f32 %v14878_v51, %v5651_v35  ;;  %v23067_v45 = vld [vmem:[#allocation171_spill] sm:$0xff] }
 0x399   : > { %v6706_v5 = vpop.f32.mrf.mxu0  ;;  %v14717_v47 = vpop.f32.mrf.mxu1 }
 0x39a   : > { %23063 = vst [vmem:[#allocation294_spill] sm:$0xff] %v19778_v57  ;;  %v5652_v0 = vadd.f32 %v14717_v47, %v23064_v30 }
 0x39b   : > { %v14882_v50 = vpop.f32.mrf.mxu0  ;;  %15141 = vmatmul.mubr.msk.bf16.gmra.mxu0 %vm1647_vm3, %v15888_v16  ;;  %v5357_v48 = vpop.f32.mrf.mxu1 }
 0x39c   : > { %15144 = vmatprep.mubr.msk.bf16.mxu0 %vm1647_vm3, %v15889_v40  ;;  %v5650_v46 = vadd.f32 %v5357_v48, %v23065_v15  ;;  %v19788_v51 = vadd.f32 %v14879_v53, %v5652_v0 }
 0x39d   : > { %v6719_v27 = vpop.f32.mrf.mxu0  ;;  %v14720_v6 = vpop.f32.mrf.mxu1  ;;  %14979 = vmatmul.mubr.msk.bf16.gmra.mxu1 %vm1647_vm3, %v7094_v2  ;;  %v23070_v2 = vld [vmem:[#allocation172_spill] sm:$0xff] }
 0x39e   : > { %23066 = vst [vmem:[#allocation297_spill] sm:$0xff] %v19788_v51  ;;  %v5654_v47 = vadd.f32 %v14720_v6, %v23067_v45  ;;  %14982 = vmatprep.mubr.msk.bf16.mxu1 %vm1647_vm3, %v7096_v19  ;;  %v19793_v30 = vadd.f32 %v6706_v5, %v5650_v46  ;;  %v15890_v51 = vld [vmem:[%s16147_s15 + $0xdc] sm:$0xff]   ;;  %v7098_v6 = vsel %vm7045_vm7, %v7095_v29, %v7097_v49  ;;  %v15891_v19 = vld [vmem:[%s16147_s15 + $0xe4] sm:$0xff]  }
 0x39f   : > { %v14883_v35 = vpop.f32.mrf.mxu0  ;;  %v5370_v57 = vpop.f32.mrf.mxu1  ;;  %v7101_v29 = vrot.slane %v15890_v51, 5 }
 0x3a0   : > { %v5653_v48 = vadd.f32 %v5370_v57, %v23068_v9  ;;  %v19796_v15 = vadd.f32 %v14882_v50, %v5654_v47  ;;  %v7100_v9 = vsel %vm7045_vm7, %v7097_v49, %v7099_v31  ;;  %v7103_v47 = vrot.slane %v15891_v19, 5 }
 0x3a1   : > { %v6722_v58 = vpop.f32.mrf.mxu0  ;;  %v14721_v53 = vpop.f32.mrf.mxu1  ;;  %v7102_v49 = vsel %vm7045_vm7, %v7099_v31, %v7101_v29  ;;  %v23078_v31 = vld [vmem:[#allocation177_spill] sm:$0xff] }
 0x3a2   : > { %23069 = vst [vmem:[#allocation6_spill] sm:$0xff] %v19796_v15  ;;  %v5655_v4 = vadd.f32 %v14721_v53, %v23070_v2  ;;  %v19804_v5 = vadd.f32 %v6719_v27, %v5653_v48  ;;  %v23073_v27 = vld [vmem:[#allocation173_spill] sm:$0xff]  ;;  %v15892_v2 = vld [vmem:[%s16147_s15 + $0xec] sm:$0xff]  }
 0x3a3   : > { %v14886_v0 = vpop.f32.mrf.mxu0  ;;  %15145 = vmatmul.mubr.msk.bf16.gmra.mxu0 %vm1647_vm3, %v15890_v51  ;;  %v5373_v58 = vpop.f32.mrf.mxu1  ;;  %v23080_v15 = vld [vmem:[#allocation43_spill] sm:$0xff] }
 0x3a4   : > { %15148 = vmatprep.mubr.msk.bf16.mxu0 %vm1647_vm3, %v15891_v19  ;;  %23071 = vst [vmem:[#allocation302_spill] sm:$0xff] %v19804_v5  ;;  %v19807_v57 = vadd.f32 %v14883_v35, %v5655_v4  ;;  %v23074_v4 = vld [vmem:[#allocation69_spill] sm:$0xff]  ;;  %v15893_v58 = vld [vmem:[%s16147_s15 + $0xf4] sm:$0xff]   ;;  %v7104_v19 = vsel %vm7045_vm7, %v7101_v29, %v7103_v47 }
 0x3a5   : > { %v6734_v16 = vpop.f32.mrf.mxu0  ;;  %v14724_v50 = vpop.f32.mrf.mxu1  ;;  %14983 = vmatmul.mubr.msk.bf16.gmra.mxu1 %vm1647_vm3, %v7098_v6  ;;  %v7107_v29 = vrot.slane %v15893_v58, 5 }
 0x3a6   : > { %23072 = vst [vmem:[#allocation60_spill] sm:$0xff] %v19807_v57  ;;  %14986 = vmatprep.mubr.msk.bf16.mxu1 %vm1647_vm3, %v7100_v9  ;;  %v23076_v50 = vld [vmem:[#allocation175_spill] sm:$0xff] }
 0x3a7   : > { %v14887_v40 = vpop.f32.mrf.mxu0  ;;  %v5385_v46 = vpop.f32.mrf.mxu1 }
 0x3a8   : > { %v5656_v48 = vadd.f32 %v5385_v46, %v23073_v27 }
 0x3a9   : > { %v6737_v45 = vpop.f32.mrf.mxu0  ;;  %v14725_v53 = vpop.f32.mrf.mxu1 }
 0x3aa   : > { %v5658_v35 = vadd.f32 %v14725_v53, %v23074_v4  ;;  %v19818_v6 = vadd.f32 %v6734_v16, %v5656_v48  ;;  %v7105_v16 = vrot.slane %v15892_v2, 5 }
 0x3ab   : > { %v14890_v0 = vpop.f32.mrf.mxu0  ;;  %15149 = vmatmul.mubr.msk.bf16.gmra.mxu0 %vm1647_vm3, %v15892_v2  ;;  %v5388_v51 = vpop.f32.mrf.mxu1 }
 0x3ac   : > { %15152 = vmatprep.mubr.msk.bf16.mxu0 %vm1647_vm3, %v15893_v58  ;;  %23075 = vst [vmem:[#allocation67_spill] sm:$0xff] %v19818_v6  ;;  %v5657_v46 = vadd.f32 %v5388_v51, %v23076_v50  ;;  %v19822_v27 = vadd.f32 %v14887_v40, %v5658_v35  ;;  %v7108_v58 = vsel %vm7045_vm7, %v7105_v16, %v7107_v29 }
 0x3ad   : > { %v6749_v9 = vpop.f32.mrf.mxu0  ;;  %v14728_v57 = vpop.f32.mrf.mxu1  ;;  %14987 = vmatmul.mubr.msk.bf16.gmra.mxu1 %vm1647_vm3, %v7102_v49  ;;  %v7106_v49 = vsel %vm7045_vm7, %v7103_v47, %v7105_v16 }
 0x3ae   : > { %23077 = vst [vmem:[#allocation73_spill] sm:$0xff] %v19822_v27  ;;  %v5661_v4 = vadd.f32 %v14728_v57, %v23078_v31  ;;  %14990 = vmatprep.mubr.msk.bf16.mxu1 %vm1647_vm3, %v7104_v19  ;;  %v19827_v48 = vadd.f32 %v6737_v45, %v5657_v46  ;;  %v15894_v27 = vld [vmem:[%s16147_s15 + $0xfc] sm:$0xff]   ;;  %v15895_v57 = vld [vmem:[%s16147_s15 + $0x104] sm:$0xff]  }
 0x3af   : > { %v14891_v53 = vpop.f32.mrf.mxu0  ;;  %v5400_v6 = vpop.f32.mrf.mxu1  ;;  %v23083_v46 = vld [vmem:[#allocation77_spill] sm:$0xff]  ;;  %v7109_v47 = vrot.slane %v15894_v27, 5 }
 0x3b0   : > { %23079 = vst [vmem:[#allocation81_spill] sm:$0xff] %v19827_v48  ;;  %v5659_v51 = vadd.f32 %v5400_v6, %v23080_v15  ;;  %v19830_v50 = vadd.f32 %v14890_v0, %v5661_v4 }
 0x3b1   : > { %v6752_v5 = vpop.f32.mrf.mxu0  ;;  %v14729_v40 = vpop.f32.mrf.mxu1 }
 0x3b2   : > { %23081 = vst [vmem:[#allocation88_spill] sm:$0xff] %v19830_v50  ;;  %v19837_v2 = vadd.f32 %v6749_v9, %v5659_v51  ;;  %v7111_v51 = vrot.slane %v15895_v57, 5  ;;  %v23084_v40 = vld [vmem:[#allocation179_spill] sm:$0xff] }
 0x3b3   : > { %v14894_v35 = vpop.f32.mrf.mxu0  ;;  %15153 = vmatmul.mubr.msk.bf16.gmra.mxu0 %vm1647_vm3, %v15894_v27  ;;  %v5403_v45 = vpop.f32.mrf.mxu1  ;;  %v15896_v50 = vld [vmem:[%s16147_s15 + $0x10c] sm:$0xff]  }
 0x3b4   : > { %15156 = vmatprep.mubr.msk.bf16.mxu0 %vm1647_vm3, %v15895_v57  ;;  %23082 = vst [vmem:[#allocation95_spill] sm:$0xff] %v19837_v2  ;;  %v5660_v15 = vadd.f32 %v5403_v45, %v23083_v46 }
 0x3b5   : > { %v6764_v19 = vpop.f32.mrf.mxu0  ;;  %v14732_v0 = vpop.f32.mrf.mxu1  ;;  %14991 = vmatmul.mubr.msk.bf16.gmra.mxu1 %vm1647_vm3, %v7106_v49  ;;  %v23086_v49 = vld [vmem:[#allocation181_spill] sm:$0xff] }
 0x3b6   : > { %v5664_v53 = vadd.f32 %v14732_v0, %v18893_v61  ;;  %14994 = vmatprep.mubr.msk.bf16.mxu1 %vm1647_vm3, %v7108_v58  ;;  %v19844_v31 = vadd.f32 %v6752_v5, %v5660_v15  ;;  %v7110_v61 = vsel %vm7045_vm7, %v7107_v29, %v7109_v47  ;;  %v15897_v58 = vld [vmem:[%s16147_s15 + $0x114] sm:$0xff]   ;;  %v7112_v15 = vsel %vm7045_vm7, %v7109_v47, %v7111_v51  ;;  %v23090_v29 = vld [vmem:[#allocation182_spill] sm:$0xff] }
 0x3b7   : > { %v14895_v6 = vpop.f32.mrf.mxu0  ;;  %v5415_v9 = vpop.f32.mrf.mxu1  ;;  %v7115_v47 = vrot.slane %v15897_v58, 5 }
 0x3b8   : > { %v5662_v16 = vadd.f32 %v5415_v9, %v23084_v40  ;;  %v19847_v2 = vadd.f32 %v14894_v35, %v5664_v53  ;;  %v23088_v35 = vld [vmem:[#allocation50_spill] sm:$0xff] }
 0x3b9   : > { %v6767_v4 = vpop.f32.mrf.mxu0  ;;  %v14733_v45 = vpop.f32.mrf.mxu1 }
 0x3ba   : > { %23085 = vst [vmem:[#allocation315_spill] sm:$0xff] %v19847_v2  ;;  %v5665_v48 = vadd.f32 %v14733_v45, %v23086_v49  ;;  %v19855_v5 = vadd.f32 %v6764_v19, %v5662_v16  ;;  %v7113_v19 = vrot.slane %v15896_v50, 5 }
 0x3bb   : > { %v14898_v46 = vpop.f32.mrf.mxu0  ;;  %15157 = vmatmul.mubr.msk.bf16.gmra.mxu0 %vm1647_vm3, %v15896_v50  ;;  %v5418_v27 = vpop.f32.mrf.mxu1 }
 0x3bc   : > { %15160 = vmatprep.mubr.msk.bf16.mxu0 %vm1647_vm3, %v15897_v58  ;;  %23087 = vst [vmem:[#allocation104_spill] sm:$0xff] %v19855_v5  ;;  %v5663_v0 = vadd.f32 %v5418_v27, %v23088_v35  ;;  %v19859_v53 = vadd.f32 %v14895_v6, %v5665_v48  ;;  %v15898_v6 = vld [vmem:[%s16147_s15 + $0x11c] sm:$0xff]  }
 0x3bd   : > { %v6780_v57 = vpop.f32.mrf.mxu0  ;;  %v14736_v9 = vpop.f32.mrf.mxu1  ;;  %14995 = vmatmul.mubr.msk.bf16.gmra.mxu1 %vm1647_vm3, %v7110_v61  ;;  %v23093_v61 = vld [vmem:[#allocation183_spill] sm:$0xff] }
 0x3be   : > { %23089 = vst [vmem:[#allocation316_spill] sm:$0xff] %v19859_v53  ;;  %v5667_v45 = vadd.f32 %v14736_v9, %v23090_v29  ;;  %14998 = vmatprep.mubr.msk.bf16.mxu1 %vm1647_vm3, %v7112_v15  ;;  %v19864_v16 = vadd.f32 %v6767_v4, %v5663_v0  ;;  %v7114_v53 = vsel %vm7045_vm7, %v7111_v51, %v7113_v19  ;;  %v15899_v9 = vld [vmem:[%s16147_s15 + $0x124] sm:$0xff]   ;;  %v7117_v51 = vrot.slane %v15898_v6, 5 }
 0x3bf   : > { %v14899_v40 = vpop.f32.mrf.mxu0  ;;  %v5431_v49 = vpop.f32.mrf.mxu1  ;;  %v7116_v15 = vsel %vm7045_vm7, %v7113_v19, %v7115_v47  ;;  %v7119_v19 = vrot.slane %v15899_v9, 5 }
 0x3c0   : > { %23091 = vst [vmem:[#allocation318_spill] sm:$0xff] %v19864_v16  ;;  %v19866_v5 = vadd.f32 %v14898_v46, %v5667_v45  ;;  %v23095_v45 = vld [vmem:[#allocation84_spill] sm:$0xff]  ;;  %v23096_v16 = vld [vmem:[#allocation185_spill] sm:$0xff] }
 0x3c1   : > { %v6782_v57 = vpop.f32.mrf.mxu0  ;;  %v14737_v27 = vpop.f32.mrf.mxu1 }
 0x3c2   : > { %23092 = vst [vmem:[#allocation320_spill] sm:$0xff] %v19866_v5  ;;  %v5668_v35 = vadd.f32 %v14737_v27, %v23093_v61 }
 0x3c3   : > { %v14902_v48 = vpop.f32.mrf.mxu0  ;;  %15161 = vmatmul.mubr.msk.bf16.gmra.mxu0 %vm1647_vm3, %v15898_v6  ;;  %v5433_v50 = vpop.f32.mrf.mxu1 }
 0x3c4   : > { %15164 = vmatprep.mubr.msk.bf16.mxu0 %vm1647_vm3, %v15899_v9  ;;  %v5666_v58 = vadd.f32 %v5433_v50, %v18946_v18  ;;  %v19876_v46 = vadd.f32 %v14899_v40, %v5668_v35 }
 0x3c5   : > { %v6795_v4 = vpop.f32.mrf.mxu0  ;;  %v14740_v0 = vpop.f32.mrf.mxu1  ;;  %14999 = vmatmul.mubr.msk.bf16.gmra.mxu1 %vm1647_vm3, %v7114_v53  ;;  %v23098_v53 = vld [vmem:[#allocation57_spill] sm:$0xff] }
 0x3c6   : > { %23094 = vst [vmem:[#allocation112_spill] sm:$0xff] %v19876_v46  ;;  %v5670_v49 = vadd.f32 %v14740_v0, %v23095_v45  ;;  %15002 = vmatprep.mubr.msk.bf16.mxu1 %vm1647_vm3, %v7116_v15  ;;  %v19881_v27 = vadd.f32 %v6782_v57, %v5666_v58  ;;  %v15900_v46 = vld [vmem:[%s16147_s15 + $0x12c] sm:$0xff]   ;;  %v7118_v0 = vsel %vm7045_vm7, %v7115_v47, %v7117_v51  ;;  %v15901_v15 = vld [vmem:[%s16147_s15 + $0x134] sm:$0xff]  }
 0x3c7   : > { %v14903_v29 = vpop.f32.mrf.mxu0  ;;  %v5446_v61 = vpop.f32.mrf.mxu1  ;;  %v7121_v47 = vrot.slane %v15900_v46, 5 }
 0x3c8   : > { %v5669_v18 = vadd.f32 %v5446_v61, %v23096_v16  ;;  %v19884_v50 = vadd.f32 %v14902_v48, %v5670_v49  ;;  %v7120_v16 = vsel %vm7045_vm7, %v7117_v51, %v7119_v19  ;;  %v7123_v61 = vrot.slane %v15901_v15, 5 }
 0x3c9   : > { %v6798_v5 = vpop.f32.mrf.mxu0  ;;  %v14741_v40 = vpop.f32.mrf.mxu1  ;;  %v7122_v51 = vsel %vm7045_vm7, %v7119_v19, %v7121_v47  ;;  %v23106_v19 = vld [vmem:[#allocation190_spill] sm:$0xff] }
 0x3ca   : > { %23097 = vst [vmem:[#allocation321_spill] sm:$0xff] %v19884_v50  ;;  %v5671_v2 = vadd.f32 %v14741_v40, %v23098_v53  ;;  %v19892_v57 = vadd.f32 %v6795_v4, %v5669_v18  ;;  %v23101_v4 = vld [vmem:[#allocation187_spill] sm:$0xff]  ;;  %v15902_v53 = vld [vmem:[%s16147_s15 + $0x13c] sm:$0xff]  }
 0x3cb   : > { %v14906_v35 = vpop.f32.mrf.mxu0  ;;  %15165 = vmatmul.mubr.msk.bf16.gmra.mxu0 %vm1647_vm3, %v15900_v46  ;;  %v5449_v5 = vpop.f32.mrf.mxu1  ;;  %v23107_v50 = vld [vmem:[#allocation192_spill] sm:$0xff] }
 0x3cc   : > { %15168 = vmatprep.mubr.msk.bf16.mxu0 %vm1647_vm3, %v15901_v15  ;;  %23099 = vst [vmem:[#allocation322_spill] sm:$0xff] %v19892_v57  ;;  %v19895_v48 = vadd.f32 %v14903_v29, %v5671_v2  ;;  %v23102_v2 = vld [vmem:[#allocation188_spill] sm:$0xff]  ;;  %v15903_v5 = vld [vmem:[%s16147_s15 + $0x144] sm:$0xff]   ;;  %v7124_v15 = vsel %vm7045_vm7, %v7121_v47, %v7123_v61 }
 0x3cd   : > { %v6810_v6 = vpop.f32.mrf.mxu0  ;;  %v14744_v9 = vpop.f32.mrf.mxu1  ;;  %15003 = vmatmul.mubr.msk.bf16.gmra.mxu1 %vm1647_vm3, %v7118_v0  ;;  %v7127_v47 = vrot.slane %v15903_v5, 5 }
 0x3ce   : > { %23100 = vst [vmem:[#allocation120_spill] sm:$0xff] %v19895_v48  ;;  %15006 = vmatprep.mubr.msk.bf16.mxu1 %vm1647_vm3, %v7120_v16  ;;  %v23104_v9 = vld [vmem:[#allocation91_spill] sm:$0xff] }
 0x3cf   : > { %v14907_v58 = vpop.f32.mrf.mxu0  ;;  %v5461_v45 = vpop.f32.mrf.mxu1 }
 0x3d0   : > { %v5672_v18 = vadd.f32 %v5461_v45, %v23101_v4 }
 0x3d1   : > { %v6813_v49 = vpop.f32.mrf.mxu0  ;;  %v14745_v40 = vpop.f32.mrf.mxu1 }
 0x3d2   : > { %v5674_v29 = vadd.f32 %v14745_v40, %v23102_v2  ;;  %v19906_v0 = vadd.f32 %v6810_v6, %v5672_v18  ;;  %v7125_v6 = vrot.slane %v15902_v53, 5 }
 0x3d3   : > { %v14910_v35 = vpop.f32.mrf.mxu0  ;;  %15169 = vmatmul.mubr.msk.bf16.gmra.mxu0 %vm1647_vm3, %v15902_v53  ;;  %v5464_v46 = vpop.f32.mrf.mxu1 }
 0x3d4   : > { %15172 = vmatprep.mubr.msk.bf16.mxu0 %vm1647_vm3, %v15903_v5  ;;  %23103 = vst [vmem:[#allocation325_spill] sm:$0xff] %v19906_v0  ;;  %v5673_v45 = vadd.f32 %v5464_v46, %v23104_v9  ;;  %v19910_v4 = vadd.f32 %v14907_v58, %v5674_v29  ;;  %v7128_v5 = vsel %vm7045_vm7, %v7125_v6, %v7127_v47 }
 0x3d5   : > { %v6825_v16 = vpop.f32.mrf.mxu0  ;;  %v14748_v48 = vpop.f32.mrf.mxu1  ;;  %15007 = vmatmul.mubr.msk.bf16.gmra.mxu1 %vm1647_vm3, %v7122_v51  ;;  %v7126_v51 = vsel %vm7045_vm7, %v7123_v61, %v7125_v6 }
 0x3d6   : > { %23105 = vst [vmem:[#allocation326_spill] sm:$0xff] %v19910_v4  ;;  %v5677_v2 = vadd.f32 %v14748_v48, %v23106_v19  ;;  %15010 = vmatprep.mubr.msk.bf16.mxu1 %vm1647_vm3, %v7124_v15  ;;  %v19915_v18 = vadd.f32 %v6813_v49, %v5673_v45  ;;  %v15904_v4 = vld [vmem:[%s16147_s15 + $0x14c] sm:$0xff]   ;;  %v15905_v48 = vld [vmem:[%s16147_s15 + $0x154] sm:$0xff]  }
 0x3d7   : > { %v14911_v40 = vpop.f32.mrf.mxu0  ;;  %v5476_v0 = vpop.f32.mrf.mxu1  ;;  %v23110_v45 = vld [vmem:[#allocation64_spill] sm:$0xff]  ;;  %v7129_v61 = vrot.slane %v15904_v4, 5 }
 0x3d8   : > { %v5675_v46 = vadd.f32 %v5476_v0, %v23107_v50  ;;  %v19918_v9 = vadd.f32 %v14910_v35, %v5677_v2 }
 0x3d9   : > { %v6828_v57 = vpop.f32.mrf.mxu0  ;;  %v14749_v58 = vpop.f32.mrf.mxu1 }
 0x3da   : > { %23108 = vst [vmem:[#allocation327_spill] sm:$0xff] %v19918_v9  ;;  %v19925_v53 = vadd.f32 %v6825_v16, %v5675_v46  ;;  %v7131_v46 = vrot.slane %v15905_v48, 5 }
 0x3db   : > { %v14914_v29 = vpop.f32.mrf.mxu0  ;;  %15173 = vmatmul.mubr.msk.bf16.gmra.mxu0 %vm1647_vm3, %v15904_v4  ;;  %v5479_v49 = vpop.f32.mrf.mxu1 }
 0x3dc   : > { %15176 = vmatprep.mubr.msk.bf16.mxu0 %vm1647_vm3, %v15905_v48  ;;  %23109 = vst [vmem:[#allocation210_spill] sm:$0xff] %v19925_v53  ;;  %v5676_v50 = vadd.f32 %v5479_v49, %v23110_v45  ;;  %v15906_v53 = vld [vmem:[%s16147_s15 + $0x15c] sm:$0xff]  }
 0x3dd   : > { %v6840_v15 = vpop.f32.mrf.mxu0  ;;  %v14752_v35 = vpop.f32.mrf.mxu1  ;;  %15011 = vmatmul.mubr.msk.bf16.gmra.mxu1 %vm1647_vm3, %v7126_v51  ;;  %v23112_v51 = vld [vmem:[#allocation193_spill] sm:$0xff] }
 0x3de   : > { %v5680_v40 = vadd.f32 %v14752_v35, %v19045_v41  ;;  %15014 = vmatprep.mubr.msk.bf16.mxu1 %vm1647_vm3, %v7128_v5  ;;  %v19932_v19 = vadd.f32 %v6828_v57, %v5676_v50  ;;  %v7130_v41 = vsel %vm7045_vm7, %v7127_v47, %v7129_v61  ;;  %v15907_v5 = vld [vmem:[%s16147_s15 + $0x164] sm:$0xff]   ;;  %v23116_v47 = vld [vmem:[#allocation100_spill] sm:$0xff] }
 0x3df   : > { %v14915_v0 = vpop.f32.mrf.mxu0  ;;  %v5491_v16 = vpop.f32.mrf.mxu1 }
 0x3e0   : > { %v5678_v6 = vadd.f32 %v5491_v16, %v19051_v26  ;;  %v19935_v58 = vadd.f32 %v14914_v29, %v5680_v40  ;;  %v7132_v26 = vsel %vm7045_vm7, %v7129_v61, %v7131_v46  ;;  %v23114_v29 = vld [vmem:[#allocation194_spill] sm:$0xff]  ;;  %v7135_v61 = vrot.slane %v15907_v5, 5 }
 0x3e1   : > { %v6843_v2 = vpop.f32.mrf.mxu0  ;;  %v14753_v49 = vpop.f32.mrf.mxu1 }
 0x3e2   : > { %23111 = vst [vmem:[#allocation128_spill] sm:$0xff] %v19935_v58  ;;  %v5681_v9 = vadd.f32 %v14753_v49, %v23112_v51  ;;  %v19943_v57 = vadd.f32 %v6840_v15, %v5678_v6  ;;  %v7133_v15 = vrot.slane %v15906_v53, 5 }
 0x3e3   : > { %v14918_v45 = vpop.f32.mrf.mxu0  ;;  %15177 = vmatmul.mubr.msk.bf16.gmra.mxu0 %vm1647_vm3, %v15906_v53  ;;  %v5494_v4 = vpop.f32.mrf.mxu1 }
 0x3e4   : > { %15180 = vmatprep.mubr.msk.bf16.mxu0 %vm1647_vm3, %v15907_v5  ;;  %23113 = vst [vmem:[#allocation329_spill] sm:$0xff] %v19943_v57  ;;  %v5679_v50 = vadd.f32 %v5494_v4, %v23114_v29  ;;  %v19947_v35 = vadd.f32 %v14915_v0, %v5681_v9  ;;  %v15908_v0 = vld [vmem:[%s16147_s15 + $0x16c] sm:$0xff]  }
 0x3e5   : > { %v6856_v48 = vpop.f32.mrf.mxu0  ;;  %v14756_v40 = vpop.f32.mrf.mxu1  ;;  %15015 = vmatmul.mubr.msk.bf16.gmra.mxu1 %vm1647_vm3, %v7130_v41  ;;  %v23119_v41 = vld [vmem:[#allocation197_spill] sm:$0xff] }
 0x3e6   : > { %23115 = vst [vmem:[#allocation330_spill] sm:$0xff] %v19947_v35  ;;  %v5683_v49 = vadd.f32 %v14756_v40, %v23116_v47  ;;  %15018 = vmatprep.mubr.msk.bf16.mxu1 %vm1647_vm3, %v7132_v26  ;;  %v19952_v6 = vadd.f32 %v6843_v2, %v5679_v50  ;;  %v7134_v35 = vsel %vm7045_vm7, %v7131_v46, %v7133_v15  ;;  %v15909_v40 = vld [vmem:[%s16147_s15 + $0x174] sm:$0xff]   ;;  %v7137_v46 = vrot.slane %v15908_v0, 5 }
 0x3e7   : > { %v14919_v16 = vpop.f32.mrf.mxu0  ;;  %v5507_v51 = vpop.f32.mrf.mxu1  ;;  %v7136_v26 = vsel %vm7045_vm7, %v7133_v15, %v7135_v61  ;;  %v7139_v15 = vrot.slane %v15909_v40, 5 }
 0x3e8   : > { %23117 = vst [vmem:[#allocation332_spill] sm:$0xff] %v19952_v6  ;;  %v19954_v57 = vadd.f32 %v14918_v45, %v5683_v49  ;;  %v23121_v49 = vld [vmem:[#allocation71_spill] sm:$0xff]  ;;  %v23122_v6 = vld [vmem:[#allocation198_spill] sm:$0xff] }
 0x3e9   : > { %v6858_v48 = vpop.f32.mrf.mxu0  ;;  %v14757_v4 = vpop.f32.mrf.mxu1 }
 0x3ea   : > { %23118 = vst [vmem:[#allocation136_spill] sm:$0xff] %v19954_v57  ;;  %v5684_v29 = vadd.f32 %v14757_v4, %v23119_v41 }
 0x3eb   : > { %v14922_v9 = vpop.f32.mrf.mxu0  ;;  %15181 = vmatmul.mubr.msk.bf16.gmra.mxu0 %vm1647_vm3, %v15908_v0  ;;  %v5509_v53 = vpop.f32.mrf.mxu1 }
 0x3ec   : > { %15184 = vmatprep.mubr.msk.bf16.mxu0 %vm1647_vm3, %v15909_v40  ;;  %v5682_v5 = vadd.f32 %v5509_v53, %v19094_v42  ;;  %v19964_v45 = vadd.f32 %v14919_v16, %v5684_v29 }
 0x3ed   : > { %v6871_v2 = vpop.f32.mrf.mxu0  ;;  %v14760_v50 = vpop.f32.mrf.mxu1  ;;  %15019 = vmatmul.mubr.msk.bf16.gmra.mxu1 %vm1647_vm3, %v7134_v35  ;;  %v23123_v35 = vld [vmem:[#allocation199_spill] sm:$0xff] }
 0x3ee   : > { %23120 = vst [vmem:[#allocation217_spill] sm:$0xff] %v19964_v45  ;;  %v5686_v51 = vadd.f32 %v14760_v50, %v23121_v49  ;;  %15022 = vmatprep.mubr.msk.bf16.mxu1 %vm1647_vm3, %v7136_v26  ;;  %v19969_v4 = vadd.f32 %v6858_v48, %v5682_v5  ;;  %v15910_v45 = vld [vmem:[%s16147_s15 + $0x17c] sm:$0xff]   ;;  %v7138_v50 = vsel %vm7045_vm7, %v7135_v61, %v7137_v46  ;;  %v15911_v26 = vld [vmem:[%s16147_s15 + $0x184] sm:$0xff]  }
 0x3ef   : > { %v14923_v47 = vpop.f32.mrf.mxu0  ;;  %v5522_v41 = vpop.f32.mrf.mxu1  ;;  %v7141_v61 = vrot.slane %v15910_v45, 5 }
 0x3f0   : > { %v5685_v42 = vadd.f32 %v5522_v41, %v23122_v6  ;;  %v19972_v53 = vadd.f32 %v14922_v9, %v5686_v51  ;;  %v7140_v6 = vsel %vm7045_vm7, %v7137_v46, %v7139_v15  ;;  %v7143_v41 = vrot.slane %v15911_v26, 5 }
 0x3f1   : > { %v6874_v57 = vpop.f32.mrf.mxu0  ;;  %v14761_v16 = vpop.f32.mrf.mxu1  ;;  %v7142_v46 = vsel %vm7045_vm7, %v7139_v15, %v7141_v61  ;;  %v23130_v15 = vld [vmem:[#allocation203_spill] sm:$0xff] }
 0x3f2   : > { %v5687_v58 = vadd.f32 %v14761_v16, %v23123_v35  ;;  %v19980_v48 = vadd.f32 %v6871_v2, %v5685_v42  ;;  %v15913_v35 = vld [vmem:[%s16147_s15 + $0x194] sm:$0xff]  }
 0x3f3   : > { %v14926_v29 = vpop.f32.mrf.mxu0  ;;  %15185 = vmatmul.mubr.msk.bf16.gmra.mxu0 %vm1647_vm3, %v15910_v45  ;;  %v5525_v57 = vpop.f32.mrf.mxu1 }
 0x3f4   : > { %15188 = vmatprep.mubr.msk.bf16.mxu0 %vm1647_vm3, %v15911_v26  ;;  %23124 = vst [vmem:[#allocation97_spill] sm:$0xff] %v19980_v48  ;;  %v19983_v9 = vadd.f32 %v14923_v47, %v5687_v58  ;;  %v15912_v29 = vld [vmem:[%s16147_s15 + $0x18c] sm:$0xff]   ;;  %v23126_v58 = vld [vmem:[#allocation108_spill] sm:$0xff]  ;;  %v7144_v26 = vsel %vm7045_vm7, %v7141_v61, %v7143_v41  ;;  %v7147_v61 = vrot.slane %v15913_v35, 5 }
 0x3f5   : > { %v6886_v0 = vpop.f32.mrf.mxu0  ;;  %v14764_v40 = vpop.f32.mrf.mxu1  ;;  %15023 = vmatmul.mubr.msk.bf16.gmra.mxu1 %vm1647_vm3, %v7138_v50  ;;  %v23131_v48 = vld [vmem:[#allocation78_spill] sm:$0xff] }
 0x3f6   : > { %23125 = vst [vmem:[#allocation223_spill] sm:$0xff] %v19983_v9  ;;  %15026 = vmatprep.mubr.msk.bf16.mxu1 %vm1647_vm3, %v7140_v6  ;;  %v23128_v6 = vld [vmem:[#allocation201_spill] sm:$0xff] }
 0x3f7   : > { %v14927_v5 = vpop.f32.mrf.mxu0  ;;  %v5537_v49 = vpop.f32.mrf.mxu1 }
 0x3f8   : > { %v5688_v2 = vadd.f32 %v5537_v49, %v19132_v11 }
 0x3f9   : > { %v6889_v51 = vpop.f32.mrf.mxu0  ;;  %v14765_v42 = vpop.f32.mrf.mxu1 }
 0x3fa   : > { %v5690_v47 = vadd.f32 %v14765_v42, %v23126_v58  ;;  %v19994_v50 = vadd.f32 %v6886_v0, %v5688_v2  ;;  %v7145_v0 = vrot.slane %v15912_v29, 5 }
 0x3fb   : > { %v14930_v16 = vpop.f32.mrf.mxu0  ;;  %15189 = vmatmul.mubr.msk.bf16.gmra.mxu0 %vm1647_vm3, %v15912_v29  ;;  %v5540_v45 = vpop.f32.mrf.mxu1 }
 0x3fc   : > { %15192 = vmatprep.mubr.msk.bf16.mxu0 %vm1647_vm3, %v15913_v35  ;;  %23127 = vst [vmem:[#allocation334_spill] sm:$0xff] %v19994_v50  ;;  %v5689_v11 = vadd.f32 %v5540_v45, %v23128_v6  ;;  %v19998_v40 = vadd.f32 %v14927_v5, %v5690_v47  ;;  %v7148_v35 = vsel %vm7045_vm7, %v7145_v0, %v7147_v61 }
 0x3fd   : > { %v6901_v57 = vpop.f32.mrf.mxu0  ;;  %v14768_v49 = vpop.f32.mrf.mxu1  ;;  %15027 = vmatmul.mubr.msk.bf16.gmra.mxu1 %vm1647_vm3, %v7142_v46  ;;  %v7146_v46 = vsel %vm7045_vm7, %v7143_v41, %v7145_v0 }
 0x3fe   : > { %23129 = vst [vmem:[#allocation144_spill] sm:$0xff] %v19998_v40  ;;  %v5693_v58 = vadd.f32 %v14768_v49, %v23130_v15  ;;  %15030 = vmatprep.mubr.msk.bf16.mxu1 %vm1647_vm3, %v7144_v26  ;;  %v20003_v2 = vadd.f32 %v6889_v51, %v5689_v11  ;;  %v15914_v40 = vld [vmem:[%s16147_s15 + $0x19c] sm:$0xff]   ;;  %v15915_v49 = vld [vmem:[%s16147_s15 + $0x1a4] sm:$0xff]  }
 0x3ff   : > { %v14931_v42 = vpop.f32.mrf.mxu0  ;;  %v5552_v50 = vpop.f32.mrf.mxu1  ;;  %v7149_v41 = vrot.slane %v15914_v40, 5 }
 0x400   : > { %v5691_v45 = vadd.f32 %v5552_v50, %v23131_v48  ;;  %v20006_v6 = vadd.f32 %v14930_v16, %v5693_v58  ;;  %v7151_v58 = vrot.slane %v15915_v49, 5 }
 0x401   : > { %v6904_v9 = vpop.f32.mrf.mxu0  ;;  %v14769_v5 = vpop.f32.mrf.mxu1 }
 0x402   : > { %v20013_v29 = vadd.f32 %v6901_v57, %v5691_v45 }
 0x403   : > { %v15098_v47 = vpop.f32.mrf.mxu0  ;;  %15193 = vmatmul.mubr.msk.bf16.gmra.mxu0 %vm1647_vm3, %v15914_v40  ;;  %v5555_v51 = vpop.f32.mrf.mxu1 }
 0x404   : > { %15196 = vmatprep.mubr.msk.bf16.mxu0 %vm1647_vm3, %v15915_v49  ;;  %v5692_v48 = vadd.f32 %v5555_v51, %v19180_v24  ;;  %v15916_v51 = vld [vmem:[%s16147_s15 + $0x1ac] sm:$0xff]  }
 0x405   : > { %v8270_v26 = vpop.f32.mrf.mxu0  ;;  %v14936_v16 = vpop.f32.mrf.mxu1  ;;  %15031 = vmatmul.mubr.msk.bf16.gmra.mxu1 %vm1647_vm3, %v7146_v46 }
 0x406   : > { %v8093_v11 = vadd.f32 %v14936_v16, %v19192_v39  ;;  %15034 = vmatprep.mubr.msk.bf16.mxu1 %vm1647_vm3, %v7148_v35  ;;  %v20020_v42 = vadd.f32 %v6904_v9, %v5692_v48  ;;  %v7150_v39 = vsel %vm7045_vm7, %v7147_v61, %v7149_v41  ;;  %v15917_v35 = vld [vmem:[%s16147_s15 + $0x1b4] sm:$0xff]  }
 0x407   : > { %v15099_v50 = vpop.f32.mrf.mxu0  ;;  %v7484_v57 = vpop.f32.mrf.mxu1 }
 0x408   : > { %v8091_v0 = vadd.f32 %v7484_v57, %v19199_v25  ;;  %v20023_v45 = vadd.f32 %v15098_v47, %v8093_v11  ;;  %v7152_v25 = vsel %vm7045_vm7, %v7149_v41, %v7151_v58  ;;  %v7155_v41 = vrot.slane %v15917_v35, 5 }
 0x409   : > { %v8273_v15 = vpop.f32.mrf.mxu0  ;;  %v14937_v24 = vpop.f32.mrf.mxu1 }
 0x40a   : > { %v8094_v46 = vadd.f32 %v14937_v24, %v19203_v63  ;;  %v20031_v9 = vadd.f32 %v8270_v26, %v8091_v0  ;;  %v7153_v26 = vrot.slane %v15916_v51, 5 }
 0x40b   : > { %v15102_v5 = vpop.f32.mrf.mxu0  ;;  %15197 = vmatmul.mubr.msk.bf16.gmra.mxu0 %vm1647_vm3, %v15916_v51  ;;  %v7487_v40 = vpop.f32.mrf.mxu1 }
 0x40c   : > { %15200 = vmatprep.mubr.msk.bf16.mxu0 %vm1647_vm3, %v15917_v35  ;;  %v8092_v47 = vadd.f32 %v7487_v40, %v19211_v20  ;;  %v20035_v48 = vadd.f32 %v15099_v50, %v8094_v46  ;;  %v15918_v46 = vld [vmem:[%s16147_s15 + $0x1bc] sm:$0xff]   ;;  %v7154_v40 = vsel %vm7045_vm7, %v7151_v58, %v7153_v26 }
 0x40d   : > { %v8286_v49 = vpop.f32.mrf.mxu0  ;;  %v14940_v16 = vpop.f32.mrf.mxu1  ;;  %15035 = vmatmul.mubr.msk.bf16.gmra.mxu1 %vm1647_vm3, %v7150_v39  ;;  %v7157_v58 = vrot.slane %v15918_v46, 5 }
 0x40e   : > { %v8096_v61 = vadd.f32 %v14940_v16, %v19220_v28  ;;  %15038 = vmatprep.mubr.msk.bf16.mxu1 %vm1647_vm3, %v7152_v25  ;;  %v20040_v11 = vadd.f32 %v8273_v15, %v8092_v47  ;;  %v15919_v28 = vld [vmem:[%s16147_s15 + $0x1c4] sm:$0xff]   ;;  %v7156_v49 = vsel %vm7045_vm7, %v7153_v26, %v7155_v41 }
 0x40f   : > { %v15103_v63 = vpop.f32.mrf.mxu0  ;;  %v7500_v57 = vpop.f32.mrf.mxu1  ;;  %v7159_v26 = vrot.slane %v15919_v28, 5 }
 0x410   : > { %v20042_v24 = vadd.f32 %v15102_v5, %v8096_v61 }
 0x411   : > { %v8288_v0 = vpop.f32.mrf.mxu0  ;;  %v14941_v20 = vpop.f32.mrf.mxu1 }
 0x412   : > { %v8097_v39 = vadd.f32 %v14941_v20, %v19228_v14 }
 0x413   : > { %v15106_v50 = vpop.f32.mrf.mxu0  ;;  %15201 = vmatmul.mubr.msk.bf16.gmra.mxu0 %vm1647_vm3, %v15918_v46  ;;  %v7502_v51 = vpop.f32.mrf.mxu1 }
 0x414   : > { %15204 = vmatprep.mubr.msk.bf16.mxu0 %vm1647_vm3, %v15919_v28  ;;  %v8095_v35 = vadd.f32 %v7502_v51, %v19236_v32  ;;  %v20052_v5 = vadd.f32 %v15103_v63, %v8097_v39  ;;  %v15920_v51 = vld [vmem:[%s16147_s15 + $0x1cc] sm:$0xff]  }
 0x415   : > { %v8301_v15 = vpop.f32.mrf.mxu0  ;;  %v14944_v25 = vpop.f32.mrf.mxu1  ;;  %15039 = vmatmul.mubr.msk.bf16.gmra.mxu1 %vm1647_vm3, %v7154_v40 }
 0x416   : > { %v8099_v14 = vadd.f32 %v14944_v25, %v19246_v33  ;;  %15042 = vmatprep.mubr.msk.bf16.mxu1 %vm1647_vm3, %v7156_v49  ;;  %v20057_v16 = vadd.f32 %v8288_v0, %v8095_v35  ;;  %v7158_v33 = vsel %vm7045_vm7, %v7155_v41, %v7157_v58  ;;  %v15921_v49 = vld [vmem:[%s16147_s15 + $0x1d4] sm:$0xff]  }
 0x417   : > { %v15107_v47 = vpop.f32.mrf.mxu0  ;;  %v7515_v61 = vpop.f32.mrf.mxu1 }
 0x418   : > { %v8098_v32 = vadd.f32 %v7515_v61, %v19252_v34  ;;  %v20060_v20 = vadd.f32 %v15106_v50, %v8099_v14  ;;  %v7160_v34 = vsel %vm7045_vm7, %v7157_v58, %v7159_v26  ;;  %v7163_v61 = vrot.slane %v15921_v49, 5 }
 0x419   : > { %v8304_v57 = vpop.f32.mrf.mxu0  ;;  %v14945_v63 = vpop.f32.mrf.mxu1 }
 0x41a   : > { %v8100_v40 = vadd.f32 %v14945_v63, %v19255_v10  ;;  %v20068_v0 = vadd.f32 %v8301_v15, %v8098_v32  ;;  %v7161_v10 = vrot.slane %v15920_v51, 5  ;;  %v15922_v63 = vld [vmem:[%s16147_s15 + $0x1dc] sm:$0xff]  }
 0x41b   : > { %v15110_v39 = vpop.f32.mrf.mxu0  ;;  %15205 = vmatmul.mubr.msk.bf16.gmra.mxu0 %vm1647_vm3, %v15920_v51  ;;  %v7518_v46 = vpop.f32.mrf.mxu1 }
 0x41c   : > { %15208 = vmatprep.mubr.msk.bf16.mxu0 %vm1647_vm3, %v15921_v49  ;;  %v20071_v50 = vadd.f32 %v15107_v47, %v8100_v40  ;;  %v7162_v58 = vsel %vm7045_vm7, %v7159_v26, %v7161_v10  ;;  %v15923_v39 = vld [vmem:[%s16147_s15 + $0x1e4] sm:$0xff]   ;;  %v7164_v49 = vsel %vm7045_vm7, %v7161_v10, %v7163_v61 }
 0x41d   : > { %v8316_v28 = vpop.f32.mrf.mxu0  ;;  %v14948_v35 = vpop.f32.mrf.mxu1  ;;  %15043 = vmatmul.mubr.msk.bf16.gmra.mxu1 %vm1647_vm3, %v7158_v33  ;;  %v7167_v10 = vrot.slane %v15923_v39, 5 }
 0x41e   : > { %15046 = vmatprep.mubr.msk.bf16.mxu1 %vm1647_vm3, %v7160_v34 }
 0x41f   : > { %v15111_v25 = vpop.f32.mrf.mxu0  ;;  %v7530_v41 = vpop.f32.mrf.mxu1 }
 0x420   : > { %v8101_v15 = vadd.f32 %v7530_v41, %v19274_v37 }
 0x421   : > { %v8319_v14 = vpop.f32.mrf.mxu0  ;;  %v14949_v57 = vpop.f32.mrf.mxu1 }
 0x422   : > { %v8103_v47 = vadd.f32 %v14949_v57, %v19278_v38  ;;  %v20082_v40 = vadd.f32 %v8316_v28, %v8101_v15  ;;  %v7165_v28 = vrot.slane %v15922_v63, 5 }
 0x423   : > { %v15114_v32 = vpop.f32.mrf.mxu0  ;;  %15209 = vmatmul.mubr.msk.bf16.gmra.mxu0 %vm1647_vm3, %v15922_v63  ;;  %v7533_v51 = vpop.f32.mrf.mxu1 }
 0x424   : > { %15212 = vmatprep.mubr.msk.bf16.mxu0 %vm1647_vm3, %v15923_v39  ;;  %v8102_v37 = vadd.f32 %v7533_v51, %v19286_v7  ;;  %v20086_v46 = vadd.f32 %v15111_v25, %v8103_v47  ;;  %v15924_v51 = vld [vmem:[%s16147_s15 + $0x1ec] sm:$0xff]   ;;  %v7168_v39 = vsel %vm7045_vm7, %v7165_v28, %v7167_v10 }
 0x425   : > { %v8331_v33 = vpop.f32.mrf.mxu0  ;;  %v14952_v34 = vpop.f32.mrf.mxu1  ;;  %15047 = vmatmul.mubr.msk.bf16.gmra.mxu1 %vm1647_vm3, %v7162_v58  ;;  %v7166_v58 = vsel %vm7045_vm7, %v7163_v61, %v7165_v28  ;;  %v7169_v61 = vrot.slane %v15924_v51, 5 }
 0x426   : > { %v8106_v26 = vadd.f32 %v14952_v34, %v19296_v44  ;;  %15050 = vmatprep.mubr.msk.bf16.mxu1 %vm1647_vm3, %v7164_v49  ;;  %v20091_v35 = vadd.f32 %v8319_v14, %v8102_v37  ;;  %v15925_v44 = vld [vmem:[%s16147_s15 + $0x1f4] sm:$0xff]  }
 0x427   : > { %v15115_v38 = vpop.f32.mrf.mxu0  ;;  %v7545_v41 = vpop.f32.mrf.mxu1 }
 0x428   : > { %v8104_v7 = vadd.f32 %v7545_v41, %v19301_v55  ;;  %v20094_v57 = vadd.f32 %v15114_v32, %v8106_v26  ;;  %v7171_v41 = vrot.slane %v15925_v44, 5 }
 0x429   : > { %v8334_v15 = vpop.f32.mrf.mxu0  ;;  %v14953_v25 = vpop.f32.mrf.mxu1 }
 0x42a   : > { %v20101_v63 = vadd.f32 %v8331_v33, %v8104_v7 }
 0x42b   : > { %v15118_v47 = vpop.f32.mrf.mxu0  ;;  %15213 = vmatmul.mubr.msk.bf16.gmra.mxu0 %vm1647_vm3, %v15924_v51  ;;  %v7548_v14 = vpop.f32.mrf.mxu1 }
 0x42c   : > { %15216 = vmatprep.mubr.msk.bf16.mxu0 %vm1647_vm3, %v15925_v44  ;;  %v8105_v55 = vadd.f32 %v7548_v14, %v19311_v62  ;;  %v15926_v14 = vld [vmem:[%s16147_s15 + $0x1fc] sm:$0xff]  }
 0x42d   : > { %v8346_v49 = vpop.f32.mrf.mxu0  ;;  %v14956_v32 = vpop.f32.mrf.mxu1  ;;  %15051 = vmatmul.mubr.msk.bf16.gmra.mxu1 %vm1647_vm3, %v7166_v58 }
 0x42e   : > { %v8109_v34 = vadd.f32 %v14956_v32, %v19321_v13  ;;  %15054 = vmatprep.mubr.msk.bf16.mxu1 %vm1647_vm3, %v7168_v39  ;;  %v20108_v38 = vadd.f32 %v8334_v15, %v8105_v55  ;;  %v7170_v13 = vsel %vm7045_vm7, %v7167_v10, %v7169_v61  ;;  %v15927_v39 = vld [vmem:[%s16147_s15 + $0x204] sm:$0xff]  }
 0x42f   : > { %v15119_v37 = vpop.f32.mrf.mxu0  ;;  %v7560_v33 = vpop.f32.mrf.mxu1 }
 0x430   : > { %v8107_v28 = vadd.f32 %v7560_v33, %v19327_v43  ;;  %v20111_v7 = vadd.f32 %v15118_v47, %v8109_v34  ;;  %v7172_v43 = vsel %vm7045_vm7, %v7169_v61, %v7171_v41  ;;  %v7175_v61 = vrot.slane %v15927_v39, 5 }
 0x431   : > { %v8349_v26 = vpop.f32.mrf.mxu0  ;;  %v14957_v62 = vpop.f32.mrf.mxu1 }
 0x432   : > { %v8110_v58 = vadd.f32 %v14957_v62, %v19331_v60  ;;  %v20119_v15 = vadd.f32 %v8346_v49, %v8107_v28  ;;  %v7173_v49 = vrot.slane %v15926_v14, 5 }
 0x433   : > { %v15122_v25 = vpop.f32.mrf.mxu0  ;;  %15217 = vmatmul.mubr.msk.bf16.gmra.mxu0 %vm1647_vm3, %v15926_v14  ;;  %v7563_v51 = vpop.f32.mrf.mxu1 }
 0x434   : > { %15220 = vmatprep.mubr.msk.bf16.mxu0 %vm1647_vm3, %v15927_v39  ;;  %v8108_v47 = vadd.f32 %v7563_v51, %v19339_v23  ;;  %v20123_v55 = vadd.f32 %v15119_v37, %v8110_v58  ;;  %v15928_v58 = vld [vmem:[%s16147_s15 + $0x20c] sm:$0xff]   ;;  %v7174_v51 = vsel %vm7045_vm7, %v7171_v41, %v7173_v49 }
 0x435   : > { %v8362_v44 = vpop.f32.mrf.mxu0  ;;  %v14960_v32 = vpop.f32.mrf.mxu1  ;;  %15055 = vmatmul.mubr.msk.bf16.gmra.mxu1 %vm1647_vm3, %v7170_v13  ;;  %v7177_v41 = vrot.slane %v15928_v58, 5 }
 0x436   : > { %v8112_v10 = vadd.f32 %v14960_v32, %v19348_v56  ;;  %15058 = vmatprep.mubr.msk.bf16.mxu1 %vm1647_vm3, %v7172_v43  ;;  %v20128_v34 = vadd.f32 %v8349_v26, %v8108_v47  ;;  %v15929_v56 = vld [vmem:[%s16147_s15 + $0x214] sm:$0xff]   ;;  %v7176_v44 = vsel %vm7045_vm7, %v7173_v49, %v7175_v61 }
 0x437   : > { %v15123_v60 = vpop.f32.mrf.mxu0  ;;  %v7576_v33 = vpop.f32.mrf.mxu1  ;;  %v7179_v49 = vrot.slane %v15929_v56, 5 }
 0x438   : > { %v20130_v62 = vadd.f32 %v15122_v25, %v8112_v10 }
 0x439   : > { %v8364_v28 = vpop.f32.mrf.mxu0  ;;  %v14961_v23 = vpop.f32.mrf.mxu1 }
 0x43a   : > { %23132 = vst [vmem:[#allocation226_spill] sm:$0xff] %v20130_v62  ;;  %v8113_v13 = vadd.f32 %v14961_v23, %v19356_v22  ;;  %v23135_v23 = vld [vmem:[#allocation115_spill] sm:$0xff] }
 0x43b   : > { %v15126_v37 = vpop.f32.mrf.mxu0  ;;  %15221 = vmatmul.mubr.msk.bf16.gmra.mxu0 %vm1647_vm3, %v15928_v58  ;;  %v7578_v14 = vpop.f32.mrf.mxu1 }
 0x43c   : > { %15224 = vmatprep.mubr.msk.bf16.mxu0 %vm1647_vm3, %v15929_v56  ;;  %v8111_v39 = vadd.f32 %v7578_v14, %v19364_v1  ;;  %v20140_v25 = vadd.f32 %v15123_v60, %v8113_v13 }
 0x43d   : > { %v8377_v26 = vpop.f32.mrf.mxu0  ;;  %v14964_v43 = vpop.f32.mrf.mxu1  ;;  %15059 = vmatmul.mubr.msk.bf16.gmra.mxu1 %vm1647_vm3, %v7174_v51  ;;  %v23137_v51 = vld [vmem:[#allocation205_spill] sm:$0xff] }
 0x43e   : > { %23133 = vst [vmem:[#allocation228_spill] sm:$0xff] %v20140_v25  ;;  %v8115_v22 = vadd.f32 %v14964_v43, %v19374_v54  ;;  %15062 = vmatprep.mubr.msk.bf16.mxu1 %vm1647_vm3, %v7176_v44  ;;  %v20145_v32 = vadd.f32 %v8364_v28, %v8111_v39  ;;  %v15930_v25 = vld [vmem:[%s16147_s15 + $0x21c] sm:$0xff]   ;;  %v7178_v54 = vsel %vm7045_vm7, %v7175_v61, %v7177_v41  ;;  %v15931_v44 = vld [vmem:[%s16147_s15 + $0x224] sm:$0xff]  }
 0x43f   : > { %v15127_v47 = vpop.f32.mrf.mxu0  ;;  %v7591_v10 = vpop.f32.mrf.mxu1  ;;  %v7181_v61 = vrot.slane %v15930_v25, 5 }
 0x440   : > { %23134 = vst [vmem:[#allocation148_spill] sm:$0xff] %v20145_v32  ;;  %v8114_v1 = vadd.f32 %v7591_v10, %v23135_v23  ;;  %v20148_v14 = vadd.f32 %v15126_v37, %v8115_v22  ;;  %v7180_v37 = vsel %vm7045_vm7, %v7177_v41, %v7179_v49  ;;  %v7183_v23 = vrot.slane %v15931_v44, 5 }
 0x441   : > { %v8380_v33 = vpop.f32.mrf.mxu0  ;;  %v14965_v60 = vpop.f32.mrf.mxu1  ;;  %v7182_v41 = vsel %vm7045_vm7, %v7179_v49, %v7181_v61  ;;  %v23145_v49 = vld [vmem:[#allocation211_spill] sm:$0xff] }
 0x442   : > { %23136 = vst [vmem:[#allocation233_spill] sm:$0xff] %v20148_v14  ;;  %v8116_v62 = vadd.f32 %v14965_v60, %v23137_v51  ;;  %v20156_v28 = vadd.f32 %v8377_v26, %v8114_v1  ;;  %v23140_v26 = vld [vmem:[#allocation207_spill] sm:$0xff]  ;;  %v23147_v14 = vld [vmem:[#allocation124_spill] sm:$0xff] }
 0x443   : > { %v15130_v13 = vpop.f32.mrf.mxu0  ;;  %15225 = vmatmul.mubr.msk.bf16.gmra.mxu0 %vm1647_vm3, %v15930_v25  ;;  %v7594_v58 = vpop.f32.mrf.mxu1  ;;  %v15932_v51 = vld [vmem:[%s16147_s15 + $0x22c] sm:$0xff]  }
 0x444   : > { %15228 = vmatprep.mubr.msk.bf16.mxu0 %vm1647_vm3, %v15931_v44  ;;  %23138 = vst [vmem:[#allocation235_spill] sm:$0xff] %v20156_v28  ;;  %v20159_v39 = vadd.f32 %v15127_v47, %v8116_v62  ;;  %v23141_v62 = vld [vmem:[#allocation85_spill] sm:$0xff]  ;;  %v15933_v58 = vld [vmem:[%s16147_s15 + $0x234] sm:$0xff]   ;;  %v7184_v44 = vsel %vm7045_vm7, %v7181_v61, %v7183_v23 }
 0x445   : > { %v8392_v56 = vpop.f32.mrf.mxu0  ;;  %v14968_v43 = vpop.f32.mrf.mxu1  ;;  %15063 = vmatmul.mubr.msk.bf16.gmra.mxu1 %vm1647_vm3, %v7178_v54  ;;  %v7187_v61 = vrot.slane %v15933_v58, 5 }
 0x446   : > { %23139 = vst [vmem:[#allocation113_spill] sm:$0xff] %v20159_v39  ;;  %15066 = vmatprep.mubr.msk.bf16.mxu1 %vm1647_vm3, %v7180_v37  ;;  %v23143_v43 = vld [vmem:[#allocation209_spill] sm:$0xff] }
 0x447   : > { %v15131_v22 = vpop.f32.mrf.mxu0  ;;  %v7606_v10 = vpop.f32.mrf.mxu1 }
 0x448   : > { %v8117_v1 = vadd.f32 %v7606_v10, %v23140_v26 }
 0x449   : > { %v8395_v33 = vpop.f32.mrf.mxu0  ;;  %v14969_v60 = vpop.f32.mrf.mxu1 }
 0x44a   : > { %v8119_v47 = vadd.f32 %v14969_v60, %v23141_v62  ;;  %v20170_v54 = vadd.f32 %v8392_v56, %v8117_v1  ;;  %v7185_v56 = vrot.slane %v15932_v51, 5 }
 0x44b   : > { %v15134_v13 = vpop.f32.mrf.mxu0  ;;  %15229 = vmatmul.mubr.msk.bf16.gmra.mxu0 %vm1647_vm3, %v15932_v51  ;;  %v7609_v25 = vpop.f32.mrf.mxu1 }
 0x44c   : > { %15232 = vmatprep.mubr.msk.bf16.mxu0 %vm1647_vm3, %v15933_v58  ;;  %23142 = vst [vmem:[#allocation241_spill] sm:$0xff] %v20170_v54  ;;  %v8118_v10 = vadd.f32 %v7609_v25, %v23143_v43  ;;  %v20174_v26 = vadd.f32 %v15131_v22, %v8119_v47  ;;  %v7188_v58 = vsel %vm7045_vm7, %v7185_v56, %v7187_v61 }
 0x44d   : > { %v8407_v37 = vpop.f32.mrf.mxu0  ;;  %v14972_v39 = vpop.f32.mrf.mxu1  ;;  %15067 = vmatmul.mubr.msk.bf16.gmra.mxu1 %vm1647_vm3, %v7182_v41  ;;  %v7186_v41 = vsel %vm7045_vm7, %v7183_v23, %v7185_v56 }
 0x44e   : > { %23144 = vst [vmem:[#allocation121_spill] sm:$0xff] %v20174_v26  ;;  %v8122_v62 = vadd.f32 %v14972_v39, %v23145_v49  ;;  %15070 = vmatprep.mubr.msk.bf16.mxu1 %vm1647_vm3, %v7184_v44  ;;  %v20179_v1 = vadd.f32 %v8395_v33, %v8118_v10  ;;  %v15934_v26 = vld [vmem:[%s16147_s15 + $0x23c] sm:$0xff]   ;;  %v15935_v39 = vld [vmem:[%s16147_s15 + $0x244] sm:$0xff]  }
 0x44f   : > { %v15135_v60 = vpop.f32.mrf.mxu0  ;;  %v7621_v54 = vpop.f32.mrf.mxu1  ;;  %v23150_v10 = vld [vmem:[#allocation213_spill] sm:$0xff]  ;;  %v7189_v23 = vrot.slane %v15934_v26, 5 }
 0x450   : > { %23146 = vst [vmem:[#allocation247_spill] sm:$0xff] %v20179_v1  ;;  %v8120_v25 = vadd.f32 %v7621_v54, %v23147_v14  ;;  %v20182_v43 = vadd.f32 %v15134_v13, %v8122_v62  ;;  %v23151_v60 = vld [vmem:[#allocation93_spill] sm:$0xff]  ;;  %v15936_v1 = vld [vmem:[%s16147_s15 + $0x24c] sm:$0xff]  }
 0x451   : > { %v8410_v28 = vpop.f32.mrf.mxu0  ;;  %v14973_v22 = vpop.f32.mrf.mxu1 }
 0x452   : > { %23148 = vst [vmem:[#allocation19_spill] sm:$0xff] %v20182_v43  ;;  %v20189_v51 = vadd.f32 %v8407_v37, %v8120_v25  ;;  %v7191_v22 = vrot.slane %v15935_v39, 5 }
 0x453   : > { %v15138_v47 = vpop.f32.mrf.mxu0  ;;  %15233 = vmatmul.mubr.msk.bf16.gmra.mxu0 %vm1647_vm3, %v15934_v26  ;;  %v7624_v33 = vpop.f32.mrf.mxu1 }
 0x454   : > { %15236 = vmatprep.mubr.msk.bf16.mxu0 %vm1647_vm3, %v15935_v39  ;;  %23149 = vst [vmem:[#allocation10_spill] sm:$0xff] %v20189_v51  ;;  %v8121_v14 = vadd.f32 %v7624_v33, %v23150_v10  ;;  %v23152_v51 = vld [vmem:[#allocation215_spill] sm:$0xff] }
 0x455   : > { %v8422_v44 = vpop.f32.mrf.mxu0  ;;  %v14976_v13 = vpop.f32.mrf.mxu1  ;;  %15071 = vmatmul.mubr.msk.bf16.gmra.mxu1 %vm1647_vm3, %v7186_v41  ;;  %v23153_v41 = vld [vmem:[#allocation216_spill] sm:$0xff] }
 0x456   : > { %v8125_v49 = vadd.f32 %v14976_v13, %v23151_v60  ;;  %15074 = vmatprep.mubr.msk.bf16.mxu1 %vm1647_vm3, %v7188_v58  ;;  %v20196_v62 = vadd.f32 %v8410_v28, %v8121_v14  ;;  %v7190_v13 = vsel %vm7045_vm7, %v7187_v61, %v7189_v23  ;;  %v15937_v58 = vld [vmem:[%s16147_s15 + $0x254] sm:$0xff]   ;;  %v23157_v61 = vld [vmem:[#allocation222_spill] sm:$0xff] }
 0x457   : > { %v15139_v54 = vpop.f32.mrf.mxu0  ;;  %v7636_v37 = vpop.f32.mrf.mxu1 }
 0x458   : > { %v8123_v56 = vadd.f32 %v7636_v37, %v23152_v51  ;;  %v20199_v43 = vadd.f32 %v15138_v47, %v8125_v49  ;;  %v7192_v51 = vsel %vm7045_vm7, %v7189_v23, %v7191_v22  ;;  %v23155_v47 = vld [vmem:[#allocation132_spill] sm:$0xff]  ;;  %v7195_v23 = vrot.slane %v15937_v58, 5 }
 0x459   : > { %v8425_v25 = vpop.f32.mrf.mxu0  ;;  %v14977_v33 = vpop.f32.mrf.mxu1 }
 0x45a   : > { %v8126_v32 = vadd.f32 %v14977_v33, %v23153_v41  ;;  %v20207_v28 = vadd.f32 %v8422_v44, %v8123_v56  ;;  %v7193_v44 = vrot.slane %v15936_v1, 5 }
 0x45b   : > { %v15142_v10 = vpop.f32.mrf.mxu0  ;;  %15237 = vmatmul.mubr.msk.bf16.gmra.mxu0 %vm1647_vm3, %v15936_v1  ;;  %v7639_v26 = vpop.f32.mrf.mxu1 }
 0x45c   : > { %15240 = vmatprep.mubr.msk.bf16.mxu0 %vm1647_vm3, %v15937_v58  ;;  %23154 = vst [vmem:[#allocation249_spill] sm:$0xff] %v20207_v28  ;;  %v8124_v14 = vadd.f32 %v7639_v26, %v23155_v47  ;;  %v20211_v60 = vadd.f32 %v15139_v54, %v8126_v32  ;;  %v15938_v54 = vld [vmem:[%s16147_s15 + $0x25c] sm:$0xff]  }
 0x45d   : > { %v8438_v39 = vpop.f32.mrf.mxu0  ;;  %v14980_v49 = vpop.f32.mrf.mxu1  ;;  %15075 = vmatmul.mubr.msk.bf16.gmra.mxu1 %vm1647_vm3, %v7190_v13  ;;  %v23158_v13 = vld [vmem:[#allocation224_spill] sm:$0xff] }
 0x45e   : > { %23156 = vst [vmem:[#allocation129_spill] sm:$0xff] %v20211_v60  ;;  %v8128_v33 = vadd.f32 %v14980_v49, %v23157_v61  ;;  %15078 = vmatprep.mubr.msk.bf16.mxu1 %vm1647_vm3, %v7192_v51  ;;  %v20216_v56 = vadd.f32 %v8425_v25, %v8124_v14  ;;  %v7194_v60 = vsel %vm7045_vm7, %v7191_v22, %v7193_v44  ;;  %v15939_v49 = vld [vmem:[%s16147_s15 + $0x264] sm:$0xff]   ;;  %v7197_v22 = vrot.slane %v15938_v54, 5 }
 0x45f   : > { %v15143_v37 = vpop.f32.mrf.mxu0  ;;  %v7652_v41 = vpop.f32.mrf.mxu1  ;;  %v7196_v51 = vsel %vm7045_vm7, %v7193_v44, %v7195_v23  ;;  %v7199_v44 = vrot.slane %v15939_v49, 5 }
 0x460   : > { %v20218_v28 = vadd.f32 %v15142_v10, %v8128_v33 }
 0x461   : > { %v8440_v39 = vpop.f32.mrf.mxu0  ;;  %v14981_v26 = vpop.f32.mrf.mxu1 }
 0x462   : > { %v8129_v47 = vadd.f32 %v14981_v26, %v23158_v13 }
 0x463   : > { %v15146_v32 = vpop.f32.mrf.mxu0  ;;  %15241 = vmatmul.mubr.msk.bf16.gmra.mxu0 %vm1647_vm3, %v15938_v54  ;;  %v7654_v1 = vpop.f32.mrf.mxu1 }
 0x464   : > { %15244 = vmatprep.mubr.msk.bf16.mxu0 %vm1647_vm3, %v15939_v49  ;;  %v8127_v58 = vadd.f32 %v7654_v1, %v19508_v59  ;;  %v20228_v10 = vadd.f32 %v15143_v37, %v8129_v47 }
 0x465   : > { %v8453_v25 = vpop.f32.mrf.mxu0  ;;  %v14984_v14 = vpop.f32.mrf.mxu1  ;;  %15079 = vmatmul.mubr.msk.bf16.gmra.mxu1 %vm1647_vm3, %v7194_v60 }
 0x466   : > { %23159 = vst [vmem:[#allocation253_spill] sm:$0xff] %v20228_v10  ;;  %v8131_v33 = vadd.f32 %v14984_v14, %v19520_v3  ;;  %15082 = vmatprep.mubr.msk.bf16.mxu1 %vm1647_vm3, %v7196_v51  ;;  %v20233_v41 = vadd.f32 %v8440_v39, %v8127_v58  ;;  %v15940_v10 = vld [vmem:[%s16147_s15 + $0x26c] sm:$0xff]   ;;  %v7198_v3 = vsel %vm7045_vm7, %v7195_v23, %v7197_v22  ;;  %v15941_v51 = vld [vmem:[%s16147_s15 + $0x274] sm:$0xff]  }
 0x467   : > { %v15147_v61 = vpop.f32.mrf.mxu0  ;;  %v7667_v26 = vpop.f32.mrf.mxu1 }
 0x468   : > { %v8130_v59 = vadd.f32 %v7667_v26, %v19528_v52  ;;  %v20236_v1 = vadd.f32 %v15146_v32, %v8131_v33  ;;  %v7200_v52 = vsel %vm7045_vm7, %v7197_v22, %v7199_v44  ;;  %v7203_v26 = vrot.slane %v15941_v51, 5 }
 0x469   : > { %v8456_v13 = vpop.f32.mrf.mxu0  ;;  %v14985_v37 = vpop.f32.mrf.mxu1 }
 0x46a   : > { %v8132_v60 = vadd.f32 %v14985_v37, %v19531_v12  ;;  %v20244_v39 = vadd.f32 %v8453_v25, %v8130_v59  ;;  %v7201_v12 = vrot.slane %v15940_v10, 5  ;;  %v23160_v37 = vld [vmem:[#allocation5_spill] sm:$0xff] }
 0x46b   : > { %v15150_v47 = vpop.f32.mrf.mxu0  ;;  %15245 = vmatmul.mubr.msk.bf16.gmra.mxu0 %vm1647_vm3, %v15940_v10  ;;  %v7670_v54 = vpop.f32.mrf.mxu1 }
 0x46c   : > { %15248 = vmatprep.mubr.msk.bf16.mxu0 %vm1647_vm3, %v15941_v51  ;;  %v20247_v32 = vadd.f32 %v15147_v61, %v8132_v60  ;;  %v7202_v22 = vsel %vm7045_vm7, %v7199_v44, %v7201_v12  ;;  %v7205_v44 = vrot.slane %v19517_v36, 5 }
 0x46d   : > { %v8468_v49 = vpop.f32.mrf.mxu0  ;;  %v14988_v58 = vpop.f32.mrf.mxu1  ;;  %15083 = vmatmul.mubr.msk.bf16.gmra.mxu1 %vm1647_vm3, %v7198_v3  ;;  %v7204_v3 = vsel %vm7045_vm7, %v7201_v12, %v7203_v26 }
 0x46e   : > { %15086 = vmatprep.mubr.msk.bf16.mxu1 %vm1647_vm3, %v7200_v52 }
 0x46f   : > { %v15151_v14 = vpop.f32.mrf.mxu0  ;;  %v7682_v33 = vpop.f32.mrf.mxu1 }
 0x470   : > { %v8133_v13 = vadd.f32 %v7682_v33, %v19548_v8 }
 0x471   : > { %v8471_v23 = vpop.f32.mrf.mxu0  ;;  %v14989_v25 = vpop.f32.mrf.mxu1 }
 0x472   : > { %v8135_v61 = vadd.f32 %v14989_v25, %v19552_v21  ;;  %v20258_v47 = vadd.f32 %v8468_v49, %v8133_v13  ;;  %v23162_v21 = vld [vmem:[#allocation225_spill] sm:$0xff]  ;;  %v23163_v25 = vld [vmem:[#allocation140_spill] sm:$0xff] }
 0x473   : > { %v15154_v59 = vpop.f32.mrf.mxu0  ;;  %15249 = vmatmul.mubr.msk.bf16.gmra.mxu0 %vm1647_vm3, %v19517_v36  ;;  %v7685_v10 = vpop.f32.mrf.mxu1 }
 0x474   : > { %15252 = vmatprep.mubr.msk.bf16.mxu0 %vm1647_vm3, %v23160_v37  ;;  %23161 = vst [vmem:[#allocation255_spill] sm:$0xff] %v20258_v47  ;;  %v8134_v8 = vadd.f32 %v7685_v10, %v19559_v17  ;;  %v20262_v51 = vadd.f32 %v15151_v14, %v8135_v61  ;;  %v7206_v61 = vsel %vm7045_vm7, %v7203_v26, %v7205_v44 }
 0x475   : > { %v8483_v60 = vpop.f32.mrf.mxu0  ;;  %v14992_v54 = vpop.f32.mrf.mxu1  ;;  %15087 = vmatmul.mubr.msk.bf16.gmra.mxu1 %vm1647_vm3, %v7202_v22  ;;  %v23164_v22 = vld [vmem:[#allocation156_spill] sm:$0xff] }
 0x476   : > { %v8138_v58 = vadd.f32 %v14992_v54, %v23162_v21  ;;  %15090 = vmatprep.mubr.msk.bf16.mxu1 %vm1647_vm3, %v7204_v3  ;;  %v20268_v49 = vadd.f32 %v8471_v23, %v8134_v8  ;;  %v23166_v8 = vld [vmem:[#allocation230_spill] sm:$0xff]  ;;  %v23167_v21 = vld [vmem:[#allocation109_spill] sm:$0xff] }
 0x477   : > { %v15155_v52 = vpop.f32.mrf.mxu0  ;;  %v7697_v33 = vpop.f32.mrf.mxu1 }
 0x478   : > { %v8136_v12 = vadd.f32 %v7697_v33, %v23163_v25  ;;  %v20271_v47 = vadd.f32 %v15154_v59, %v8138_v58  ;;  %v23168_v33 = vld [vmem:[#allocation27_spill] sm:$0xff]  ;;  %v23170_v25 = vld [vmem:[#allocation232_spill] sm:$0xff] }
 0x479   : > { %v8486_v13 = vpop.f32.mrf.mxu0  ;;  %v14993_v17 = vpop.f32.mrf.mxu1 }
 0x47a   : > { %v20278_v10 = vadd.f32 %v8483_v60, %v8136_v12 }
 0x47b   : > { %v15158_v14 = vpop.f32.mrf.mxu0  ;;  %15253 = vmatmul.mubr.msk.bf16.gmra.mxu0 %vm1647_vm3, %v23160_v37  ;;  %v7700_v23 = vpop.f32.mrf.mxu1 }
 0x47c   : > { %15420 = vmatprep.mubr.msk.bf16.mxu0 %vm1647_vm3, %v23164_v22  ;;  %23165 = vst [vmem:[#allocation25_spill] sm:$0xff] %v20278_v10  ;;  %v8137_v54 = vadd.f32 %v7700_v23, %v23166_v8  ;;  %v23172_v23 = vld [vmem:[#allocation157_spill] sm:$0xff]  ;;  %v23174_v10 = vld [vmem:[#allocation158_spill] sm:$0xff] }
 0x47d   : > { %v8498_v3 = vpop.f32.mrf.mxu0  ;;  %v14996_v52 = vpop.f32.mrf.mxu1  ;;  %15091 = vmatmul.mubr.msk.bf16.gmra.mxu1 %vm1647_vm3, %v7206_v61  ;;  %v23173_v61 = vld [vmem:[#allocation234_spill] sm:$0xff] }
 0x47e   : > { %v8141_v58 = vadd.f32 %v14996_v52, %v23167_v21  ;;  %15258 = vmatprep.mubr.msk.bf16.mxu1 %vm1647_vm3, %v23168_v33  ;;  %v20285_v37 = vadd.f32 %v8486_v13, %v8137_v54  ;;  %v23176_v21 = vld [vmem:[#allocation237_spill] sm:$0xff] }
 0x47f   : > { %v15159_v59 = vpop.f32.mrf.mxu0  ;;  %v7712_v26 = vpop.f32.mrf.mxu1 }
 0x480   : > { %23169 = vst [vmem:[#allocation23_spill] sm:$0xff] %v20285_v37  ;;  %v8139_v60 = vadd.f32 %v7712_v26, %v23170_v25  ;;  %v20288_v12 = vadd.f32 %v15158_v14, %v8141_v58  ;;  %v23178_v58 = vld [vmem:[#allocation32_spill] sm:$0xff]  ;;  %v23179_v25 = vld [vmem:[#allocation239_spill] sm:$0xff] }
 0x481   : > { %v8501_v44 = vpop.f32.mrf.mxu0  ;;  %v14997_v17 = vpop.f32.mrf.mxu1 }
 0x482   : > { %23171 = vst [vmem:[#allocation257_spill] sm:$0xff] %v20288_v12  ;;  %v8142_v8 = vadd.f32 %v14997_v17, %v23173_v61  ;;  %v20295_v52 = vadd.f32 %v8498_v3, %v8139_v60  ;;  %v23180_v12 = vld [vmem:[#allocation37_spill] sm:$0xff] }
 0x483   : > { %v15162_v22 = vpop.f32.mrf.mxu0  ;;  %15421 = vmatmul.mubr.msk.bf16.vlgmr.msra.gmra.mxu0 %vm1647_vm3, %v23172_v23  ;;  %v7715_v13 = vpop.f32.mrf.mxu1 }
 0x484   : > { %15424 = vmatprep.mubr.msk.bf16.mxu0 %vm1647_vm3, %v23174_v10  ;;  %23175 = vst [vmem:[#allocation259_spill] sm:$0xff] %v20295_v52  ;;  %v8140_v33 = vadd.f32 %v7715_v13, %v23176_v21  ;;  %v20298_v37 = vadd.f32 %v15159_v59, %v8142_v8  ;;  %v23183_v59 = vld [vmem:[#allocation159_spill] sm:$0xff]  ;;  %v23184_v8 = vld [vmem:[#allocation117_spill] sm:$0xff]  ;;  %v23185_v21 = vld [vmem:[#allocation160_spill] sm:$0xff] }
 0x485   : > { %v8514_v54 = vpop.f32.mrf.mxu0  ;;  %v15000_v14 = vpop.f32.mrf.mxu1  ;;  %15259 = vmatmul.mubr.msk.bf16.vlgmr.msra.gmra.mxu1 %vm1647_vm3, %v23178_v58 }
 0x486   : > { %23177 = vst [vmem:[#allocation137_spill] sm:$0xff] %v20298_v37  ;;  %v8144_v23 = vadd.f32 %v15000_v14, %v23179_v25  ;;  %15262 = vmatprep.mubr.msk.bf16.mxu1 %vm1647_vm3, %v23180_v12  ;;  %v20305_v17 = vadd.f32 %v8501_v44, %v8140_v33  ;;  %v23186_v25 = vld [vmem:[#allocation15_spill] sm:$0xff] }
 0x487   : > { %v15163_v26 = vpop.f32.mrf.mxu0  ;;  %v7728_v10 = vpop.f32.mrf.mxu1 }
 0x488   : > { %23181 = vst [vmem:[#allocation262_spill] sm:$0xff] %v20305_v17  ;;  %v20307_v60 = vadd.f32 %v15162_v22, %v8144_v23  ;;  %v23188_v10 = vld [vmem:[#allocation38_spill] sm:$0xff]  ;;  %v23189_v23 = vld [vmem:[#allocation243_spill] sm:$0xff]  ;;  %v23190_v17 = vld [vmem:[#allocation44_spill] sm:$0xff] }
 0x489   : > { %v8516_v3 = vpop.f32.mrf.mxu0  ;;  %v15001_v61 = vpop.f32.mrf.mxu1 }
 0x48a   : > { %23182 = vst [vmem:[#allocation265_spill] sm:$0xff] %v20307_v60  ;;  %v8145_v54 = vadd.f32 %v15001_v61, %v23184_v8 }
 0x48b   : > { %v15166_v13 = vpop.f32.mrf.mxu0  ;;  %15425 = vmatmul.mubr.msk.bf16.gmra.mxu0 %vm1647_vm3, %v23183_v59  ;;  %v7730_v14 = vpop.f32.mrf.mxu1 }
 0x48c   : > { %15428 = vmatprep.mubr.msk.bf16.mxu0 %vm1647_vm3, %v23185_v21  ;;  %v8143_v12 = vadd.f32 %v7730_v14, %v23186_v25  ;;  %v20315_v44 = vadd.f32 %v15163_v26, %v8145_v54  ;;  %v23192_v21 = vld [vmem:[#allocation246_spill] sm:$0xff]  ;;  %v23194_v14 = vld [vmem:[#allocation161_spill] sm:$0xff] }
 0x48d   : > { %v8529_v58 = vpop.f32.mrf.mxu0  ;;  %v15004_v33 = vpop.f32.mrf.mxu1  ;;  %15263 = vmatmul.mubr.msk.bf16.gmra.mxu1 %vm1647_vm3, %v23188_v10  ;;  %v23195_v25 = vld [vmem:[#allocation125_spill] sm:$0xff] }
 0x48e   : > { %23187 = vst [vmem:[#allocation298_spill] sm:$0xff] %v20315_v44  ;;  %v8147_v60 = vadd.f32 %v15004_v33, %v23189_v23  ;;  %15266 = vmatprep.mubr.msk.bf16.mxu1 %vm1647_vm3, %v23190_v17  ;;  %v20322_v61 = vadd.f32 %v8516_v3, %v8143_v12  ;;  %v23196_v44 = vld [vmem:[#allocation163_spill] sm:$0xff] }
 0x48f   : > { %v15167_v22 = vpop.f32.mrf.mxu0  ;;  %v7743_v59 = vpop.f32.mrf.mxu1 }
 0x490   : > { %23191 = vst [vmem:[#allocation301_spill] sm:$0xff] %v20322_v61  ;;  %v8146_v37 = vadd.f32 %v7743_v59, %v23192_v21  ;;  %v20325_v52 = vadd.f32 %v15166_v13, %v8147_v60  ;;  %v23199_v59 = vld [vmem:[#allocation45_spill] sm:$0xff]  ;;  %v23200_v13 = vld [vmem:[#allocation51_spill] sm:$0xff]  ;;  %v23210_v61 = vld [vmem:[#allocation58_spill] sm:$0xff] }
 0x491   : > { %v8532_v8 = vpop.f32.mrf.mxu0  ;;  %v15005_v26 = vpop.f32.mrf.mxu1 }
 0x492   : > { %23193 = vst [vmem:[#allocation30_spill] sm:$0xff] %v20325_v52  ;;  %v8148_v10 = vadd.f32 %v15005_v26, %v23195_v25  ;;  %v20332_v33 = vadd.f32 %v8529_v58, %v8146_v37  ;;  %v23201_v26 = vld [vmem:[#allocation248_spill] sm:$0xff]  ;;  %v23202_v37 = vld [vmem:[#allocation165_spill] sm:$0xff]  ;;  %v23203_v58 = vld [vmem:[#allocation250_spill] sm:$0xff] }
 0x493   : > { %v15170_v54 = vpop.f32.mrf.mxu0  ;;  %15429 = vmatmul.mubr.msk.bf16.gmra.mxu0 %vm1647_vm3, %v23194_v14  ;;  %v7746_v17 = vpop.f32.mrf.mxu1  ;;  %v23204_v25 = vld [vmem:[#allocation169_spill] sm:$0xff]  ;;  %v23209_v52 = vld [vmem:[#allocation252_spill] sm:$0xff] }
 0x494   : > { %15432 = vmatprep.mubr.msk.bf16.mxu0 %vm1647_vm3, %v23196_v44  ;;  %23197 = vst [vmem:[#allocation268_spill] sm:$0xff] %v20332_v33  ;;  %v20334_v12 = vadd.f32 %v15167_v22, %v8148_v10 }
 0x495   : > { %v8544_v3 = vpop.f32.mrf.mxu0  ;;  %v15008_v23 = vpop.f32.mrf.mxu1  ;;  %15267 = vmatmul.mubr.msk.bf16.gmra.mxu1 %vm1647_vm3, %v23199_v59  ;;  %v23206_v59 = vld [vmem:[#allocation20_spill] sm:$0xff] }
 0x496   : > { %23198 = vst [vmem:[#allocation11_spill] sm:$0xff] %v20334_v12  ;;  %15270 = vmatprep.mubr.msk.bf16.mxu1 %vm1647_vm3, %v23200_v13 }
 0x497   : > { %v15171_v60 = vpop.f32.mrf.mxu0  ;;  %v7758_v8 = vpop.f32.mrf.mxu1 }
 0x498   : > { %v8149_v54 = vadd.f32 %v7758_v8, %v23201_v26  ;;  %v23208_v8 = vld [vmem:[#allocation53_spill] sm:$0xff] }
 0x499   : > { %v8547_v21 = vpop.f32.mrf.mxu0  ;;  %v15009_v14 = vpop.f32.mrf.mxu1 }
 0x49a   : > { %v8151_v22 = vadd.f32 %v15009_v14, %v23203_v58  ;;  %v20346_v10 = vadd.f32 %v8544_v3, %v8149_v54  ;;  %v23212_v58 = vld [vmem:[#allocation133_spill] sm:$0xff] }
 0x49b   : > { %v15174_v44 = vpop.f32.mrf.mxu0  ;;  %15433 = vmatmul.mubr.msk.bf16.gmra.mxu0 %vm1647_vm3, %v23202_v37  ;;  %v7761_v17 = vpop.f32.mrf.mxu1 }
 0x49c   : > { %15436 = vmatprep.mubr.msk.bf16.mxu0 %vm1647_vm3, %v23204_v25  ;;  %23205 = vst [vmem:[#allocation270_spill] sm:$0xff] %v20346_v10  ;;  %v8150_v13 = vadd.f32 %v7761_v17, %v23206_v59  ;;  %v20349_v12 = vadd.f32 %v15171_v60, %v8151_v22  ;;  %v23214_v17 = vld [vmem:[#allocation170_spill] sm:$0xff] }
 0x49d   : > { %v8559_v23 = vpop.f32.mrf.mxu0  ;;  %v15012_v33 = vpop.f32.mrf.mxu1  ;;  %15271 = vmatmul.mubr.msk.bf16.gmra.mxu1 %vm1647_vm3, %v23208_v8  ;;  %v23215_v59 = vld [vmem:[#allocation174_spill] sm:$0xff] }
 0x49e   : > { %23207 = vst [vmem:[#allocation273_spill] sm:$0xff] %v20349_v12  ;;  %v8154_v37 = vadd.f32 %v15012_v33, %v23209_v52  ;;  %15274 = vmatprep.mubr.msk.bf16.mxu1 %vm1647_vm3, %v23210_v61  ;;  %v20356_v14 = vadd.f32 %v8547_v21, %v8150_v13  ;;  %v23217_v21 = vld [vmem:[#allocation256_spill] sm:$0xff]  ;;  %v23226_v12 = vld [vmem:[#allocation178_spill] sm:$0xff] }
 0x49f   : > { %v15175_v26 = vpop.f32.mrf.mxu0  ;;  %v7773_v3 = vpop.f32.mrf.mxu1 }
 0x4a0   : > { %23211 = vst [vmem:[#allocation36_spill] sm:$0xff] %v20356_v14  ;;  %v8152_v25 = vadd.f32 %v7773_v3, %v23212_v58  ;;  %v20359_v10 = vadd.f32 %v15174_v44, %v8154_v37  ;;  %v23218_v26 = vld [vmem:[#allocation59_spill] sm:$0xff]  ;;  %v23219_v37 = vld [vmem:[#allocation258_spill] sm:$0xff]  ;;  %v23220_v58 = vld [vmem:[#allocation65_spill] sm:$0xff] }
 0x4a1   : > { %v8562_v54 = vpop.f32.mrf.mxu0  ;;  %v15013_v60 = vpop.f32.mrf.mxu1 }
 0x4a2   : > { %23213 = vst [vmem:[#allocation275_spill] sm:$0xff] %v20359_v10  ;;  %v20365_v52 = vadd.f32 %v8559_v23, %v8152_v25  ;;  %v23222_v23 = vld [vmem:[#allocation26_spill] sm:$0xff] }
 0x4a3   : > { %v15178_v22 = vpop.f32.mrf.mxu0  ;;  %15437 = vmatmul.mubr.msk.bf16.gmra.mxu0 %vm1647_vm3, %v23214_v17  ;;  %v7776_v33 = vpop.f32.mrf.mxu1 }
 0x4a4   : > { %15440 = vmatprep.mubr.msk.bf16.mxu0 %vm1647_vm3, %v23215_v59  ;;  %23216 = vst [vmem:[#allocation277_spill] sm:$0xff] %v20365_v52  ;;  %v8153_v13 = vadd.f32 %v7776_v33, %v23217_v21  ;;  %v23224_v21 = vld [vmem:[#allocation176_spill] sm:$0xff] }
 0x4a5   : > { %v8574_v61 = vpop.f32.mrf.mxu0  ;;  %v15016_v8 = vpop.f32.mrf.mxu1  ;;  %15275 = vmatmul.mubr.msk.bf16.gmra.mxu1 %vm1647_vm3, %v23218_v26  ;;  %v23225_v26 = vld [vmem:[#allocation261_spill] sm:$0xff] }
 0x4a6   : > { %v8157_v3 = vadd.f32 %v15016_v8, %v23219_v37  ;;  %15278 = vmatprep.mubr.msk.bf16.mxu1 %vm1647_vm3, %v23220_v58  ;;  %v20373_v60 = vadd.f32 %v8562_v54, %v8153_v13  ;;  %v23228_v37 = vld [vmem:[#allocation264_spill] sm:$0xff] }
 0x4a7   : > { %v15179_v44 = vpop.f32.mrf.mxu0  ;;  %v7788_v17 = vpop.f32.mrf.mxu1 }
 0x4a8   : > { %23221 = vst [vmem:[#allocation12_spill] sm:$0xff] %v20373_v60  ;;  %v8155_v25 = vadd.f32 %v7788_v17, %v23222_v23  ;;  %v20376_v52 = vadd.f32 %v15178_v22, %v8157_v3  ;;  %v23230_v3 = vld [vmem:[#allocation66_spill] sm:$0xff]  ;;  %v23231_v23 = vld [vmem:[#allocation141_spill] sm:$0xff] }
 0x4a9   : > { %v8577_v59 = vpop.f32.mrf.mxu0  ;;  %v15017_v10 = vpop.f32.mrf.mxu1 }
 0x4aa   : > { %23223 = vst [vmem:[#allocation13_spill] sm:$0xff] %v20376_v52  ;;  %v8158_v14 = vadd.f32 %v15017_v10, %v23225_v26  ;;  %v20383_v8 = vadd.f32 %v8574_v61, %v8155_v25  ;;  %v23232_v52 = vld [vmem:[#allocation72_spill] sm:$0xff] }
 0x4ab   : > { %v15182_v33 = vpop.f32.mrf.mxu0  ;;  %15441 = vmatmul.mubr.msk.bf16.gmra.mxu0 %vm1647_vm3, %v23224_v21  ;;  %v7791_v54 = vpop.f32.mrf.mxu1 }
 0x4ac   : > { %15444 = vmatprep.mubr.msk.bf16.mxu0 %vm1647_vm3, %v23226_v12  ;;  %23227 = vst [vmem:[#allocation42_spill] sm:$0xff] %v20383_v8  ;;  %v8156_v58 = vadd.f32 %v7791_v54, %v23228_v37  ;;  %v20386_v60 = vadd.f32 %v15179_v44, %v8158_v14  ;;  %v23235_v14 = vld [vmem:[#allocation180_spill] sm:$0xff]  ;;  %v23236_v44 = vld [vmem:[#allocation266_spill] sm:$0xff] }
 0x4ad   : > { %v8590_v13 = vpop.f32.mrf.mxu0  ;;  %v15020_v22 = vpop.f32.mrf.mxu1  ;;  %15279 = vmatmul.mubr.msk.bf16.gmra.mxu1 %vm1647_vm3, %v23230_v3  ;;  %v23237_v37 = vld [vmem:[#allocation184_spill] sm:$0xff] }
 0x4ae   : > { %23229 = vst [vmem:[#allocation282_spill] sm:$0xff] %v20386_v60  ;;  %v8160_v21 = vadd.f32 %v15020_v22, %v23231_v23  ;;  %15282 = vmatprep.mubr.msk.bf16.mxu1 %vm1647_vm3, %v23232_v52  ;;  %v20393_v10 = vadd.f32 %v8577_v59, %v8156_v58  ;;  %v23238_v23 = vld [vmem:[#allocation267_spill] sm:$0xff] }
 0x4af   : > { %v15183_v17 = vpop.f32.mrf.mxu0  ;;  %v7804_v12 = vpop.f32.mrf.mxu1 }
 0x4b0   : > { %23233 = vst [vmem:[#allocation283_spill] sm:$0xff] %v20393_v10  ;;  %v20395_v25 = vadd.f32 %v15182_v33, %v8160_v21  ;;  %v23240_v12 = vld [vmem:[#allocation74_spill] sm:$0xff]  ;;  %v23241_v21 = vld [vmem:[#allocation33_spill] sm:$0xff]  ;;  %v23242_v10 = vld [vmem:[#allocation79_spill] sm:$0xff] }
 0x4b1   : > { %v8592_v61 = vpop.f32.mrf.mxu0  ;;  %v15021_v26 = vpop.f32.mrf.mxu1 }
 0x4b2   : > { %23234 = vst [vmem:[#allocation16_spill] sm:$0xff] %v20395_v25  ;;  %v8161_v13 = vadd.f32 %v15021_v26, %v23236_v44 }
 0x4b3   : > { %v15186_v54 = vpop.f32.mrf.mxu0  ;;  %15445 = vmatmul.mubr.msk.bf16.gmra.mxu0 %vm1647_vm3, %v23235_v14  ;;  %v7806_v22 = vpop.f32.mrf.mxu1 }
 0x4b4   : > { %15448 = vmatprep.mubr.msk.bf16.mxu0 %vm1647_vm3, %v23237_v37  ;;  %v8159_v52 = vadd.f32 %v7806_v22, %v23238_v23  ;;  %v20403_v59 = vadd.f32 %v15183_v17, %v8161_v13  ;;  %v23244_v37 = vld [vmem:[#allocation272_spill] sm:$0xff]  ;;  %v23246_v22 = vld [vmem:[#allocation186_spill] sm:$0xff] }
 0x4b5   : > { %v8605_v3 = vpop.f32.mrf.mxu0  ;;  %v15024_v58 = vpop.f32.mrf.mxu1  ;;  %15283 = vmatmul.mubr.msk.bf16.gmra.mxu1 %vm1647_vm3, %v23240_v12  ;;  %v23247_v23 = vld [vmem:[#allocation274_spill] sm:$0xff] }
 0x4b6   : > { %23239 = vst [vmem:[#allocation286_spill] sm:$0xff] %v20403_v59  ;;  %v8163_v25 = vadd.f32 %v15024_v58, %v23241_v21  ;;  %15286 = vmatprep.mubr.msk.bf16.mxu1 %vm1647_vm3, %v23242_v10  ;;  %v20410_v26 = vadd.f32 %v8592_v61, %v8159_v52  ;;  %v23248_v59 = vld [vmem:[#allocation189_spill] sm:$0xff] }
 0x4b7   : > { %v15187_v33 = vpop.f32.mrf.mxu0  ;;  %v7819_v14 = vpop.f32.mrf.mxu1 }
 0x4b8   : > { %23243 = vst [vmem:[#allocation289_spill] sm:$0xff] %v20410_v26  ;;  %v8162_v60 = vadd.f32 %v7819_v14, %v23244_v37  ;;  %v20413_v8 = vadd.f32 %v15186_v54, %v8163_v25  ;;  %v23251_v14 = vld [vmem:[#allocation80_spill] sm:$0xff]  ;;  %v23252_v54 = vld [vmem:[#allocation86_spill] sm:$0xff] }
 0x4b9   : > { %v8608_v44 = vpop.f32.mrf.mxu0  ;;  %v15025_v17 = vpop.f32.mrf.mxu1  ;;  %v23262_v26 = vld [vmem:[#allocation94_spill] sm:$0xff] }
 0x4ba   : > { %23245 = vst [vmem:[#allocation48_spill] sm:$0xff] %v20413_v8  ;;  %v8164_v12 = vadd.f32 %v15025_v17, %v23247_v23  ;;  %v20420_v58 = vadd.f32 %v8605_v3, %v8162_v60  ;;  %v23253_v17 = vld [vmem:[#allocation276_spill] sm:$0xff]  ;;  %v23254_v60 = vld [vmem:[#allocation191_spill] sm:$0xff]  ;;  %v23261_v8 = vld [vmem:[#allocation281_spill] sm:$0xff] }
 0x4bb   : > { %v15190_v13 = vpop.f32.mrf.mxu0  ;;  %15449 = vmatmul.mubr.msk.bf16.gmra.mxu0 %vm1647_vm3, %v23246_v22  ;;  %v7822_v10 = vpop.f32.mrf.mxu1  ;;  %v23255_v3 = vld [vmem:[#allocation39_spill] sm:$0xff] }
 0x4bc   : > { %15452 = vmatprep.mubr.msk.bf16.mxu0 %vm1647_vm3, %v23248_v59  ;;  %23249 = vst [vmem:[#allocation291_spill] sm:$0xff] %v20420_v58  ;;  %v20422_v52 = vadd.f32 %v15187_v33, %v8164_v12  ;;  %v23256_v23 = vld [vmem:[#allocation195_spill] sm:$0xff] }
 0x4bd   : > { %v8620_v61 = vpop.f32.mrf.mxu0  ;;  %v15028_v21 = vpop.f32.mrf.mxu1  ;;  %15287 = vmatmul.mubr.msk.bf16.gmra.mxu1 %vm1647_vm3, %v23251_v14  ;;  %v23258_v14 = vld [vmem:[#allocation279_spill] sm:$0xff] }
 0x4be   : > { %23250 = vst [vmem:[#allocation22_spill] sm:$0xff] %v20422_v52  ;;  %15290 = vmatprep.mubr.msk.bf16.mxu1 %vm1647_vm3, %v23252_v54 }
 0x4bf   : > { %v15191_v25 = vpop.f32.mrf.mxu0  ;;  %v7834_v44 = vpop.f32.mrf.mxu1 }
 0x4c0   : > { %v8165_v13 = vadd.f32 %v7834_v44, %v23253_v17  ;;  %v23260_v44 = vld [vmem:[#allocation87_spill] sm:$0xff] }
 0x4c1   : > { %v8623_v37 = vpop.f32.mrf.mxu0  ;;  %v15029_v22 = vpop.f32.mrf.mxu1 }
 0x4c2   : > { %v8167_v33 = vadd.f32 %v15029_v22, %v23255_v3  ;;  %v20434_v12 = vadd.f32 %v8620_v61, %v8165_v13  ;;  %v23264_v3 = vld [vmem:[#allocation46_spill] sm:$0xff] }
 0x4c3   : > { %v15194_v59 = vpop.f32.mrf.mxu0  ;;  %15453 = vmatmul.mubr.msk.bf16.gmra.mxu0 %vm1647_vm3, %v23254_v60  ;;  %v7837_v10 = vpop.f32.mrf.mxu1 }
 0x4c4   : > { %15456 = vmatprep.mubr.msk.bf16.mxu0 %vm1647_vm3, %v23256_v23  ;;  %23257 = vst [vmem:[#allocation295_spill] sm:$0xff] %v20434_v12  ;;  %v8166_v54 = vadd.f32 %v7837_v10, %v23258_v14  ;;  %v20437_v52 = vadd.f32 %v15191_v25, %v8167_v33  ;;  %v23266_v10 = vld [vmem:[#allocation196_spill] sm:$0xff] }
 0x4c5   : > { %v8635_v21 = vpop.f32.mrf.mxu0  ;;  %v15032_v58 = vpop.f32.mrf.mxu1  ;;  %15291 = vmatmul.mubr.msk.bf16.gmra.mxu1 %vm1647_vm3, %v23260_v44  ;;  %v23267_v14 = vld [vmem:[#allocation200_spill] sm:$0xff] }
 0x4c6   : > { %23259 = vst [vmem:[#allocation162_spill] sm:$0xff] %v20437_v52  ;;  %v8170_v60 = vadd.f32 %v15032_v58, %v23261_v8  ;;  %15294 = vmatprep.mubr.msk.bf16.mxu1 %vm1647_vm3, %v23262_v26  ;;  %v20444_v22 = vadd.f32 %v8623_v37, %v8166_v54  ;;  %v23269_v37 = vld [vmem:[#allocation285_spill] sm:$0xff]  ;;  %v23278_v52 = vld [vmem:[#allocation204_spill] sm:$0xff] }
 0x4c7   : > { %v15195_v17 = vpop.f32.mrf.mxu0  ;;  %v7849_v61 = vpop.f32.mrf.mxu1 }
 0x4c8   : > { %23263 = vst [vmem:[#allocation56_spill] sm:$0xff] %v20444_v22  ;;  %v8168_v23 = vadd.f32 %v7849_v61, %v23264_v3  ;;  %v20447_v12 = vadd.f32 %v15194_v59, %v8170_v60  ;;  %v23270_v17 = vld [vmem:[#allocation96_spill] sm:$0xff]  ;;  %v23272_v3 = vld [vmem:[#allocation102_spill] sm:$0xff] }
 0x4c9   : > { %v8638_v13 = vpop.f32.mrf.mxu0  ;;  %v15033_v25 = vpop.f32.mrf.mxu1  ;;  %v23271_v60 = vld [vmem:[#allocation288_spill] sm:$0xff] }
 0x4ca   : > { %23265 = vst [vmem:[#allocation164_spill] sm:$0xff] %v20447_v12  ;;  %v20453_v8 = vadd.f32 %v8635_v21, %v8168_v23  ;;  %v23274_v21 = vld [vmem:[#allocation290_spill] sm:$0xff] }
 0x4cb   : > { %v15198_v33 = vpop.f32.mrf.mxu0  ;;  %15457 = vmatmul.mubr.msk.bf16.gmra.mxu0 %vm1647_vm3, %v23266_v10  ;;  %v7852_v58 = vpop.f32.mrf.mxu1 }
 0x4cc   : > { %15460 = vmatprep.mubr.msk.bf16.mxu0 %vm1647_vm3, %v23267_v14  ;;  %23268 = vst [vmem:[#allocation166_spill] sm:$0xff] %v20453_v8  ;;  %v8169_v54 = vadd.f32 %v7852_v58, %v23269_v37  ;;  %v23276_v37 = vld [vmem:[#allocation202_spill] sm:$0xff] }
 0x4cd   : > { %v8650_v26 = vpop.f32.mrf.mxu0  ;;  %v15036_v44 = vpop.f32.mrf.mxu1  ;;  %15295 = vmatmul.mubr.msk.bf16.gmra.mxu1 %vm1647_vm3, %v23270_v17  ;;  %v23277_v17 = vld [vmem:[#allocation292_spill] sm:$0xff] }
 0x4ce   : > { %v8173_v61 = vadd.f32 %v15036_v44, %v23271_v60  ;;  %15298 = vmatprep.mubr.msk.bf16.mxu1 %vm1647_vm3, %v23272_v3  ;;  %v20461_v25 = vadd.f32 %v8638_v13, %v8169_v54  ;;  %v23279_v60 = vld [vmem:[#allocation52_spill] sm:$0xff] }
 0x4cf   : > { %v15199_v59 = vpop.f32.mrf.mxu0  ;;  %v7864_v10 = vpop.f32.mrf.mxu1 }
 0x4d0   : > { %23273 = vst [vmem:[#allocation29_spill] sm:$0xff] %v20461_v25  ;;  %v8171_v23 = vadd.f32 %v7864_v10, %v23274_v21  ;;  %v20464_v8 = vadd.f32 %v15198_v33, %v8173_v61  ;;  %v23281_v61 = vld [vmem:[#allocation103_spill] sm:$0xff]  ;;  %v23282_v21 = vld [vmem:[#allocation294_spill] sm:$0xff] }
 0x4d1   : > { %v8653_v14 = vpop.f32.mrf.mxu0  ;;  %v15037_v12 = vpop.f32.mrf.mxu1 }
 0x4d2   : > { %23275 = vst [vmem:[#allocation167_spill] sm:$0xff] %v20464_v8  ;;  %v8174_v22 = vadd.f32 %v15037_v12, %v23277_v17  ;;  %v20471_v44 = vadd.f32 %v8650_v26, %v8171_v23  ;;  %v23283_v8 = vld [vmem:[#allocation110_spill] sm:$0xff] }
 0x4d3   : > { %v15202_v58 = vpop.f32.mrf.mxu0  ;;  %15461 = vmatmul.mubr.msk.bf16.gmra.mxu0 %vm1647_vm3, %v23276_v37  ;;  %v7867_v13 = vpop.f32.mrf.mxu1 }
 0x4d4   : > { %15464 = vmatprep.mubr.msk.bf16.mxu0 %vm1647_vm3, %v23278_v52  ;;  %v8172_v3 = vadd.f32 %v7867_v13, %v23279_v60  ;;  %v20474_v25 = vadd.f32 %v15199_v59, %v8174_v22  ;;  %v23286_v22 = vld [vmem:[#allocation206_spill] sm:$0xff]  ;;  %v23287_v59 = vld [vmem:[#allocation297_spill] sm:$0xff]  ;;  %v23288_v60 = vld [vmem:[#allocation212_spill] sm:$0xff] }
 0x4d5   : > { %v8666_v54 = vpop.f32.mrf.mxu0  ;;  %v15040_v33 = vpop.f32.mrf.mxu1  ;;  %15299 = vmatmul.mubr.msk.bf16.gmra.mxu1 %vm1647_vm3, %v23281_v61 }
 0x4d6   : > { %23280 = vst [vmem:[#allocation168_spill] sm:$0xff] %v20474_v25  ;;  %v8176_v37 = vadd.f32 %v15040_v33, %v23282_v21  ;;  %15302 = vmatprep.mubr.msk.bf16.mxu1 %vm1647_vm3, %v23283_v8  ;;  %v20481_v12 = vadd.f32 %v8653_v14, %v8172_v3  ;;  %v23290_v21 = vld [vmem:[#allocation111_spill] sm:$0xff] }
 0x4d7   : > { %v15203_v10 = vpop.f32.mrf.mxu0  ;;  %v7880_v52 = vpop.f32.mrf.mxu1 }
 0x4d8   : > { %23284 = vst [vmem:[#allocation63_spill] sm:$0xff] %v20481_v12  ;;  %v20483_v23 = vadd.f32 %v15202_v58, %v8176_v37  ;;  %v23291_v37 = vld [vmem:[#allocation6_spill] sm:$0xff] }
 0x4d9   : > { %v8668_v26 = vpop.f32.mrf.mxu0  ;;  %v15041_v17 = vpop.f32.mrf.mxu1 }
 0x4da   : > { %23285 = vst [vmem:[#allocation171_spill] sm:$0xff] %v20483_v23  ;;  %v8177_v54 = vadd.f32 %v15041_v17, %v23287_v59  ;;  %v23292_v23 = vld [vmem:[#allocation118_spill] sm:$0xff] }
 0x4db   : > { %v15206_v13 = vpop.f32.mrf.mxu0  ;;  %15465 = vmatmul.mubr.msk.bf16.gmra.mxu0 %vm1647_vm3, %v23286_v22  ;;  %v7882_v33 = vpop.f32.mrf.mxu1 }
 0x4dc   : > { %15468 = vmatprep.mubr.msk.bf16.mxu0 %vm1647_vm3, %v23288_v60  ;;  %v8175_v8 = vadd.f32 %v7882_v33, %v19793_v30  ;;  %v20491_v14 = vadd.f32 %v15203_v10, %v8177_v54  ;;  %v23294_v60 = vld [vmem:[#allocation302_spill] sm:$0xff]  ;;  %v23297_v33 = vld [vmem:[#allocation60_spill] sm:$0xff] }
 0x4dd   : > { %v8681_v61 = vpop.f32.mrf.mxu0  ;;  %v15044_v3 = vpop.f32.mrf.mxu1  ;;  %15303 = vmatmul.mubr.msk.bf16.gmra.mxu1 %vm1647_vm3, %v23290_v21  ;;  %v23296_v54 = vld [vmem:[#allocation214_spill] sm:$0xff] }
 0x4de   : > { %23289 = vst [vmem:[#allocation35_spill] sm:$0xff] %v20491_v14  ;;  %v8179_v52 = vadd.f32 %v15044_v3, %v23291_v37  ;;  %15306 = vmatprep.mubr.msk.bf16.mxu1 %vm1647_vm3, %v23292_v23  ;;  %v20498_v17 = vadd.f32 %v8668_v26, %v8175_v8  ;;  %v23298_v14 = vld [vmem:[#allocation218_spill] sm:$0xff] }
 0x4df   : > { %v15207_v58 = vpop.f32.mrf.mxu0  ;;  %v7895_v22 = vpop.f32.mrf.mxu1 }
 0x4e0   : > { %23293 = vst [vmem:[#allocation172_spill] sm:$0xff] %v20498_v17  ;;  %v8178_v12 = vadd.f32 %v7895_v22, %v23294_v60  ;;  %v20501_v25 = vadd.f32 %v15206_v13, %v8179_v52  ;;  %v23301_v22 = vld [vmem:[#allocation119_spill] sm:$0xff]  ;;  %v23302_v52 = vld [vmem:[#allocation126_spill] sm:$0xff] }
 0x4e1   : > { %v8684_v59 = vpop.f32.mrf.mxu0  ;;  %v15045_v30 = vpop.f32.mrf.mxu1  ;;  %v23311_v17 = vld [vmem:[#allocation134_spill] sm:$0xff] }
 0x4e2   : > { %23295 = vst [vmem:[#allocation173_spill] sm:$0xff] %v20501_v25  ;;  %v8180_v21 = vadd.f32 %v15045_v30, %v23297_v33  ;;  %v20508_v3 = vadd.f32 %v8681_v61, %v8178_v12  ;;  %v23303_v30 = vld [vmem:[#allocation67_spill] sm:$0xff]  ;;  %v23304_v12 = vld [vmem:[#allocation221_spill] sm:$0xff]  ;;  %v23310_v25 = vld [vmem:[#allocation88_spill] sm:$0xff] }
 0x4e3   : > { %v15210_v10 = vpop.f32.mrf.mxu0  ;;  %15469 = vmatmul.mubr.msk.bf16.gmra.mxu0 %vm1647_vm3, %v23296_v54  ;;  %v7898_v26 = vpop.f32.mrf.mxu1  ;;  %v23305_v61 = vld [vmem:[#allocation73_spill] sm:$0xff]  ;;  %v23306_v33 = vld [vmem:[#allocation227_spill] sm:$0xff] }
 0x4e4   : > { %15472 = vmatprep.mubr.msk.bf16.mxu0 %vm1647_vm3, %v23298_v14  ;;  %23299 = vst [vmem:[#allocation69_spill] sm:$0xff] %v20508_v3  ;;  %v20510_v8 = vadd.f32 %v15207_v58, %v8180_v21 }
 0x4e5   : > { %v8696_v23 = vpop.f32.mrf.mxu0  ;;  %v15048_v37 = vpop.f32.mrf.mxu1  ;;  %15307 = vmatmul.mubr.msk.bf16.gmra.mxu1 %vm1647_vm3, %v23301_v22  ;;  %v23308_v22 = vld [vmem:[#allocation81_spill] sm:$0xff] }
 0x4e6   : > { %23300 = vst [vmem:[#allocation175_spill] sm:$0xff] %v20510_v8  ;;  %15310 = vmatprep.mubr.msk.bf16.mxu1 %vm1647_vm3, %v23302_v52 }
 0x4e7   : > { %v15211_v13 = vpop.f32.mrf.mxu0  ;;  %v7910_v59 = vpop.f32.mrf.mxu1 }
 0x4e8   : > { %v8181_v10 = vadd.f32 %v7910_v59, %v23303_v30  ;;  %v23309_v59 = vld [vmem:[#allocation127_spill] sm:$0xff] }
 0x4e9   : > { %v8699_v60 = vpop.f32.mrf.mxu0  ;;  %v15049_v54 = vpop.f32.mrf.mxu1 }
 0x4ea   : > { %v8183_v58 = vadd.f32 %v15049_v54, %v23305_v61  ;;  %v20522_v21 = vadd.f32 %v8696_v23, %v8181_v10  ;;  %v23313_v61 = vld [vmem:[#allocation95_spill] sm:$0xff] }
 0x4eb   : > { %v15214_v14 = vpop.f32.mrf.mxu0  ;;  %15473 = vmatmul.mubr.msk.bf16.gmra.mxu0 %vm1647_vm3, %v23304_v12  ;;  %v7913_v26 = vpop.f32.mrf.mxu1 }
 0x4ec   : > { %15476 = vmatprep.mubr.msk.bf16.mxu0 %vm1647_vm3, %v23306_v33  ;;  %23307 = vst [vmem:[#allocation177_spill] sm:$0xff] %v20522_v21  ;;  %v8182_v52 = vadd.f32 %v7913_v26, %v23308_v22  ;;  %v20525_v8 = vadd.f32 %v15211_v13, %v8183_v58  ;;  %v23315_v26 = vld [vmem:[#allocation229_spill] sm:$0xff]  ;;  %v23316_v22 = vld [vmem:[#allocation236_spill] sm:$0xff] }
 0x4ed   : > { %v8711_v37 = vpop.f32.mrf.mxu0  ;;  %v15052_v3 = vpop.f32.mrf.mxu1  ;;  %15311 = vmatmul.mubr.msk.bf16.gmra.mxu1 %vm1647_vm3, %v23309_v59  ;;  %v23318_v59 = vld [vmem:[#allocation135_spill] sm:$0xff] }
 0x4ee   : > { %v8186_v12 = vadd.f32 %v15052_v3, %v23310_v25  ;;  %15314 = vmatprep.mubr.msk.bf16.mxu1 %vm1647_vm3, %v23311_v17  ;;  %v20532_v54 = vadd.f32 %v8699_v60, %v8182_v52 }
 0x4ef   : > { %v15215_v30 = vpop.f32.mrf.mxu0  ;;  %v7925_v23 = vpop.f32.mrf.mxu1 }
 0x4f0   : > { %23312 = vst [vmem:[#allocation43_spill] sm:$0xff] %v20532_v54  ;;  %v8184_v33 = vadd.f32 %v7925_v23, %v23313_v61  ;;  %v20535_v21 = vadd.f32 %v15214_v14, %v8186_v12  ;;  %v23319_v30 = vld [vmem:[#allocation315_spill] sm:$0xff]  ;;  %v23320_v23 = vld [vmem:[#allocation142_spill] sm:$0xff] }
 0x4f1   : > { %v8714_v10 = vpop.f32.mrf.mxu0  ;;  %v15053_v13 = vpop.f32.mrf.mxu1  ;;  %v23326_v54 = vld [vmem:[#allocation242_spill] sm:$0xff] }
 0x4f2   : > { %23314 = vst [vmem:[#allocation77_spill] sm:$0xff] %v20535_v21  ;;  %v20541_v25 = vadd.f32 %v8711_v37, %v8184_v33  ;;  %v23322_v37 = vld [vmem:[#allocation104_spill] sm:$0xff] }
 0x4f3   : > { %v15218_v58 = vpop.f32.mrf.mxu0  ;;  %15477 = vmatmul.mubr.msk.bf16.gmra.mxu0 %vm1647_vm3, %v23315_v26  ;;  %v7928_v3 = vpop.f32.mrf.mxu1 }
 0x4f4   : > { %15480 = vmatprep.mubr.msk.bf16.mxu0 %vm1647_vm3, %v23316_v22  ;;  %23317 = vst [vmem:[#allocation179_spill] sm:$0xff] %v20541_v25  ;;  %v8185_v60 = vadd.f32 %v7928_v3, %v19844_v31  ;;  %v23324_v3 = vld [vmem:[#allocation238_spill] sm:$0xff] }
 0x4f5   : > { %v8726_v17 = vpop.f32.mrf.mxu0  ;;  %v15056_v52 = vpop.f32.mrf.mxu1  ;;  %15315 = vmatmul.mubr.msk.bf16.gmra.mxu1 %vm1647_vm3, %v23318_v59  ;;  %v23325_v59 = vld [vmem:[#allocation316_spill] sm:$0xff] }
 0x4f6   : > { %v8189_v12 = vadd.f32 %v15056_v52, %v23319_v30  ;;  %15318 = vmatprep.mubr.msk.bf16.mxu1 %vm1647_vm3, %v23320_v23  ;;  %v20549_v61 = vadd.f32 %v8714_v10, %v8185_v60  ;;  %v23327_v30 = vld [vmem:[#allocation318_spill] sm:$0xff] }
 0x4f7   : > { %v15219_v14 = vpop.f32.mrf.mxu0  ;;  %v7940_v13 = vpop.f32.mrf.mxu1 }
 0x4f8   : > { %23321 = vst [vmem:[#allocation181_spill] sm:$0xff] %v20549_v61  ;;  %v8187_v33 = vadd.f32 %v7940_v13, %v23322_v37  ;;  %v20552_v22 = vadd.f32 %v15218_v58, %v8189_v12  ;;  %v23329_v12 = vld [vmem:[#allocation143_spill] sm:$0xff]  ;;  %v23330_v37 = vld [vmem:[#allocation320_spill] sm:$0xff] }
 0x4f9   : > { %v8729_v26 = vpop.f32.mrf.mxu0  ;;  %v15057_v25 = vpop.f32.mrf.mxu1 }
 0x4fa   : > { %23323 = vst [vmem:[#allocation50_spill] sm:$0xff] %v20552_v22  ;;  %v8190_v21 = vadd.f32 %v15057_v25, %v23325_v59  ;;  %v20559_v52 = vadd.f32 %v8726_v17, %v8187_v33  ;;  %v23331_v22 = vld [vmem:[#allocation147_spill] sm:$0xff] }
 0x4fb   : > { %v15222_v31 = vpop.f32.mrf.mxu0  ;;  %15481 = vmatmul.mubr.msk.bf16.gmra.mxu0 %vm1647_vm3, %v23324_v3  ;;  %v7943_v10 = vpop.f32.mrf.mxu1 }
 0x4fc   : > { %15484 = vmatprep.mubr.msk.bf16.mxu0 %vm1647_vm3, %v23326_v54  ;;  %v8188_v23 = vadd.f32 %v7943_v10, %v23327_v30  ;;  %v20562_v61 = vadd.f32 %v15219_v14, %v8190_v21  ;;  %v23334_v21 = vld [vmem:[#allocation245_spill] sm:$0xff]  ;;  %v23335_v14 = vld [vmem:[#allocation112_spill] sm:$0xff]  ;;  %v23336_v30 = vld [vmem:[#allocation251_spill] sm:$0xff] }
 0x4fd   : > { %v8742_v60 = vpop.f32.mrf.mxu0  ;;  %v15060_v58 = vpop.f32.mrf.mxu1  ;;  %15319 = vmatmul.mubr.msk.bf16.gmra.mxu1 %vm1647_vm3, %v23329_v12 }
 0x4fe   : > { %23328 = vst [vmem:[#allocation182_spill] sm:$0xff] %v20562_v61  ;;  %v8192_v3 = vadd.f32 %v15060_v58, %v23330_v37  ;;  %15322 = vmatprep.mubr.msk.bf16.mxu1 %vm1647_vm3, %v23331_v22  ;;  %v20569_v25 = vadd.f32 %v8729_v26, %v8188_v23  ;;  %v23338_v37 = vld [vmem:[#allocation149_spill] sm:$0xff] }
 0x4ff   : > { %v15223_v13 = vpop.f32.mrf.mxu0  ;;  %v7956_v54 = vpop.f32.mrf.mxu1 }
 0x500   : > { %23332 = vst [vmem:[#allocation183_spill] sm:$0xff] %v20569_v25  ;;  %v20571_v33 = vadd.f32 %v15222_v31, %v8192_v3  ;;  %v23339_v3 = vld [vmem:[#allocation321_spill] sm:$0xff] }
 0x501   : > { %v8744_v17 = vpop.f32.mrf.mxu0  ;;  %v15061_v59 = vpop.f32.mrf.mxu1 }
 0x502   : > { %23333 = vst [vmem:[#allocation84_spill] sm:$0xff] %v20571_v33  ;;  %v8193_v60 = vadd.f32 %v15061_v59, %v23335_v14  ;;  %v23340_v33 = vld [vmem:[#allocation152_spill] sm:$0xff] }
 0x503   : > { %v15226_v10 = vpop.f32.mrf.mxu0  ;;  %15485 = vmatmul.mubr.msk.bf16.gmra.mxu0 %vm1647_vm3, %v23334_v21  ;;  %v7958_v58 = vpop.f32.mrf.mxu1 }
 0x504   : > { %15488 = vmatprep.mubr.msk.bf16.mxu0 %vm1647_vm3, %v23336_v30  ;;  %v8191_v22 = vadd.f32 %v7958_v58, %v19881_v27  ;;  %v20579_v26 = vadd.f32 %v15223_v13, %v8193_v60  ;;  %v23341_v30 = vld [vmem:[#allocation322_spill] sm:$0xff]  ;;  %v23344_v58 = vld [vmem:[#allocation120_spill] sm:$0xff] }
 0x505   : > { %v8757_v12 = vpop.f32.mrf.mxu0  ;;  %v15064_v23 = vpop.f32.mrf.mxu1  ;;  %15323 = vmatmul.mubr.msk.bf16.gmra.mxu1 %vm1647_vm3, %v23338_v37  ;;  %v23343_v60 = vld [vmem:[#allocation254_spill] sm:$0xff] }
 0x506   : > { %23337 = vst [vmem:[#allocation185_spill] sm:$0xff] %v20579_v26  ;;  %v8195_v54 = vadd.f32 %v15064_v23, %v23339_v3  ;;  %15326 = vmatprep.mubr.msk.bf16.mxu1 %vm1647_vm3, %v23340_v33  ;;  %v20586_v59 = vadd.f32 %v8744_v17, %v8191_v22  ;;  %v23345_v26 = vld [vmem:[#allocation260_spill] sm:$0xff] }
 0x507   : > { %v15227_v31 = vpop.f32.mrf.mxu0  ;;  %v7971_v21 = vpop.f32.mrf.mxu1 }
 0x508   : > { %v8194_v25 = vadd.f32 %v7971_v21, %v23341_v30  ;;  %v20589_v61 = vadd.f32 %v15226_v10, %v8195_v54  ;;  %v23348_v21 = vld [vmem:[#allocation17_spill] sm:$0xff]  ;;  %v23349_v54 = vld [vmem:[#allocation18_spill] sm:$0xff] }
 0x509   : > { %v8760_v14 = vpop.f32.mrf.mxu0  ;;  %v15065_v27 = vpop.f32.mrf.mxu1 }
 0x50a   : > { %23342 = vst [vmem:[#allocation57_spill] sm:$0xff] %v20589_v61  ;;  %v8196_v37 = vadd.f32 %v15065_v27, %v23344_v58  ;;  %v20596_v23 = vadd.f32 %v8757_v12, %v8194_v25  ;;  %v23350_v27 = vld [vmem:[#allocation325_spill] sm:$0xff]  ;;  %v23351_v25 = vld [vmem:[#allocation263_spill] sm:$0xff]  ;;  %v23352_v12 = vld [vmem:[#allocation326_spill] sm:$0xff] }
 0x50b   : > { %v15230_v13 = vpop.f32.mrf.mxu0  ;;  %15489 = vmatmul.mubr.msk.bf16.gmra.mxu0 %vm1647_vm3, %v23343_v60  ;;  %v7974_v17 = vpop.f32.mrf.mxu1  ;;  %v23353_v58 = vld [vmem:[#allocation269_spill] sm:$0xff]  ;;  %v23357_v61 = vld [vmem:[#allocation24_spill] sm:$0xff] }
 0x50c   : > { %15492 = vmatprep.mubr.msk.bf16.mxu0 %vm1647_vm3, %v23345_v26  ;;  %23346 = vst [vmem:[#allocation187_spill] sm:$0xff] %v20596_v23  ;;  %v20598_v22 = vadd.f32 %v15227_v31, %v8196_v37  ;;  %v23356_v23 = vld [vmem:[#allocation327_spill] sm:$0xff] }
 0x50d   : > { %v8772_v33 = vpop.f32.mrf.mxu0  ;;  %v15068_v3 = vpop.f32.mrf.mxu1  ;;  %15327 = vmatmul.mubr.msk.bf16.gmra.mxu1 %vm1647_vm3, %v23348_v21 }
 0x50e   : > { %23347 = vst [vmem:[#allocation188_spill] sm:$0xff] %v20598_v22  ;;  %15330 = vmatprep.mubr.msk.bf16.mxu1 %vm1647_vm3, %v23349_v54 }
 0x50f   : > { %v15231_v10 = vpop.f32.mrf.mxu0  ;;  %v7986_v14 = vpop.f32.mrf.mxu1 }
 0x510   : > { %v8197_v13 = vadd.f32 %v7986_v14, %v23350_v27  ;;  %v23355_v14 = vld [vmem:[#allocation21_spill] sm:$0xff] }
 0x511   : > { %v8775_v30 = vpop.f32.mrf.mxu0  ;;  %v15069_v60 = vpop.f32.mrf.mxu1 }
 0x512   : > { %v8199_v31 = vadd.f32 %v15069_v60, %v23352_v12  ;;  %v20610_v37 = vadd.f32 %v8772_v33, %v8197_v13  ;;  %v23359_v12 = vld [vmem:[#allocation210_spill] sm:$0xff] }
 0x513   : > { %v15234_v26 = vpop.f32.mrf.mxu0  ;;  %15493 = vmatmul.mubr.msk.bf16.gmra.mxu0 %vm1647_vm3, %v23351_v25  ;;  %v7989_v17 = vpop.f32.mrf.mxu1 }
 0x514   : > { %15496 = vmatprep.mubr.msk.bf16.mxu0 %vm1647_vm3, %v23353_v58  ;;  %23354 = vst [vmem:[#allocation91_spill] sm:$0xff] %v20610_v37  ;;  %v8198_v21 = vadd.f32 %v7989_v17, %v19915_v18  ;;  %v20613_v54 = vadd.f32 %v15231_v10, %v8199_v31  ;;  %v23361_v31 = vld [vmem:[#allocation271_spill] sm:$0xff]  ;;  %v23362_v17 = vld [vmem:[#allocation278_spill] sm:$0xff] }
 0x515   : > { %v8787_v3 = vpop.f32.mrf.mxu0  ;;  %v15072_v22 = vpop.f32.mrf.mxu1  ;;  %15331 = vmatmul.mubr.msk.bf16.gmra.mxu1 %vm1647_vm3, %v23355_v14  ;;  %v23364_v14 = vld [vmem:[#allocation28_spill] sm:$0xff] }
 0x516   : > { %v8202_v25 = vadd.f32 %v15072_v22, %v23356_v23  ;;  %15334 = vmatprep.mubr.msk.bf16.mxu1 %vm1647_vm3, %v23357_v61  ;;  %v20620_v60 = vadd.f32 %v8775_v30, %v8198_v21 }
 0x517   : > { %v15235_v27 = vpop.f32.mrf.mxu0  ;;  %v8001_v33 = vpop.f32.mrf.mxu1 }
 0x518   : > { %23358 = vst [vmem:[#allocation190_spill] sm:$0xff] %v20620_v60  ;;  %v8200_v58 = vadd.f32 %v8001_v33, %v23359_v12  ;;  %v20623_v37 = vadd.f32 %v15234_v26, %v8202_v25  ;;  %v23365_v27 = vld [vmem:[#allocation128_spill] sm:$0xff]  ;;  %v23366_v33 = vld [vmem:[#allocation31_spill] sm:$0xff] }
 0x519   : > { %v8790_v13 = vpop.f32.mrf.mxu0  ;;  %v15073_v18 = vpop.f32.mrf.mxu1  ;;  %v23372_v60 = vld [vmem:[#allocation284_spill] sm:$0xff] }
 0x51a   : > { %23360 = vst [vmem:[#allocation192_spill] sm:$0xff] %v20623_v37  ;;  %v20629_v23 = vadd.f32 %v8787_v3, %v8200_v58  ;;  %v23368_v3 = vld [vmem:[#allocation329_spill] sm:$0xff] }
 0x51b   : > { %v15238_v10 = vpop.f32.mrf.mxu0  ;;  %15497 = vmatmul.mubr.msk.bf16.gmra.mxu0 %vm1647_vm3, %v23361_v31  ;;  %v8004_v22 = vpop.f32.mrf.mxu1 }
 0x51c   : > { %15500 = vmatprep.mubr.msk.bf16.mxu0 %vm1647_vm3, %v23362_v17  ;;  %23363 = vst [vmem:[#allocation64_spill] sm:$0xff] %v20629_v23  ;;  %v8201_v30 = vadd.f32 %v8004_v22, %v19932_v19  ;;  %v23370_v22 = vld [vmem:[#allocation280_spill] sm:$0xff] }
 0x51d   : > { %v8802_v61 = vpop.f32.mrf.mxu0  ;;  %v15076_v21 = vpop.f32.mrf.mxu1  ;;  %15335 = vmatmul.mubr.msk.bf16.gmra.mxu1 %vm1647_vm3, %v23364_v14  ;;  %v23371_v14 = vld [vmem:[#allocation330_spill] sm:$0xff] }
 0x51e   : > { %v8205_v25 = vadd.f32 %v15076_v21, %v23365_v27  ;;  %15338 = vmatprep.mubr.msk.bf16.mxu1 %vm1647_vm3, %v23366_v33  ;;  %v20637_v12 = vadd.f32 %v8790_v13, %v8201_v30  ;;  %v23373_v27 = vld [vmem:[#allocation332_spill] sm:$0xff] }
 0x51f   : > { %v15239_v26 = vpop.f32.mrf.mxu0  ;;  %v8016_v18 = vpop.f32.mrf.mxu1 }
 0x520   : > { %23367 = vst [vmem:[#allocation193_spill] sm:$0xff] %v20637_v12  ;;  %v8203_v58 = vadd.f32 %v8016_v18, %v23368_v3  ;;  %v20640_v17 = vadd.f32 %v15238_v10, %v8205_v25  ;;  %v23374_v25 = vld [vmem:[#allocation34_spill] sm:$0xff]  ;;  %v23375_v3 = vld [vmem:[#allocation136_spill] sm:$0xff] }
 0x521   : > { %v8805_v31 = vpop.f32.mrf.mxu0  ;;  %v15077_v23 = vpop.f32.mrf.mxu1 }
 0x522   : > { %23369 = vst [vmem:[#allocation194_spill] sm:$0xff] %v20640_v17  ;;  %v8206_v37 = vadd.f32 %v15077_v23, %v23371_v14  ;;  %v20647_v21 = vadd.f32 %v8802_v61, %v8203_v58  ;;  %v23376_v17 = vld [vmem:[#allocation40_spill] sm:$0xff] }
 0x523   : > { %v15242_v19 = vpop.f32.mrf.mxu0  ;;  %15501 = vmatmul.mubr.msk.bf16.gmra.mxu0 %vm1647_vm3, %v23370_v22  ;;  %v8019_v13 = vpop.f32.mrf.mxu1 }
 0x524   : > { %15504 = vmatprep.mubr.msk.bf16.mxu0 %vm1647_vm3, %v23372_v60  ;;  %v8204_v33 = vadd.f32 %v8019_v13, %v23373_v27  ;;  %v20650_v12 = vadd.f32 %v15239_v26, %v8206_v37  ;;  %v23379_v37 = vld [vmem:[#allocation287_spill] sm:$0xff]  ;;  %v23380_v26 = vld [vmem:[#allocation217_spill] sm:$0xff] }
 0x525   : > { %v8818_v30 = vpop.f32.mrf.mxu0  ;;  %v15080_v10 = vpop.f32.mrf.mxu1  ;;  %15339 = vmatmul.mubr.msk.bf16.gmra.mxu1 %vm1647_vm3, %v23374_v25  ;;  %v23381_v27 = vld [vmem:[#allocation293_spill] sm:$0xff] }
 0x526   : > { %v8208_v22 = vadd.f32 %v15080_v10, %v23375_v3  ;;  %15342 = vmatprep.mubr.msk.bf16.mxu1 %vm1647_vm3, %v23376_v17  ;;  %v20657_v23 = vadd.f32 %v8805_v31, %v8204_v33  ;;  %v23383_v3 = vld [vmem:[#allocation41_spill] sm:$0xff] }
 0x527   : > { %v15243_v18 = vpop.f32.mrf.mxu0  ;;  %v8032_v60 = vpop.f32.mrf.mxu1 }
 0x528   : > { %23377 = vst [vmem:[#allocation100_spill] sm:$0xff] %v20657_v23  ;;  %v20659_v58 = vadd.f32 %v15242_v19, %v8208_v22  ;;  %v23384_v60 = vld [vmem:[#allocation47_spill] sm:$0xff] }
 0x529   : > { %v8820_v61 = vpop.f32.mrf.mxu0  ;;  %v15081_v14 = vpop.f32.mrf.mxu1 }
 0x52a   : > { %23378 = vst [vmem:[#allocation197_spill] sm:$0xff] %v20659_v58  ;;  %v8209_v30 = vadd.f32 %v15081_v14, %v23380_v26 }
 0x52b   : > { %v15246_v13 = vpop.f32.mrf.mxu0  ;;  %15505 = vmatmul.mubr.msk.bf16.gmra.mxu0 %vm1647_vm3, %v23379_v37  ;;  %v8034_v10 = vpop.f32.mrf.mxu1 }
 0x52c   : > { %15508 = vmatprep.mubr.msk.bf16.mxu0 %vm1647_vm3, %v23381_v27  ;;  %v8207_v17 = vadd.f32 %v8034_v10, %v19969_v4  ;;  %v20667_v31 = vadd.f32 %v15243_v18, %v8209_v30  ;;  %v23385_v27 = vld [vmem:[#allocation97_spill] sm:$0xff]  ;;  %v23386_v30 = vld [vmem:[#allocation296_spill] sm:$0xff]  ;;  %v23387_v10 = vld [vmem:[#allocation223_spill] sm:$0xff] }
 0x52d   : > { %v8833_v25 = vpop.f32.mrf.mxu0  ;;  %v15084_v33 = vpop.f32.mrf.mxu1  ;;  %15343 = vmatmul.mubr.msk.bf16.gmra.mxu1 %vm1647_vm3, %v23383_v3 }
 0x52e   : > { %23382 = vst [vmem:[#allocation71_spill] sm:$0xff] %v20667_v31  ;;  %v8211_v22 = vadd.f32 %v15084_v33, %v19972_v53  ;;  %15346 = vmatprep.mubr.msk.bf16.mxu1 %vm1647_vm3, %v23384_v60  ;;  %v20674_v14 = vadd.f32 %v8820_v61, %v8207_v17  ;;  %v23388_v31 = vld [vmem:[#allocation299_spill] sm:$0xff] }
 0x52f   : > { %v15247_v19 = vpop.f32.mrf.mxu0  ;;  %v8047_v37 = vpop.f32.mrf.mxu1 }
 0x530   : > { %v8210_v58 = vadd.f32 %v8047_v37, %v23385_v27  ;;  %v20677_v23 = vadd.f32 %v15246_v13, %v8211_v22  ;;  %v23391_v37 = vld [vmem:[#allocation49_spill] sm:$0xff]  ;;  %v23392_v22 = vld [vmem:[#allocation54_spill] sm:$0xff] }
 0x531   : > { %v8836_v26 = vpop.f32.mrf.mxu0  ;;  %v15085_v4 = vpop.f32.mrf.mxu1 }
 0x532   : > { %v8212_v3 = vadd.f32 %v15085_v4, %v23387_v10  ;;  %v20684_v53 = vadd.f32 %v8833_v25, %v8210_v58  ;;  %v23393_v4 = vld [vmem:[#allocation334_spill] sm:$0xff]  ;;  %v23394_v58 = vld [vmem:[#allocation300_spill] sm:$0xff]  ;;  %v23396_v10 = vld [vmem:[#allocation303_spill] sm:$0xff] }
 0x533   : > { %v15250_v18 = vpop.f32.mrf.mxu0  ;;  %15509 = vmatmul.mubr.msk.bf16.gmra.mxu0 %vm1647_vm3, %v23386_v30  ;;  %v8050_v61 = vpop.f32.mrf.mxu1  ;;  %v23395_v25 = vld [vmem:[#allocation144_spill] sm:$0xff] }
 0x534   : > { %15512 = vmatprep.mubr.msk.bf16.mxu0 %vm1647_vm3, %v23388_v31  ;;  %23389 = vst [vmem:[#allocation198_spill] sm:$0xff] %v20684_v53  ;;  %v20686_v33 = vadd.f32 %v15247_v19, %v8212_v3  ;;  %v23398_v53 = vld [vmem:[#allocation61_spill] sm:$0xff] }
 0x535   : > { %v8848_v17 = vpop.f32.mrf.mxu0  ;;  %v15088_v60 = vpop.f32.mrf.mxu1  ;;  %15347 = vmatmul.mubr.msk.bf16.gmra.mxu1 %vm1647_vm3, %v23391_v37 }
 0x536   : > { %23390 = vst [vmem:[#allocation199_spill] sm:$0xff] %v20686_v33  ;;  %15350 = vmatprep.mubr.msk.bf16.mxu1 %vm1647_vm3, %v23392_v22 }
 0x537   : > { %v15251_v13 = vpop.f32.mrf.mxu0  ;;  %v8062_v26 = vpop.f32.mrf.mxu1 }
 0x538   : > { %v8213_v18 = vadd.f32 %v8062_v26, %v23393_v4  ;;  %v23397_v26 = vld [vmem:[#allocation55_spill] sm:$0xff] }
 0x539   : > { %v8851_v27 = vpop.f32.mrf.mxu0  ;;  %v15089_v30 = vpop.f32.mrf.mxu1 }
 0x53a   : > { %v8215_v19 = vadd.f32 %v15089_v30, %v23395_v25  ;;  %v20698_v3 = vadd.f32 %v8848_v17, %v8213_v18 }
 0x53b   : > { %v15254_v31 = vpop.f32.mrf.mxu0  ;;  %15513 = vmatmul.mubr.msk.bf16.gmra.mxu0 %vm1647_vm3, %v23394_v58  ;;  %v8065_v61 = vpop.f32.mrf.mxu1 }
 0x53c   : > { %15516 = vmatprep.mubr.msk.bf16.mxu0 %vm1647_vm3, %v23396_v10  ;;  %v8214_v37 = vadd.f32 %v8065_v61, %v20003_v2  ;;  %v20701_v22 = vadd.f32 %v15251_v13, %v8215_v19  ;;  %v23401_v19 = vld [vmem:[#allocation304_spill] sm:$0xff]  ;;  %v23402_v61 = vld [vmem:[#allocation305_spill] sm:$0xff] }
 0x53d   : > { %v8863_v60 = vpop.f32.mrf.mxu0  ;;  %v15092_v33 = vpop.f32.mrf.mxu1  ;;  %15351 = vmatmul.mubr.msk.bf16.gmra.mxu1 %vm1647_vm3, %v23397_v26  ;;  %v23404_v26 = vld [vmem:[#allocation62_spill] sm:$0xff] }
 0x53e   : > { %v8218_v58 = vadd.f32 %v15092_v33, %v20006_v6  ;;  %15354 = vmatprep.mubr.msk.bf16.mxu1 %vm1647_vm3, %v23398_v53  ;;  %v20708_v30 = vadd.f32 %v8851_v27, %v8214_v37 }
 0x53f   : > { %v15255_v4 = vpop.f32.mrf.mxu0  ;;  %v8077_v17 = vpop.f32.mrf.mxu1 }
 0x540   : > { %23399 = vst [vmem:[#allocation108_spill] sm:$0xff] %v20708_v30  ;;  %v8216_v25 = vadd.f32 %v8077_v17, %v20013_v29  ;;  %v20711_v10 = vadd.f32 %v15254_v31, %v8218_v58  ;;  %v23405_v4 = vld [vmem:[#allocation68_spill] sm:$0xff] }
 0x541   : > { %v8866_v18 = vpop.f32.mrf.mxu0  ;;  %v15093_v2 = vpop.f32.mrf.mxu1 }
 0x542   : > { %23400 = vst [vmem:[#allocation201_spill] sm:$0xff] %v20711_v10  ;;  %v20717_v6 = vadd.f32 %v8863_v60, %v8216_v25 }
 0x543   : > { %v15422_v13 = vpop.f32.mrf.mxu0  ;;  %15517 = vmatmul.mubr.msk.bf16.gmra.mxu0 %vm1647_vm3, %v23401_v19  ;;  %v8080_v33 = vpop.f32.mrf.mxu1 }
 0x544   : > { %15520 = vmatprep.mubr.msk.bf16.mxu0 %vm1647_vm3, %v23402_v61  ;;  %23403 = vst [vmem:[#allocation203_spill] sm:$0xff] %v20717_v6  ;;  %v8217_v27 = vadd.f32 %v8080_v33, %v20020_v42  ;;  %v20731_v42 = vld [vmem:[%s21721_s4] ss:$0 sm:$0xff]  ;;  %v23407_v33 = vld [vmem:[#allocation306_spill] sm:$0xff] }
 0x545   : > { %v9885_v53 = vpop.f32.mrf.mxu0  ;;  %v15260_v37 = vpop.f32.mrf.mxu1  ;;  %15355 = vmatmul.mubr.msk.bf16.gmra.mxu1 %vm1647_vm3, %v23404_v26 }
 0x546   : > { %v9694_v31 = vadd.f32 %v15260_v37, %v20023_v45  ;;  %15358 = vmatprep.mubr.msk.bf16.mxu1 %vm1647_vm3, %v23405_v4  ;;  %v20725_v58 = vadd.f32 %v8866_v18, %v8217_v27  ;;  %v23408_v18 = vld [vmem:[#allocation307_spill] sm:$0xff] }
 0x547   : > { %v15423_v29 = vpop.f32.mrf.mxu0  ;;  %v9085_v17 = vpop.f32.mrf.mxu1 }
 0x548   : > { %23406 = vst [vmem:[#allocation78_spill] sm:$0xff] %v20725_v58  ;;  %v10494_v60 = vadd.f32 %v15422_v13, %v9694_v31  ;;  %v9692_v25 = vadd.f32 %v9085_v17, %v20031_v9  ;;  %v23409_v17 = vld [vmem:[#allocation70_spill] sm:$0xff] }
 0x549   : > { %v9888_v2 = vpop.f32.mrf.mxu0  ;;  %v15261_v19 = vpop.f32.mrf.mxu1 }
 0x54a   : > { %v10492_v45 = vadd.f32 %v9885_v53, %v9692_v25  ;;  %v9695_v37 = vadd.f32 %v15261_v19, %v20035_v48  ;;  %v10629_v9 = vadd.f32 %v20731_v42, %v10494_v60 }
 0x54b   : > { %v15426_v61 = vpop.f32.mrf.mxu0  ;;  %15521 = vmatmul.mubr.msk.bf16.gmra.mxu0 %vm1647_vm3, %v23407_v33  ;;  %v9088_v27 = vpop.f32.mrf.mxu1  ;;  %v23410_v33 = vld [vmem:[#allocation75_spill] sm:$0xff] }
 0x54c   : > { %15524 = vmatprep.mubr.msk.bf16.mxu0 %vm1647_vm3, %v23408_v18  ;;  %v10495_v26 = vadd.f32 %v15423_v29, %v9695_v37  ;;  %v9693_v31 = vadd.f32 %v9088_v27, %v20040_v11  ;;  %v10627_v53 = vadd.f32 %v20731_v42, %v10492_v45  ;;  %v10757_v37 = vmax.f32 %v10629_v9, 0.0 }
 0x54d   : > { %v9901_v13 = vpop.f32.mrf.mxu0  ;;  %v15264_v4 = vpop.f32.mrf.mxu1  ;;  %15359 = vmatmul.mubr.msk.bf16.gmra.mxu1 %vm1647_vm3, %v23409_v17  ;;  %v23411_v17 = vld [vmem:[#allocation308_spill] sm:$0xff] }
 0x54e   : > { %v10630_v48 = vadd.f32 %v20731_v42, %v10495_v26  ;;  %v10493_v25 = vadd.f32 %v9888_v2, %v9693_v31  ;;  %v9697_v19 = vadd.f32 %v15264_v4, %v20042_v24  ;;  %15362 = vmatprep.mubr.msk.bf16.mxu1 %vm1647_vm3, %v23410_v33  ;;  %v10755_v2 = vmax.f32 %v10627_v53, 0.0  ;;  %v23412_v4 = vld [vmem:[#allocation309_spill] sm:$0xff] }
 0x54f   : > { %v15427_v58 = vpop.f32.mrf.mxu0  ;;  %v9101_v60 = vpop.f32.mrf.mxu1 }
 0x550   : > { %v10758_v11 = vmax.f32 %v10630_v48, 0.0  ;;  %v10628_v18 = vadd.f32 %v20731_v42, %v10493_v25  ;;  %v10497_v27 = vadd.f32 %v15426_v61, %v9697_v19 }
 0x551   : > { %v9903_v29 = vpop.f32.mrf.mxu0  ;;  %v15265_v13 = vpop.f32.mrf.mxu1 }
 0x552   : > { %v10884_v24 = vpack.c.bf16 %v10758_v11, %v10757_v37  ;;  %v10756_v26 = vmax.f32 %v10628_v18, 0.0  ;;  %v9698_v31 = vadd.f32 %v15265_v13, %v20052_v5  ;;  %v10632_v33 = vadd.f32 %v20731_v42, %v10497_v27  ;;  %v23415_v37 = vld [vmem:[#allocation76_spill] sm:$0xff] }
 0x553   : > { %v15430_v45 = vpop.f32.mrf.mxu0  ;;  %15525 = vmatmul.mubr.msk.bf16.gmra.mxu0 %vm1647_vm3, %v23411_v17  ;;  %v9103_v9 = vpop.f32.mrf.mxu1 }
 0x554   : > { %15528 = vmatprep.mubr.msk.bf16.mxu0 %vm1647_vm3, %v23412_v4  ;;  %v10956_v25 = vshrl.u32 %v10884_v24, 16  ;;  %v10883_v61 = vpack.c.bf16 %v10756_v26, %v10755_v2  ;;  %v10959_v53 = vshll.u32 %v10884_v24, 16  ;;  %v9696_v5 = vadd.f32 %v9103_v9, %v20057_v16  ;;  %v23416_v26 = vld [vmem:[#allocation82_spill] sm:$0xff] }
 0x555   : > { %v9916_v48 = vpop.f32.mrf.mxu0  ;;  %v15268_v60 = vpop.f32.mrf.mxu1  ;;  %15363 = vmatmul.mubr.msk.bf16.gmra.mxu1 %vm1647_vm3, %v23415_v37  ;;  %v10498_v17 = vadd.f32 %v15427_v58, %v9698_v31  ;;  %v10760_v30 = vmax.f32 %v10632_v33, 0.0 }
 0x556   : > { %v10958_v18 = vrot.slane %v10956_v25, 7  ;;  %v10949_v13 = vshrl.u32 %v10883_v61, 16  ;;  %v9700_v2 = vadd.f32 %v15268_v60, %v20060_v20  ;;  %15366 = vmatprep.mubr.msk.bf16.mxu1 %vm1647_vm3, %v23416_v26  ;;  %v10952_v4 = vshll.u32 %v10883_v61, 16  ;;  %v23417_v26 = vld [vmem:[#allocation310_spill] sm:$0xff] }
 0x557   : > { %v15431_v11 = vpop.f32.mrf.mxu0  ;;  %v10496_v24 = vadd.f32 %v9903_v29, %v9696_v5  ;;  %v9116_v6 = vpop.f32.mrf.mxu1 }
 0x558   : > { %v10961_v10 = vor.u32 %v10959_v53, %v10958_v18  ;;  %v11526_v16 = vsel %vm20760_vm9, %v10958_v18, 0  ;;  %v10951_v9 = vrot.slane %v10949_v13, 7  ;;  %v10500_v37 = vadd.f32 %v15430_v45, %v9700_v2  ;;  %v23418_v18 = vld [vmem:[#allocation311_spill] sm:$0xff] }
 0x559   : > { %v9919_v27 = vpop.f32.mrf.mxu0  ;;  %v13232_v25 = vcombine.low %v11526_v16, %v11526_v16  ;;  %v10631_v58 = vadd.f32 %v20731_v42, %v10496_v24  ;;  %v9699_v20 = vadd.f32 %v9116_v6, %v20068_v0  ;;  %v15269_v31 = vpop.f32.mrf.mxu1  ;;  %v10633_v53 = vadd.f32 %v20731_v42, %v10498_v17 }
 0x55a   : > { %v10954_v29 = vor.u32 %v10952_v4, %v10951_v9  ;;  %v10962_v61 = vsel %vm10947_vm8, %v10951_v9, %v10961_v10  ;;  %v9701_v5 = vadd.f32 %v15269_v31, %v20071_v50  ;;  %v10635_v17 = vadd.f32 %v20731_v42, %v10500_v37  ;;  %v23419_v9 = vld [vmem:[#allocation83_spill] sm:$0xff] }
 0x55b   : > { %v15434_v60 = vpop.f32.mrf.mxu0  ;;  %15529 = vmatmul.mubr.msk.bf16.gmra.mxu0 %vm1647_vm3, %v23417_v26  ;;  %12107 = vst.msk [vmem:[%s20783_s16 + $0x10] sm:$0xf] %vm12102_vm10, %v13232_v25  ;;  %v13230_v0 = vcombine.low %v10962_v61, %v10962_v61  ;;  %v13231_v6 = vcombine.high %v10962_v61, %v10962_v61  ;;  %v10759_v45 = vmax.f32 %v10631_v58, 0.0  ;;  %v10499_v33 = vadd.f32 %v9916_v48, %v9699_v20  ;;  %v9119_v13 = vpop.f32.mrf.mxu1  ;;  %v23420_v20 = vld [vmem:[#allocation90_spill] sm:$0xff] }
 0x55c   : > { %15532 = vmatprep.mubr.msk.bf16.mxu0 %vm1647_vm3, %v23418_v18  ;;  %v11494_v50 = vsel %vm20760_vm9, 0, %v10954_v29  ;;  %v10501_v2 = vadd.f32 %v15431_v11, %v9701_v5  ;;  %v10761_v11 = vmax.f32 %v10633_v53, 0.0  ;;  %v10763_v26 = vmax.f32 %v10635_v17, 0.0 }
 0x55d   : > { %v9931_v10 = vpop.f32.mrf.mxu0  ;;  %v13228_v4 = vcombine.low %v11494_v50, %v11494_v50  ;;  %v13229_v24 = vcombine.high %v11494_v50, %v11494_v50  ;;  %12105 = vst.msk [vmem:[%s20783_s16 + $0x8] sm:$0xf] %vm12102_vm10, %v13230_v0  ;;  %12106 = vst.msk [vmem:[%s20783_s16 + $0xc] sm:$0xf] %vm12102_vm10, %v13231_v6  ;;  %v10885_v27 = vpack.c.bf16 %v10760_v30, %v10759_v45  ;;  %v15272_v48 = vpop.f32.mrf.mxu1  ;;  %15367 = vmatmul.mubr.msk.bf16.gmra.mxu1 %vm1647_vm3, %v23419_v9 }
 0x55e   : > { %v10634_v16 = vadd.f32 %v20731_v42, %v10499_v33  ;;  %v10636_v58 = vadd.f32 %v20731_v42, %v10501_v2  ;;  %15370 = vmatprep.mubr.msk.bf16.mxu1 %vm1647_vm3, %v23420_v20  ;;  %v23421_v33 = vld [vmem:[#allocation312_spill] sm:$0xff]  ;;  %v23422_v2 = vld [vmem:[#allocation313_spill] sm:$0xff] }
 0x55f   : > { %v15435_v25 = vpop.f32.mrf.mxu0  ;;  %12103 = vst.msk [vmem:[%s20783_s16] sm:$0xf] %vm12102_vm10, %v13228_v4  ;;  %12104 = vst.msk [vmem:[%s20783_s16 + $0x4] sm:$0xf] %vm12102_vm10, %v13229_v24  ;;  %v10964_v37 = vshrl.u32 %v10885_v27, 16  ;;  %v9131_v30 = vpop.f32.mrf.mxu1  ;;  %v10967_v18 = vshll.u32 %v10885_v27, 16 }
 0x560   : > { %v10762_v31 = vmax.f32 %v10634_v16, 0.0  ;;  %v10764_v29 = vmax.f32 %v10636_v58, 0.0  ;;  %v9702_v61 = vadd.f32 %v9131_v30, %v20082_v40 }
 0x561   : > { %v9934_v60 = vpop.f32.mrf.mxu0  ;;  %v10966_v5 = vrot.slane %v10964_v37, 7  ;;  %v15273_v6 = vpop.f32.mrf.mxu1 }
 0x562   : > { %v10886_v0 = vpack.c.bf16 %v10762_v31, %v10761_v11  ;;  %v10887_v13 = vpack.c.bf16 %v10764_v29, %v10763_v26  ;;  %v10502_v50 = vadd.f32 %v9931_v10, %v9702_v61  ;;  %v9704_v53 = vadd.f32 %v15273_v6, %v20086_v46  ;;  %v23423_v11 = vld [vmem:[#allocation92_spill] sm:$0xff]  ;;  %v23424_v61 = vld [vmem:[#allocation98_spill] sm:$0xff] }
 0x563   : > { %v15438_v45 = vpop.f32.mrf.mxu0  ;;  %15533 = vmatmul.mubr.msk.bf16.gmra.mxu0 %vm1647_vm3, %v23421_v33  ;;  %v10969_v4 = vor.u32 %v10967_v18, %v10966_v5  ;;  %v9134_v24 = vpop.f32.mrf.mxu1 }
 0x564   : > { %15536 = vmatprep.mubr.msk.bf16.mxu0 %vm1647_vm3, %v23422_v2  ;;  %v10971_v17 = vshrl.u32 %v10886_v0, 16  ;;  %v10974_v40 = vshll.u32 %v10886_v0, 16  ;;  %v10979_v48 = vshrl.u32 %v10887_v13, 16  ;;  %v10637_v27 = vadd.f32 %v20731_v42, %v10502_v50 }
 0x565   : > { %v9946_v16 = vpop.f32.mrf.mxu0  ;;  %v11495_v9 = vsel %vm20760_vm9, 0, %v10969_v4  ;;  %v10504_v20 = vadd.f32 %v15435_v25, %v9704_v53  ;;  %v9703_v46 = vadd.f32 %v9134_v24, %v20091_v35  ;;  %v15276_v10 = vpop.f32.mrf.mxu1  ;;  %15371 = vmatmul.mubr.msk.bf16.gmra.mxu1 %vm1647_vm3, %v23423_v11  ;;  %v10982_v29 = vshll.u32 %v10887_v13, 16 }
 0x566   : > { %v10973_v58 = vrot.slane %v10971_v17, 7  ;;  %v13233_v31 = vcombine.low %v11495_v9, %v11495_v9  ;;  %v13234_v30 = vcombine.high %v11495_v9, %v11495_v9  ;;  %v20816_v26 = vrot.slane %v10979_v48, 7  ;;  %15374 = vmatprep.mubr.msk.bf16.mxu1 %vm1647_vm3, %v23424_v61  ;;  %v23425_v48 = vld [vmem:[#allocation314_spill] sm:$0xff]  ;;  %v23427_v61 = vld [vmem:[#allocation99_spill] sm:$0xff] }
 0x567   : > { %v15439_v37 = vpop.f32.mrf.mxu0  ;;  %v10503_v0 = vadd.f32 %v9934_v60, %v9703_v46  ;;  %v9146_v6 = vpop.f32.mrf.mxu1  ;;  %v9707_v13 = vadd.f32 %v15276_v10, %v20094_v57  ;;  %v10765_v4 = vmax.f32 %v10637_v27, 0.0  ;;  %v10639_v17 = vadd.f32 %v20731_v42, %v10504_v20  ;;  %v23426_v27 = vld [vmem:[#allocation317_spill] sm:$0xff] }
 0x568   : > { %v10976_v18 = vor.u32 %v10974_v40, %v10973_v58  ;;  %v11527_v25 = vsel %vm20760_vm9, %v10973_v58, 0  ;;  %12108 = vst.msk [vmem:[%s20783_s16 + $0x14] sm:$0xf] %vm12102_vm10, %v13233_v31  ;;  %12109 = vst.msk [vmem:[%s20783_s16 + $0x18] sm:$0xf] %vm12102_vm10, %v13234_v30  ;;  %v10984_v50 = vor.u32 %v10982_v29, %v20816_v26  ;;  %v9705_v53 = vadd.f32 %v9146_v6, %v20101_v63  ;;  %v23428_v6 = vld [vmem:[#allocation106_spill] sm:$0xff] }
 0x569   : > { %v9949_v35 = vpop.f32.mrf.mxu0  ;;  %v13237_v33 = vcombine.low %v11527_v25, %v11527_v25  ;;  %v10638_v60 = vadd.f32 %v20731_v42, %v10503_v0  ;;  %v15277_v24 = vpop.f32.mrf.mxu1 }
 0x56a   : > { %v10977_v2 = vsel %vm10947_vm8, %v10966_v5, %v10976_v18  ;;  %v11496_v63 = vsel %vm20760_vm9, 0, %v10984_v50  ;;  %v10507_v5 = vadd.f32 %v15438_v45, %v9707_v13  ;;  %v10505_v10 = vadd.f32 %v9946_v16, %v9705_v53 }
 0x56b   : > { %v15442_v40 = vpop.f32.mrf.mxu0  ;;  %15537 = vmatmul.mubr.msk.bf16.gmra.mxu0 %vm1647_vm3, %v23425_v48  ;;  %v13235_v9 = vcombine.low %v10977_v2, %v10977_v2  ;;  %v13236_v57 = vcombine.high %v10977_v2, %v10977_v2  ;;  %12112 = vst.msk [vmem:[%s20783_s16 + $0x24] sm:$0xf] %vm12102_vm10, %v13237_v33  ;;  %v13238_v58 = vcombine.low %v11496_v63, %v11496_v63  ;;  %v10766_v46 = vmax.f32 %v10638_v60, 0.0  ;;  %v9149_v11 = vpop.f32.mrf.mxu1 }
 0x56c   : > { %15540 = vmatprep.mubr.msk.bf16.mxu0 %vm1647_vm3, %v23426_v27  ;;  %v13239_v20 = vcombine.high %v11496_v63, %v11496_v63  ;;  %v9706_v31 = vadd.f32 %v9149_v11, %v20108_v38  ;;  %v10640_v30 = vadd.f32 %v20731_v42, %v10505_v10  ;;  %v10642_v18 = vadd.f32 %v20731_v42, %v10507_v5  ;;  %v23429_v63 = vld [vmem:[#allocation319_spill] sm:$0xff] }
 0x56d   : > { %v9961_v37 = vpop.f32.mrf.mxu0  ;;  %12110 = vst.msk [vmem:[%s20783_s16 + $0x1c] sm:$0xf] %vm12102_vm10, %v13235_v9  ;;  %12111 = vst.msk [vmem:[%s20783_s16 + $0x20] sm:$0xf] %vm12102_vm10, %v13236_v57  ;;  %v10888_v45 = vpack.c.bf16 %v10766_v46, %v10765_v4  ;;  %v15280_v29 = vpop.f32.mrf.mxu1  ;;  %15375 = vmatmul.mubr.msk.bf16.gmra.mxu1 %vm1647_vm3, %v23427_v61  ;;  %v10767_v38 = vmax.f32 %v10639_v17, 0.0  ;;  %v23430_v27 = vld [vmem:[#allocation323_spill] sm:$0xff] }
 0x56e   : > { %12113 = vst.msk [vmem:[%s20783_s16 + $0x28] sm:$0xf] %vm12102_vm10, %v13238_v58  ;;  %12114 = vst.msk [vmem:[%s20783_s16 + $0x2c] sm:$0xf] %vm12102_vm10, %v13239_v20  ;;  %v10506_v25 = vadd.f32 %v9949_v35, %v9706_v31  ;;  %v9710_v0 = vadd.f32 %v15280_v29, %v20111_v7  ;;  %15378 = vmatprep.mubr.msk.bf16.mxu1 %vm1647_vm3, %v23428_v6  ;;  %v10768_v50 = vmax.f32 %v10640_v30, 0.0  ;;  %v10770_v7 = vmax.f32 %v10642_v18, 0.0 }
 0x56f   : > { %v15443_v16 = vpop.f32.mrf.mxu0  ;;  %v10986_v33 = vshrl.u32 %v10888_v45, 16  ;;  %v9161_v13 = vpop.f32.mrf.mxu1  ;;  %v10989_v48 = vshll.u32 %v10888_v45, 16 }
 0x570   : > { %v10641_v2 = vadd.f32 %v20731_v42, %v10506_v25  ;;  %v10510_v4 = vadd.f32 %v15442_v40, %v9710_v0  ;;  %v9708_v60 = vadd.f32 %v9161_v13, %v20119_v15  ;;  %v10889_v9 = vpack.c.bf16 %v10768_v50, %v10767_v38  ;;  %v23431_v0 = vld [vmem:[#allocation107_spill] sm:$0xff] }
 0x571   : > { %v9964_v53 = vpop.f32.mrf.mxu0  ;;  %v10988_v24 = vrot.slane %v10986_v33, 7  ;;  %v15281_v57 = vpop.f32.mrf.mxu1 }
 0x572   : > { %v10769_v5 = vmax.f32 %v10641_v2, 0.0  ;;  %v9711_v17 = vadd.f32 %v15281_v57, %v20123_v55  ;;  %v10994_v15 = vshrl.u32 %v10889_v9, 16  ;;  %v10645_v20 = vadd.f32 %v20731_v42, %v10510_v4 }
 0x573   : > { %v15446_v35 = vpop.f32.mrf.mxu0  ;;  %15541 = vmatmul.mubr.msk.bf16.gmra.mxu0 %vm1647_vm3, %v23429_v63  ;;  %v10991_v58 = vor.u32 %v10989_v48, %v10988_v24  ;;  %v11528_v40 = vsel %vm20760_vm9, %v10988_v24, 0  ;;  %v9164_v46 = vpop.f32.mrf.mxu1  ;;  %v10997_v31 = vshll.u32 %v10889_v9, 16  ;;  %v10508_v30 = vadd.f32 %v9961_v37, %v9708_v60  ;;  %v23432_v37 = vld [vmem:[#allocation114_spill] sm:$0xff] }
 0x574   : > { %15544 = vmatprep.mubr.msk.bf16.mxu0 %vm1647_vm3, %v23430_v27  ;;  %v13242_v11 = vcombine.low %v11528_v40, %v11528_v40  ;;  %v10890_v45 = vpack.c.bf16 %v10770_v7, %v10769_v5  ;;  %v10996_v29 = vrot.slane %v10994_v15, 7  ;;  %v10511_v61 = vadd.f32 %v15443_v16, %v9711_v17  ;;  %v23433_v48 = vld [vmem:[#allocation226_spill] sm:$0xff]  ;;  %v23434_v27 = vld [vmem:[#allocation324_spill] sm:$0xff] }
 0x575   : > { %v9977_v10 = vpop.f32.mrf.mxu0  ;;  %v10992_v55 = vsel %vm10947_vm8, %v20816_v26, %v10991_v58  ;;  %v9709_v18 = vadd.f32 %v9164_v46, %v20128_v34  ;;  %v15284_v25 = vpop.f32.mrf.mxu1  ;;  %15379 = vmatmul.mubr.msk.bf16.gmra.mxu1 %vm1647_vm3, %v23431_v0  ;;  %v10643_v24 = vadd.f32 %v20731_v42, %v10508_v30  ;;  %v10773_v63 = vmax.f32 %v10645_v20, 0.0 }
 0x576   : > { %v13240_v38 = vcombine.low %v10992_v55, %v10992_v55  ;;  %v13241_v33 = vcombine.high %v10992_v55, %v10992_v55  ;;  %12117 = vst.msk [vmem:[%s20783_s16 + $0x38] sm:$0xf] %vm12102_vm10, %v13242_v11  ;;  %v11001_v50 = vshrl.u32 %v10890_v45, 16  ;;  %15382 = vmatprep.mubr.msk.bf16.mxu1 %vm1647_vm3, %v23432_v37  ;;  %v10999_v26 = vor.u32 %v10997_v31, %v10996_v29  ;;  %v23435_v10 = vld [vmem:[#allocation208_spill] sm:$0xff] }
 0x577   : > { %v15447_v6 = vpop.f32.mrf.mxu0  ;;  %v10646_v13 = vadd.f32 %v20731_v42, %v10511_v61  ;;  %v10509_v16 = vadd.f32 %v9964_v53, %v9709_v18  ;;  %v9177_v2 = vpop.f32.mrf.mxu1  ;;  %v11004_v60 = vshll.u32 %v10890_v45, 16  ;;  %v9713_v9 = vadd.f32 %v15284_v25, %v23433_v48  ;;  %v23436_v25 = vld [vmem:[#allocation228_spill] sm:$0xff] }
 0x578   : > { %12115 = vst.msk [vmem:[%s20783_s16 + $0x30] sm:$0xf] %vm12102_vm10, %v13240_v38  ;;  %12116 = vst.msk [vmem:[%s20783_s16 + $0x34] sm:$0xf] %vm12102_vm10, %v13241_v33  ;;  %v11003_v34 = vrot.slane %v11001_v50, 7  ;;  %v11497_v57 = vsel %vm20760_vm9, 0, %v10999_v26 }
 0x579   : > { %v9979_v4 = vpop.f32.mrf.mxu0  ;;  %v10774_v7 = vmax.f32 %v10646_v13, 0.0  ;;  %v10644_v53 = vadd.f32 %v20731_v42, %v10509_v16  ;;  %v15285_v5 = vpop.f32.mrf.mxu1  ;;  %v13243_v58 = vcombine.low %v11497_v57, %v11497_v57  ;;  %v13244_v40 = vcombine.high %v11497_v57, %v11497_v57  ;;  %v23437_v38 = vld [vmem:[#allocation148_spill] sm:$0xff] }
 0x57a   : > { %v11006_v15 = vor.u32 %v11004_v60, %v11003_v34  ;;  %v11529_v46 = vsel %vm20760_vm9, %v11003_v34, 0  ;;  %v10513_v45 = vadd.f32 %v15446_v35, %v9713_v9  ;;  %v10771_v18 = vmax.f32 %v10643_v24, 0.0  ;;  %v23438_v13 = vld [vmem:[#allocation116_spill] sm:$0xff]  ;;  %v23439_v60 = vld [vmem:[#allocation122_spill] sm:$0xff]  ;;  %v23440_v9 = vld [vmem:[#allocation233_spill] sm:$0xff] }
 0x57b   : > { %v15450_v17 = vpop.f32.mrf.mxu0  ;;  %15545 = vmatmul.mubr.msk.bf16.gmra.mxu0 %vm1647_vm3, %v23434_v27  ;;  %v13247_v20 = vcombine.low %v11529_v46, %v11529_v46  ;;  %v10892_v11 = vpack.c.bf16 %v10774_v7, %v10773_v63  ;;  %v10772_v31 = vmax.f32 %v10644_v53, 0.0  ;;  %v9179_v30 = vpop.f32.mrf.mxu1  ;;  %12118 = vst.msk [vmem:[%s20783_s16 + $0x3c] sm:$0xf] %vm12102_vm10, %v13243_v58  ;;  %12119 = vst.msk [vmem:[%s20783_s16 + $0x40] sm:$0xf] %vm12102_vm10, %v13244_v40 }
 0x57c   : > { %15548 = vmatprep.mubr.msk.bf16.mxu0 %vm1647_vm3, %v23435_v10  ;;  %v11007_v61 = vsel %vm10947_vm8, %v10996_v29, %v11006_v15  ;;  %v9714_v0 = vadd.f32 %v15285_v5, %v23436_v25  ;;  %v9712_v33 = vadd.f32 %v9179_v30, %v23437_v38  ;;  %v10648_v48 = vadd.f32 %v20731_v42, %v10513_v45  ;;  %v23441_v10 = vld [vmem:[#allocation328_spill] sm:$0xff]  ;;  %v23442_v45 = vld [vmem:[#allocation235_spill] sm:$0xff]  ;;  %v23444_v25 = vld [vmem:[#allocation113_spill] sm:$0xff] }
 0x57d   : > { %v9992_v55 = vpop.f32.mrf.mxu0  ;;  %v13245_v50 = vcombine.low %v11007_v61, %v11007_v61  ;;  %v13246_v37 = vcombine.high %v11007_v61, %v11007_v61  ;;  %12122 = vst.msk [vmem:[%s20783_s16 + $0x4c] sm:$0xf] %vm12102_vm10, %v13247_v20  ;;  %v11016_v35 = vshrl.u32 %v10892_v11, 16  ;;  %v15288_v26 = vpop.f32.mrf.mxu1  ;;  %15383 = vmatmul.mubr.msk.bf16.gmra.mxu1 %vm1647_vm3, %v23438_v13  ;;  %v10891_v2 = vpack.c.bf16 %v10772_v31, %v10771_v18  ;;  %v23443_v61 = vld [vmem:[#allocation89_spill] sm:$0xff] }
 0x57e   : > { %v10512_v34 = vadd.f32 %v9979_v4, %v9712_v33  ;;  %15386 = vmatprep.mubr.msk.bf16.mxu1 %vm1647_vm3, %v23439_v60  ;;  %v11019_v24 = vshll.u32 %v10892_v11, 16  ;;  %v9716_v57 = vadd.f32 %v15288_v26, %v23440_v9  ;;  %v10514_v5 = vadd.f32 %v15447_v6, %v9714_v0 }
 0x57f   : > { %v15451_v16 = vpop.f32.mrf.mxu0  ;;  %12120 = vst.msk [vmem:[%s20783_s16 + $0x44] sm:$0xf] %vm12102_vm10, %v13245_v50  ;;  %12121 = vst.msk [vmem:[%s20783_s16 + $0x48] sm:$0xf] %vm12102_vm10, %v13246_v37  ;;  %v11018_v29 = vrot.slane %v11016_v35, 7  ;;  %v9192_v63 = vpop.f32.mrf.mxu1  ;;  %v11009_v53 = vshrl.u32 %v10891_v2, 16 }
 0x580   : > { %v10647_v58 = vadd.f32 %v20731_v42, %v10512_v34  ;;  %v10516_v40 = vadd.f32 %v15450_v17, %v9716_v57  ;;  %v11012_v31 = vshll.u32 %v10891_v2, 16  ;;  %v9715_v30 = vadd.f32 %v9192_v63, %v23442_v45  ;;  %v23446_v63 = vld [vmem:[#allocation130_spill] sm:$0xff]  ;;  %v23448_v45 = vld [vmem:[#allocation331_spill] sm:$0xff] }
 0x581   : > { %v9995_v7 = vpop.f32.mrf.mxu0  ;;  %v11021_v27 = vor.u32 %v11019_v24, %v11018_v29  ;;  %v11530_v4 = vsel %vm20760_vm9, %v11018_v29, 0  ;;  %v15289_v15 = vpop.f32.mrf.mxu1  ;;  %v11011_v11 = vrot.slane %v11009_v53, 7  ;;  %v10776_v6 = vmax.f32 %v10648_v48, 0.0  ;;  %v23445_v29 = vld [vmem:[#allocation123_spill] sm:$0xff] }
 0x582   : > { %v13252_v20 = vcombine.low %v11530_v4, %v11530_v4  ;;  %v10775_v18 = vmax.f32 %v10647_v58, 0.0  ;;  %v9717_v0 = vadd.f32 %v15289_v15, %v23444_v25  ;;  %v10649_v37 = vadd.f32 %v20731_v42, %v10514_v5  ;;  %v23447_v15 = vld [vmem:[#allocation241_spill] sm:$0xff] }
 0x583   : > { %v15454_v46 = vpop.f32.mrf.mxu0  ;;  %15549 = vmatmul.mubr.msk.bf16.gmra.mxu0 %vm1647_vm3, %v23441_v10  ;;  %v9195_v38 = vpop.f32.mrf.mxu1  ;;  %v11014_v17 = vor.u32 %v11012_v31, %v11011_v11  ;;  %v11022_v50 = vsel %vm10947_vm8, %v11011_v11, %v11021_v27  ;;  %v10515_v35 = vadd.f32 %v9992_v55, %v9715_v30  ;;  %v10651_v34 = vadd.f32 %v20731_v42, %v10516_v40 }
 0x584   : > { %15552 = vmatprep.mubr.msk.bf16.mxu0 %vm1647_vm3, %v23443_v61  ;;  %12127 = vst.msk [vmem:[%s20783_s16 + $0x60] sm:$0xf] %vm12102_vm10, %v13252_v20  ;;  %v13250_v26 = vcombine.low %v11022_v50, %v11022_v50  ;;  %v13251_v13 = vcombine.high %v11022_v50, %v11022_v50  ;;  %v10893_v2 = vpack.c.bf16 %v10776_v6, %v10775_v18  ;;  %v10777_v4 = vmax.f32 %v10649_v37, 0.0  ;;  %v23449_v18 = vld [vmem:[#allocation121_spill] sm:$0xff] }
 0x585   : > { %v10007_v33 = vpop.f32.mrf.mxu0  ;;  %v15292_v60 = vpop.f32.mrf.mxu1  ;;  %15387 = vmatmul.mubr.msk.bf16.gmra.mxu1 %vm1647_vm3, %v23445_v29  ;;  %v11498_v48 = vsel %vm20760_vm9, 0, %v11014_v17  ;;  %v10650_v9 = vadd.f32 %v20731_v42, %v10515_v35  ;;  %v10517_v57 = vadd.f32 %v15451_v16, %v9717_v0  ;;  %v10779_v20 = vmax.f32 %v10651_v34, 0.0  ;;  %v23450_v0 = vld [vmem:[#allocation220_spill] sm:$0xff] }
 0x586   : > { %15390 = vmatprep.mubr.msk.bf16.mxu1 %vm1647_vm3, %v23446_v63  ;;  %v13248_v55 = vcombine.low %v11498_v48, %v11498_v48  ;;  %v13249_v7 = vcombine.high %v11498_v48, %v11498_v48  ;;  %12125 = vst.msk [vmem:[%s20783_s16 + $0x58] sm:$0xf] %vm12102_vm10, %v13250_v26  ;;  %12126 = vst.msk [vmem:[%s20783_s16 + $0x5c] sm:$0xf] %vm12102_vm10, %v13251_v13  ;;  %v11024_v53 = vshrl.u32 %v10893_v2, 16  ;;  %v11027_v10 = vshll.u32 %v10893_v2, 16 }
 0x587   : > { %v15455_v24 = vpop.f32.mrf.mxu0  ;;  %v9207_v5 = vpop.f32.mrf.mxu1  ;;  %v10778_v58 = vmax.f32 %v10650_v9, 0.0  ;;  %v10652_v40 = vadd.f32 %v20731_v42, %v10517_v57  ;;  %v23452_v48 = vld [vmem:[#allocation131_spill] sm:$0xff] }
 0x588   : > { %v9718_v46 = vadd.f32 %v9207_v5, %v23447_v15  ;;  %12123 = vst.msk [vmem:[%s20783_s16 + $0x50] sm:$0xf] %vm12102_vm10, %v13248_v55  ;;  %12124 = vst.msk [vmem:[%s20783_s16 + $0x54] sm:$0xf] %vm12102_vm10, %v13249_v7  ;;  %v11026_v16 = vrot.slane %v11024_v53, 7  ;;  %v23453_v53 = vld [vmem:[#allocation138_spill] sm:$0xff] }
 0x589   : > { %v10010_v27 = vpop.f32.mrf.mxu0  ;;  %v15293_v11 = vpop.f32.mrf.mxu1  ;;  %v10894_v30 = vpack.c.bf16 %v10778_v58, %v10777_v4  ;;  %v10780_v61 = vmax.f32 %v10652_v40, 0.0 }
 0x58a   : > { %v10518_v6 = vadd.f32 %v10007_v33, %v9718_v46  ;;  %v9720_v25 = vadd.f32 %v15293_v11, %v23449_v18  ;;  %v11029_v38 = vor.u32 %v11027_v10, %v11026_v16  ;;  %v23451_v33 = vld [vmem:[#allocation247_spill] sm:$0xff] }
 0x58b   : > { %v15458_v31 = vpop.f32.mrf.mxu0  ;;  %15553 = vmatmul.mubr.msk.bf16.gmra.mxu0 %vm1647_vm3, %v23448_v45  ;;  %v9210_v17 = vpop.f32.mrf.mxu1  ;;  %v11031_v37 = vshrl.u32 %v10894_v30, 16  ;;  %v11034_v35 = vshll.u32 %v10894_v30, 16  ;;  %v10895_v26 = vpack.c.bf16 %v10780_v61, %v10779_v20  ;;  %v23454_v10 = vld [vmem:[#allocation19_spill] sm:$0xff] }
 0x58c   : > { %15556 = vmatprep.mubr.msk.bf16.mxu0 %vm1647_vm3, %v23450_v0  ;;  %v11499_v13 = vsel %vm20760_vm9, 0, %v11029_v38  ;;  %v10653_v2 = vadd.f32 %v20731_v42, %v10518_v6  ;;  %v10520_v34 = vadd.f32 %v15455_v24, %v9720_v25  ;;  %v9719_v60 = vadd.f32 %v9210_v17, %v23451_v33  ;;  %v23456_v25 = vld [vmem:[#allocation333_spill] sm:$0xff] }
 0x58d   : > { %v10022_v50 = vpop.f32.mrf.mxu0  ;;  %v15296_v29 = vpop.f32.mrf.mxu1  ;;  %15391 = vmatmul.mubr.msk.bf16.gmra.mxu1 %vm1647_vm3, %v23452_v48  ;;  %v13253_v57 = vcombine.low %v11499_v13, %v11499_v13  ;;  %v13254_v63 = vcombine.high %v11499_v13, %v11499_v13  ;;  %v11033_v55 = vrot.slane %v11031_v37, 7  ;;  %v11039_v7 = vshrl.u32 %v10895_v26, 16 }
 0x58e   : > { %15394 = vmatprep.mubr.msk.bf16.mxu1 %vm1647_vm3, %v23453_v53  ;;  %v11042_v5 = vshll.u32 %v10895_v26, 16  ;;  %v10519_v4 = vadd.f32 %v10010_v27, %v9719_v60  ;;  %v9723_v20 = vadd.f32 %v15296_v29, %v23454_v10  ;;  %v10781_v45 = vmax.f32 %v10653_v2, 0.0  ;;  %v23455_v27 = vld [vmem:[#allocation10_spill] sm:$0xff] }
 0x58f   : > { %v15459_v9 = vpop.f32.mrf.mxu0  ;;  %v9222_v58 = vpop.f32.mrf.mxu1  ;;  %12128 = vst.msk [vmem:[%s20783_s16 + $0x64] sm:$0xf] %vm12102_vm10, %v13253_v57  ;;  %12129 = vst.msk [vmem:[%s20783_s16 + $0x68] sm:$0xf] %vm12102_vm10, %v13254_v63  ;;  %v11036_v24 = vor.u32 %v11034_v35, %v11033_v55  ;;  %v11531_v15 = vsel %vm20760_vm9, %v11033_v55, 0  ;;  %v20960_v46 = vrot.slane %v11039_v7, 7  ;;  %v10655_v17 = vadd.f32 %v20731_v42, %v10520_v34 }
 0x590   : > { %v13257_v11 = vcombine.low %v11531_v15, %v11531_v15  ;;  %v10654_v30 = vadd.f32 %v20731_v42, %v10519_v4  ;;  %v9721_v61 = vadd.f32 %v9222_v58, %v23455_v27  ;;  %v10523_v37 = vadd.f32 %v15458_v31, %v9723_v20  ;;  %v23457_v35 = vld [vmem:[#allocation105_spill] sm:$0xff] }
 0x591   : > { %v10025_v40 = vpop.f32.mrf.mxu0  ;;  %v15297_v6 = vpop.f32.mrf.mxu1  ;;  %v11037_v0 = vsel %vm10947_vm8, %v11026_v16, %v11036_v24  ;;  %v11044_v38 = vor.u32 %v11042_v5, %v20960_v46  ;;  %v10783_v4 = vmax.f32 %v10655_v17, 0.0  ;;  %v23460_v20 = vld [vmem:[#allocation153_spill] sm:$0xff]  ;;  %v23464_v17 = vld [vmem:[#allocation231_spill] sm:$0xff] }
 0x592   : > { %v13255_v26 = vcombine.low %v11037_v0, %v11037_v0  ;;  %v13256_v13 = vcombine.high %v11037_v0, %v11037_v0  ;;  %12132 = vst.msk [vmem:[%s20783_s16 + $0x74] sm:$0xf] %vm12102_vm10, %v13257_v11  ;;  %v10782_v2 = vmax.f32 %v10654_v30, 0.0  ;;  %v10521_v33 = vadd.f32 %v10022_v50, %v9721_v61  ;;  %v23458_v50 = vld [vmem:[#allocation139_spill] sm:$0xff]  ;;  %v23461_v11 = vld [vmem:[#allocation101_spill] sm:$0xff] }
 0x593   : > { %v15462_v18 = vpop.f32.mrf.mxu0  ;;  %15557 = vmatmul.mubr.msk.bf16.gmra.mxu0 %vm1647_vm3, %v23456_v25  ;;  %v9225_v60 = vpop.f32.mrf.mxu1  ;;  %v11500_v16 = vsel %vm20760_vm9, 0, %v11044_v38  ;;  %v10658_v7 = vadd.f32 %v20731_v42, %v10523_v37  ;;  %v23463_v27 = vld [vmem:[#allocation249_spill] sm:$0xff] }
 0x594   : > { %15560 = vmatprep.mubr.msk.bf16.mxu0 %vm1647_vm3, %v23457_v35  ;;  %v9722_v48 = vadd.f32 %v9225_v60, %v20196_v62  ;;  %12130 = vst.msk [vmem:[%s20783_s16 + $0x6c] sm:$0xf] %vm12102_vm10, %v13255_v26  ;;  %12131 = vst.msk [vmem:[%s20783_s16 + $0x70] sm:$0xf] %vm12102_vm10, %v13256_v13  ;;  %v13258_v31 = vcombine.low %v11500_v16, %v11500_v16  ;;  %v13259_v34 = vcombine.high %v11500_v16, %v11500_v16  ;;  %v23459_v62 = vld [vmem:[#allocation145_spill] sm:$0xff]  ;;  %v21002_v35 = vld [vmem:[%s16147_s15 + $0x274] sm:$0xff]  }
 0x595   : > { %v10037_v29 = vpop.f32.mrf.mxu0  ;;  %v10896_v9 = vpack.c.bf16 %v10782_v2, %v10781_v45  ;;  %v10656_v57 = vadd.f32 %v20731_v42, %v10521_v33  ;;  %v15300_v63 = vpop.f32.mrf.mxu1  ;;  %15395 = vmatmul.mubr.msk.bf16.gmra.mxu1 %vm1647_vm3, %v23458_v50  ;;  %v23462_v45 = vshrl.u32 %v23461_v11, 16  ;;  %v9823_v26 = vrot.slane %v21002_v35, 1  ;;  %v23465_v33 = vld [vmem:[#allocation129_spill] sm:$0xff]  ;;  %v23466_v16 = vld [vmem:[#allocation335_spill] sm:$0xff] }
 0x596   : > { %v10522_v53 = vadd.f32 %v10025_v40, %v9722_v48  ;;  %v9726_v5 = vadd.f32 %v15300_v63, %v20199_v43  ;;  %15398 = vmatprep.mubr.msk.bf16.mxu1 %vm1647_vm3, %v23459_v62  ;;  %12133 = vst.msk [vmem:[%s20783_s16 + $0x78] sm:$0xf] %vm12102_vm10, %v13258_v31  ;;  %12134 = vst.msk [vmem:[%s20783_s16 + $0x7c] sm:$0xf] %vm12102_vm10, %v13259_v34  ;;  %v10786_v13 = vmax.f32 %v10658_v7, 0.0 }
 0x597   : > { %v15463_v55 = vpop.f32.mrf.mxu0  ;;  %v11046_v58 = vshrl.u32 %v10896_v9, 16  ;;  %v10784_v24 = vmax.f32 %v10656_v57, 0.0  ;;  %v9237_v15 = vpop.f32.mrf.mxu1  ;;  %v20995_v30 = vor.u32 %v23462_v45, %v23460_v20  ;;  %v11049_v25 = vshll.u32 %v10896_v9, 16  ;;  %v23469_v45 = vld [vmem:[#allocation146_spill] sm:$0xff] }
 0x598   : > { %v10657_v43 = vadd.f32 %v20731_v42, %v10522_v53  ;;  %v10526_v40 = vadd.f32 %v15462_v18, %v9726_v5  ;;  %v9724_v61 = vadd.f32 %v9237_v15, %v23463_v27  ;;  %v23467_v18 = vld [vmem:[#allocation219_spill] sm:$0xff] }
 0x599   : > { %v10040_v10 = vpop.f32.mrf.mxu0  ;;  %v11048_v6 = vrot.slane %v11046_v58, 7  ;;  %v10897_v0 = vpack.c.bf16 %v10784_v24, %v10783_v4  ;;  %v15301_v38 = vpop.f32.mrf.mxu1  ;;  %v23468_v48 = vshll.u32 %v23467_v18, 16 }
 0x59a   : > { %v10785_v2 = vmax.f32 %v10657_v43, 0.0  ;;  %v9727_v60 = vadd.f32 %v15301_v38, %v23465_v33  ;;  %v10661_v63 = vadd.f32 %v20731_v42, %v10526_v40  ;;  %v10524_v4 = vadd.f32 %v10037_v29, %v9724_v61  ;;  %v23470_v61 = vld [vmem:[#allocation150_spill] sm:$0xff] }
 0x59b   : > { %v15466_v37 = vpop.f32.mrf.mxu0  ;;  %15561 = vmatmul.mubr.msk.bf16.gmra.mxu0 %vm1647_vm3, %v23464_v17  ;;  %v21010_v31 = vrot.slane %v23468_v48, 1  ;;  %v11051_v34 = vor.u32 %v11049_v25, %v11048_v6  ;;  %v11532_v9 = vsel %vm20760_vm9, %v11048_v6, 0  ;;  %v11054_v57 = vshrl.u32 %v10897_v0, 16  ;;  %v9240_v50 = vpop.f32.mrf.mxu1 }
 0x59c   : > { %15564 = vmatprep.mubr.msk.bf16.mxu0 %vm1647_vm3, %v23466_v16  ;;  %v13262_v53 = vcombine.low %v11532_v9, %v11532_v9  ;;  %v11057_v5 = vshll.u32 %v10897_v0, 16  ;;  %v10898_v62 = vpack.c.bf16 %v10786_v13, %v10785_v2  ;;  %v10527_v15 = vadd.f32 %v15463_v55, %v9727_v60 }
 0x59d   : > { %v10053_v7 = vpop.f32.mrf.mxu0  ;;  %v11052_v58 = vsel %vm10947_vm8, %v20960_v46, %v11051_v34  ;;  %v11056_v24 = vrot.slane %v11054_v57, 7  ;;  %v9725_v20 = vadd.f32 %v9240_v50, %v20216_v56  ;;  %v15304_v11 = vpop.f32.mrf.mxu1  ;;  %15399 = vmatmul.mubr.msk.bf16.gmra.mxu1 %vm1647_vm3, %v23469_v45  ;;  %v9825_v46 = vrot.slane %v19517_v36, 1  ;;  %v23472_v50 = vld [vmem:[#allocation14_spill] sm:$0xff] }
 0x59e   : > { %v13260_v40 = vcombine.low %v11052_v58, %v11052_v58  ;;  %v13261_v27 = vcombine.high %v11052_v58, %v11052_v58  ;;  %12137 = vst.msk [vmem:[%s20783_s16 + $0x88] sm:$0xf] %vm12102_vm10, %v13262_v53  ;;  %v11061_v29 = vshrl.u32 %v10898_v62, 16  ;;  %15402 = vmatprep.mubr.msk.bf16.mxu1 %vm1647_vm3, %v23470_v61  ;;  %v10662_v56 = vadd.f32 %v20731_v42, %v10527_v15 }
 0x59f   : > { %v21020_v43 = vpop.f32.mrf.mxu0  ;;  %v11059_v55 = vor.u32 %v11057_v5, %v11056_v24  ;;  %v10525_v6 = vadd.f32 %v10040_v10, %v9725_v20  ;;  %v9253_v25 = vpop.f32.mrf.mxu1  ;;  %v23471_v38 = vshll.u32 %v19517_v36, 16  ;;  %v11064_v2 = vshll.u32 %v10898_v62, 16  ;;  %v23473_v62 = vld [vmem:[#allocation244_spill] sm:$0xff] }
 0x5a0   : > { %12135 = vst.msk [vmem:[%s20783_s16 + $0x80] sm:$0xf] %vm12102_vm10, %v13260_v40  ;;  %12136 = vst.msk [vmem:[%s20783_s16 + $0x84] sm:$0xf] %vm12102_vm10, %v13261_v27  ;;  %v11063_v13 = vrot.slane %v11061_v29, 7  ;;  %v10659_v33 = vadd.f32 %v20731_v42, %v10524_v4  ;;  %v9729_v60 = vadd.f32 %v15304_v11, %v20218_v28  ;;  %v10789_v10 = vmax.f32 %v10661_v63, 0.0 }
 0x5a1   : > { %v10055_v0 = vpop.f32.mrf.mxu0  ;;  %v21030_v17 = vrot.slane %v23471_v38, 1  ;;  %v11501_v16 = vsel %vm20760_vm9, 0, %v11059_v55  ;;  %v10790_v48 = vmax.f32 %v10662_v56, 0.0  ;;  %v10660_v34 = vadd.f32 %v20731_v42, %v10525_v6  ;;  %v15305_v9 = vpop.f32.mrf.mxu1  ;;  %v23474_v27 = vld [vmem:[#allocation253_spill] sm:$0xff]  ;;  %v23475_v25 = vld [vmem:[#allocation151_spill] sm:$0xff] }
 0x5a2   : > { %v13263_v7 = vcombine.low %v11501_v16, %v11501_v16  ;;  %v13264_v53 = vcombine.high %v11501_v16, %v11501_v16  ;;  %v11066_v5 = vor.u32 %v11064_v2, %v11063_v13  ;;  %v11533_v28 = vsel %vm20760_vm9, %v11063_v13, 0  ;;  %v23478_v16 = vld [vmem:[#allocation155_spill] sm:$0xff] }
 0x5a3   : > { %v15470_v57 = vpop.f32.mrf.mxu0  ;;  %15565 = vmatmul.mubr.msk.bf16.gmra.mxu0 %vm1647_vm3, %v23472_v50  ;;  %v13267_v63 = vcombine.low %v11533_v28, %v11533_v28  ;;  %v10900_v4 = vpack.c.bf16 %v10790_v48, %v10789_v10  ;;  %v10788_v58 = vmax.f32 %v10660_v34, 0.0  ;;  %v10529_v15 = vadd.f32 %v15466_v37, %v9729_v60  ;;  %v9255_v20 = vpop.f32.mrf.mxu1 }
 0x5a4   : > { %15568 = vmatprep.mubr.msk.bf16.mxu0 %vm1647_vm3, %v23473_v62  ;;  %12138 = vst.msk [vmem:[%s20783_s16 + $0x8c] sm:$0xf] %vm12102_vm10, %v13263_v7  ;;  %12139 = vst.msk [vmem:[%s20783_s16 + $0x90] sm:$0xf] %vm12102_vm10, %v13264_v53  ;;  %v11067_v45 = vsel %vm10947_vm8, %v11056_v24, %v11066_v5  ;;  %v10787_v40 = vmax.f32 %v10659_v33, 0.0  ;;  %v9730_v29 = vadd.f32 %v15305_v9, %v23474_v27  ;;  %v23476_v24 = vld [vmem:[#allocation240_spill] sm:$0xff] }
 0x5a5   : > { %v10068_v11 = vpop.f32.mrf.mxu0  ;;  %v9728_v61 = vadd.f32 %v9255_v20, %v20233_v41  ;;  %v13265_v55 = vcombine.low %v11067_v45, %v11067_v45  ;;  %v13266_v56 = vcombine.high %v11067_v45, %v11067_v45  ;;  %12142 = vst.msk [vmem:[%s20783_s16 + $0x9c] sm:$0xf] %vm12102_vm10, %v13267_v63  ;;  %v11076_v37 = vshrl.u32 %v10900_v4, 16  ;;  %v15308_v6 = vpop.f32.mrf.mxu1  ;;  %15403 = vmatmul.mubr.msk.bf16.gmra.mxu1 %vm1647_vm3, %v23475_v25 }
 0x5a6   : > { %v23477_v13 = vrot.slane %v23476_v24, 1  ;;  %v10899_v33 = vpack.c.bf16 %v10788_v58, %v10787_v40  ;;  %15406 = vmatprep.mubr.msk.bf16.mxu1 %vm1647_vm3, %v23478_v16  ;;  %v9826_v41 = vsel %vm3343_vm5, %v9823_v26, %v9825_v46  ;;  %v23479_v10 = vshrl.u32 %v23467_v18, 16  ;;  %v23481_v16 = vld [vmem:[#allocation154_spill] sm:$0xff] }
 0x5a7   : > { %v15471_v38 = vpop.f32.mrf.mxu0  ;;  %v10528_v60 = vadd.f32 %v10055_v0, %v9728_v61  ;;  %12140 = vst.msk [vmem:[%s20783_s16 + $0x94] sm:$0xf] %vm12102_vm10, %v13265_v55  ;;  %12141 = vst.msk [vmem:[%s20783_s16 + $0x98] sm:$0xf] %vm12102_vm10, %v13266_v56  ;;  %v11078_v34 = vrot.slane %v11076_v37, 7  ;;  %v11079_v9 = vshll.u32 %v10900_v4, 16  ;;  %v10664_v0 = vadd.f32 %v20731_v42, %v10529_v15  ;;  %v9268_v7 = vpop.f32.mrf.mxu1 }
 0x5a8   : > { %v9824_v2 = vsel %vm3343_vm5, %v23477_v13, %v9823_v26  ;;  %v9010_v48 = vor.u32 %v21010_v31, %v23479_v10  ;;  %v9732_v50 = vadd.f32 %v15308_v6, %v20236_v1  ;;  %v11069_v5 = vshrl.u32 %v10899_v33, 16 }
 0x5a9   : > { %v10071_v53 = vpop.f32.mrf.mxu0  ;;  %v10530_v35 = vadd.f32 %v21020_v43, %v9730_v29  ;;  %v9009_v26 = vsel %vm1003_vm2, %v20995_v30, %v21010_v31  ;;  %v23480_v18 = vshrl.u32 %v19517_v36, 16  ;;  %v11081_v62 = vor.u32 %v11079_v9, %v11078_v34  ;;  %v15309_v58 = vpop.f32.mrf.mxu1 }
 0x5aa   : > { %v11534_v63 = vsel %vm20760_vm9, %v11078_v34, 0  ;;  %v10663_v4 = vadd.f32 %v20731_v42, %v10528_v60  ;;  %v10532_v1 = vadd.f32 %v15470_v57, %v9732_v50  ;;  %v11071_v20 = vrot.slane %v11069_v5, 7  ;;  %v23483_v53 = vld [vmem:[#allocation255_spill] sm:$0xff] }
 0x5ab   : > { %v9013_v28 = vor.u32 %v21030_v17, %v23480_v18  ;;  %v15474_v15 = vpop.f32.mrf.mxu0  ;;  %15569 = vmatmul.mubr.msk.bf16.gmra.mxu0 %vm1647_vm3, %v9824_v2  ;;  %v13272_v43 = vcombine.low %v11534_v63, %v11534_v63  ;;  %v11072_v45 = vshll.u32 %v10899_v33, 16  ;;  %v9731_v30 = vadd.f32 %v9268_v7, %v20244_v39  ;;  %v9271_v29 = vpop.f32.mrf.mxu1  ;;  %v21101_v39 = vld [vmem:[%s21721_s4] ss:$0 sm:$0xff]  ;;  %v23484_v63 = vld [vmem:[#allocation7_spill] sm:$0xff] }
 0x5ac   : > { %15572 = vmatprep.mubr.msk.bf16.mxu0 %vm1647_vm3, %v9826_v41  ;;  %v10792_v31 = vmax.f32 %v10664_v0, 0.0  ;;  %v10791_v40 = vmax.f32 %v10663_v4, 0.0  ;;  %v9733_v27 = vadd.f32 %v15309_v58, %v20247_v32  ;;  %v9012_v42 = vsel %vm1003_vm2, %v9010_v48, %v21030_v17 }
 0x5ad   : > { %v10083_v61 = vpop.f32.mrf.mxu0  ;;  %12147 = vst.msk [vmem:[%s20783_s16 + $0xb0] sm:$0xf] %vm12102_vm10, %v13272_v43  ;;  %v11074_v57 = vor.u32 %v11072_v45, %v11071_v20  ;;  %v11082_v55 = vsel %vm10947_vm8, %v11071_v20, %v11081_v62  ;;  %v10665_v56 = vadd.f32 %v21101_v39, %v10530_v35  ;;  %v10531_v37 = vadd.f32 %v10068_v11, %v9731_v30  ;;  %v15312_v24 = vpop.f32.mrf.mxu1 }
 0x5ae   : > { %v13270_v32 = vcombine.low %v11082_v55, %v11082_v55  ;;  %v13271_v6 = vcombine.high %v11082_v55, %v11082_v55  ;;  %v10901_v25 = vpack.c.bf16 %v10792_v31, %v10791_v40  ;;  %v10667_v17 = vadd.f32 %v21101_v39, %v10532_v1  ;;  %15407 = vmatmul.mubr.msk.bf16.gmra.mxu1 %vm1647_vm3, %v9009_v26 }
 0x5af   : > { %v15475_v13 = vpop.f32.mrf.mxu0  ;;  %v11502_v2 = vsel %vm20760_vm9, 0, %v11074_v57  ;;  %v10666_v33 = vadd.f32 %v21101_v39, %v10531_v37  ;;  %v10533_v60 = vadd.f32 %v15471_v38, %v9733_v27  ;;  %v9828_v11 = vsel %vm3343_vm5, %v9825_v46, %v23481_v16  ;;  %15410 = vmatprep.mubr.msk.bf16.mxu1 %vm1647_vm3, %v9012_v42  ;;  %v9283_v34 = vpop.f32.mrf.mxu1 }
 0x5b0   : > { %v13268_v41 = vcombine.low %v11502_v2, %v11502_v2  ;;  %v13269_v10 = vcombine.high %v11502_v2, %v11502_v2  ;;  %12145 = vst.msk [vmem:[%s20783_s16 + $0xa8] sm:$0xf] %vm12102_vm10, %v13270_v32  ;;  %12146 = vst.msk [vmem:[%s20783_s16 + $0xac] sm:$0xf] %vm12102_vm10, %v13271_v6  ;;  %v11084_v48 = vshrl.u32 %v10901_v25, 16  ;;  %v23482_v0 = vmov 0  }
 0x5b1   : > { %v10086_v9 = vpop.f32.mrf.mxu0  ;;  %v9031_v50 = vrot.slane %v23482_v0, 1  ;;  %v10793_v38 = vmax.f32 %v10665_v56, 0.0  ;;  %v10794_v7 = vmax.f32 %v10666_v33, 0.0  ;;  %v10668_v36 = vadd.f32 %v21101_v39, %v10533_v60  ;;  %v15313_v18 = vpop.f32.mrf.mxu1  ;;  %v23486_v60 = vld [vmem:[#allocation8_spill] sm:$0xff] }
 0x5b2   : > { %v9734_v5 = vadd.f32 %v9283_v34, %v23483_v53  ;;  %12143 = vst.msk [vmem:[%s20783_s16 + $0xa0] sm:$0xf] %vm12102_vm10, %v13268_v41  ;;  %12144 = vst.msk [vmem:[%s20783_s16 + $0xa4] sm:$0xf] %vm12102_vm10, %v13269_v10  ;;  %v11086_v46 = vrot.slane %v11084_v48, 7  ;;  %v11087_v35 = vshll.u32 %v10901_v25, 16  ;;  %v9017_v4 = vsel %vm1003_vm2, %v9013_v28, %v23484_v63 }
 0x5b3   : > { %v10795_v26 = vmax.f32 %v10667_v17, 0.0  ;;  %v15478_v62 = vpop.f32.mrf.mxu0  ;;  %15573 = vmatmul.mubr.msk.bf16.gmra.mxu0 %vm1647_vm3, %v9828_v11  ;;  %v10902_v1 = vpack.c.bf16 %v10794_v7, %v10793_v38  ;;  %v10796_v58 = vmax.f32 %v10668_v36, 0.0  ;;  %v9736_v43 = vadd.f32 %v15313_v18, %v20262_v51  ;;  %v9286_v45 = vpop.f32.mrf.mxu1  ;;  %v23485_v25 = vld [vmem:[#allocation9_spill] sm:$0xff] }
 0x5b4   : > { %v10534_v15 = vadd.f32 %v10083_v61, %v9734_v5  ;;  %15576 = vmatprep.mubr.msk.bf16.mxu0 %vm1647_vm3, %v23481_v16  ;;  %v11089_v20 = vor.u32 %v11087_v35, %v11086_v46  ;;  %v9832_v29 = vsel %vm3343_vm5, %v23481_v16, %v9031_v50  ;;  %v9735_v51 = vadd.f32 %v9286_v45, %v20268_v49 }
 0x5b5   : > { %v10098_v30 = vpop.f32.mrf.mxu0  ;;  %v11091_v31 = vshrl.u32 %v10902_v1, 16  ;;  %v11094_v40 = vshll.u32 %v10902_v1, 16  ;;  %v10903_v27 = vpack.c.bf16 %v10796_v58, %v10795_v26  ;;  %v10536_v61 = vadd.f32 %v15475_v13, %v9736_v43  ;;  %v15316_v57 = vpop.f32.mrf.mxu1  ;;  %v23488_v58 = vld [vmem:[#allocation23_spill] sm:$0xff] }
 0x5b6   : > { %v11503_v28 = vsel %vm20760_vm9, 0, %v11089_v20  ;;  %v10669_v42 = vadd.f32 %v21101_v39, %v10534_v15  ;;  %15411 = vmatmul.mubr.msk.bf16.gmra.mxu1 %vm1647_vm3, %v9017_v4  ;;  %v10535_v24 = vadd.f32 %v10086_v9, %v9735_v51  ;;  %v9032_v13 = vsel %vm1003_vm2, %v23486_v60, %v9031_v50  ;;  %v23487_v9 = vld [vmem:[#allocation25_spill] sm:$0xff] }
 0x5b7   : > { %v15479_v55 = vpop.f32.mrf.mxu0  ;;  %v13273_v56 = vcombine.low %v11503_v28, %v11503_v28  ;;  %v13274_v37 = vcombine.high %v11503_v28, %v11503_v28  ;;  %v11093_v32 = vrot.slane %v11091_v31, 7  ;;  %v11099_v6 = vshrl.u32 %v10903_v27, 16  ;;  %15414 = vmatprep.mubr.msk.bf16.mxu1 %vm1647_vm3, %v23485_v25  ;;  %v9298_v2 = vpop.f32.mrf.mxu1 }
 0x5b8   : > { %v11102_v17 = vshll.u32 %v10903_v27, 16  ;;  %v9739_v41 = vadd.f32 %v15316_v57, %v20271_v47  ;;  %v10797_v48 = vmax.f32 %v10669_v42, 0.0  ;;  %v10670_v34 = vadd.f32 %v21101_v39, %v10535_v24  ;;  %v23489_v27 = vld [vmem:[#allocation257_spill] sm:$0xff] }
 0x5b9   : > { %v10101_v33 = vpop.f32.mrf.mxu0  ;;  %12148 = vst.msk [vmem:[%s20783_s16 + $0xb4] sm:$0xf] %vm12102_vm10, %v13273_v56  ;;  %12149 = vst.msk [vmem:[%s20783_s16 + $0xb8] sm:$0xf] %vm12102_vm10, %v13274_v37  ;;  %v11096_v49 = vor.u32 %v11094_v40, %v11093_v32  ;;  %v11535_v16 = vsel %vm20760_vm9, %v11093_v32, 0  ;;  %v21148_v11 = vrot.slane %v11099_v6, 7  ;;  %v9737_v0 = vadd.f32 %v9298_v2, %v23487_v9  ;;  %v15317_v50 = vpop.f32.mrf.mxu1 }
 0x5ba   : > { %v13277_v10 = vcombine.low %v11535_v16, %v11535_v16  ;;  %v10671_v53 = vadd.f32 %v21101_v39, %v10536_v61  ;;  %v10539_v5 = vadd.f32 %v15478_v62, %v9739_v41  ;;  %v10798_v26 = vmax.f32 %v10670_v34, 0.0  ;;  %v23490_v37 = vld [vmem:[#allocation259_spill] sm:$0xff] }
 0x5bb   : > { %v15482_v38 = vpop.f32.mrf.mxu0  ;;  %15577 = vmatmul.mubr.msk.bf16.gmra.mxu0 %vm1647_vm3, %v9832_v29  ;;  %v11097_v7 = vsel %vm10947_vm8, %v11086_v46, %v11096_v49  ;;  %v11104_v36 = vor.u32 %v11102_v17, %v21148_v11  ;;  %v10537_v18 = vadd.f32 %v10098_v30, %v9737_v0  ;;  %v9301_v63 = vpop.f32.mrf.mxu1 }
 0x5bc   : > { %v13275_v47 = vcombine.low %v11097_v7, %v11097_v7  ;;  %v13276_v35 = vcombine.high %v11097_v7, %v11097_v7  ;;  %12152 = vst.msk [vmem:[%s20783_s16 + $0xc4] sm:$0xf] %vm12102_vm10, %v13277_v10  ;;  %v9738_v46 = vadd.f32 %v9301_v63, %v23488_v58  ;;  %v10904_v43 = vpack.c.bf16 %v10798_v26, %v10797_v48 }
 0x5bd   : > { %v10113_v4 = vpop.f32.mrf.mxu0  ;;  %v11504_v1 = vsel %vm20760_vm9, 0, %v11104_v36  ;;  %v10672_v20 = vadd.f32 %v21101_v39, %v10537_v18  ;;  %v15320_v45 = vpop.f32.mrf.mxu1  ;;  %v10674_v31 = vadd.f32 %v21101_v39, %v10539_v5  ;;  %v10799_v28 = vmax.f32 %v10671_v53, 0.0 }
 0x5be   : > { %12150 = vst.msk [vmem:[%s20783_s16 + $0xbc] sm:$0xf] %vm12102_vm10, %v13275_v47  ;;  %12151 = vst.msk [vmem:[%s20783_s16 + $0xc0] sm:$0xf] %vm12102_vm10, %v13276_v35  ;;  %v13278_v62 = vcombine.low %v11504_v1, %v11504_v1  ;;  %v13279_v15 = vcombine.high %v11504_v1, %v11504_v1  ;;  %15415 = vmatmul.mubr.msk.bf16.gmra.mxu1 %vm1647_vm3, %v9032_v13  ;;  %v10538_v40 = vadd.f32 %v10101_v33, %v9738_v46  ;;  %v23491_v13 = vld [vmem:[#allocation137_spill] sm:$0xff]  ;;  %v23492_v47 = vld [vmem:[#allocation262_spill] sm:$0xff] }
 0x5bf   : > { %v15483_v30 = vpop.f32.mrf.mxu0  ;;  %v9742_v29 = vadd.f32 %v15320_v45, %v23489_v27  ;;  %v11106_v42 = vshrl.u32 %v10904_v43, 16  ;;  %v10800_v61 = vmax.f32 %v10672_v20, 0.0  ;;  %v9313_v51 = vpop.f32.mrf.mxu1  ;;  %v11109_v25 = vshll.u32 %v10904_v43, 16 }
 0x5c0   : > { %12153 = vst.msk [vmem:[%s20783_s16 + $0xc8] sm:$0xf] %vm12102_vm10, %v13278_v62  ;;  %12154 = vst.msk [vmem:[%s20783_s16 + $0xcc] sm:$0xf] %vm12102_vm10, %v13279_v15  ;;  %v10673_v55 = vadd.f32 %v21101_v39, %v10538_v40  ;;  %v9740_v32 = vadd.f32 %v9313_v51, %v23490_v37  ;;  %v10802_v33 = vmax.f32 %v10674_v31, 0.0 }
 0x5c1   : > { %v10116_v57 = vpop.f32.mrf.mxu0  ;;  %v10542_v56 = vadd.f32 %v15482_v38, %v9742_v29  ;;  %v11108_v6 = vrot.slane %v11106_v42, 7  ;;  %v10905_v17 = vpack.c.bf16 %v10800_v61, %v10799_v28  ;;  %v15321_v24 = vpop.f32.mrf.mxu1 }
 0x5c2   : > { %v10801_v60 = vmax.f32 %v10673_v55, 0.0  ;;  %v9743_v49 = vadd.f32 %v15321_v24, %v23491_v13  ;;  %v10540_v7 = vadd.f32 %v10113_v4, %v9740_v32  ;;  %v23494_v13 = vld [vmem:[#allocation298_spill] sm:$0xff] }
 0x5c3   : > { %v15486_v2 = vpop.f32.mrf.mxu0  ;;  %v11111_v16 = vor.u32 %v11109_v25, %v11108_v6  ;;  %v11536_v41 = vsel %vm20760_vm9, %v11108_v6, 0  ;;  %v11114_v10 = vshrl.u32 %v10905_v17, 16  ;;  %v10677_v48 = vadd.f32 %v21101_v39, %v10542_v56  ;;  %v9316_v34 = vpop.f32.mrf.mxu1 }
 0x5c4   : > { %v13282_v0 = vcombine.low %v11536_v41, %v11536_v41  ;;  %v11117_v50 = vshll.u32 %v10905_v17, 16  ;;  %v10906_v38 = vpack.c.bf16 %v10802_v33, %v10801_v60  ;;  %v10543_v5 = vadd.f32 %v15483_v30, %v9743_v49  ;;  %v23493_v30 = vld [vmem:[#allocation265_spill] sm:$0xff] }
 0x5c5   : > { %v10129_v9 = vpop.f32.mrf.mxu0  ;;  %v11112_v36 = vsel %vm10947_vm8, %v21148_v11, %v11111_v16  ;;  %v11116_v53 = vrot.slane %v11114_v10, 7  ;;  %v9741_v35 = vadd.f32 %v9316_v34, %v23492_v47  ;;  %v15324_v26 = vpop.f32.mrf.mxu1  ;;  %v10675_v45 = vadd.f32 %v21101_v39, %v10540_v7  ;;  %v23495_v16 = vld [vmem:[#allocation301_spill] sm:$0xff] }
 0x5c6   : > { %v13280_v63 = vcombine.low %v11112_v36, %v11112_v36  ;;  %v13281_v1 = vcombine.high %v11112_v36, %v11112_v36  ;;  %12157 = vst.msk [vmem:[%s20783_s16 + $0xd8] sm:$0xf] %vm12102_vm10, %v13282_v0  ;;  %v11121_v58 = vshrl.u32 %v10906_v38, 16  ;;  %v10678_v62 = vadd.f32 %v21101_v39, %v10543_v5 }
 0x5c7   : > { %v15487_v18 = vpop.f32.mrf.mxu0  ;;  %v11119_v46 = vor.u32 %v11117_v50, %v11116_v53  ;;  %v10541_v4 = vadd.f32 %v10116_v57, %v9741_v35  ;;  %v9329_v15 = vpop.f32.mrf.mxu1  ;;  %v11124_v20 = vshll.u32 %v10906_v38, 16  ;;  %v9745_v31 = vadd.f32 %v15324_v26, %v23493_v30 }
 0x5c8   : > { %12155 = vst.msk [vmem:[%s20783_s16 + $0xd0] sm:$0xf] %vm12102_vm10, %v13280_v63  ;;  %12156 = vst.msk [vmem:[%s20783_s16 + $0xd4] sm:$0xf] %vm12102_vm10, %v13281_v1  ;;  %v11123_v11 = vrot.slane %v11121_v58, 7  ;;  %v10805_v27 = vmax.f32 %v10677_v48, 0.0 }
 0x5c9   : > { %v10131_v43 = vpop.f32.mrf.mxu0  ;;  %v11505_v40 = vsel %vm20760_vm9, 0, %v11119_v46  ;;  %v10806_v29 = vmax.f32 %v10678_v62, 0.0  ;;  %v10676_v28 = vadd.f32 %v21101_v39, %v10541_v4  ;;  %v15325_v42 = vpop.f32.mrf.mxu1  ;;  %v10545_v25 = vadd.f32 %v15486_v2, %v9745_v31 }
 0x5ca   : > { %v13283_v51 = vcombine.low %v11505_v40, %v11505_v40  ;;  %v13284_v57 = vcombine.high %v11505_v40, %v11505_v40  ;;  %v11126_v55 = vor.u32 %v11124_v20, %v11123_v11  ;;  %v11537_v56 = vsel %vm20760_vm9, %v11123_v11, 0 }
 0x5cb   : > { %v15490_v61 = vpop.f32.mrf.mxu0  ;;  %v13287_v37 = vcombine.low %v11537_v56, %v11537_v56  ;;  %v10908_v32 = vpack.c.bf16 %v10806_v29, %v10805_v27  ;;  %v10804_v6 = vmax.f32 %v10676_v28, 0.0  ;;  %v9331_v17 = vpop.f32.mrf.mxu1  ;;  %v10803_v60 = vmax.f32 %v10675_v45, 0.0  ;;  %v23497_v45 = vld [vmem:[#allocation268_spill] sm:$0xff]  ;;  %v23498_v27 = vld [vmem:[#allocation11_spill] sm:$0xff] }
 0x5cc   : > { %12158 = vst.msk [vmem:[%s20783_s16 + $0xdc] sm:$0xf] %vm12102_vm10, %v13283_v51  ;;  %12159 = vst.msk [vmem:[%s20783_s16 + $0xe0] sm:$0xf] %vm12102_vm10, %v13284_v57  ;;  %v11127_v33 = vsel %vm10947_vm8, %v11116_v53, %v11126_v55  ;;  %v9746_v49 = vadd.f32 %v15325_v42, %v23494_v13  ;;  %v9744_v41 = vadd.f32 %v9331_v17, %v23495_v16  ;;  %v23496_v53 = vld [vmem:[#allocation30_spill] sm:$0xff] }
 0x5cd   : > { %v10144_v24 = vpop.f32.mrf.mxu0  ;;  %v13285_v10 = vcombine.low %v11127_v33, %v11127_v33  ;;  %v13286_v48 = vcombine.high %v11127_v33, %v11127_v33  ;;  %12162 = vst.msk [vmem:[%s20783_s16 + $0xec] sm:$0xf] %vm12102_vm10, %v13287_v37  ;;  %v11136_v2 = vshrl.u32 %v10908_v32, 16  ;;  %v15328_v34 = vpop.f32.mrf.mxu1  ;;  %v10907_v0 = vpack.c.bf16 %v10804_v6, %v10803_v60 }
 0x5ce   : > { %v10544_v50 = vadd.f32 %v10131_v43, %v9744_v41  ;;  %v11139_v7 = vshll.u32 %v10908_v32, 16  ;;  %v10680_v36 = vadd.f32 %v21101_v39, %v10545_v25  ;;  %v9748_v5 = vadd.f32 %v15328_v34, %v23496_v53  ;;  %v23499_v34 = vld [vmem:[#allocation270_spill] sm:$0xff] }
 0x5cf   : > { %v15491_v9 = vpop.f32.mrf.mxu0  ;;  %12160 = vst.msk [vmem:[%s20783_s16 + $0xe4] sm:$0xf] %vm12102_vm10, %v13285_v10  ;;  %12161 = vst.msk [vmem:[%s20783_s16 + $0xe8] sm:$0xf] %vm12102_vm10, %v13286_v48  ;;  %v11138_v38 = vrot.slane %v11136_v2, 7  ;;  %v9344_v47 = vpop.f32.mrf.mxu1  ;;  %v11129_v26 = vshrl.u32 %v10907_v0, 16  ;;  %v10546_v63 = vadd.f32 %v15487_v18, %v9746_v49 }
 0x5d0   : > { %v10679_v46 = vadd.f32 %v21101_v39, %v10544_v50  ;;  %v10548_v62 = vadd.f32 %v15490_v61, %v9748_v5  ;;  %v11132_v20 = vshll.u32 %v10907_v0, 16  ;;  %v9747_v30 = vadd.f32 %v9344_v47, %v23497_v45 }
 0x5d1   : > { %v10147_v35 = vpop.f32.mrf.mxu0  ;;  %v11141_v1 = vor.u32 %v11139_v7, %v11138_v38  ;;  %v11538_v58 = vsel %vm20760_vm9, %v11138_v38, 0  ;;  %v15329_v4 = vpop.f32.mrf.mxu1  ;;  %v11131_v11 = vrot.slane %v11129_v26, 7  ;;  %v10808_v31 = vmax.f32 %v10680_v36, 0.0 }
 0x5d2   : > { %v13292_v43 = vcombine.low %v11538_v58, %v11538_v58  ;;  %v10807_v40 = vmax.f32 %v10679_v46, 0.0  ;;  %v9749_v29 = vadd.f32 %v15329_v4, %v23498_v27  ;;  %v10681_v51 = vadd.f32 %v21101_v39, %v10546_v63  ;;  %v23500_v35 = vld [vmem:[#allocation273_spill] sm:$0xff] }
 0x5d3   : > { %v15494_v15 = vpop.f32.mrf.mxu0  ;;  %v9347_v18 = vpop.f32.mrf.mxu1  ;;  %v11134_v42 = vor.u32 %v11132_v20, %v11131_v11  ;;  %v11142_v61 = vsel %vm10947_vm8, %v11131_v11, %v11141_v1  ;;  %v10547_v57 = vadd.f32 %v10144_v24, %v9747_v30  ;;  %v10683_v32 = vadd.f32 %v21101_v39, %v10548_v62  ;;  %v23501_v20 = vld [vmem:[#allocation36_spill] sm:$0xff] }
 0x5d4   : > { %12167 = vst.msk [vmem:[%s20783_s16 + $0x100] sm:$0xf] %vm12102_vm10, %v13292_v43  ;;  %v13290_v55 = vcombine.low %v11142_v61, %v11142_v61  ;;  %v13291_v56 = vcombine.high %v11142_v61, %v11142_v61  ;;  %v10909_v37 = vpack.c.bf16 %v10808_v31, %v10807_v40  ;;  %v10549_v60 = vadd.f32 %v15491_v9, %v9749_v29 }
 0x5d5   : > { %v10159_v28 = vpop.f32.mrf.mxu0  ;;  %v15332_v6 = vpop.f32.mrf.mxu1  ;;  %v11506_v17 = vsel %vm20760_vm9, 0, %v11134_v42  ;;  %v10682_v33 = vadd.f32 %v21101_v39, %v10547_v57  ;;  %v10809_v10 = vmax.f32 %v10681_v51, 0.0  ;;  %v10811_v38 = vmax.f32 %v10683_v32, 0.0 }
 0x5d6   : > { %v13288_v13 = vcombine.low %v11506_v17, %v11506_v17  ;;  %v13289_v49 = vcombine.high %v11506_v17, %v11506_v17  ;;  %12165 = vst.msk [vmem:[%s20783_s16 + $0xf8] sm:$0xf] %vm12102_vm10, %v13290_v55  ;;  %12166 = vst.msk [vmem:[%s20783_s16 + $0xfc] sm:$0xf] %vm12102_vm10, %v13291_v56  ;;  %v11144_v24 = vshrl.u32 %v10909_v37, 16  ;;  %v10684_v2 = vadd.f32 %v21101_v39, %v10549_v60 }
 0x5d7   : > { %v15495_v25 = vpop.f32.mrf.mxu0  ;;  %v9359_v16 = vpop.f32.mrf.mxu1  ;;  %v10810_v48 = vmax.f32 %v10682_v33, 0.0  ;;  %v11147_v50 = vshll.u32 %v10909_v37, 16  ;;  %v23502_v37 = vld [vmem:[#allocation275_spill] sm:$0xff]  ;;  %v23503_v33 = vld [vmem:[#allocation277_spill] sm:$0xff] }
 0x5d8   : > { %v9750_v0 = vadd.f32 %v9359_v16, %v23499_v34  ;;  %12163 = vst.msk [vmem:[%s20783_s16 + $0xf0] sm:$0xf] %vm12102_vm10, %v13288_v13  ;;  %12164 = vst.msk [vmem:[%s20783_s16 + $0xf4] sm:$0xf] %vm12102_vm10, %v13289_v49  ;;  %v11146_v9 = vrot.slane %v11144_v24, 7  ;;  %v10812_v5 = vmax.f32 %v10684_v2, 0.0 }
 0x5d9   : > { %v10162_v41 = vpop.f32.mrf.mxu0  ;;  %v15333_v7 = vpop.f32.mrf.mxu1  ;;  %v10910_v53 = vpack.c.bf16 %v10810_v48, %v10809_v10 }
 0x5da   : > { %v10550_v47 = vadd.f32 %v10159_v28, %v9750_v0  ;;  %v9752_v26 = vadd.f32 %v15333_v7, %v23500_v35  ;;  %v11149_v63 = vor.u32 %v11147_v50, %v11146_v9  ;;  %v10911_v4 = vpack.c.bf16 %v10812_v5, %v10811_v38 }
 0x5db   : > { %v15498_v36 = vpop.f32.mrf.mxu0  ;;  %v9362_v1 = vpop.f32.mrf.mxu1  ;;  %v11151_v46 = vshrl.u32 %v10910_v53, 16  ;;  %v11154_v62 = vshll.u32 %v10910_v53, 16  ;;  %v23504_v53 = vld [vmem:[#allocation12_spill] sm:$0xff] }
 0x5dc   : > { %v11507_v15 = vsel %vm20760_vm9, 0, %v11149_v63  ;;  %v10685_v43 = vadd.f32 %v21101_v39, %v10550_v47  ;;  %v10552_v11 = vadd.f32 %v15495_v25, %v9752_v26  ;;  %v9751_v45 = vadd.f32 %v9362_v1, %v23501_v20 }
 0x5dd   : > { %v10174_v58 = vpop.f32.mrf.mxu0  ;;  %v15336_v30 = vpop.f32.mrf.mxu1  ;;  %v13293_v40 = vcombine.low %v11507_v15, %v11507_v15  ;;  %v13294_v27 = vcombine.high %v11507_v15, %v11507_v15  ;;  %v11153_v29 = vrot.slane %v11151_v46, 7  ;;  %v11159_v18 = vshrl.u32 %v10911_v4, 16  ;;  %v23505_v46 = vld [vmem:[#allocation13_spill] sm:$0xff] }
 0x5de   : > { %v11162_v28 = vshll.u32 %v10911_v4, 16  ;;  %v10551_v42 = vadd.f32 %v10162_v41, %v9751_v45  ;;  %v9755_v32 = vadd.f32 %v15336_v30, %v23502_v37  ;;  %v10813_v25 = vmax.f32 %v10685_v43, 0.0 }
 0x5df   : > { %v15499_v31 = vpop.f32.mrf.mxu0  ;;  %v9374_v61 = vpop.f32.mrf.mxu1  ;;  %12168 = vst.msk [vmem:[%s20783_s16 + $0x104] sm:$0xf] %vm12102_vm10, %v13293_v40  ;;  %12169 = vst.msk [vmem:[%s20783_s16 + $0x108] sm:$0xf] %vm12102_vm10, %v13294_v27  ;;  %v11156_v57 = vor.u32 %v11154_v62, %v11153_v29  ;;  %v11539_v55 = vsel %vm20760_vm9, %v11153_v29, 0  ;;  %v11161_v56 = vrot.slane %v11159_v18, 7  ;;  %v10687_v41 = vadd.f32 %v21101_v39, %v10552_v11 }
 0x5e0   : > { %v13297_v6 = vcombine.low %v11539_v55, %v11539_v55  ;;  %v10686_v17 = vadd.f32 %v21101_v39, %v10551_v42  ;;  %v9753_v60 = vadd.f32 %v9374_v61, %v23503_v33  ;;  %v10555_v10 = vadd.f32 %v15498_v36, %v9755_v32  ;;  %v23506_v31 = vld [vmem:[#allocation42_spill] sm:$0xff] }
 0x5e1   : > { %v10177_v51 = vpop.f32.mrf.mxu0  ;;  %v15337_v13 = vpop.f32.mrf.mxu1  ;;  %v11157_v24 = vsel %vm10947_vm8, %v11146_v9, %v11156_v57  ;;  %v11164_v16 = vor.u32 %v11162_v28, %v11161_v56  ;;  %v10815_v4 = vmax.f32 %v10687_v41, 0.0  ;;  %v23507_v57 = vld [vmem:[#allocation282_spill] sm:$0xff] }
 0x5e2   : > { %v13295_v48 = vcombine.low %v11157_v24, %v11157_v24  ;;  %v13296_v2 = vcombine.high %v11157_v24, %v11157_v24  ;;  %12172 = vst.msk [vmem:[%s20783_s16 + $0x114] sm:$0xf] %vm12102_vm10, %v13297_v6  ;;  %v10814_v34 = vmax.f32 %v10686_v17, 0.0  ;;  %v10553_v0 = vadd.f32 %v10174_v58, %v9753_v60 }
 0x5e3   : > { %v15502_v49 = vpop.f32.mrf.mxu0  ;;  %v9377_v50 = vpop.f32.mrf.mxu1  ;;  %v11508_v7 = vsel %vm20760_vm9, 0, %v11164_v16  ;;  %v10690_v1 = vadd.f32 %v21101_v39, %v10555_v10 }
 0x5e4   : > { %v9754_v5 = vadd.f32 %v9377_v50, %v23504_v53  ;;  %12170 = vst.msk [vmem:[%s20783_s16 + $0x10c] sm:$0xf] %vm12102_vm10, %v13295_v48  ;;  %12171 = vst.msk [vmem:[%s20783_s16 + $0x110] sm:$0xf] %vm12102_vm10, %v13296_v2  ;;  %v13298_v9 = vcombine.low %v11508_v7, %v11508_v7  ;;  %v13299_v36 = vcombine.high %v11508_v7, %v11508_v7  ;;  %v23508_v48 = vld [vmem:[#allocation283_spill] sm:$0xff] }
 0x5e5   : > { %v10189_v38 = vpop.f32.mrf.mxu0  ;;  %v10912_v47 = vpack.c.bf16 %v10814_v34, %v10813_v25  ;;  %v10688_v35 = vadd.f32 %v21101_v39, %v10553_v0  ;;  %v15340_v26 = vpop.f32.mrf.mxu1  ;;  %v10818_v61 = vmax.f32 %v10690_v1, 0.0 }
 0x5e6   : > { %v10554_v58 = vadd.f32 %v10177_v51, %v9754_v5  ;;  %v9758_v62 = vadd.f32 %v15340_v26, %v23505_v46  ;;  %12173 = vst.msk [vmem:[%s20783_s16 + $0x118] sm:$0xf] %vm12102_vm10, %v13298_v9  ;;  %12174 = vst.msk [vmem:[%s20783_s16 + $0x11c] sm:$0xf] %vm12102_vm10, %v13299_v36 }
 0x5e7   : > { %v15503_v63 = vpop.f32.mrf.mxu0  ;;  %v11166_v15 = vshrl.u32 %v10912_v47, 16  ;;  %v10816_v43 = vmax.f32 %v10688_v35, 0.0  ;;  %v9389_v11 = vpop.f32.mrf.mxu1  ;;  %v11169_v29 = vshll.u32 %v10912_v47, 16 }
 0x5e8   : > { %v10689_v45 = vadd.f32 %v21101_v39, %v10554_v58  ;;  %v10558_v30 = vadd.f32 %v15502_v49, %v9758_v62  ;;  %v9756_v40 = vadd.f32 %v9389_v11, %v23506_v31 }
 0x5e9   : > { %v10192_v20 = vpop.f32.mrf.mxu0  ;;  %v11168_v27 = vrot.slane %v11166_v15, 7  ;;  %v10913_v18 = vpack.c.bf16 %v10816_v43, %v10815_v4  ;;  %v15341_v28 = vpop.f32.mrf.mxu1 }
 0x5ea   : > { %v10817_v51 = vmax.f32 %v10689_v45, 0.0  ;;  %v9759_v55 = vadd.f32 %v15341_v28, %v23507_v57  ;;  %v10693_v25 = vadd.f32 %v21101_v39, %v10558_v30  ;;  %v10556_v24 = vadd.f32 %v10189_v38, %v9756_v40  ;;  %v23510_v57 = vld [vmem:[#allocation286_spill] sm:$0xff] }
 0x5eb   : > { %v15506_v42 = vpop.f32.mrf.mxu0  ;;  %v11171_v37 = vor.u32 %v11169_v29, %v11168_v27  ;;  %v11540_v32 = vsel %vm20760_vm9, %v11168_v27, 0  ;;  %v11174_v6 = vshrl.u32 %v10913_v18, 16  ;;  %v9392_v17 = vpop.f32.mrf.mxu1  ;;  %v11177_v13 = vshll.u32 %v10913_v18, 16 }
 0x5ec   : > { %v13302_v60 = vcombine.low %v11540_v32, %v11540_v32  ;;  %v10914_v49 = vpack.c.bf16 %v10818_v61, %v10817_v51  ;;  %v10559_v10 = vadd.f32 %v15503_v63, %v9759_v55  ;;  %v9757_v2 = vadd.f32 %v9392_v17, %v23508_v48  ;;  %v23509_v63 = vld [vmem:[#allocation16_spill] sm:$0xff] }
 0x5ed   : > { %v10205_v33 = vpop.f32.mrf.mxu0  ;;  %v11172_v16 = vsel %vm10947_vm8, %v11161_v56, %v11171_v37  ;;  %v11176_v41 = vrot.slane %v11174_v6, 7  ;;  %v15344_v34 = vpop.f32.mrf.mxu1  ;;  %v10691_v26 = vadd.f32 %v21101_v39, %v10556_v24  ;;  %v10821_v46 = vmax.f32 %v10693_v25, 0.0  ;;  %v23511_v37 = vld [vmem:[#allocation289_spill] sm:$0xff] }
 0x5ee   : > { %v13300_v50 = vcombine.low %v11172_v16, %v11172_v16  ;;  %v13301_v7 = vcombine.high %v11172_v16, %v11172_v16  ;;  %12177 = vst.msk [vmem:[%s20783_s16 + $0x128] sm:$0xf] %vm12102_vm10, %v13302_v60  ;;  %v11181_v53 = vshrl.u32 %v10914_v49, 16  ;;  %v10694_v9 = vadd.f32 %v21101_v39, %v10559_v10 }
 0x5ef   : > { %v15507_v0 = vpop.f32.mrf.mxu0  ;;  %v11179_v5 = vor.u32 %v11177_v13, %v11176_v41  ;;  %v10557_v36 = vadd.f32 %v10192_v20, %v9757_v2  ;;  %v9405_v38 = vpop.f32.mrf.mxu1  ;;  %v11184_v35 = vshll.u32 %v10914_v49, 16  ;;  %v9761_v1 = vadd.f32 %v15344_v34, %v23509_v63 }
 0x5f0   : > { %12175 = vst.msk [vmem:[%s20783_s16 + $0x120] sm:$0xf] %vm12102_vm10, %v13300_v50  ;;  %12176 = vst.msk [vmem:[%s20783_s16 + $0x124] sm:$0xf] %vm12102_vm10, %v13301_v7  ;;  %v11183_v56 = vrot.slane %v11181_v53, 7  ;;  %v10822_v62 = vmax.f32 %v10694_v9, 0.0 }
 0x5f1   : > { %v10207_v47 = vpop.f32.mrf.mxu0  ;;  %v11509_v58 = vsel %vm20760_vm9, 0, %v11179_v5  ;;  %v10692_v4 = vadd.f32 %v21101_v39, %v10557_v36  ;;  %v15345_v15 = vpop.f32.mrf.mxu1  ;;  %v10561_v29 = vadd.f32 %v15506_v42, %v9761_v1  ;;  %v10819_v51 = vmax.f32 %v10691_v26, 0.0  ;;  %v23513_v26 = vld [vmem:[#allocation291_spill] sm:$0xff] }
 0x5f2   : > { %v13303_v11 = vcombine.low %v11509_v58, %v11509_v58  ;;  %v13304_v20 = vcombine.high %v11509_v58, %v11509_v58  ;;  %v11186_v45 = vor.u32 %v11184_v35, %v11183_v56  ;;  %v11541_v30 = vsel %vm20760_vm9, %v11183_v56, 0 }
 0x5f3   : > { %v15510_v43 = vpop.f32.mrf.mxu0  ;;  %v13307_v31 = vcombine.low %v11541_v30, %v11541_v30  ;;  %v10916_v40 = vpack.c.bf16 %v10822_v62, %v10821_v46  ;;  %v10820_v27 = vmax.f32 %v10692_v4, 0.0  ;;  %v9407_v18 = vpop.f32.mrf.mxu1  ;;  %v9762_v55 = vadd.f32 %v15345_v15, %v23510_v57  ;;  %v23514_v46 = vld [vmem:[#allocation22_spill] sm:$0xff] }
 0x5f4   : > { %12178 = vst.msk [vmem:[%s20783_s16 + $0x12c] sm:$0xf] %vm12102_vm10, %v13303_v11  ;;  %12179 = vst.msk [vmem:[%s20783_s16 + $0x130] sm:$0xf] %vm12102_vm10, %v13304_v20  ;;  %v11187_v61 = vsel %vm10947_vm8, %v11176_v41, %v11186_v45  ;;  %v9760_v32 = vadd.f32 %v9407_v18, %v23511_v37  ;;  %v10696_v16 = vadd.f32 %v21101_v39, %v10561_v29  ;;  %v23512_v41 = vld [vmem:[#allocation48_spill] sm:$0xff] }
 0x5f5   : > { %v10220_v28 = vpop.f32.mrf.mxu0  ;;  %v13305_v6 = vcombine.low %v11187_v61, %v11187_v61  ;;  %v13306_v25 = vcombine.high %v11187_v61, %v11187_v61  ;;  %12182 = vst.msk [vmem:[%s20783_s16 + $0x13c] sm:$0xf] %vm12102_vm10, %v13307_v31  ;;  %v11196_v42 = vshrl.u32 %v10916_v40, 16  ;;  %v15348_v17 = vpop.f32.mrf.mxu1  ;;  %v10915_v60 = vpack.c.bf16 %v10820_v27, %v10819_v51 }
 0x5f6   : > { %v10560_v13 = vadd.f32 %v10207_v47, %v9760_v32  ;;  %v11199_v24 = vshll.u32 %v10916_v40, 16  ;;  %v9764_v10 = vadd.f32 %v15348_v17, %v23512_v41  ;;  %v10562_v50 = vadd.f32 %v15507_v0, %v9762_v55  ;;  %v23515_v17 = vld [vmem:[#allocation295_spill] sm:$0xff] }
 0x5f7   : > { %v15511_v33 = vpop.f32.mrf.mxu0  ;;  %12180 = vst.msk [vmem:[%s20783_s16 + $0x134] sm:$0xf] %vm12102_vm10, %v13305_v6  ;;  %12181 = vst.msk [vmem:[%s20783_s16 + $0x138] sm:$0xf] %vm12102_vm10, %v13306_v25  ;;  %v11198_v49 = vrot.slane %v11196_v42, 7  ;;  %v9420_v48 = vpop.f32.mrf.mxu1  ;;  %v11189_v34 = vshrl.u32 %v10915_v60, 16 }
 0x5f8   : > { %v10695_v5 = vadd.f32 %v21101_v39, %v10560_v13  ;;  %v10564_v9 = vadd.f32 %v15510_v43, %v9764_v10  ;;  %v11192_v35 = vshll.u32 %v10915_v60, 16  ;;  %v9763_v63 = vadd.f32 %v9420_v48, %v23513_v26 }
 0x5f9   : > { %v10223_v2 = vpop.f32.mrf.mxu0  ;;  %v11201_v7 = vor.u32 %v11199_v24, %v11198_v49  ;;  %v11542_v53 = vsel %vm20760_vm9, %v11198_v49, 0  ;;  %v15349_v36 = vpop.f32.mrf.mxu1  ;;  %v11191_v56 = vrot.slane %v11189_v34, 7  ;;  %v10824_v1 = vmax.f32 %v10696_v16, 0.0 }
 0x5fa   : > { %v13312_v47 = vcombine.low %v11542_v53, %v11542_v53  ;;  %v10823_v58 = vmax.f32 %v10695_v5, 0.0  ;;  %v9765_v62 = vadd.f32 %v15349_v36, %v23514_v46  ;;  %v10697_v11 = vadd.f32 %v21101_v39, %v10562_v50  ;;  %v23516_v2 = vld [vmem:[#allocation162_spill] sm:$0xff] }
 0x5fb   : > { %v15514_v38 = vpop.f32.mrf.mxu0  ;;  %v9423_v0 = vpop.f32.mrf.mxu1  ;;  %v11194_v15 = vor.u32 %v11192_v35, %v11191_v56  ;;  %v11202_v43 = vsel %vm10947_vm8, %v11191_v56, %v11201_v7  ;;  %v10563_v20 = vadd.f32 %v10220_v28, %v9763_v63  ;;  %v10699_v40 = vadd.f32 %v21101_v39, %v10564_v9  ;;  %v23517_v35 = vld [vmem:[#allocation56_spill] sm:$0xff] }
 0x5fc   : > { %12187 = vst.msk [vmem:[%s20783_s16 + $0x150] sm:$0xf] %vm12102_vm10, %v13312_v47  ;;  %v13310_v45 = vcombine.low %v11202_v43, %v11202_v43  ;;  %v13311_v30 = vcombine.high %v11202_v43, %v11202_v43  ;;  %v10917_v31 = vpack.c.bf16 %v10824_v1, %v10823_v58  ;;  %v10565_v51 = vadd.f32 %v15511_v33, %v9765_v62 }
 0x5fd   : > { %v10235_v4 = vpop.f32.mrf.mxu0  ;;  %v15352_v27 = vpop.f32.mrf.mxu1  ;;  %v11510_v18 = vsel %vm20760_vm9, 0, %v11194_v15  ;;  %v10698_v61 = vadd.f32 %v21101_v39, %v10563_v20  ;;  %v10825_v6 = vmax.f32 %v10697_v11, 0.0  ;;  %v10827_v49 = vmax.f32 %v10699_v40, 0.0 }
 0x5fe   : > { %v13308_v57 = vcombine.low %v11510_v18, %v11510_v18  ;;  %v13309_v55 = vcombine.high %v11510_v18, %v11510_v18  ;;  %12185 = vst.msk [vmem:[%s20783_s16 + $0x148] sm:$0xf] %vm12102_vm10, %v13310_v45  ;;  %12186 = vst.msk [vmem:[%s20783_s16 + $0x14c] sm:$0xf] %vm12102_vm10, %v13311_v30  ;;  %v11204_v28 = vshrl.u32 %v10917_v31, 16  ;;  %v10700_v42 = vadd.f32 %v21101_v39, %v10565_v51 }
 0x5ff   : > { %v15515_v29 = vpop.f32.mrf.mxu0  ;;  %v9435_v37 = vpop.f32.mrf.mxu1  ;;  %v10826_v25 = vmax.f32 %v10698_v61, 0.0  ;;  %v11207_v13 = vshll.u32 %v10917_v31, 16  ;;  %v23518_v31 = vld [vmem:[#allocation164_spill] sm:$0xff]  ;;  %v23519_v61 = vld [vmem:[#allocation166_spill] sm:$0xff] }
 0x600   : > { %v9766_v60 = vadd.f32 %v9435_v37, %v23515_v17  ;;  %12183 = vst.msk [vmem:[%s20783_s16 + $0x140] sm:$0xf] %vm12102_vm10, %v13308_v57  ;;  %12184 = vst.msk [vmem:[%s20783_s16 + $0x144] sm:$0xf] %vm12102_vm10, %v13309_v55  ;;  %v11206_v33 = vrot.slane %v11204_v28, 7  ;;  %v10828_v10 = vmax.f32 %v10700_v42, 0.0 }
 0x601   : > { %v10238_v32 = vpop.f32.mrf.mxu0  ;;  %v15353_v24 = vpop.f32.mrf.mxu1  ;;  %v10918_v41 = vpack.c.bf16 %v10826_v25, %v10825_v6 }
 0x602   : > { %v10566_v48 = vadd.f32 %v10235_v4, %v9766_v60  ;;  %v9768_v34 = vadd.f32 %v15353_v24, %v23516_v2  ;;  %v11209_v50 = vor.u32 %v11207_v13, %v11206_v33  ;;  %v10919_v36 = vpack.c.bf16 %v10828_v10, %v10827_v49 }
 0x603   : > { %v15518_v16 = vpop.f32.mrf.mxu0  ;;  %v9438_v7 = vpop.f32.mrf.mxu1  ;;  %v11211_v5 = vshrl.u32 %v10918_v41, 16  ;;  %v11214_v9 = vshll.u32 %v10918_v41, 16  ;;  %v23520_v41 = vld [vmem:[#allocation29_spill] sm:$0xff] }
 0x604   : > { %v11511_v38 = vsel %vm20760_vm9, 0, %v11209_v50  ;;  %v10701_v47 = vadd.f32 %v21101_v39, %v10566_v48  ;;  %v10568_v56 = vadd.f32 %v15515_v29, %v9768_v34  ;;  %v9767_v26 = vadd.f32 %v9438_v7, %v23517_v35 }
 0x605   : > { %v10250_v53 = vpop.f32.mrf.mxu0  ;;  %v15356_v63 = vpop.f32.mrf.mxu1  ;;  %v13313_v58 = vcombine.low %v11511_v38, %v11511_v38  ;;  %v13314_v46 = vcombine.high %v11511_v38, %v11511_v38  ;;  %v11213_v62 = vrot.slane %v11211_v5, 7  ;;  %v11219_v0 = vshrl.u32 %v10919_v36, 16  ;;  %v23521_v5 = vld [vmem:[#allocation167_spill] sm:$0xff] }
 0x606   : > { %v11222_v4 = vshll.u32 %v10919_v36, 16  ;;  %v10567_v15 = vadd.f32 %v10238_v32, %v9767_v26  ;;  %v9771_v40 = vadd.f32 %v15356_v63, %v23518_v31  ;;  %v10829_v29 = vmax.f32 %v10701_v47, 0.0 }
 0x607   : > { %v15519_v1 = vpop.f32.mrf.mxu0  ;;  %v9450_v43 = vpop.f32.mrf.mxu1  ;;  %12188 = vst.msk [vmem:[%s20783_s16 + $0x154] sm:$0xf] %vm12102_vm10, %v13313_v58  ;;  %12189 = vst.msk [vmem:[%s20783_s16 + $0x158] sm:$0xf] %vm12102_vm10, %v13314_v46  ;;  %v11216_v20 = vor.u32 %v11214_v9, %v11213_v62  ;;  %v11543_v45 = vsel %vm20760_vm9, %v11213_v62, 0  ;;  %v11221_v30 = vrot.slane %v11219_v0, 7  ;;  %v10703_v32 = vadd.f32 %v21101_v39, %v10568_v56 }
 0x608   : > { %v13317_v27 = vcombine.low %v11543_v45, %v11543_v45  ;;  %v10702_v18 = vadd.f32 %v21101_v39, %v10567_v15  ;;  %v9769_v51 = vadd.f32 %v9450_v43, %v23519_v61  ;;  %v10571_v6 = vadd.f32 %v15518_v16, %v9771_v40 }
 0x609   : > { %v10253_v11 = vpop.f32.mrf.mxu0  ;;  %v15357_v57 = vpop.f32.mrf.mxu1  ;;  %v11217_v28 = vsel %vm10947_vm8, %v11206_v33, %v11216_v20  ;;  %v11224_v37 = vor.u32 %v11222_v4, %v11221_v30  ;;  %v10831_v36 = vmax.f32 %v10703_v32, 0.0  ;;  %v23523_v32 = vld [vmem:[#allocation63_spill] sm:$0xff] }
 0x60a   : > { %v13315_v25 = vcombine.low %v11217_v28, %v11217_v28  ;;  %v13316_v42 = vcombine.high %v11217_v28, %v11217_v28  ;;  %12192 = vst.msk [vmem:[%s20783_s16 + $0x164] sm:$0xf] %vm12102_vm10, %v13317_v27  ;;  %v10830_v17 = vmax.f32 %v10702_v18, 0.0  ;;  %v10569_v60 = vadd.f32 %v10250_v53, %v9769_v51 }
 0x60b   : > { %v15522_v55 = vpop.f32.mrf.mxu0  ;;  %v9453_v13 = vpop.f32.mrf.mxu1  ;;  %v11512_v24 = vsel %vm20760_vm9, 0, %v11224_v37  ;;  %v10706_v7 = vadd.f32 %v21101_v39, %v10571_v6 }
 0x60c   : > { %v9770_v10 = vadd.f32 %v9453_v13, %v23520_v41  ;;  %12190 = vst.msk [vmem:[%s20783_s16 + $0x15c] sm:$0xf] %vm12102_vm10, %v13315_v25  ;;  %12191 = vst.msk [vmem:[%s20783_s16 + $0x160] sm:$0xf] %vm12102_vm10, %v13316_v42  ;;  %v13318_v33 = vcombine.low %v11512_v24, %v11512_v24  ;;  %v13319_v16 = vcombine.high %v11512_v24, %v11512_v24 }
 0x60d   : > { %v10265_v49 = vpop.f32.mrf.mxu0  ;;  %v10920_v48 = vpack.c.bf16 %v10830_v17, %v10829_v29  ;;  %v10704_v2 = vadd.f32 %v21101_v39, %v10569_v60  ;;  %v15360_v34 = vpop.f32.mrf.mxu1  ;;  %v10834_v15 = vmax.f32 %v10706_v7, 0.0 }
 0x60e   : > { %v10570_v53 = vadd.f32 %v10253_v11, %v9770_v10  ;;  %v9774_v9 = vadd.f32 %v15360_v34, %v23521_v5  ;;  %12193 = vst.msk [vmem:[%s20783_s16 + $0x168] sm:$0xf] %vm12102_vm10, %v13318_v33  ;;  %12194 = vst.msk [vmem:[%s20783_s16 + $0x16c] sm:$0xf] %vm12102_vm10, %v13319_v16  ;;  %v23522_v11 = vld [vmem:[#allocation168_spill] sm:$0xff] }
 0x60f   : > { %v15523_v50 = vpop.f32.mrf.mxu0  ;;  %v11226_v38 = vshrl.u32 %v10920_v48, 16  ;;  %v10832_v47 = vmax.f32 %v10704_v2, 0.0  ;;  %v9465_v56 = vpop.f32.mrf.mxu1  ;;  %v11229_v46 = vshll.u32 %v10920_v48, 16  ;;  %v23524_v2 = vld [vmem:[#allocation171_spill] sm:$0xff] }
 0x610   : > { %v10705_v26 = vadd.f32 %v21101_v39, %v10570_v53  ;;  %v10574_v63 = vadd.f32 %v15522_v55, %v9774_v9  ;;  %v9772_v1 = vadd.f32 %v9465_v56, %v20471_v44  ;;  %v21367_v39 = vld [vmem:[%s21721_s4] ss:$0 sm:$0xff] }
 0x611   : > { %v10268_v35 = vpop.f32.mrf.mxu0  ;;  %v11228_v58 = vrot.slane %v11226_v38, 7  ;;  %v10921_v62 = vpack.c.bf16 %v10832_v47, %v10831_v36  ;;  %v15361_v0 = vpop.f32.mrf.mxu1 }
 0x612   : > { %v10833_v43 = vmax.f32 %v10705_v26, 0.0  ;;  %v9775_v20 = vadd.f32 %v15361_v0, %v23522_v11  ;;  %v10709_v44 = vadd.f32 %v21367_v39, %v10574_v63  ;;  %v10572_v57 = vadd.f32 %v10265_v49, %v9772_v1 }
 0x613   : > { %v15526_v4 = vpop.f32.mrf.mxu0  ;;  %v11231_v45 = vor.u32 %v11229_v46, %v11228_v58  ;;  %v11544_v31 = vsel %vm20760_vm9, %v11228_v58, 0  ;;  %v11234_v40 = vshrl.u32 %v10921_v62, 16  ;;  %v9468_v27 = vpop.f32.mrf.mxu1  ;;  %v11237_v61 = vshll.u32 %v10921_v62, 16 }
 0x614   : > { %v13322_v18 = vcombine.low %v11544_v31, %v11544_v31  ;;  %v10922_v51 = vpack.c.bf16 %v10834_v15, %v10833_v43  ;;  %v10575_v37 = vadd.f32 %v15523_v50, %v9775_v20  ;;  %v9773_v6 = vadd.f32 %v9468_v27, %v23523_v32  ;;  %v23525_v43 = vld [vmem:[#allocation35_spill] sm:$0xff]  ;;  %v23526_v20 = vld [vmem:[#allocation172_spill] sm:$0xff] }
 0x615   : > { %v10281_v29 = vpop.f32.mrf.mxu0  ;;  %v11232_v55 = vsel %vm10947_vm8, %v11221_v30, %v11231_v45  ;;  %v11236_v28 = vrot.slane %v11234_v40, 7  ;;  %v15364_v25 = vpop.f32.mrf.mxu1  ;;  %v10707_v48 = vadd.f32 %v21367_v39, %v10572_v57  ;;  %v10837_v7 = vmax.f32 %v10709_v44, 0.0 }
 0x616   : > { %v13320_v17 = vcombine.low %v11232_v55, %v11232_v55  ;;  %v13321_v60 = vcombine.high %v11232_v55, %v11232_v55  ;;  %12197 = vst.msk [vmem:[%s20783_s16 + $0x178] sm:$0xf] %vm12102_vm10, %v13322_v18  ;;  %v11241_v13 = vshrl.u32 %v10922_v51, 16  ;;  %v10710_v41 = vadd.f32 %v21367_v39, %v10575_v37  ;;  %v23527_v55 = vld [vmem:[#allocation173_spill] sm:$0xff] }
 0x617   : > { %v15527_v42 = vpop.f32.mrf.mxu0  ;;  %v11239_v24 = vor.u32 %v11237_v61, %v11236_v28  ;;  %v10573_v10 = vadd.f32 %v10268_v35, %v9773_v6  ;;  %v9481_v49 = vpop.f32.mrf.mxu1  ;;  %v11244_v16 = vshll.u32 %v10922_v51, 16  ;;  %v9777_v34 = vadd.f32 %v15364_v25, %v23524_v2 }
 0x618   : > { %12195 = vst.msk [vmem:[%s20783_s16 + $0x170] sm:$0xf] %vm12102_vm10, %v13320_v17  ;;  %12196 = vst.msk [vmem:[%s20783_s16 + $0x174] sm:$0xf] %vm12102_vm10, %v13321_v60  ;;  %v11243_v30 = vrot.slane %v11241_v13, 7  ;;  %v10838_v53 = vmax.f32 %v10710_v41, 0.0 }
 0x619   : > { %v10283_v33 = vpop.f32.mrf.mxu0  ;;  %v11513_v50 = vsel %vm20760_vm9, 0, %v11239_v24  ;;  %v10708_v5 = vadd.f32 %v21367_v39, %v10573_v10  ;;  %v15365_v9 = vpop.f32.mrf.mxu1  ;;  %v10577_v58 = vadd.f32 %v15526_v4, %v9777_v34  ;;  %v10835_v15 = vmax.f32 %v10707_v48, 0.0 }
 0x61a   : > { %v13323_v38 = vcombine.low %v11513_v50, %v11513_v50  ;;  %v13324_v47 = vcombine.high %v11513_v50, %v11513_v50  ;;  %v11246_v56 = vor.u32 %v11244_v16, %v11243_v30  ;;  %v11545_v35 = vsel %vm20760_vm9, %v11243_v30, 0  ;;  %v23528_v16 = vld [vmem:[#allocation69_spill] sm:$0xff]  ;;  %v23529_v50 = vld [vmem:[#allocation175_spill] sm:$0xff] }
 0x61b   : > { %v15530_v36 = vpop.f32.mrf.mxu0  ;;  %v13327_v26 = vcombine.low %v11545_v35, %v11545_v35  ;;  %v10924_v63 = vpack.c.bf16 %v10838_v53, %v10837_v7  ;;  %v10836_v1 = vmax.f32 %v10708_v5, 0.0  ;;  %v9483_v46 = vpop.f32.mrf.mxu1  ;;  %v9778_v11 = vadd.f32 %v15365_v9, %v23525_v43 }
 0x61c   : > { %12198 = vst.msk [vmem:[%s20783_s16 + $0x17c] sm:$0xf] %vm12102_vm10, %v13323_v38  ;;  %12199 = vst.msk [vmem:[%s20783_s16 + $0x180] sm:$0xf] %vm12102_vm10, %v13324_v47  ;;  %v11247_v0 = vsel %vm10947_vm8, %v11236_v28, %v11246_v56  ;;  %v9776_v45 = vadd.f32 %v9483_v46, %v23526_v20  ;;  %v10712_v57 = vadd.f32 %v21367_v39, %v10577_v58 }
 0x61d   : > { %v10296_v62 = vpop.f32.mrf.mxu0  ;;  %v13325_v31 = vcombine.low %v11247_v0, %v11247_v0  ;;  %v13326_v40 = vcombine.high %v11247_v0, %v11247_v0  ;;  %12202 = vst.msk [vmem:[%s20783_s16 + $0x18c] sm:$0xf] %vm12102_vm10, %v13327_v26  ;;  %v11256_v4 = vshrl.u32 %v10924_v63, 16  ;;  %v15368_v44 = vpop.f32.mrf.mxu1  ;;  %v10923_v29 = vpack.c.bf16 %v10836_v1, %v10835_v15 }
 0x61e   : > { %v10576_v18 = vadd.f32 %v10283_v33, %v9776_v45  ;;  %v11259_v51 = vshll.u32 %v10924_v63, 16  ;;  %v9780_v28 = vadd.f32 %v15368_v44, %v23527_v55  ;;  %v10578_v25 = vadd.f32 %v15527_v42, %v9778_v11 }
 0x61f   : > { %v15531_v27 = vpop.f32.mrf.mxu0  ;;  %12200 = vst.msk [vmem:[%s20783_s16 + $0x184] sm:$0xf] %vm12102_vm10, %v13325_v31  ;;  %12201 = vst.msk [vmem:[%s20783_s16 + $0x188] sm:$0xf] %vm12102_vm10, %v13326_v40  ;;  %v11258_v61 = vrot.slane %v11256_v4, 7  ;;  %v9496_v37 = vpop.f32.mrf.mxu1  ;;  %v11249_v6 = vshrl.u32 %v10923_v29, 16 }
 0x620   : > { %v10711_v13 = vadd.f32 %v21367_v39, %v10576_v18  ;;  %v10580_v24 = vadd.f32 %v15530_v36, %v9780_v28  ;;  %v11252_v30 = vshll.u32 %v10923_v29, 16  ;;  %v9779_v48 = vadd.f32 %v9496_v37, %v23528_v16  ;;  %v23530_v4 = vld [vmem:[#allocation177_spill] sm:$0xff] }
 0x621   : > { %v10299_v32 = vpop.f32.mrf.mxu0  ;;  %v11261_v17 = vor.u32 %v11259_v51, %v11258_v61  ;;  %v11546_v60 = vsel %vm20760_vm9, %v11258_v61, 0  ;;  %v15369_v41 = vpop.f32.mrf.mxu1  ;;  %v11251_v33 = vrot.slane %v11249_v6, 7  ;;  %v10840_v2 = vmax.f32 %v10712_v57, 0.0 }
 0x622   : > { %v13332_v49 = vcombine.low %v11546_v60, %v11546_v60  ;;  %v10839_v34 = vmax.f32 %v10711_v13, 0.0  ;;  %v9781_v7 = vadd.f32 %v15369_v41, %v23529_v50  ;;  %v10713_v36 = vadd.f32 %v21367_v39, %v10578_v25 }
 0x623   : > { %v15534_v10 = vpop.f32.mrf.mxu0  ;;  %v9499_v42 = vpop.f32.mrf.mxu1  ;;  %v11254_v5 = vor.u32 %v11252_v30, %v11251_v33  ;;  %v11262_v9 = vsel %vm10947_vm8, %v11251_v33, %v11261_v17  ;;  %v10579_v38 = vadd.f32 %v10296_v62, %v9779_v48  ;;  %v10715_v26 = vadd.f32 %v21367_v39, %v10580_v24 }
 0x624   : > { %12207 = vst.msk [vmem:[%s20783_s16 + $0x1a0] sm:$0xf] %vm12102_vm10, %v13332_v49  ;;  %v13330_v47 = vcombine.low %v11262_v9, %v11262_v9  ;;  %v13331_v56 = vcombine.high %v11262_v9, %v11262_v9  ;;  %v10925_v35 = vpack.c.bf16 %v10840_v2, %v10839_v34  ;;  %v10581_v0 = vadd.f32 %v15531_v27, %v9781_v7  ;;  %v23531_v49 = vld [vmem:[#allocation43_spill] sm:$0xff] }
 0x625   : > { %v10311_v53 = vpop.f32.mrf.mxu0  ;;  %v15372_v63 = vpop.f32.mrf.mxu1  ;;  %v11514_v58 = vsel %vm20760_vm9, 0, %v11254_v5  ;;  %v10714_v46 = vadd.f32 %v21367_v39, %v10579_v38  ;;  %v10841_v45 = vmax.f32 %v10713_v36, 0.0  ;;  %v10843_v18 = vmax.f32 %v10715_v26, 0.0  ;;  %v23532_v38 = vld [vmem:[#allocation77_spill] sm:$0xff] }
 0x626   : > { %v13328_v15 = vcombine.low %v11514_v58, %v11514_v58  ;;  %v13329_v43 = vcombine.high %v11514_v58, %v11514_v58  ;;  %12205 = vst.msk [vmem:[%s20783_s16 + $0x198] sm:$0xf] %vm12102_vm10, %v13330_v47  ;;  %12206 = vst.msk [vmem:[%s20783_s16 + $0x19c] sm:$0xf] %vm12102_vm10, %v13331_v56  ;;  %v11264_v62 = vshrl.u32 %v10925_v35, 16  ;;  %v10716_v40 = vadd.f32 %v21367_v39, %v10581_v0  ;;  %v23533_v63 = vld [vmem:[#allocation179_spill] sm:$0xff] }
 0x627   : > { %v15535_v1 = vpop.f32.mrf.mxu0  ;;  %v9511_v11 = vpop.f32.mrf.mxu1  ;;  %v10842_v31 = vmax.f32 %v10714_v46, 0.0  ;;  %v11267_v29 = vshll.u32 %v10925_v35, 16 }
 0x628   : > { %v9782_v44 = vadd.f32 %v9511_v11, %v23530_v4  ;;  %12203 = vst.msk [vmem:[%s20783_s16 + $0x190] sm:$0xf] %vm12102_vm10, %v13328_v15  ;;  %12204 = vst.msk [vmem:[%s20783_s16 + $0x194] sm:$0xf] %vm12102_vm10, %v13329_v43  ;;  %v11266_v27 = vrot.slane %v11264_v62, 7  ;;  %v10844_v55 = vmax.f32 %v10716_v40, 0.0 }
 0x629   : > { %v10314_v20 = vpop.f32.mrf.mxu0  ;;  %v15373_v61 = vpop.f32.mrf.mxu1  ;;  %v10926_v57 = vpack.c.bf16 %v10842_v31, %v10841_v45 }
 0x62a   : > { %v10582_v28 = vadd.f32 %v10311_v53, %v9782_v44  ;;  %v9784_v37 = vadd.f32 %v15373_v61, %v20525_v8  ;;  %v11269_v32 = vor.u32 %v11267_v29, %v11266_v27  ;;  %v10927_v13 = vpack.c.bf16 %v10844_v55, %v10843_v18  ;;  %v23534_v29 = vld [vmem:[#allocation181_spill] sm:$0xff] }
 0x62b   : > { %v15538_v51 = vpop.f32.mrf.mxu0  ;;  %v9514_v6 = vpop.f32.mrf.mxu1  ;;  %v11271_v17 = vshrl.u32 %v10926_v57, 16  ;;  %v11274_v60 = vshll.u32 %v10926_v57, 16 }
 0x62c   : > { %v11515_v24 = vsel %vm20760_vm9, 0, %v11269_v32  ;;  %v10717_v41 = vadd.f32 %v21367_v39, %v10582_v28  ;;  %v10584_v10 = vadd.f32 %v15535_v1, %v9784_v37  ;;  %v9783_v33 = vadd.f32 %v9514_v6, %v23531_v49  ;;  %v23535_v6 = vld [vmem:[#allocation50_spill] sm:$0xff] }
 0x62d   : > { %v10326_v25 = vpop.f32.mrf.mxu0  ;;  %v15376_v30 = vpop.f32.mrf.mxu1  ;;  %v13333_v48 = vcombine.low %v11515_v24, %v11515_v24  ;;  %v13334_v8 = vcombine.high %v11515_v24, %v11515_v24  ;;  %v11273_v2 = vrot.slane %v11271_v17, 7  ;;  %v11279_v34 = vshrl.u32 %v10927_v13, 16 }
 0x62e   : > { %v11282_v50 = vshll.u32 %v10927_v13, 16  ;;  %v10583_v7 = vadd.f32 %v10314_v20, %v9783_v33  ;;  %v9787_v47 = vadd.f32 %v15376_v30, %v23532_v38  ;;  %v10845_v35 = vmax.f32 %v10717_v41, 0.0 }
 0x62f   : > { %v15539_v16 = vpop.f32.mrf.mxu0  ;;  %v9526_v42 = vpop.f32.mrf.mxu1  ;;  %12208 = vst.msk [vmem:[%s20783_s16 + $0x1a4] sm:$0xf] %vm12102_vm10, %v13333_v48  ;;  %12209 = vst.msk [vmem:[%s20783_s16 + $0x1a8] sm:$0xf] %vm12102_vm10, %v13334_v8  ;;  %v11276_v5 = vor.u32 %v11274_v60, %v11273_v2  ;;  %v11547_v9 = vsel %vm20760_vm9, %v11273_v2, 0  ;;  %v11281_v36 = vrot.slane %v11279_v34, 7  ;;  %v10719_v43 = vadd.f32 %v21367_v39, %v10584_v10 }
 0x630   : > { %v13337_v56 = vcombine.low %v11547_v9, %v11547_v9  ;;  %v10718_v26 = vadd.f32 %v21367_v39, %v10583_v7  ;;  %v9785_v1 = vadd.f32 %v9526_v42, %v23533_v63  ;;  %v10587_v62 = vadd.f32 %v15538_v51, %v9787_v47  ;;  %v23536_v7 = vld [vmem:[#allocation182_spill] sm:$0xff] }
 0x631   : > { %v10329_v53 = vpop.f32.mrf.mxu0  ;;  %v15377_v58 = vpop.f32.mrf.mxu1  ;;  %v11277_v0 = vsel %vm10947_vm8, %v11266_v27, %v11276_v5  ;;  %v11284_v15 = vor.u32 %v11282_v50, %v11281_v36  ;;  %v10847_v17 = vmax.f32 %v10719_v43, 0.0 }
 0x632   : > { %v13335_v11 = vcombine.low %v11277_v0, %v11277_v0  ;;  %v13336_v20 = vcombine.high %v11277_v0, %v11277_v0  ;;  %12212 = vst.msk [vmem:[%s20783_s16 + $0x1b4] sm:$0xf] %vm12102_vm10, %v13337_v56  ;;  %v10846_v45 = vmax.f32 %v10718_v26, 0.0  ;;  %v10585_v31 = vadd.f32 %v10326_v25, %v9785_v1  ;;  %v23537_v0 = vld [vmem:[#allocation183_spill] sm:$0xff] }
 0x633   : > { %v15542_v46 = vpop.f32.mrf.mxu0  ;;  %v9529_v40 = vpop.f32.mrf.mxu1  ;;  %v11516_v44 = vsel %vm20760_vm9, 0, %v11284_v15  ;;  %v10722_v37 = vadd.f32 %v21367_v39, %v10587_v62 }
 0x634   : > { %v9786_v18 = vadd.f32 %v9529_v40, %v23534_v29  ;;  %12210 = vst.msk [vmem:[%s20783_s16 + $0x1ac] sm:$0xf] %vm12102_vm10, %v13335_v11  ;;  %12211 = vst.msk [vmem:[%s20783_s16 + $0x1b0] sm:$0xf] %vm12102_vm10, %v13336_v20  ;;  %v13338_v27 = vcombine.low %v11516_v44, %v11516_v44  ;;  %v13339_v61 = vcombine.high %v11516_v44, %v11516_v44 }
 0x635   : > { %v10341_v4 = vpop.f32.mrf.mxu0  ;;  %v10928_v51 = vpack.c.bf16 %v10846_v45, %v10845_v35  ;;  %v10720_v57 = vadd.f32 %v21367_v39, %v10585_v31  ;;  %v15380_v55 = vpop.f32.mrf.mxu1  ;;  %v10850_v34 = vmax.f32 %v10722_v37, 0.0 }
 0x636   : > { %v10586_v32 = vadd.f32 %v10329_v53, %v9786_v18  ;;  %v9790_v25 = vadd.f32 %v15380_v55, %v23535_v6  ;;  %12213 = vst.msk [vmem:[%s20783_s16 + $0x1b8] sm:$0xf] %vm12102_vm10, %v13338_v27  ;;  %12214 = vst.msk [vmem:[%s20783_s16 + $0x1bc] sm:$0xf] %vm12102_vm10, %v13339_v61  ;;  %v23538_v61 = vld [vmem:[#allocation84_spill] sm:$0xff] }
 0x637   : > { %v15543_v28 = vpop.f32.mrf.mxu0  ;;  %v11286_v60 = vshrl.u32 %v10928_v51, 16  ;;  %v10848_v13 = vmax.f32 %v10720_v57, 0.0  ;;  %v9541_v24 = vpop.f32.mrf.mxu1  ;;  %v11289_v16 = vshll.u32 %v10928_v51, 16 }
 0x638   : > { %v10721_v10 = vadd.f32 %v21367_v39, %v10586_v32  ;;  %v10590_v49 = vadd.f32 %v15542_v46, %v9790_v25  ;;  %v9788_v33 = vadd.f32 %v9541_v24, %v20559_v52 }
 0x639   : > { %v10344_v41 = vpop.f32.mrf.mxu0  ;;  %v11288_v30 = vrot.slane %v11286_v60, 7  ;;  %v10929_v48 = vpack.c.bf16 %v10848_v13, %v10847_v17  ;;  %v15381_v8 = vpop.f32.mrf.mxu1 }
 0x63a   : > { %v10849_v50 = vmax.f32 %v10721_v10, 0.0  ;;  %v9791_v42 = vadd.f32 %v15381_v8, %v23536_v7  ;;  %v10725_v38 = vadd.f32 %v21367_v39, %v10590_v49  ;;  %v10588_v63 = vadd.f32 %v10341_v4, %v9788_v33  ;;  %v23539_v8 = vld [vmem:[#allocation185_spill] sm:$0xff] }
 0x63b   : > { %v15546_v2 = vpop.f32.mrf.mxu0  ;;  %v11291_v53 = vor.u32 %v11289_v16, %v11288_v30  ;;  %v11548_v5 = vsel %vm20760_vm9, %v11288_v30, 0  ;;  %v11294_v9 = vshrl.u32 %v10929_v48, 16  ;;  %v9544_v47 = vpop.f32.mrf.mxu1  ;;  %v11297_v35 = vshll.u32 %v10929_v48, 16 }
 0x63c   : > { %v13342_v52 = vcombine.low %v11548_v5, %v11548_v5  ;;  %v10930_v26 = vpack.c.bf16 %v10850_v34, %v10849_v50  ;;  %v10591_v46 = vadd.f32 %v15543_v28, %v9791_v42  ;;  %v9789_v15 = vadd.f32 %v9544_v47, %v23537_v0 }
 0x63d   : > { %v10357_v56 = vpop.f32.mrf.mxu0  ;;  %v11292_v1 = vsel %vm10947_vm8, %v11281_v36, %v11291_v53  ;;  %v11296_v58 = vrot.slane %v11294_v9, 7  ;;  %v15384_v43 = vpop.f32.mrf.mxu1  ;;  %v10723_v27 = vadd.f32 %v21367_v39, %v10588_v63  ;;  %v10853_v55 = vmax.f32 %v10725_v38, 0.0 }
 0x63e   : > { %v13340_v11 = vcombine.low %v11292_v1, %v11292_v1  ;;  %v13341_v20 = vcombine.high %v11292_v1, %v11292_v1  ;;  %12217 = vst.msk [vmem:[%s20783_s16 + $0x1c8] sm:$0xf] %vm12102_vm10, %v13342_v52  ;;  %v11301_v45 = vshrl.u32 %v10930_v26, 16  ;;  %v10726_v40 = vadd.f32 %v21367_v39, %v10591_v46 }
 0x63f   : > { %v15547_v62 = vpop.f32.mrf.mxu0  ;;  %v11299_v31 = vor.u32 %v11297_v35, %v11296_v58  ;;  %v10589_v44 = vadd.f32 %v10344_v41, %v9789_v15  ;;  %v9557_v4 = vpop.f32.mrf.mxu1  ;;  %v11304_v18 = vshll.u32 %v10930_v26, 16  ;;  %v9793_v51 = vadd.f32 %v15384_v43, %v23538_v61  ;;  %v23540_v35 = vld [vmem:[#allocation57_spill] sm:$0xff] }
 0x640   : > { %12215 = vst.msk [vmem:[%s20783_s16 + $0x1c0] sm:$0xf] %vm12102_vm10, %v13340_v11  ;;  %12216 = vst.msk [vmem:[%s20783_s16 + $0x1c4] sm:$0xf] %vm12102_vm10, %v13341_v20  ;;  %v11303_v36 = vrot.slane %v11301_v45, 7  ;;  %v10854_v28 = vmax.f32 %v10726_v40, 0.0 }
 0x641   : > { %v10359_v29 = vpop.f32.mrf.mxu0  ;;  %v11517_v57 = vsel %vm20760_vm9, 0, %v11299_v31  ;;  %v10724_v37 = vadd.f32 %v21367_v39, %v10589_v44  ;;  %v15385_v32 = vpop.f32.mrf.mxu1  ;;  %v10593_v49 = vadd.f32 %v15546_v2, %v9793_v51  ;;  %v10851_v48 = vmax.f32 %v10723_v27, 0.0  ;;  %v23541_v44 = vld [vmem:[#allocation187_spill] sm:$0xff] }
 0x642   : > { %v13343_v25 = vcombine.low %v11517_v57, %v11517_v57  ;;  %v13344_v17 = vcombine.high %v11517_v57, %v11517_v57  ;;  %v11306_v60 = vor.u32 %v11304_v18, %v11303_v36  ;;  %v11549_v13 = vsel %vm20760_vm9, %v11303_v36, 0  ;;  %v23542_v18 = vld [vmem:[#allocation188_spill] sm:$0xff] }
 0x643   : > { %v15550_v6 = vpop.f32.mrf.mxu0  ;;  %v13347_v24 = vcombine.low %v11549_v13, %v11549_v13  ;;  %v10932_v41 = vpack.c.bf16 %v10854_v28, %v10853_v55  ;;  %v10852_v10 = vmax.f32 %v10724_v37, 0.0  ;;  %v9559_v33 = vpop.f32.mrf.mxu1  ;;  %v9794_v34 = vadd.f32 %v15385_v32, %v23539_v8 }
 0x644   : > { %12218 = vst.msk [vmem:[%s20783_s16 + $0x1cc] sm:$0xf] %vm12102_vm10, %v13343_v25  ;;  %12219 = vst.msk [vmem:[%s20783_s16 + $0x1d0] sm:$0xf] %vm12102_vm10, %v13344_v17  ;;  %v11307_v16 = vsel %vm10947_vm8, %v11296_v58, %v11306_v60  ;;  %v9792_v50 = vadd.f32 %v9559_v33, %v20586_v59  ;;  %v10728_v52 = vadd.f32 %v21367_v39, %v10593_v49 }
 0x645   : > { %v10372_v30 = vpop.f32.mrf.mxu0  ;;  %v13345_v7 = vcombine.low %v11307_v16, %v11307_v16  ;;  %v13346_v42 = vcombine.high %v11307_v16, %v11307_v16  ;;  %12222 = vst.msk [vmem:[%s20783_s16 + $0x1dc] sm:$0xf] %vm12102_vm10, %v13347_v24  ;;  %v11316_v2 = vshrl.u32 %v10932_v41, 16  ;;  %v15388_v53 = vpop.f32.mrf.mxu1  ;;  %v10931_v9 = vpack.c.bf16 %v10852_v10, %v10851_v48 }
 0x646   : > { %v10592_v38 = vadd.f32 %v10359_v29, %v9792_v50  ;;  %v11319_v56 = vshll.u32 %v10932_v41, 16  ;;  %v9796_v26 = vadd.f32 %v15388_v53, %v23540_v35  ;;  %v10594_v58 = vadd.f32 %v15547_v62, %v9794_v34  ;;  %v23543_v50 = vld [vmem:[#allocation91_spill] sm:$0xff] }
 0x647   : > { %v15551_v5 = vpop.f32.mrf.mxu0  ;;  %12220 = vst.msk [vmem:[%s20783_s16 + $0x1d4] sm:$0xf] %vm12102_vm10, %v13345_v7  ;;  %12221 = vst.msk [vmem:[%s20783_s16 + $0x1d8] sm:$0xf] %vm12102_vm10, %v13346_v42  ;;  %v11318_v47 = vrot.slane %v11316_v2, 7  ;;  %v9572_v59 = vpop.f32.mrf.mxu1  ;;  %v11309_v1 = vshrl.u32 %v10931_v9, 16 }
 0x648   : > { %v10727_v15 = vadd.f32 %v21367_v39, %v10592_v38  ;;  %v10596_v43 = vadd.f32 %v15550_v6, %v9796_v26  ;;  %v11312_v40 = vshll.u32 %v10931_v9, 16  ;;  %v9795_v4 = vadd.f32 %v9572_v59, %v23541_v44 }
 0x649   : > { %v10375_v63 = vpop.f32.mrf.mxu0  ;;  %v11321_v46 = vor.u32 %v11319_v56, %v11318_v47  ;;  %v11550_v0 = vsel %vm20760_vm9, %v11318_v47, 0  ;;  %v15389_v11 = vpop.f32.mrf.mxu1  ;;  %v11311_v31 = vrot.slane %v11309_v1, 7  ;;  %v10856_v29 = vmax.f32 %v10728_v52, 0.0 }
 0x64a   : > { %v13352_v45 = vcombine.low %v11550_v0, %v11550_v0  ;;  %v10855_v36 = vmax.f32 %v10727_v15, 0.0  ;;  %v9797_v27 = vadd.f32 %v15389_v11, %v23542_v18  ;;  %v10729_v55 = vadd.f32 %v21367_v39, %v10594_v58 }
 0x64b   : > { %v15554_v20 = vpop.f32.mrf.mxu0  ;;  %v9575_v62 = vpop.f32.mrf.mxu1  ;;  %v11314_v51 = vor.u32 %v11312_v40, %v11311_v31  ;;  %v11322_v57 = vsel %vm10947_vm8, %v11311_v31, %v11321_v46  ;;  %v10595_v28 = vadd.f32 %v10372_v30, %v9795_v4  ;;  %v10731_v25 = vadd.f32 %v21367_v39, %v10596_v43  ;;  %v23544_v43 = vld [vmem:[#allocation190_spill] sm:$0xff] }
 0x64c   : > { %12227 = vst.msk [vmem:[%s20783_s16 + $0x1f0] sm:$0xf] %vm12102_vm10, %v13352_v45  ;;  %v13350_v37 = vcombine.low %v11322_v57, %v11322_v57  ;;  %v13351_v32 = vcombine.high %v11322_v57, %v11322_v57  ;;  %v10933_v6 = vpack.c.bf16 %v10856_v29, %v10855_v36  ;;  %v10597_v41 = vadd.f32 %v15551_v5, %v9797_v27 }
 0x64d   : > { %v10387_v61 = vpop.f32.mrf.mxu0  ;;  %v15392_v17 = vpop.f32.mrf.mxu1  ;;  %v11518_v13 = vsel %vm20760_vm9, 0, %v11314_v51  ;;  %v10730_v24 = vadd.f32 %v21367_v39, %v10595_v28  ;;  %v10857_v48 = vmax.f32 %v10729_v55, 0.0  ;;  %v10859_v53 = vmax.f32 %v10731_v25, 0.0  ;;  %v23545_v51 = vld [vmem:[#allocation192_spill] sm:$0xff] }
 0x64e   : > { %v13348_v10 = vcombine.low %v11518_v13, %v11518_v13  ;;  %v13349_v49 = vcombine.high %v11518_v13, %v11518_v13  ;;  %12225 = vst.msk [vmem:[%s20783_s16 + $0x1e8] sm:$0xf] %vm12102_vm10, %v13350_v37  ;;  %12226 = vst.msk [vmem:[%s20783_s16 + $0x1ec] sm:$0xf] %vm12102_vm10, %v13351_v32  ;;  %v11324_v33 = vshrl.u32 %v10933_v6, 16  ;;  %v10732_v34 = vadd.f32 %v21367_v39, %v10597_v41  ;;  %v23546_v32 = vld [vmem:[#allocation64_spill] sm:$0xff] }
 0x64f   : > { %v15555_v60 = vpop.f32.mrf.mxu0  ;;  %v9587_v30 = vpop.f32.mrf.mxu1  ;;  %v10858_v8 = vmax.f32 %v10730_v24, 0.0  ;;  %v11327_v2 = vshll.u32 %v10933_v6, 16 }
 0x650   : > { %v9798_v7 = vadd.f32 %v9587_v30, %v23543_v50  ;;  %12223 = vst.msk [vmem:[%s20783_s16 + $0x1e0] sm:$0xf] %vm12102_vm10, %v13348_v10  ;;  %12224 = vst.msk [vmem:[%s20783_s16 + $0x1e4] sm:$0xf] %vm12102_vm10, %v13349_v49  ;;  %v11326_v42 = vrot.slane %v11324_v33, 7  ;;  %v10860_v47 = vmax.f32 %v10732_v34, 0.0 }
 0x651   : > { %v10390_v16 = vpop.f32.mrf.mxu0  ;;  %v15393_v5 = vpop.f32.mrf.mxu1  ;;  %v10934_v38 = vpack.c.bf16 %v10858_v8, %v10857_v48  ;;  %v23547_v34 = vld [vmem:[#allocation193_spill] sm:$0xff] }
 0x652   : > { %v10598_v56 = vadd.f32 %v10387_v61, %v9798_v7  ;;  %v9800_v52 = vadd.f32 %v15393_v5, %v20613_v54  ;;  %v11329_v35 = vor.u32 %v11327_v2, %v11326_v42  ;;  %v10935_v58 = vpack.c.bf16 %v10860_v47, %v10859_v53 }
 0x653   : > { %v15558_v9 = vpop.f32.mrf.mxu0  ;;  %v9590_v26 = vpop.f32.mrf.mxu1  ;;  %v11331_v63 = vshrl.u32 %v10934_v38, 16  ;;  %v11334_v1 = vshll.u32 %v10934_v38, 16 }
 0x654   : > { %v11519_v46 = vsel %vm20760_vm9, 0, %v11329_v35  ;;  %v10733_v0 = vadd.f32 %v21367_v39, %v10598_v56  ;;  %v10600_v15 = vadd.f32 %v15555_v60, %v9800_v52  ;;  %v9799_v11 = vadd.f32 %v9590_v26, %v23544_v43  ;;  %v23548_v56 = vld [vmem:[#allocation194_spill] sm:$0xff] }
 0x655   : > { %v10402_v59 = vpop.f32.mrf.mxu0  ;;  %v15396_v20 = vpop.f32.mrf.mxu1  ;;  %v13353_v31 = vcombine.low %v11519_v46, %v11519_v46  ;;  %v13354_v54 = vcombine.high %v11519_v46, %v11519_v46  ;;  %v11333_v40 = vrot.slane %v11331_v63, 7  ;;  %v11339_v44 = vshrl.u32 %v10935_v58, 16 }
 0x656   : > { %v11342_v4 = vshll.u32 %v10935_v58, 16  ;;  %v10599_v29 = vadd.f32 %v10390_v16, %v9799_v11  ;;  %v9803_v57 = vadd.f32 %v15396_v20, %v23545_v51  ;;  %v10861_v28 = vmax.f32 %v10733_v0, 0.0 }
 0x657   : > { %v15559_v45 = vpop.f32.mrf.mxu0  ;;  %v9602_v36 = vpop.f32.mrf.mxu1  ;;  %12228 = vst.msk [vmem:[%s20783_s16 + $0x1f4] sm:$0xf] %vm12102_vm10, %v13353_v31  ;;  %12229 = vst.msk [vmem:[%s20783_s16 + $0x1f8] sm:$0xf] %vm12102_vm10, %v13354_v54  ;;  %v11336_v27 = vor.u32 %v11334_v1, %v11333_v40  ;;  %v11551_v62 = vsel %vm20760_vm9, %v11333_v40, 0  ;;  %v11341_v61 = vrot.slane %v11339_v44, 7  ;;  %v10735_v24 = vadd.f32 %v21367_v39, %v10600_v15 }
 0x658   : > { %v13357_v55 = vcombine.low %v11551_v62, %v11551_v62  ;;  %v10734_v37 = vadd.f32 %v21367_v39, %v10599_v29  ;;  %v9801_v6 = vadd.f32 %v9602_v36, %v23546_v32  ;;  %v10603_v41 = vadd.f32 %v15558_v9, %v9803_v57 }
 0x659   : > { %v10405_v18 = vpop.f32.mrf.mxu0  ;;  %v15397_v25 = vpop.f32.mrf.mxu1  ;;  %v11337_v60 = vsel %vm10947_vm8, %v11326_v42, %v11336_v27  ;;  %v11344_v13 = vor.u32 %v11342_v4, %v11341_v61  ;;  %v10863_v35 = vmax.f32 %v10735_v24, 0.0 }
 0x65a   : > { %v13355_v10 = vcombine.low %v11337_v60, %v11337_v60  ;;  %v13356_v49 = vcombine.high %v11337_v60, %v11337_v60  ;;  %12232 = vst.msk [vmem:[%s20783_s16 + $0x204] sm:$0xf] %vm12102_vm10, %v13357_v55  ;;  %v10862_v33 = vmax.f32 %v10734_v37, 0.0  ;;  %v10601_v30 = vadd.f32 %v10402_v59, %v9801_v6  ;;  %v23549_v37 = vld [vmem:[#allocation100_spill] sm:$0xff] }
 0x65b   : > { %v15562_v17 = vpop.f32.mrf.mxu0  ;;  %v9605_v16 = vpop.f32.mrf.mxu1  ;;  %v11520_v8 = vsel %vm20760_vm9, 0, %v11344_v13  ;;  %v10738_v38 = vadd.f32 %v21367_v39, %v10603_v41 }
 0x65c   : > { %v9802_v50 = vadd.f32 %v9605_v16, %v23547_v34  ;;  %12230 = vst.msk [vmem:[%s20783_s16 + $0x1fc] sm:$0xf] %vm12102_vm10, %v13355_v10  ;;  %12231 = vst.msk [vmem:[%s20783_s16 + $0x200] sm:$0xf] %vm12102_vm10, %v13356_v49  ;;  %v13358_v7 = vcombine.low %v11520_v8, %v11520_v8  ;;  %v13359_v42 = vcombine.high %v11520_v8, %v11520_v8 }
 0x65d   : > { %v10417_v48 = vpop.f32.mrf.mxu0  ;;  %v10936_v2 = vpack.c.bf16 %v10862_v33, %v10861_v28  ;;  %v10736_v53 = vadd.f32 %v21367_v39, %v10601_v30  ;;  %v15400_v5 = vpop.f32.mrf.mxu1  ;;  %v10866_v31 = vmax.f32 %v10738_v38, 0.0 }
 0x65e   : > { %v10602_v47 = vadd.f32 %v10405_v18, %v9802_v50  ;;  %v9806_v52 = vadd.f32 %v15400_v5, %v23548_v56  ;;  %12233 = vst.msk [vmem:[%s20783_s16 + $0x208] sm:$0xf] %vm12102_vm10, %v13358_v7  ;;  %12234 = vst.msk [vmem:[%s20783_s16 + $0x20c] sm:$0xf] %vm12102_vm10, %v13359_v42 }
 0x65f   : > { %v15563_v9 = vpop.f32.mrf.mxu0  ;;  %v11346_v26 = vshrl.u32 %v10936_v2, 16  ;;  %v10864_v59 = vmax.f32 %v10736_v53, 0.0  ;;  %v9617_v63 = vpop.f32.mrf.mxu1  ;;  %v11349_v43 = vshll.u32 %v10936_v2, 16 }
 0x660   : > { %v10737_v58 = vadd.f32 %v21367_v39, %v10602_v47  ;;  %v10606_v46 = vadd.f32 %v15562_v17, %v9806_v52  ;;  %v9804_v0 = vadd.f32 %v9617_v63, %v20647_v21 }
 0x661   : > { %v10420_v1 = vpop.f32.mrf.mxu0  ;;  %v11348_v15 = vrot.slane %v11346_v26, 7  ;;  %v10937_v11 = vpack.c.bf16 %v10864_v59, %v10863_v35  ;;  %v15401_v20 = vpop.f32.mrf.mxu1 }
 0x662   : > { %v10865_v54 = vmax.f32 %v10737_v58, 0.0  ;;  %v9807_v40 = vadd.f32 %v15401_v20, %v20650_v12  ;;  %v10741_v36 = vadd.f32 %v21367_v39, %v10606_v46  ;;  %v10604_v57 = vadd.f32 %v10417_v48, %v9804_v0  ;;  %v23550_v48 = vld [vmem:[#allocation197_spill] sm:$0xff]  ;;  %v23551_v46 = vld [vmem:[#allocation71_spill] sm:$0xff] }
 0x663   : > { %v15566_v45 = vpop.f32.mrf.mxu0  ;;  %v11351_v44 = vor.u32 %v11349_v43, %v11348_v15  ;;  %v11552_v4 = vsel %vm20760_vm9, %v11348_v15, 0  ;;  %v11354_v29 = vshrl.u32 %v10937_v11, 16  ;;  %v9620_v18 = vpop.f32.mrf.mxu1  ;;  %v11357_v62 = vshll.u32 %v10937_v11, 16 }
 0x664   : > { %v13362_v21 = vcombine.low %v11552_v4, %v11552_v4  ;;  %v10938_v51 = vpack.c.bf16 %v10866_v31, %v10865_v54  ;;  %v10607_v12 = vadd.f32 %v15563_v9, %v9807_v40  ;;  %v9805_v32 = vadd.f32 %v9620_v18, %v23549_v37 }
 0x665   : > { %v10433_v27 = vpop.f32.mrf.mxu0  ;;  %v11352_v55 = vsel %vm10947_vm8, %v11341_v61, %v11351_v44  ;;  %v11356_v28 = vrot.slane %v11354_v29, 7  ;;  %v15404_v6 = vpop.f32.mrf.mxu1  ;;  %v10739_v16 = vadd.f32 %v21367_v39, %v10604_v57  ;;  %v10869_v50 = vmax.f32 %v10741_v36, 0.0 }
 0x666   : > { %v13360_v17 = vcombine.low %v11352_v55, %v11352_v55  ;;  %v13361_v60 = vcombine.high %v11352_v55, %v11352_v55  ;;  %12237 = vst.msk [vmem:[%s20783_s16 + $0x218] sm:$0xf] %vm12102_vm10, %v13362_v21  ;;  %v11361_v13 = vshrl.u32 %v10938_v51, 16  ;;  %v10742_v41 = vadd.f32 %v21367_v39, %v10607_v12 }
 0x667   : > { %v15567_v25 = vpop.f32.mrf.mxu0  ;;  %v11359_v24 = vor.u32 %v11357_v62, %v11356_v28  ;;  %v10605_v10 = vadd.f32 %v10420_v1, %v9805_v32  ;;  %v9633_v49 = vpop.f32.mrf.mxu1  ;;  %v11364_v30 = vshll.u32 %v10938_v51, 16  ;;  %v9809_v8 = vadd.f32 %v15404_v6, %v23550_v48 }
 0x668   : > { %12235 = vst.msk [vmem:[%s20783_s16 + $0x210] sm:$0xf] %vm12102_vm10, %v13360_v17  ;;  %12236 = vst.msk [vmem:[%s20783_s16 + $0x214] sm:$0xf] %vm12102_vm10, %v13361_v60  ;;  %v11363_v61 = vrot.slane %v11361_v13, 7  ;;  %v10870_v7 = vmax.f32 %v10742_v41, 0.0 }
 0x669   : > { %v10435_v33 = vpop.f32.mrf.mxu0  ;;  %v11521_v34 = vsel %vm20760_vm9, 0, %v11359_v24  ;;  %v10740_v42 = vadd.f32 %v21367_v39, %v10605_v10  ;;  %v15405_v2 = vpop.f32.mrf.mxu1  ;;  %v10609_v26 = vadd.f32 %v15566_v45, %v9809_v8  ;;  %v10867_v58 = vmax.f32 %v10739_v16, 0.0  ;;  %v23552_v17 = vld [vmem:[#allocation198_spill] sm:$0xff]  ;;  %v23553_v24 = vld [vmem:[#allocation199_spill] sm:$0xff] }
 0x66a   : > { %v13363_v5 = vcombine.low %v11521_v34, %v11521_v34  ;;  %v13364_v9 = vcombine.high %v11521_v34, %v11521_v34  ;;  %v11366_v38 = vor.u32 %v11364_v30, %v11363_v61  ;;  %v11553_v47 = vsel %vm20760_vm9, %v11363_v61, 0 }
 0x66b   : > { %v15570_v53 = vpop.f32.mrf.mxu0  ;;  %v13367_v56 = vcombine.low %v11553_v47, %v11553_v47  ;;  %v10940_v52 = vpack.c.bf16 %v10870_v7, %v10869_v50  ;;  %v10868_v35 = vmax.f32 %v10740_v42, 0.0  ;;  %v9635_v59 = vpop.f32.mrf.mxu1  ;;  %v9810_v0 = vadd.f32 %v15405_v2, %v23551_v46 }
 0x66c   : > { %12238 = vst.msk [vmem:[%s20783_s16 + $0x21c] sm:$0xf] %vm12102_vm10, %v13363_v5  ;;  %12239 = vst.msk [vmem:[%s20783_s16 + $0x220] sm:$0xf] %vm12102_vm10, %v13364_v9  ;;  %v11367_v1 = vsel %vm10947_vm8, %v11356_v28, %v11366_v38  ;;  %v9808_v15 = vadd.f32 %v9635_v59, %v20674_v14  ;;  %v10744_v29 = vadd.f32 %v21367_v39, %v10609_v26 }
 0x66d   : > { %v10448_v63 = vpop.f32.mrf.mxu0  ;;  %v13365_v43 = vcombine.low %v11367_v1, %v11367_v1  ;;  %v13366_v11 = vcombine.high %v11367_v1, %v11367_v1  ;;  %12242 = vst.msk [vmem:[%s20783_s16 + $0x22c] sm:$0xf] %vm12102_vm10, %v13367_v56  ;;  %v11376_v20 = vshrl.u32 %v10940_v52, 16  ;;  %v10939_v54 = vpack.c.bf16 %v10868_v35, %v10867_v58 }
 0x66e   : > { %v15408_v45 = vpop.f32.mrf.mxu1  ;;  %v10608_v40 = vadd.f32 %v10435_v33, %v9808_v15  ;;  %v11379_v4 = vshll.u32 %v10940_v52, 16  ;;  %v10610_v21 = vadd.f32 %v15567_v25, %v9810_v0 }
 0x66f   : > { %v15571_v31 = vpop.f32.mrf.mxu0  ;;  %12240 = vst.msk [vmem:[%s20783_s16 + $0x224] sm:$0xf] %vm12102_vm10, %v13365_v43  ;;  %12241 = vst.msk [vmem:[%s20783_s16 + $0x228] sm:$0xf] %vm12102_vm10, %v13366_v11  ;;  %v11378_v44 = vrot.slane %v11376_v20, 7  ;;  %v9812_v36 = vadd.f32 %v15408_v45, %v20677_v23  ;;  %v11369_v27 = vshrl.u32 %v10939_v54, 16 }
 0x670   : > { %v9648_v14 = vpop.f32.mrf.mxu1  ;;  %v10743_v57 = vadd.f32 %v21367_v39, %v10608_v40  ;;  %v11372_v6 = vshll.u32 %v10939_v54, 16  ;;  %v10872_v23 = vmax.f32 %v10744_v29, 0.0  ;;  %v10745_v61 = vadd.f32 %v21367_v39, %v10610_v21 }
 0x671   : > { %v10451_v18 = vpop.f32.mrf.mxu0  ;;  %v11381_v62 = vor.u32 %v11379_v4, %v11378_v44  ;;  %v11554_v51 = vsel %vm20760_vm9, %v11378_v44, 0  ;;  %v10612_v55 = vadd.f32 %v15570_v53, %v9812_v36  ;;  %v11371_v32 = vrot.slane %v11369_v27, 7  ;;  %v15945_v4 = vld [vmem:[%s21721_s4] ss:$0 sm:$0xff] }
 0x672   : > { %v15409_v28 = vpop.f32.mrf.mxu1  ;;  %v13372_v37 = vcombine.low %v11554_v51, %v11554_v51  ;;  %v9811_v60 = vadd.f32 %v9648_v14, %v23552_v17  ;;  %v10871_v13 = vmax.f32 %v10743_v57, 0.0  ;;  %v10873_v52 = vmax.f32 %v10745_v61, 0.0  ;;  %v23554_v14 = vld [vmem:[#allocation108_spill] sm:$0xff]  ;;  %v23555_v17 = vld [vmem:[#allocation201_spill] sm:$0xff] }
 0x673   : > { %v15574_v12 = vpop.f32.mrf.mxu0  ;;  %v9813_v41 = vadd.f32 %v15409_v28, %v23553_v24  ;;  %v11374_v49 = vor.u32 %v11372_v6, %v11371_v32  ;;  %v11382_v33 = vsel %vm10947_vm8, %v11371_v32, %v11381_v62  ;;  %v10747_v34 = vadd.f32 %v21367_v39, %v10612_v55 }
 0x674   : > { %v9651_v25 = vpop.f32.mrf.mxu1  ;;  %12247 = vst.msk [vmem:[%s20783_s16 + $0x240] sm:$0xf] %vm12102_vm10, %v13372_v37  ;;  %v10611_v30 = vadd.f32 %v10448_v63, %v9811_v60  ;;  %v13370_v16 = vcombine.low %v11382_v33, %v11382_v33  ;;  %v13371_v48 = vcombine.high %v11382_v33, %v11382_v33  ;;  %v10941_v8 = vpack.c.bf16 %v10872_v23, %v10871_v13 }
 0x675   : > { %v10463_v10 = vpop.f32.mrf.mxu0  ;;  %v11522_v42 = vsel %vm20760_vm9, 0, %v11374_v49  ;;  %v10613_v53 = vadd.f32 %v15571_v31, %v9813_v41  ;;  %v10875_v58 = vmax.f32 %v10747_v34, 0.0  ;;  %v23556_v41 = vld [vmem:[#allocation203_spill] sm:$0xff] }
 0x676   : > { %v15412_v50 = vpop.f32.mrf.mxu1  ;;  %v10746_v2 = vadd.f32 %v21367_v39, %v10611_v30  ;;  %v13368_v5 = vcombine.low %v11522_v42, %v11522_v42  ;;  %v13369_v9 = vcombine.high %v11522_v42, %v11522_v42  ;;  %12245 = vst.msk [vmem:[%s20783_s16 + $0x238] sm:$0xf] %vm12102_vm10, %v13370_v16  ;;  %12246 = vst.msk [vmem:[%s20783_s16 + $0x23c] sm:$0xf] %vm12102_vm10, %v13371_v48  ;;  %v11384_v38 = vshrl.u32 %v10941_v8, 16  ;;  %v23557_v42 = vld [vmem:[#allocation78_spill] sm:$0xff] }
 0x677   : > { %v15575_v7 = vpop.f32.mrf.mxu0  ;;  %v10748_v26 = vadd.f32 %v21367_v39, %v10613_v53  ;;  %v11387_v1 = vshll.u32 %v10941_v8, 16 }
 0x678   : > { %v9663_v47 = vpop.f32.mrf.mxu1  ;;  %v10874_v35 = vmax.f32 %v10746_v2, 0.0  ;;  %12243 = vst.msk [vmem:[%s20783_s16 + $0x230] sm:$0xf] %vm12102_vm10, %v13368_v5  ;;  %12244 = vst.msk [vmem:[%s20783_s16 + $0x234] sm:$0xf] %vm12102_vm10, %v13369_v9  ;;  %v11386_v63 = vrot.slane %v11384_v38, 7 }
 0x679   : > { %v10466_v56 = vpop.f32.mrf.mxu0  ;;  %v9814_v59 = vadd.f32 %v9663_v47, %v20698_v3  ;;  %v10876_v43 = vmax.f32 %v10748_v26, 0.0 }
 0x67a   : > { %v15413_v46 = vpop.f32.mrf.mxu1  ;;  %v10942_v15 = vpack.c.bf16 %v10874_v35, %v10873_v52  ;;  %v11389_v45 = vor.u32 %v11387_v1, %v11386_v63 }
 0x67b   : > { %v15578_v0 = vpop.f32.mrf.mxu0  ;;  %v10614_v11 = vadd.f32 %v10463_v10, %v9814_v59  ;;  %v9816_v20 = vadd.f32 %v15413_v46, %v20701_v22  ;;  %v10943_v3 = vpack.c.bf16 %v10876_v43, %v10875_v58 }
 0x67c   : > { %v9666_v31 = vpop.f32.mrf.mxu1  ;;  %v11391_v39 = vshrl.u32 %v10942_v15, 16  ;;  %v11394_v40 = vshll.u32 %v10942_v15, 16  ;;  %v11523_v44 = vsel %vm20760_vm9, 0, %v11389_v45 }
 0x67d   : > { %v10478_v54 = vpop.f32.mrf.mxu0  ;;  %v10749_v29 = vadd.f32 %v15945_v4, %v10614_v11  ;;  %v10616_v36 = vadd.f32 %v15575_v7, %v9816_v20  ;;  %v9815_v18 = vadd.f32 %v9666_v31, %v23554_v14  ;;  %v13373_v21 = vcombine.low %v11523_v44, %v11523_v44 }
 0x67e   : > { %v15416_v22 = vpop.f32.mrf.mxu1  ;;  %v13374_v62 = vcombine.high %v11523_v44, %v11523_v44  ;;  %v11393_v51 = vrot.slane %v11391_v39, 7  ;;  %v11399_v57 = vshrl.u32 %v10943_v3, 16  ;;  %v11402_v55 = vshll.u32 %v10943_v3, 16 }
 0x67f   : > { %v15579_v27 = vpop.f32.mrf.mxu0  ;;  %v10615_v28 = vadd.f32 %v10466_v56, %v9815_v18  ;;  %12248 = vst.msk [vmem:[%s20783_s16 + $0x244] sm:$0xf] %vm12102_vm10, %v13373_v21  ;;  %v9819_v60 = vadd.f32 %v15416_v22, %v23555_v17  ;;  %v10877_v13 = vmax.f32 %v10749_v29, 0.0  ;;  %v10751_v61 = vadd.f32 %v15945_v4, %v10616_v36 }
 0x680   : > { %v9678_v12 = vpop.f32.mrf.mxu1  ;;  %12249 = vst.msk [vmem:[%s20783_s16 + $0x248] sm:$0xf] %vm12102_vm10, %v13374_v62  ;;  %v11396_v37 = vor.u32 %v11394_v40, %v11393_v51  ;;  %v11555_v32 = vsel %vm20760_vm9, %v11393_v51, 0  ;;  %v11401_v6 = vrot.slane %v11399_v57, 7 }
 0x681   : > { %v13377_v23 = vcombine.low %v11555_v32, %v11555_v32  ;;  %v10750_v24 = vadd.f32 %v15945_v4, %v10615_v28  ;;  %v9817_v25 = vadd.f32 %v9678_v12, %v23556_v41  ;;  %v10619_v30 = vadd.f32 %v15578_v0, %v9819_v60  ;;  %v10481_v47 = vpop.f32.mrf.mxu0 }
 0x682   : > { %v15417_v10 = vpop.f32.mrf.mxu1  ;;  %v11397_v49 = vsel %vm10947_vm8, %v11386_v63, %v11396_v37  ;;  %v11404_v33 = vor.u32 %v11402_v55, %v11401_v6  ;;  %v10879_v35 = vmax.f32 %v10751_v61, 0.0 }
 0x683   : > { %v13375_v16 = vcombine.low %v11397_v49, %v11397_v49  ;;  %v13376_v48 = vcombine.high %v11397_v49, %v11397_v49  ;;  %12252 = vst.msk [vmem:[%s20783_s16 + $0x254] sm:$0xf] %vm12102_vm10, %v13377_v23  ;;  %v10878_v8 = vmax.f32 %v10750_v24, 0.0  ;;  %v10617_v34 = vadd.f32 %v10478_v54, %v9817_v25 }
 0x684   : > { %v9681_v50 = vpop.f32.mrf.mxu1  ;;  %v11524_v7 = vsel %vm20760_vm9, 0, %v11404_v33  ;;  %v10754_v56 = vadd.f32 %v15945_v4, %v10619_v30 }
 0x685   : > { %v9818_v2 = vadd.f32 %v9681_v50, %v23557_v42  ;;  %12250 = vst.msk [vmem:[%s20783_s16 + $0x24c] sm:$0xf] %vm12102_vm10, %v13375_v16  ;;  %12251 = vst.msk [vmem:[%s20783_s16 + $0x250] sm:$0xf] %vm12102_vm10, %v13376_v48  ;;  %v13378_v53 = vcombine.low %v11524_v7, %v11524_v7  ;;  %v13379_v5 = vcombine.high %v11524_v7, %v11524_v7 }
 0x686   : > { %v10944_v9 = vpack.c.bf16 %v10878_v8, %v10877_v13  ;;  %v10752_v38 = vadd.f32 %v15945_v4, %v10617_v34  ;;  %v10882_v0 = vmax.f32 %v10754_v56, 0.0 }
 0x687   : > { %v10618_v52 = vadd.f32 %v10481_v47, %v9818_v2  ;;  %12253 = vst.msk [vmem:[%s20783_s16 + $0x258] sm:$0xf] %vm12102_vm10, %v13378_v53  ;;  %12254 = vst.msk [vmem:[%s20783_s16 + $0x25c] sm:$0xf] %vm12102_vm10, %v13379_v5 }
 0x688   : > { %v11406_v26 = vshrl.u32 %v10944_v9, 16  ;;  %v10880_v59 = vmax.f32 %v10752_v38, 0.0  ;;  %v11409_v58 = vshll.u32 %v10944_v9, 16 }
 0x689   : > { %v10753_v63 = vadd.f32 %v15945_v4, %v10618_v52 }
 0x68a   : > { %v11408_v1 = vrot.slane %v11406_v26, 7  ;;  %v10945_v46 = vpack.c.bf16 %v10880_v59, %v10879_v35 }
 0x68b   : > { %v10881_v15 = vmax.f32 %v10753_v63, 0.0 }
 0x68c   : > { %v11411_v43 = vor.u32 %v11409_v58, %v11408_v1  ;;  %v11556_v11 = vsel %vm20760_vm9, %v11408_v1, 0  ;;  %v11414_v20 = vshrl.u32 %v10945_v46, 16  ;;  %v11417_v40 = vshll.u32 %v10945_v46, 16 }
 0x68d   : > { %v13382_v45 = vcombine.low %v11556_v11, %v11556_v11  ;;  %v10946_v31 = vpack.c.bf16 %v10882_v0, %v10881_v15 }
 0x68e   : > { %v11412_v54 = vsel %vm10947_vm8, %v11401_v6, %v11411_v43  ;;  %v11416_v39 = vrot.slane %v11414_v20, 7 }
 0x68f   : > { %v13380_v3 = vcombine.low %v11412_v54, %v11412_v54  ;;  %v13381_v44 = vcombine.high %v11412_v54, %v11412_v54  ;;  %12257 = vst.msk [vmem:[%s20783_s16 + $0x268] sm:$0xf] %vm12102_vm10, %v13382_v45  ;;  %v11421_v4 = vshrl.u32 %v10946_v31, 16  ;;  %v11424_v14 = vshll.u32 %v10946_v31, 16 }
 0x690   : > { %v11419_v29 = vor.u32 %v11417_v40, %v11416_v39 }
 0x691   : > { %12255 = vst.msk [vmem:[%s20783_s16 + $0x260] sm:$0xf] %vm12102_vm10, %v13380_v3  ;;  %12256 = vst.msk [vmem:[%s20783_s16 + $0x264] sm:$0xf] %vm12102_vm10, %v13381_v44  ;;  %v11423_v36 = vrot.slane %v11421_v4, 7 }
 0x692   : > { %v11525_v18 = vsel %vm20760_vm9, 0, %v11419_v29 }
 0x693   : > { %v13383_v22 = vcombine.low %v11525_v18, %v11525_v18  ;;  %v13384_v27 = vcombine.high %v11525_v18, %v11525_v18  ;;  %v11426_v21 = vor.u32 %v11424_v14, %v11423_v36  ;;  %v11557_v62 = vsel %vm20760_vm9, %v11423_v36, 0 }
 0x694   : > { %v13387_v51 = vcombine.low %v11557_v62, %v11557_v62 }
 0x695   : > { %12258 = vst.msk [vmem:[%s20783_s16 + $0x26c] sm:$0xf] %vm12102_vm10, %v13383_v22  ;;  %12259 = vst.msk [vmem:[%s20783_s16 + $0x270] sm:$0xf] %vm12102_vm10, %v13384_v27  ;;  %v11427_v57 = vsel %vm10947_vm8, %v11416_v39, %v11426_v21 }
 0x696   : > { %v13385_v55 = vcombine.low %v11427_v57, %v11427_v57  ;;  %v13386_v28 = vcombine.high %v11427_v57, %v11427_v57  ;;  %12262 = vst.msk [vmem:[%s20783_s16 + $0x27c] sm:$0xf] %vm12102_vm10, %v13387_v51 }
 0x698   : > { %12260 = vst.msk [vmem:[%s20783_s16 + $0x274] sm:$0xf] %vm12102_vm10, %v13385_v55  ;;  %12261 = vst.msk [vmem:[%s20783_s16 + $0x278] sm:$0xf] %vm12102_vm10, %v13386_v28 }
 0x699   : > { %15959 = shalt.err (!%p15956_p5)
}
 0x69a   : > { %s15960_s13 = scalar_lea.hbm %s21660_s8, 10240  ;;  %s15964_s17 = scalar_lea.hbm %s21722_s5, 20480 }
 0x69b   : > { %p15961_p6 = scmp.ne.s32.totalorder %s21660_s8, %s15960_s13  ;;  %p15965_p10 = scmp.lt.s32.totalorder %s21660_s8, %s21722_s5 }
 0x69c   : > { %p15966_p11 = scmp.lt.s32.totalorder %s15964_s17, %s15960_s13 }
 0x69d   : > { %p15962_p7 = pnand %p15961_p6, %p16099_p4 }
 0x69e   : > { %p15967_p12 = por %p15966_p11, %p15965_p10 }
 0x69f   : > { %p15963_p9 = pneg %p15962_p7 }
 0x6a1   : > { %p15968_p13 = pnand %p15967_p12, %p15963_p9 }
 0x6a3   : > { %15971 = shalt.err (!%p15968_p13)
}
 0x6a4   : > { %s16027_s25 = smov 64   ;;  %s16028_s27 = smov 4  }
 0x6a5   : > { %15585 = dma.vmem_to_hbm [thread:$0]  (%p16099_p4), %s21664_s6, 10240, %s21660_s8, %s21672_s9, %s16027_s25, %s16027_s25, %s16028_s27  }
 0x6a6 PF: > { %p15591_p0 = scmp.ge.s32.totalorder %s16022_s21, 2  ;;  %s12295_s30 = sand.u32 1, %s16002_s18  }
 0x6a7   : > { %s12296_s20 = scalar_lea.sflag [#allocation3], %s12295_s30 }
 0x6a8   : > { %p15588_p1 = pnand %p15591_p0, %p16106_p8 }
 0x6aa   : > { %p15589_p2 = pneg %p15588_p1 }
 0x6ac   : > { %15997 = dma.done.wait (%p15589_p2), %s12296_s20, 10240  }
 0x6ad   : > { %15999 = vsyncadd (%p15589_p2), %s12296_s20, 4294957056  ;;  %s18_s21 = sadd.s32 1, %s16022_s21   ;;  %s23558_s18 = smov %s16006_s0 }
 0x6ae   : > { %p15_p3 = scmp.ge.s32.totalorder %s18_s21, 4   ;;  %s23559_s0 = smov %s16010_s19 }
 0x6af   : > { %s23560_s19 = smov %s16112_s29  ;;  %s23561_s20 = smov %s16018_s2 }
 0x6b0   : > { %s23562_s2 = smov %s23564_s24  ;;  %17 = sbr.rel (!%p15_p3) target bundleno = 4 (0x4), region = 89 }
 0x6b5   :  { %12301 = vsyncpa [#allocation3], 1 }
 0x6b6   :  { %12303 = vsyncpa [#allocation3 + $0x1], 1 }

</bundles_post_ra>
